<compile_context>
chip_gen: v7x
topology: tpu7x:2x2x1
jax: 0.10.0
libtpu: 0.0.40
codegen_flags: <defaults>
</compile_context>

<pallas_src>
import functools

import jax
import jax.numpy as jnp
import numpy as np
from jax.experimental import pallas as pl
from jax.experimental.pallas import tpu as pltpu

jax.config.update("jax_default_matmul_precision", "float32")

# ---- wargs (small synthetic config) ----
SRC_VOCAB = 20
TRG_VOCAB = 20
SRC_WEMB = 16      # wargs.src_wemb_size
TRG_WEMB = 16      # wargs.trg_wemb_size
ENC_HID = 16       # wargs.enc_hid_size
DEC_HID = 32       # wargs.dec_hid_size
ALIGN = 16         # wargs.align_size
OUT_SIZE = 16      # wargs.out_size
PAD = 0
L_SRC = 8
L_TRG = 6
BATCH = 2
MAX_OUT = True     # Decoder(max_out=True)


# ============================================================================
# Fused Pallas kernel: encoder + init + decoder + step_out in one invocation
# ============================================================================

def nmt_fused_kernel(Ls, Lt, Bp,
                     # inputs
                     xs_pack_ref, m_pack_ref, ys_e_ref, ys_m_ref, xs_mT_ref,
                     wx_bd_ref, bx_ref, wh_bd_ref, bh_ref,
                     wsi_ref, bsi_ref, wha_ref, bha_ref,
                     wsa_t_ref, bsa_t_ref, wa1_bd_ref, ba1_ref,
                     wdx_ref, bdx_ref, wdh_ref, bdh_ref, wdc_ref, bdc_ref,
                     wstep_ref, bstep_ref,
                     # output
                     logit_ref,
                     # scratch
                     xs_h_ref, uh_ref, feat_ref):
    f32 = jnp.float32
    H = wha_ref.shape[0] // 2        # enc_hid
    A = wha_ref.shape[1]             # align
    D = wdh_ref.shape[0]             # dec_hid
    O = logit_ref.shape[1]           # out_size

    def dot32(a, b):
        return jnp.dot(a, b, preferred_element_type=f32)

    # ---- encoder: fwd+bwd recurrences fused into ONE lane-packed chain ----
    # hoisted x-side gates for both directions in a single block-diag dot
    gx_pack = dot32(xs_pack_ref[...], wx_bd_ref[...]) + bx_ref[...]   # (Ls*Bp, 6H)
    h = jnp.zeros((Bp, 2 * H), f32)                                   # [h_fwd | h_bwd]
    for k in range(Ls):
        r0, r1 = k * Bp, (k + 1) * Bp
        gx = gx_pack[r0:r1, :]                                        # (Bp, 6H)
        gh = dot32(h, wh_bd_ref[...]) + bh_ref[...]                   # one dot / step
        z = jax.nn.sigmoid(gx[:, 0:2 * H] + gh[:, 0:2 * H])
        r = jax.nn.sigmoid(gx[:, 2 * H:4 * H] + gh[:, 2 * H:4 * H])
        cand = jnp.tanh(gx[:, 4 * H:6 * H] + r * gh[:, 4 * H:6 * H])
        h_new = (1.0 - z) * h + z * cand
        m = m_pack_ref[r0:r1, :]                                      # (Bp, 2H)
        h = m * h_new + (1.0 - m) * h
        # stage xs_h = [right | left] lane-packed in VMEM scratch
        xs_h_ref[r0:r1, 0:H] = h[:, 0:H]                              # right[k]
        kb = Ls - 1 - k
        xs_h_ref[kb * Bp:(kb + 1) * Bp, H:2 * H] = h[:, H:2 * H]      # left[Ls-1-k]
    h0_left = h[:, H:2 * H]

    # ---- s0 and lane-packed uh (Bp, Ls*A): one dot + 8 one-time stores -----
    s = jnp.tanh(dot32(h0_left, wsi_ref[...]) + bsi_ref[...])         # (Bp, D)
    uh_std = dot32(xs_h_ref[...], wha_ref[...]) + bha_ref[...]        # (Ls*Bp, A)
    for l in range(Ls):
        uh_ref[:, l * A:(l + 1) * A] = uh_std[l * Bp:(l + 1) * Bp, :]

    # ---- hoisted decoder y-side gate pre-activations + ys_e into feat ------
    ys_e = ys_e_ref[...]                                              # (Lt*Bp, E)
    gdy = dot32(ys_e, wdx_ref[...]) + bdx_ref[...]                    # (Lt*Bp, 3D)
    feat_ref[:, D + 2 * H:] = ys_e

    xs_mT = xs_mT_ref[...]                                            # (Bp, Ls)

    # ---- decoder: attention + conditional GRU (fully unrolled) -------------
    for k in range(Lt):
        r0, r1 = k * Bp, (k + 1) * Bp
        # attention energies for all Ls positions in one lane-packed vreg
        sa = dot32(s, wsa_t_ref[...]) + bsa_t_ref[...]                # (Bp, Ls*A)
        t = jnp.tanh(sa + uh_ref[...])
        score = dot32(t, wa1_bd_ref[...]) + ba1_ref[...]              # (Bp, Ls)
        mx = jnp.max(score, axis=-1, keepdims=True)
        e = jnp.exp(score - mx) * xs_mT                               # masked exp
        inv = pl.reciprocal(jnp.sum(e, axis=-1, keepdims=True), approx=True)
        en = e * inv                                                  # (Bp, Ls)
        # weighted context, kept lane-packed as [right | left]
        ctx = en[:, 0:1] * xs_h_ref[0:Bp, :]
        for l in range(1, Ls):
            ctx = ctx + en[:, l:l + 1] * xs_h_ref[l * Bp:(l + 1) * Bp, :]

        # conditional GRU: gate-fused 3D-wide dots (gh is independent of ctx)
        gh = dot32(s, wdh_ref[...]) + bdh_ref[...]                    # (Bp, 3D)
        gc = dot32(ctx, wdc_ref[...]) + bdc_ref[...]                  # (Bp, 3D)
        gy = gdy[r0:r1, :]
        z = jax.nn.sigmoid(gy[:, 0:D] + gh[:, 0:D] + gc[:, 0:D])
        r = jax.nn.sigmoid(gy[:, D:2 * D] + gh[:, D:2 * D] + gc[:, D:2 * D])
        cand = jnp.tanh(gy[:, 2 * D:3 * D] + r * gh[:, 2 * D:3 * D]
                        + gc[:, 2 * D:3 * D])
        s_new = (1.0 - z) * s + z * cand
        m = ys_m_ref[r0:r1, :]                                        # (Bp, 1)
        s = m * s_new + (1.0 - m) * s
        # stage [s | c] into the fused step_out feature scratch
        feat_ref[r0:r1, 0:D] = s
        feat_ref[r0:r1, D:D + 2 * H] = ctx

    # ---- step_out: single fused [s|c|y] dot + maxout + ys mask -------------
    out = dot32(feat_ref[...], wstep_ref[...]) + bstep_ref[...]       # (Lt*Bp, 2O)
    logit_ref[...] = jnp.maximum(out[:, 0:O], out[:, O:2 * O]) * ys_m_ref[...]


# ============================================================================
# Wrapper: padding, weight repacking (block-diag / tiled), single pallas_call
# ============================================================================

def _enc_pack_w(wf, wb, H):
    """Block-diag pack fwd/bwd GRU weights (in,3H)+(in,3H) -> (2*in, 6H).

    Output column layout: [z_f z_b r_f r_b h_f h_b] (each H wide), matching
    the kernel's packed hidden state [h_fwd | h_bwd]."""
    din = wf.shape[0]
    Z = jnp.zeros((din, H), wf.dtype)
    top = jnp.concatenate(
        [wf[:, 0:H], Z, wf[:, H:2 * H], Z, wf[:, 2 * H:3 * H], Z], axis=1)
    bot = jnp.concatenate(
        [Z, wb[:, 0:H], Z, wb[:, H:2 * H], Z, wb[:, 2 * H:3 * H]], axis=1)
    return jnp.concatenate([top, bot], axis=0)


def _enc_pack_b(bf, bb, H):
    return jnp.concatenate([bf[:, 0:H], bb[:, 0:H], bf[:, H:2 * H],
                            bb[:, H:2 * H], bf[:, 2 * H:3 * H],
                            bb[:, 2 * H:3 * H]], axis=1)


def nmt_forward_pallas(params, srcs, trgs, srcs_m, trgs_m):
    Ls, B = srcs.shape
    Lt = trgs.shape[0]
    H, D, A, E, O = ENC_HID, DEC_HID, ALIGN, TRG_WEMB, OUT_SIZE
    Bp = max(8, -(-B // 8) * 8)          # pad batch to f32 sublane count
    pad = Bp - B

    srcs_p = jnp.pad(srcs, ((0, 0), (0, pad)))                   # pad with PAD=0
    trgs_p = jnp.pad(trgs, ((0, 0), (0, pad)))
    # pad masks with ones so the attention normalizer never divides by zero
    xs_m = jnp.pad(srcs_m, ((0, 0), (0, pad)), constant_values=1.0)   # (Ls, Bp)
    ys_m = jnp.pad(trgs_m, ((0, 0), (0, pad)), constant_values=1.0)   # (Lt, Bp)

    # --- data: lane-pack [x_k | x_{Ls-1-k}] so one dot serves both directions
    xs_e3 = jnp.take(params['src_emb'], srcs_p, axis=0)               # (Ls,Bp,Es)
    xs_pack = jnp.concatenate([xs_e3, xs_e3[::-1]], axis=-1)
    xs_pack = xs_pack.reshape(Ls * Bp, 2 * SRC_WEMB)
    xm3 = jnp.broadcast_to(xs_m[:, :, None], (Ls, Bp, H))
    m_pack = jnp.concatenate([xm3, xm3[::-1]], axis=-1).reshape(Ls * Bp, 2 * H)
    xs_mT = xs_m.T                                                    # (Bp, Ls)
    ys_e = jnp.take(params['trg_emb'], trgs_p, axis=0).reshape(Lt * Bp, E)
    ys_m2 = ys_m.reshape(Lt * Bp, 1)

    # --- encoder weights: block-diag fwd/bwd pack --------------------------
    wx_bd = _enc_pack_w(params['enc_f']['wx'], params['enc_b']['wx'], H)
    bx_pk = _enc_pack_b(params['enc_f']['bx'], params['enc_b']['bx'], H)
    wh_bd = _enc_pack_w(params['enc_f']['wh'], params['enc_b']['wh'], H)
    bh_pk = _enc_pack_b(params['enc_f']['bh'], params['enc_b']['bh'], H)

    # --- attention: tile wsa over the Ls*A lane-packed source axis; wa1 as a
    #     block-diagonal (Ls*A, Ls) selector so scores come out (Bp, Ls) ------
    wsa_t = jnp.tile(params['wsa'], (1, Ls))                          # (D, Ls*A)
    bsa_t = jnp.tile(params['bsa'], (1, Ls))                          # (1, Ls*A)
    wa1_bd = jnp.kron(jnp.eye(Ls, dtype=jnp.float32),
                      params['wa1'].reshape(A, 1))                    # (Ls*A, Ls)
    ba1 = params['ba1'].reshape(1, 1)

    # --- step_out: row-stack [Wls; Wlc; Wly] and pre-split even/odd maxout --
    bsum = params['bls'] + params['bly'] + params['blc']
    w_step = jnp.concatenate([
        jnp.concatenate([params['wls'][:, 0::2], params['wls'][:, 1::2]], axis=1),
        jnp.concatenate([params['wlc'][:, 0::2], params['wlc'][:, 1::2]], axis=1),
        jnp.concatenate([params['wly'][:, 0::2], params['wly'][:, 1::2]], axis=1),
    ], axis=0)                                                        # (D+2H+E, 2O)
    b_step = jnp.concatenate([bsum[:, 0::2], bsum[:, 1::2]], axis=1)  # (1, 2O)

    dec = params['dec']
    kernel = functools.partial(nmt_fused_kernel, Ls, Lt, Bp)
    logit2 = pl.pallas_call(
        kernel,
        out_shape=jax.ShapeDtypeStruct((Lt * Bp, O), jnp.float32),
        scratch_shapes=[
            pltpu.VMEM((Ls * Bp, 2 * H), jnp.float32),      # xs_h = [right|left]
            pltpu.VMEM((Bp, Ls * A), jnp.float32),          # uh lane-packed
            pltpu.VMEM((Lt * Bp, D + 2 * H + E), jnp.float32),  # feat = [s|c|y]
        ],
        compiler_params=pltpu.CompilerParams(vmem_limit_bytes=32 * 1024 * 1024),
    )(xs_pack, m_pack, ys_e, ys_m2, xs_mT,
      wx_bd, bx_pk, wh_bd, bh_pk,
      params['wsi'], params['bsi'], params['wha'], params['bha'],
      wsa_t, bsa_t, wa1_bd, ba1,
      dec['wx'], dec['bx'], dec['wh'], dec['bh'], dec['wc'], dec['bc'],
      w_step, b_step)
    return logit2.reshape(Lt, Bp, O)[:, :B]


# ============================================================================
# Pure-JAX reference (mirrors the PyTorch forward exactly)
# ============================================================================

def _gru_step_ref(x, m, h, gp, ctx=None):
    H = h.shape[1]
    gx = x @ gp['wx'] + gp['bx']
    gh = h @ gp['wh'] + gp['bh']
    gc = (ctx @ gp['wc'] + gp['bc']) if ctx is not None else jnp.zeros_like(gx)
    z = jax.nn.sigmoid(gx[:, :H] + gh[:, :H] + gc[:, :H])
    r = jax.nn.sigmoid(gx[:, H:2 * H] + gh[:, H:2 * H] + gc[:, H:2 * H])
    cand = jnp.tanh(gx[:, 2 * H:] + r * gh[:, 2 * H:] + gc[:, 2 * H:])
    h_t = (1.0 - z) * h + z * cand
    h_t = m[:, None] * h_t + (1.0 - m[:, None]) * h
    return h_t


def nmt_forward_ref(p, srcs, trgs, srcs_m, trgs_m):
    Ls, B = srcs.shape
    Lt = trgs.shape[0]
    xs_e = p['src_emb'][srcs]
    h = jnp.zeros((B, ENC_HID), jnp.float32)
    right = []
    for k in range(Ls):
        h = _gru_step_ref(xs_e[k], srcs_m[k], h, p['enc_f'])
        right.append(h)
    h = jnp.zeros((B, ENC_HID), jnp.float32)
    left = []
    for k in reversed(range(Ls)):
        h = _gru_step_ref(xs_e[k], srcs_m[k], h, p['enc_b'])
        left.append(h)
    right = jnp.stack(right, 0)
    left = jnp.stack(left[::-1], 0)
    xs_h = jnp.concatenate([right, left], -1)
    h0_left = left[0]
    s0 = jnp.tanh(h0_left @ p['wsi'] + p['bsi'])
    uh = xs_h @ p['wha'] + p['bha']

    ys_e = p['trg_emb'][trgs]
    s_tm1 = s0
    s_list, c_list = [], []
    for k in range(Lt):
        sa = s_tm1 @ p['wsa'] + p['bsa']
        t = jnp.tanh(sa[None] + uh)
        e = jnp.sum(t * p['wa1'], -1) + p['ba1']
        e = jnp.exp(e) * srcs_m
        e = e / e.sum(0, keepdims=True)
        attend = (e[:, :, None] * xs_h).sum(0)
        s_t = _gru_step_ref(ys_e[k], trgs_m[k], s_tm1, p['dec'], ctx=attend)
        s_list.append(s_t)
        c_list.append(attend)
        s_tm1 = s_t
    s = jnp.stack(s_list, 0)
    c = jnp.stack(c_list, 0)
    logit = (s @ p['wls'] + p['bls'] + ys_e @ p['wly'] + p['bly']
             + c @ p['wlc'] + p['blc'])
    logit = logit.reshape(Lt, B, OUT_SIZE, 2).max(-1)
    logit = logit * trgs_m[:, :, None]
    return logit


# ============================================================================
# Deterministic parameter init
# ============================================================================

def init_params(key):
    ks = jax.random.split(key, 40)
    it = iter(range(40))

    def w(shape, scale=0.1):
        return (scale * jax.random.normal(ks[next(it)], shape)).astype(jnp.float32)

    p = {}
    src_emb = w((SRC_VOCAB, SRC_WEMB))
    trg_emb = w((TRG_VOCAB, TRG_WEMB))
    p['src_emb'] = src_emb.at[PAD].set(0.0)          # padding_idx=PAD
    p['trg_emb'] = trg_emb.at[PAD].set(0.0)
    for name in ('enc_f', 'enc_b'):
        p[name] = dict(wx=w((SRC_WEMB, 3 * ENC_HID)), wh=w((ENC_HID, 3 * ENC_HID)),
                       bx=w((1, 3 * ENC_HID)), bh=w((1, 3 * ENC_HID)))
    p['wsi'] = w((ENC_HID, DEC_HID)); p['bsi'] = w((1, DEC_HID))
    p['wha'] = w((2 * ENC_HID, ALIGN)); p['bha'] = w((1, ALIGN))
    p['wsa'] = w((DEC_HID, ALIGN)); p['bsa'] = w((1, ALIGN))
    p['wa1'] = w((1, 1, ALIGN)); p['ba1'] = w((1, 1))
    p['dec'] = dict(wx=w((TRG_WEMB, 3 * DEC_HID)), wh=w((DEC_HID, 3 * DEC_HID)),
                    wc=w((2 * ENC_HID, 3 * DEC_HID)),
                    bx=w((1, 3 * DEC_HID)), bh=w((1, 3 * DEC_HID)),
                    bc=w((1, 3 * DEC_HID)))
    p['wls'] = w((DEC_HID, 2 * OUT_SIZE)); p['bls'] = w((1, 2 * OUT_SIZE))
    p['wly'] = w((TRG_WEMB, 2 * OUT_SIZE)); p['bly'] = w((1, 2 * OUT_SIZE))
    p['wlc'] = w((2 * ENC_HID, 2 * OUT_SIZE)); p['blc'] = w((1, 2 * OUT_SIZE))
    return p


if __name__ == "__main__":
    key = jax.random.PRNGKey(0)
    kp, ks, kt = jax.random.split(key, 3)
    params = init_params(kp)

    srcs = jax.random.randint(ks, (L_SRC, BATCH), 1, SRC_VOCAB)      # (Ls, B) int
    trgs = jax.random.randint(kt, (L_TRG, BATCH), 1, TRG_VOCAB)      # (Lt, B) int
    srcs_m = jnp.ones((L_SRC, BATCH), jnp.float32).at[6:, 1].set(0.0)
    trgs_m = jnp.ones((L_TRG, BATCH), jnp.float32).at[4:, 1].set(0.0)

    logit = nmt_forward_pallas(params, srcs, trgs, srcs_m, trgs_m)
    logit = jax.block_until_ready(logit)

    ref = nmt_forward_ref(params, srcs, trgs, srcs_m, trgs_m)
    np.testing.assert_allclose(np.asarray(logit), np.asarray(ref),
                               rtol=2e-3, atol=2e-3)
    print("KERNEL_OK")
</pallas_src>

<mosaic_0001>
module attributes {stable_mosaic.version = 11 : i64} {
  func.func @nmt_fused_kernel(%arg0: memref<64x32xf32, #tpu.memory_space<vmem>>, %arg1: memref<64x32xf32, #tpu.memory_space<vmem>>, %arg2: memref<48x16xf32, #tpu.memory_space<vmem>>, %arg3: memref<48x1xf32, #tpu.memory_space<vmem>>, %arg4: memref<8x8xf32, #tpu.memory_space<vmem>>, %arg5: memref<32x96xf32, #tpu.memory_space<vmem>>, %arg6: memref<1x96xf32, #tpu.memory_space<vmem>>, %arg7: memref<32x96xf32, #tpu.memory_space<vmem>>, %arg8: memref<1x96xf32, #tpu.memory_space<vmem>>, %arg9: memref<16x32xf32, #tpu.memory_space<vmem>>, %arg10: memref<1x32xf32, #tpu.memory_space<vmem>>, %arg11: memref<32x16xf32, #tpu.memory_space<vmem>>, %arg12: memref<1x16xf32, #tpu.memory_space<vmem>>, %arg13: memref<32x128xf32, #tpu.memory_space<vmem>>, %arg14: memref<1x128xf32, #tpu.memory_space<vmem>>, %arg15: memref<128x8xf32, #tpu.memory_space<vmem>>, %arg16: memref<1x1xf32, #tpu.memory_space<vmem>>, %arg17: memref<16x96xf32, #tpu.memory_space<vmem>>, %arg18: memref<1x96xf32, #tpu.memory_space<vmem>>, %arg19: memref<32x96xf32, #tpu.memory_space<vmem>>, %arg20: memref<1x96xf32, #tpu.memory_space<vmem>>, %arg21: memref<32x96xf32, #tpu.memory_space<vmem>>, %arg22: memref<1x96xf32, #tpu.memory_space<vmem>>, %arg23: memref<80x32xf32, #tpu.memory_space<vmem>>, %arg24: memref<1x32xf32, #tpu.memory_space<vmem>>, %arg25: memref<48x16xf32, #tpu.memory_space<vmem>>, %arg26: memref<64x32xf32, #tpu.memory_space<vmem>>, %arg27: memref<8x128xf32, #tpu.memory_space<vmem>>, %arg28: memref<48x80xf32, #tpu.memory_space<vmem>>) attributes {dimension_semantics = [], scalar_prefetch = 0 : i64, scratch_operands = 3 : i64, tpu.core_type = #tpu.core_type<tc>} {
    %c0 = arith.constant 0 : index
    %c0_0 = arith.constant 0 : index
    %0 = vector.load %arg0[%c0, %c0_0] : memref<64x32xf32, #tpu.memory_space<vmem>>, vector<64x32xf32>
    %c0_1 = arith.constant 0 : index
    %c0_2 = arith.constant 0 : index
    %1 = vector.load %arg5[%c0_1, %c0_2] : memref<32x96xf32, #tpu.memory_space<vmem>>, vector<32x96xf32>
    %cst = arith.constant dense<0.000000e+00> : vector<64x96xf32>
    %2 = tpu.matmul %0, %1, %cst {dimension_numbers = #tpu.dot_dimension_numbers<[1], [0], [0], [1], [0, 0, 1, 1], [], []>, precision = #tpu.contract_precision<fp32>} : vector<64x32xf32>, vector<32x96xf32>, vector<64x96xf32> -> vector<64x96xf32>
    %c0_3 = arith.constant 0 : index
    %c0_4 = arith.constant 0 : index
    %3 = vector.load %arg6[%c0_3, %c0_4] : memref<1x96xf32, #tpu.memory_space<vmem>>, vector<1x96xf32>
    %4 = vector.broadcast %3 : vector<1x96xf32> to vector<64x96xf32>
    %5 = arith.addf %2, %4 : vector<64x96xf32>
    %cst_5 = arith.constant 0.000000e+00 : f32
    %6 = vector.broadcast %cst_5 : f32 to vector<8x32xf32>
    %7 = vector.extract_strided_slice %5 {offsets = [0, 0], sizes = [8, 96], strides = [1, 1]} : vector<64x96xf32> to vector<8x96xf32>
    %c0_6 = arith.constant 0 : index
    %c0_7 = arith.constant 0 : index
    %8 = vector.load %arg7[%c0_6, %c0_7] : memref<32x96xf32, #tpu.memory_space<vmem>>, vector<32x96xf32>
    %cst_8 = arith.constant dense<0.000000e+00> : vector<8x96xf32>
    %9 = tpu.matmul %6, %8, %cst_8 {dimension_numbers = #tpu.dot_dimension_numbers<[1], [0], [0], [1], [0, 0, 1, 1], [], []>, precision = #tpu.contract_precision<fp32>} : vector<8x32xf32>, vector<32x96xf32>, vector<8x96xf32> -> vector<8x96xf32>
    %c0_9 = arith.constant 0 : index
    %c0_10 = arith.constant 0 : index
    %10 = vector.load %arg8[%c0_9, %c0_10] : memref<1x96xf32, #tpu.memory_space<vmem>>, vector<1x96xf32>
    %11 = vector.broadcast %10 : vector<1x96xf32> to vector<8x96xf32>
    %12 = arith.addf %9, %11 : vector<8x96xf32>
    %13 = vector.extract_strided_slice %7 {offsets = [0, 0], sizes = [8, 32], strides = [1, 1]} : vector<8x96xf32> to vector<8x32xf32>
    %14 = vector.extract_strided_slice %12 {offsets = [0, 0], sizes = [8, 32], strides = [1, 1]} : vector<8x96xf32> to vector<8x32xf32>
    %15 = arith.addf %13, %14 : vector<8x32xf32>
    %16 = arith.negf %15 : vector<8x32xf32>
    %17 = math.exp %16 : vector<8x32xf32>
    %cst_11 = arith.constant 1.000000e+00 : f32
    %18 = vector.broadcast %cst_11 : f32 to vector<8x32xf32>
    %19 = arith.addf %18, %17 : vector<8x32xf32>
    %20 = arith.divf %18, %19 : vector<8x32xf32>
    %21 = vector.extract_strided_slice %7 {offsets = [0, 32], sizes = [8, 32], strides = [1, 1]} : vector<8x96xf32> to vector<8x32xf32>
    %22 = vector.extract_strided_slice %12 {offsets = [0, 32], sizes = [8, 32], strides = [1, 1]} : vector<8x96xf32> to vector<8x32xf32>
    %23 = arith.addf %21, %22 : vector<8x32xf32>
    %24 = arith.negf %23 : vector<8x32xf32>
    %25 = math.exp %24 : vector<8x32xf32>
    %cst_12 = arith.constant 1.000000e+00 : f32
    %26 = vector.broadcast %cst_12 : f32 to vector<8x32xf32>
    %27 = arith.addf %26, %25 : vector<8x32xf32>
    %28 = arith.divf %26, %27 : vector<8x32xf32>
    %29 = vector.extract_strided_slice %7 {offsets = [0, 64], sizes = [8, 32], strides = [1, 1]} : vector<8x96xf32> to vector<8x32xf32>
    %30 = vector.extract_strided_slice %12 {offsets = [0, 64], sizes = [8, 32], strides = [1, 1]} : vector<8x96xf32> to vector<8x32xf32>
    %31 = arith.mulf %28, %30 : vector<8x32xf32>
    %32 = arith.addf %29, %31 : vector<8x32xf32>
    %33 = math.tanh %32 : vector<8x32xf32>
    %cst_13 = arith.constant 1.000000e+00 : f32
    %34 = vector.broadcast %cst_13 : f32 to vector<8x32xf32>
    %35 = arith.subf %34, %20 : vector<8x32xf32>
    %36 = arith.mulf %35, %6 : vector<8x32xf32>
    %37 = arith.mulf %20, %33 : vector<8x32xf32>
    %38 = arith.addf %36, %37 : vector<8x32xf32>
    %c0_14 = arith.constant 0 : index
    %c0_15 = arith.constant 0 : index
    %39 = vector.load %arg1[%c0_14, %c0_15] : memref<64x32xf32, #tpu.memory_space<vmem>>, vector<8x32xf32>
    %40 = arith.mulf %39, %38 : vector<8x32xf32>
    %cst_16 = arith.constant 1.000000e+00 : f32
    %41 = vector.broadcast %cst_16 : f32 to vector<8x32xf32>
    %42 = arith.subf %41, %39 : vector<8x32xf32>
    %43 = arith.mulf %42, %6 : vector<8x32xf32>
    %44 = arith.addf %40, %43 : vector<8x32xf32>
    %45 = vector.extract_strided_slice %44 {offsets = [0, 0], sizes = [8, 16], strides = [1, 1]} : vector<8x32xf32> to vector<8x16xf32>
    %c0_17 = arith.constant 0 : index
    %c0_18 = arith.constant 0 : index
    %46 = vector.load %arg26[%c0_17, %c0_18] : memref<64x32xf32, #tpu.memory_space<vmem>>, vector<8x16xf32>
    tpu.vector_store %arg26[%c0_17, %c0_18], %45 {strides = array<i32>} : memref<64x32xf32, #tpu.memory_space<vmem>>, vector<8x16xf32>,
    %47 = vector.extract_strided_slice %44 {offsets = [0, 16], sizes = [8, 16], strides = [1, 1]} : vector<8x32xf32> to vector<8x16xf32>
    %c56 = arith.constant 56 : index
    %c16 = arith.constant 16 : index
    %48 = vector.load %arg26[%c56, %c16] : memref<64x32xf32, #tpu.memory_space<vmem>>, vector<8x16xf32>
    tpu.vector_store %arg26[%c56, %c16], %47 {strides = array<i32>} : memref<64x32xf32, #tpu.memory_space<vmem>>, vector<8x16xf32>,
    %49 = vector.extract_strided_slice %5 {offsets = [8, 0], sizes = [8, 96], strides = [1, 1]} : vector<64x96xf32> to vector<8x96xf32>
    %c0_19 = arith.constant 0 : index
    %c0_20 = arith.constant 0 : index
    %50 = vector.load %arg7[%c0_19, %c0_20] : memref<32x96xf32, #tpu.memory_space<vmem>>, vector<32x96xf32>
    %cst_21 = arith.constant dense<0.000000e+00> : vector<8x96xf32>
    %51 = tpu.matmul %44, %50, %cst_21 {dimension_numbers = #tpu.dot_dimension_numbers<[1], [0], [0], [1], [0, 0, 1, 1], [], []>, precision = #tpu.contract_precision<fp32>} : vector<8x32xf32>, vector<32x96xf32>, vector<8x96xf32> -> vector<8x96xf32>
    %c0_22 = arith.constant 0 : index
    %c0_23 = arith.constant 0 : index
    %52 = vector.load %arg8[%c0_22, %c0_23] : memref<1x96xf32, #tpu.memory_space<vmem>>, vector<1x96xf32>
    %53 = vector.broadcast %52 : vector<1x96xf32> to vector<8x96xf32>
    %54 = arith.addf %51, %53 : vector<8x96xf32>
    %55 = vector.extract_strided_slice %49 {offsets = [0, 0], sizes = [8, 32], strides = [1, 1]} : vector<8x96xf32> to vector<8x32xf32>
    %56 = vector.extract_strided_slice %54 {offsets = [0, 0], sizes = [8, 32], strides = [1, 1]} : vector<8x96xf32> to vector<8x32xf32>
    %57 = arith.addf %55, %56 : vector<8x32xf32>
    %58 = arith.negf %57 : vector<8x32xf32>
    %59 = math.exp %58 : vector<8x32xf32>
    %cst_24 = arith.constant 1.000000e+00 : f32
    %60 = vector.broadcast %cst_24 : f32 to vector<8x32xf32>
    %61 = arith.addf %60, %59 : vector<8x32xf32>
    %62 = arith.divf %60, %61 : vector<8x32xf32>
    %63 = vector.extract_strided_slice %49 {offsets = [0, 32], sizes = [8, 32], strides = [1, 1]} : vector<8x96xf32> to vector<8x32xf32>
    %64 = vector.extract_strided_slice %54 {offsets = [0, 32], sizes = [8, 32], strides = [1, 1]} : vector<8x96xf32> to vector<8x32xf32>
    %65 = arith.addf %63, %64 : vector<8x32xf32>
    %66 = arith.negf %65 : vector<8x32xf32>
    %67 = math.exp %66 : vector<8x32xf32>
    %cst_25 = arith.constant 1.000000e+00 : f32
    %68 = vector.broadcast %cst_25 : f32 to vector<8x32xf32>
    %69 = arith.addf %68, %67 : vector<8x32xf32>
    %70 = arith.divf %68, %69 : vector<8x32xf32>
    %71 = vector.extract_strided_slice %49 {offsets = [0, 64], sizes = [8, 32], strides = [1, 1]} : vector<8x96xf32> to vector<8x32xf32>
    %72 = vector.extract_strided_slice %54 {offsets = [0, 64], sizes = [8, 32], strides = [1, 1]} : vector<8x96xf32> to vector<8x32xf32>
    %73 = arith.mulf %70, %72 : vector<8x32xf32>
    %74 = arith.addf %71, %73 : vector<8x32xf32>
    %75 = math.tanh %74 : vector<8x32xf32>
    %cst_26 = arith.constant 1.000000e+00 : f32
    %76 = vector.broadcast %cst_26 : f32 to vector<8x32xf32>
    %77 = arith.subf %76, %62 : vector<8x32xf32>
    %78 = arith.mulf %77, %44 : vector<8x32xf32>
    %79 = arith.mulf %62, %75 : vector<8x32xf32>
    %80 = arith.addf %78, %79 : vector<8x32xf32>
    %c8 = arith.constant 8 : index
    %c0_27 = arith.constant 0 : index
    %81 = vector.load %arg1[%c8, %c0_27] : memref<64x32xf32, #tpu.memory_space<vmem>>, vector<8x32xf32>
    %82 = arith.mulf %81, %80 : vector<8x32xf32>
    %cst_28 = arith.constant 1.000000e+00 : f32
    %83 = vector.broadcast %cst_28 : f32 to vector<8x32xf32>
    %84 = arith.subf %83, %81 : vector<8x32xf32>
    %85 = arith.mulf %84, %44 : vector<8x32xf32>
    %86 = arith.addf %82, %85 : vector<8x32xf32>
    %87 = vector.extract_strided_slice %86 {offsets = [0, 0], sizes = [8, 16], strides = [1, 1]} : vector<8x32xf32> to vector<8x16xf32>
    %c8_29 = arith.constant 8 : index
    %c0_30 = arith.constant 0 : index
    %88 = vector.load %arg26[%c8_29, %c0_30] : memref<64x32xf32, #tpu.memory_space<vmem>>, vector<8x16xf32>
    tpu.vector_store %arg26[%c8_29, %c0_30], %87 {strides = array<i32>} : memref<64x32xf32, #tpu.memory_space<vmem>>, vector<8x16xf32>,
    %89 = vector.extract_strided_slice %86 {offsets = [0, 16], sizes = [8, 16], strides = [1, 1]} : vector<8x32xf32> to vector<8x16xf32>
    %c48 = arith.constant 48 : index
    %c16_31 = arith.constant 16 : index
    %90 = vector.load %arg26[%c48, %c16_31] : memref<64x32xf32, #tpu.memory_space<vmem>>, vector<8x16xf32>
    tpu.vector_store %arg26[%c48, %c16_31], %89 {strides = array<i32>} : memref<64x32xf32, #tpu.memory_space<vmem>>, vector<8x16xf32>,
    %91 = vector.extract_strided_slice %5 {offsets = [16, 0], sizes = [8, 96], strides = [1, 1]} : vector<64x96xf32> to vector<8x96xf32>
    %c0_32 = arith.constant 0 : index
    %c0_33 = arith.constant 0 : index
    %92 = vector.load %arg7[%c0_32, %c0_33] : memref<32x96xf32, #tpu.memory_space<vmem>>, vector<32x96xf32>
    %cst_34 = arith.constant dense<0.000000e+00> : vector<8x96xf32>
    %93 = tpu.matmul %86, %92, %cst_34 {dimension_numbers = #tpu.dot_dimension_numbers<[1], [0], [0], [1], [0, 0, 1, 1], [], []>, precision = #tpu.contract_precision<fp32>} : vector<8x32xf32>, vector<32x96xf32>, vector<8x96xf32> -> vector<8x96xf32>
    %c0_35 = arith.constant 0 : index
    %c0_36 = arith.constant 0 : index
    %94 = vector.load %arg8[%c0_35, %c0_36] : memref<1x96xf32, #tpu.memory_space<vmem>>, vector<1x96xf32>
    %95 = vector.broadcast %94 : vector<1x96xf32> to vector<8x96xf32>
    %96 = arith.addf %93, %95 : vector<8x96xf32>
    %97 = vector.extract_strided_slice %91 {offsets = [0, 0], sizes = [8, 32], strides = [1, 1]} : vector<8x96xf32> to vector<8x32xf32>
    %98 = vector.extract_strided_slice %96 {offsets = [0, 0], sizes = [8, 32], strides = [1, 1]} : vector<8x96xf32> to vector<8x32xf32>
    %99 = arith.addf %97, %98 : vector<8x32xf32>
    %100 = arith.negf %99 : vector<8x32xf32>
    %101 = math.exp %100 : vector<8x32xf32>
    %cst_37 = arith.constant 1.000000e+00 : f32
    %102 = vector.broadcast %cst_37 : f32 to vector<8x32xf32>
    %103 = arith.addf %102, %101 : vector<8x32xf32>
    %104 = arith.divf %102, %103 : vector<8x32xf32>
    %105 = vector.extract_strided_slice %91 {offsets = [0, 32], sizes = [8, 32], strides = [1, 1]} : vector<8x96xf32> to vector<8x32xf32>
    %106 = vector.extract_strided_slice %96 {offsets = [0, 32], sizes = [8, 32], strides = [1, 1]} : vector<8x96xf32> to vector<8x32xf32>
    %107 = arith.addf %105, %106 : vector<8x32xf32>
    %108 = arith.negf %107 : vector<8x32xf32>
    %109 = math.exp %108 : vector<8x32xf32>
    %cst_38 = arith.constant 1.000000e+00 : f32
    %110 = vector.broadcast %cst_38 : f32 to vector<8x32xf32>
    %111 = arith.addf %110, %109 : vector<8x32xf32>
    %112 = arith.divf %110, %111 : vector<8x32xf32>
    %113 = vector.extract_strided_slice %91 {offsets = [0, 64], sizes = [8, 32], strides = [1, 1]} : vector<8x96xf32> to vector<8x32xf32>
    %114 = vector.extract_strided_slice %96 {offsets = [0, 64], sizes = [8, 32], strides = [1, 1]} : vector<8x96xf32> to vector<8x32xf32>
    %115 = arith.mulf %112, %114 : vector<8x32xf32>
    %116 = arith.addf %113, %115 : vector<8x32xf32>
    %117 = math.tanh %116 : vector<8x32xf32>
    %cst_39 = arith.constant 1.000000e+00 : f32
    %118 = vector.broadcast %cst_39 : f32 to vector<8x32xf32>
    %119 = arith.subf %118, %104 : vector<8x32xf32>
    %120 = arith.mulf %119, %86 : vector<8x32xf32>
    %121 = arith.mulf %104, %117 : vector<8x32xf32>
    %122 = arith.addf %120, %121 : vector<8x32xf32>
    %c16_40 = arith.constant 16 : index
    %c0_41 = arith.constant 0 : index
    %123 = vector.load %arg1[%c16_40, %c0_41] : memref<64x32xf32, #tpu.memory_space<vmem>>, vector<8x32xf32>
    %124 = arith.mulf %123, %122 : vector<8x32xf32>
    %cst_42 = arith.constant 1.000000e+00 : f32
    %125 = vector.broadcast %cst_42 : f32 to vector<8x32xf32>
    %126 = arith.subf %125, %123 : vector<8x32xf32>
    %127 = arith.mulf %126, %86 : vector<8x32xf32>
    %128 = arith.addf %124, %127 : vector<8x32xf32>
    %129 = vector.extract_strided_slice %128 {offsets = [0, 0], sizes = [8, 16], strides = [1, 1]} : vector<8x32xf32> to vector<8x16xf32>
    %c16_43 = arith.constant 16 : index
    %c0_44 = arith.constant 0 : index
    %130 = vector.load %arg26[%c16_43, %c0_44] : memref<64x32xf32, #tpu.memory_space<vmem>>, vector<8x16xf32>
    tpu.vector_store %arg26[%c16_43, %c0_44], %129 {strides = array<i32>} : memref<64x32xf32, #tpu.memory_space<vmem>>, vector<8x16xf32>,
    %131 = vector.extract_strided_slice %128 {offsets = [0, 16], sizes = [8, 16], strides = [1, 1]} : vector<8x32xf32> to vector<8x16xf32>
    %c40 = arith.constant 40 : index
    %c16_45 = arith.constant 16 : index
    %132 = vector.load %arg26[%c40, %c16_45] : memref<64x32xf32, #tpu.memory_space<vmem>>, vector<8x16xf32>
    tpu.vector_store %arg26[%c40, %c16_45], %131 {strides = array<i32>} : memref<64x32xf32, #tpu.memory_space<vmem>>, vector<8x16xf32>,
    %133 = vector.extract_strided_slice %5 {offsets = [24, 0], sizes = [8, 96], strides = [1, 1]} : vector<64x96xf32> to vector<8x96xf32>
    %c0_46 = arith.constant 0 : index
    %c0_47 = arith.constant 0 : index
    %134 = vector.load %arg7[%c0_46, %c0_47] : memref<32x96xf32, #tpu.memory_space<vmem>>, vector<32x96xf32>
    %cst_48 = arith.constant dense<0.000000e+00> : vector<8x96xf32>
    %135 = tpu.matmul %128, %134, %cst_48 {dimension_numbers = #tpu.dot_dimension_numbers<[1], [0], [0], [1], [0, 0, 1, 1], [], []>, precision = #tpu.contract_precision<fp32>} : vector<8x32xf32>, vector<32x96xf32>, vector<8x96xf32> -> vector<8x96xf32>
    %c0_49 = arith.constant 0 : index
    %c0_50 = arith.constant 0 : index
    %136 = vector.load %arg8[%c0_49, %c0_50] : memref<1x96xf32, #tpu.memory_space<vmem>>, vector<1x96xf32>
    %137 = vector.broadcast %136 : vector<1x96xf32> to vector<8x96xf32>
    %138 = arith.addf %135, %137 : vector<8x96xf32>
    %139 = vector.extract_strided_slice %133 {offsets = [0, 0], sizes = [8, 32], strides = [1, 1]} : vector<8x96xf32> to vector<8x32xf32>
    %140 = vector.extract_strided_slice %138 {offsets = [0, 0], sizes = [8, 32], strides = [1, 1]} : vector<8x96xf32> to vector<8x32xf32>
    %141 = arith.addf %139, %140 : vector<8x32xf32>
    %142 = arith.negf %141 : vector<8x32xf32>
    %143 = math.exp %142 : vector<8x32xf32>
    %cst_51 = arith.constant 1.000000e+00 : f32
    %144 = vector.broadcast %cst_51 : f32 to vector<8x32xf32>
    %145 = arith.addf %144, %143 : vector<8x32xf32>
    %146 = arith.divf %144, %145 : vector<8x32xf32>
    %147 = vector.extract_strided_slice %133 {offsets = [0, 32], sizes = [8, 32], strides = [1, 1]} : vector<8x96xf32> to vector<8x32xf32>
    %148 = vector.extract_strided_slice %138 {offsets = [0, 32], sizes = [8, 32], strides = [1, 1]} : vector<8x96xf32> to vector<8x32xf32>
    %149 = arith.addf %147, %148 : vector<8x32xf32>
    %150 = arith.negf %149 : vector<8x32xf32>
    %151 = math.exp %150 : vector<8x32xf32>
    %cst_52 = arith.constant 1.000000e+00 : f32
    %152 = vector.broadcast %cst_52 : f32 to vector<8x32xf32>
    %153 = arith.addf %152, %151 : vector<8x32xf32>
    %154 = arith.divf %152, %153 : vector<8x32xf32>
    %155 = vector.extract_strided_slice %133 {offsets = [0, 64], sizes = [8, 32], strides = [1, 1]} : vector<8x96xf32> to vector<8x32xf32>
    %156 = vector.extract_strided_slice %138 {offsets = [0, 64], sizes = [8, 32], strides = [1, 1]} : vector<8x96xf32> to vector<8x32xf32>
    %157 = arith.mulf %154, %156 : vector<8x32xf32>
    %158 = arith.addf %155, %157 : vector<8x32xf32>
    %159 = math.tanh %158 : vector<8x32xf32>
    %cst_53 = arith.constant 1.000000e+00 : f32
    %160 = vector.broadcast %cst_53 : f32 to vector<8x32xf32>
    %161 = arith.subf %160, %146 : vector<8x32xf32>
    %162 = arith.mulf %161, %128 : vector<8x32xf32>
    %163 = arith.mulf %146, %159 : vector<8x32xf32>
    %164 = arith.addf %162, %163 : vector<8x32xf32>
    %c24 = arith.constant 24 : index
    %c0_54 = arith.constant 0 : index
    %165 = vector.load %arg1[%c24, %c0_54] : memref<64x32xf32, #tpu.memory_space<vmem>>, vector<8x32xf32>
    %166 = arith.mulf %165, %164 : vector<8x32xf32>
    %cst_55 = arith.constant 1.000000e+00 : f32
    %167 = vector.broadcast %cst_55 : f32 to vector<8x32xf32>
    %168 = arith.subf %167, %165 : vector<8x32xf32>
    %169 = arith.mulf %168, %128 : vector<8x32xf32>
    %170 = arith.addf %166, %169 : vector<8x32xf32>
    %171 = vector.extract_strided_slice %170 {offsets = [0, 0], sizes = [8, 16], strides = [1, 1]} : vector<8x32xf32> to vector<8x16xf32>
    %c24_56 = arith.constant 24 : index
    %c0_57 = arith.constant 0 : index
    %172 = vector.load %arg26[%c24_56, %c0_57] : memref<64x32xf32, #tpu.memory_space<vmem>>, vector<8x16xf32>
    tpu.vector_store %arg26[%c24_56, %c0_57], %171 {strides = array<i32>} : memref<64x32xf32, #tpu.memory_space<vmem>>, vector<8x16xf32>,
    %173 = vector.extract_strided_slice %170 {offsets = [0, 16], sizes = [8, 16], strides = [1, 1]} : vector<8x32xf32> to vector<8x16xf32>
    %c32 = arith.constant 32 : index
    %c16_58 = arith.constant 16 : index
    %174 = vector.load %arg26[%c32, %c16_58] : memref<64x32xf32, #tpu.memory_space<vmem>>, vector<8x16xf32>
    tpu.vector_store %arg26[%c32, %c16_58], %173 {strides = array<i32>} : memref<64x32xf32, #tpu.memory_space<vmem>>, vector<8x16xf32>,
    %175 = vector.extract_strided_slice %5 {offsets = [32, 0], sizes = [8, 96], strides = [1, 1]} : vector<64x96xf32> to vector<8x96xf32>
    %c0_59 = arith.constant 0 : index
    %c0_60 = arith.constant 0 : index
    %176 = vector.load %arg7[%c0_59, %c0_60] : memref<32x96xf32, #tpu.memory_space<vmem>>, vector<32x96xf32>
    %cst_61 = arith.constant dense<0.000000e+00> : vector<8x96xf32>
    %177 = tpu.matmul %170, %176, %cst_61 {dimension_numbers = #tpu.dot_dimension_numbers<[1], [0], [0], [1], [0, 0, 1, 1], [], []>, precision = #tpu.contract_precision<fp32>} : vector<8x32xf32>, vector<32x96xf32>, vector<8x96xf32> -> vector<8x96xf32>
    %c0_62 = arith.constant 0 : index
    %c0_63 = arith.constant 0 : index
    %178 = vector.load %arg8[%c0_62, %c0_63] : memref<1x96xf32, #tpu.memory_space<vmem>>, vector<1x96xf32>
    %179 = vector.broadcast %178 : vector<1x96xf32> to vector<8x96xf32>
    %180 = arith.addf %177, %179 : vector<8x96xf32>
    %181 = vector.extract_strided_slice %175 {offsets = [0, 0], sizes = [8, 32], strides = [1, 1]} : vector<8x96xf32> to vector<8x32xf32>
    %182 = vector.extract_strided_slice %180 {offsets = [0, 0], sizes = [8, 32], strides = [1, 1]} : vector<8x96xf32> to vector<8x32xf32>
    %183 = arith.addf %181, %182 : vector<8x32xf32>
    %184 = arith.negf %183 : vector<8x32xf32>
    %185 = math.exp %184 : vector<8x32xf32>
    %cst_64 = arith.constant 1.000000e+00 : f32
    %186 = vector.broadcast %cst_64 : f32 to vector<8x32xf32>
    %187 = arith.addf %186, %185 : vector<8x32xf32>
    %188 = arith.divf %186, %187 : vector<8x32xf32>
    %189 = vector.extract_strided_slice %175 {offsets = [0, 32], sizes = [8, 32], strides = [1, 1]} : vector<8x96xf32> to vector<8x32xf32>
    %190 = vector.extract_strided_slice %180 {offsets = [0, 32], sizes = [8, 32], strides = [1, 1]} : vector<8x96xf32> to vector<8x32xf32>
    %191 = arith.addf %189, %190 : vector<8x32xf32>
    %192 = arith.negf %191 : vector<8x32xf32>
    %193 = math.exp %192 : vector<8x32xf32>
    %cst_65 = arith.constant 1.000000e+00 : f32
    %194 = vector.broadcast %cst_65 : f32 to vector<8x32xf32>
    %195 = arith.addf %194, %193 : vector<8x32xf32>
    %196 = arith.divf %194, %195 : vector<8x32xf32>
    %197 = vector.extract_strided_slice %175 {offsets = [0, 64], sizes = [8, 32], strides = [1, 1]} : vector<8x96xf32> to vector<8x32xf32>
    %198 = vector.extract_strided_slice %180 {offsets = [0, 64], sizes = [8, 32], strides = [1, 1]} : vector<8x96xf32> to vector<8x32xf32>
    %199 = arith.mulf %196, %198 : vector<8x32xf32>
    %200 = arith.addf %197, %199 : vector<8x32xf32>
    %201 = math.tanh %200 : vector<8x32xf32>
    %cst_66 = arith.constant 1.000000e+00 : f32
    %202 = vector.broadcast %cst_66 : f32 to vector<8x32xf32>
    %203 = arith.subf %202, %188 : vector<8x32xf32>
    %204 = arith.mulf %203, %170 : vector<8x32xf32>
    %205 = arith.mulf %188, %201 : vector<8x32xf32>
    %206 = arith.addf %204, %205 : vector<8x32xf32>
    %c32_67 = arith.constant 32 : index
    %c0_68 = arith.constant 0 : index
    %207 = vector.load %arg1[%c32_67, %c0_68] : memref<64x32xf32, #tpu.memory_space<vmem>>, vector<8x32xf32>
    %208 = arith.mulf %207, %206 : vector<8x32xf32>
    %cst_69 = arith.constant 1.000000e+00 : f32
    %209 = vector.broadcast %cst_69 : f32 to vector<8x32xf32>
    %210 = arith.subf %209, %207 : vector<8x32xf32>
    %211 = arith.mulf %210, %170 : vector<8x32xf32>
    %212 = arith.addf %208, %211 : vector<8x32xf32>
    %213 = vector.extract_strided_slice %212 {offsets = [0, 0], sizes = [8, 16], strides = [1, 1]} : vector<8x32xf32> to vector<8x16xf32>
    %c32_70 = arith.constant 32 : index
    %c0_71 = arith.constant 0 : index
    %214 = vector.load %arg26[%c32_70, %c0_71] : memref<64x32xf32, #tpu.memory_space<vmem>>, vector<8x16xf32>
    tpu.vector_store %arg26[%c32_70, %c0_71], %213 {strides = array<i32>} : memref<64x32xf32, #tpu.memory_space<vmem>>, vector<8x16xf32>,
    %215 = vector.extract_strided_slice %212 {offsets = [0, 16], sizes = [8, 16], strides = [1, 1]} : vector<8x32xf32> to vector<8x16xf32>
    %c24_72 = arith.constant 24 : index
    %c16_73 = arith.constant 16 : index
    %216 = vector.load %arg26[%c24_72, %c16_73] : memref<64x32xf32, #tpu.memory_space<vmem>>, vector<8x16xf32>
    tpu.vector_store %arg26[%c24_72, %c16_73], %215 {strides = array<i32>} : memref<64x32xf32, #tpu.memory_space<vmem>>, vector<8x16xf32>,
    %217 = vector.extract_strided_slice %5 {offsets = [40, 0], sizes = [8, 96], strides = [1, 1]} : vector<64x96xf32> to vector<8x96xf32>
    %c0_74 = arith.constant 0 : index
    %c0_75 = arith.constant 0 : index
    %218 = vector.load %arg7[%c0_74, %c0_75] : memref<32x96xf32, #tpu.memory_space<vmem>>, vector<32x96xf32>
    %cst_76 = arith.constant dense<0.000000e+00> : vector<8x96xf32>
    %219 = tpu.matmul %212, %218, %cst_76 {dimension_numbers = #tpu.dot_dimension_numbers<[1], [0], [0], [1], [0, 0, 1, 1], [], []>, precision = #tpu.contract_precision<fp32>} : vector<8x32xf32>, vector<32x96xf32>, vector<8x96xf32> -> vector<8x96xf32>
    %c0_77 = arith.constant 0 : index
    %c0_78 = arith.constant 0 : index
    %220 = vector.load %arg8[%c0_77, %c0_78] : memref<1x96xf32, #tpu.memory_space<vmem>>, vector<1x96xf32>
    %221 = vector.broadcast %220 : vector<1x96xf32> to vector<8x96xf32>
    %222 = arith.addf %219, %221 : vector<8x96xf32>
    %223 = vector.extract_strided_slice %217 {offsets = [0, 0], sizes = [8, 32], strides = [1, 1]} : vector<8x96xf32> to vector<8x32xf32>
    %224 = vector.extract_strided_slice %222 {offsets = [0, 0], sizes = [8, 32], strides = [1, 1]} : vector<8x96xf32> to vector<8x32xf32>
    %225 = arith.addf %223, %224 : vector<8x32xf32>
    %226 = arith.negf %225 : vector<8x32xf32>
    %227 = math.exp %226 : vector<8x32xf32>
    %cst_79 = arith.constant 1.000000e+00 : f32
    %228 = vector.broadcast %cst_79 : f32 to vector<8x32xf32>
    %229 = arith.addf %228, %227 : vector<8x32xf32>
    %230 = arith.divf %228, %229 : vector<8x32xf32>
    %231 = vector.extract_strided_slice %217 {offsets = [0, 32], sizes = [8, 32], strides = [1, 1]} : vector<8x96xf32> to vector<8x32xf32>
    %232 = vector.extract_strided_slice %222 {offsets = [0, 32], sizes = [8, 32], strides = [1, 1]} : vector<8x96xf32> to vector<8x32xf32>
    %233 = arith.addf %231, %232 : vector<8x32xf32>
    %234 = arith.negf %233 : vector<8x32xf32>
    %235 = math.exp %234 : vector<8x32xf32>
    %cst_80 = arith.constant 1.000000e+00 : f32
    %236 = vector.broadcast %cst_80 : f32 to vector<8x32xf32>
    %237 = arith.addf %236, %235 : vector<8x32xf32>
    %238 = arith.divf %236, %237 : vector<8x32xf32>
    %239 = vector.extract_strided_slice %217 {offsets = [0, 64], sizes = [8, 32], strides = [1, 1]} : vector<8x96xf32> to vector<8x32xf32>
    %240 = vector.extract_strided_slice %222 {offsets = [0, 64], sizes = [8, 32], strides = [1, 1]} : vector<8x96xf32> to vector<8x32xf32>
    %241 = arith.mulf %238, %240 : vector<8x32xf32>
    %242 = arith.addf %239, %241 : vector<8x32xf32>
    %243 = math.tanh %242 : vector<8x32xf32>
    %cst_81 = arith.constant 1.000000e+00 : f32
    %244 = vector.broadcast %cst_81 : f32 to vector<8x32xf32>
    %245 = arith.subf %244, %230 : vector<8x32xf32>
    %246 = arith.mulf %245, %212 : vector<8x32xf32>
    %247 = arith.mulf %230, %243 : vector<8x32xf32>
    %248 = arith.addf %246, %247 : vector<8x32xf32>
    %c40_82 = arith.constant 40 : index
    %c0_83 = arith.constant 0 : index
    %249 = vector.load %arg1[%c40_82, %c0_83] : memref<64x32xf32, #tpu.memory_space<vmem>>, vector<8x32xf32>
    %250 = arith.mulf %249, %248 : vector<8x32xf32>
    %cst_84 = arith.constant 1.000000e+00 : f32
    %251 = vector.broadcast %cst_84 : f32 to vector<8x32xf32>
    %252 = arith.subf %251, %249 : vector<8x32xf32>
    %253 = arith.mulf %252, %212 : vector<8x32xf32>
    %254 = arith.addf %250, %253 : vector<8x32xf32>
    %255 = vector.extract_strided_slice %254 {offsets = [0, 0], sizes = [8, 16], strides = [1, 1]} : vector<8x32xf32> to vector<8x16xf32>
    %c40_85 = arith.constant 40 : index
    %c0_86 = arith.constant 0 : index
    %256 = vector.load %arg26[%c40_85, %c0_86] : memref<64x32xf32, #tpu.memory_space<vmem>>, vector<8x16xf32>
    tpu.vector_store %arg26[%c40_85, %c0_86], %255 {strides = array<i32>} : memref<64x32xf32, #tpu.memory_space<vmem>>, vector<8x16xf32>,
    %257 = vector.extract_strided_slice %254 {offsets = [0, 16], sizes = [8, 16], strides = [1, 1]} : vector<8x32xf32> to vector<8x16xf32>
    %c16_87 = arith.constant 16 : index
    %c16_88 = arith.constant 16 : index
    %258 = vector.load %arg26[%c16_87, %c16_88] : memref<64x32xf32, #tpu.memory_space<vmem>>, vector<8x16xf32>
    tpu.vector_store %arg26[%c16_87, %c16_88], %257 {strides = array<i32>} : memref<64x32xf32, #tpu.memory_space<vmem>>, vector<8x16xf32>,
    %259 = vector.extract_strided_slice %5 {offsets = [48, 0], sizes = [8, 96], strides = [1, 1]} : vector<64x96xf32> to vector<8x96xf32>
    %c0_89 = arith.constant 0 : index
    %c0_90 = arith.constant 0 : index
    %260 = vector.load %arg7[%c0_89, %c0_90] : memref<32x96xf32, #tpu.memory_space<vmem>>, vector<32x96xf32>
    %cst_91 = arith.constant dense<0.000000e+00> : vector<8x96xf32>
    %261 = tpu.matmul %254, %260, %cst_91 {dimension_numbers = #tpu.dot_dimension_numbers<[1], [0], [0], [1], [0, 0, 1, 1], [], []>, precision = #tpu.contract_precision<fp32>} : vector<8x32xf32>, vector<32x96xf32>, vector<8x96xf32> -> vector<8x96xf32>
    %c0_92 = arith.constant 0 : index
    %c0_93 = arith.constant 0 : index
    %262 = vector.load %arg8[%c0_92, %c0_93] : memref<1x96xf32, #tpu.memory_space<vmem>>, vector<1x96xf32>
    %263 = vector.broadcast %262 : vector<1x96xf32> to vector<8x96xf32>
    %264 = arith.addf %261, %263 : vector<8x96xf32>
    %265 = vector.extract_strided_slice %259 {offsets = [0, 0], sizes = [8, 32], strides = [1, 1]} : vector<8x96xf32> to vector<8x32xf32>
    %266 = vector.extract_strided_slice %264 {offsets = [0, 0], sizes = [8, 32], strides = [1, 1]} : vector<8x96xf32> to vector<8x32xf32>
    %267 = arith.addf %265, %266 : vector<8x32xf32>
    %268 = arith.negf %267 : vector<8x32xf32>
    %269 = math.exp %268 : vector<8x32xf32>
    %cst_94 = arith.constant 1.000000e+00 : f32
    %270 = vector.broadcast %cst_94 : f32 to vector<8x32xf32>
    %271 = arith.addf %270, %269 : vector<8x32xf32>
    %272 = arith.divf %270, %271 : vector<8x32xf32>
    %273 = vector.extract_strided_slice %259 {offsets = [0, 32], sizes = [8, 32], strides = [1, 1]} : vector<8x96xf32> to vector<8x32xf32>
    %274 = vector.extract_strided_slice %264 {offsets = [0, 32], sizes = [8, 32], strides = [1, 1]} : vector<8x96xf32> to vector<8x32xf32>
    %275 = arith.addf %273, %274 : vector<8x32xf32>
    %276 = arith.negf %275 : vector<8x32xf32>
    %277 = math.exp %276 : vector<8x32xf32>
    %cst_95 = arith.constant 1.000000e+00 : f32
    %278 = vector.broadcast %cst_95 : f32 to vector<8x32xf32>
    %279 = arith.addf %278, %277 : vector<8x32xf32>
    %280 = arith.divf %278, %279 : vector<8x32xf32>
    %281 = vector.extract_strided_slice %259 {offsets = [0, 64], sizes = [8, 32], strides = [1, 1]} : vector<8x96xf32> to vector<8x32xf32>
    %282 = vector.extract_strided_slice %264 {offsets = [0, 64], sizes = [8, 32], strides = [1, 1]} : vector<8x96xf32> to vector<8x32xf32>
    %283 = arith.mulf %280, %282 : vector<8x32xf32>
    %284 = arith.addf %281, %283 : vector<8x32xf32>
    %285 = math.tanh %284 : vector<8x32xf32>
    %cst_96 = arith.constant 1.000000e+00 : f32
    %286 = vector.broadcast %cst_96 : f32 to vector<8x32xf32>
    %287 = arith.subf %286, %272 : vector<8x32xf32>
    %288 = arith.mulf %287, %254 : vector<8x32xf32>
    %289 = arith.mulf %272, %285 : vector<8x32xf32>
    %290 = arith.addf %288, %289 : vector<8x32xf32>
    %c48_97 = arith.constant 48 : index
    %c0_98 = arith.constant 0 : index
    %291 = vector.load %arg1[%c48_97, %c0_98] : memref<64x32xf32, #tpu.memory_space<vmem>>, vector<8x32xf32>
    %292 = arith.mulf %291, %290 : vector<8x32xf32>
    %cst_99 = arith.constant 1.000000e+00 : f32
    %293 = vector.broadcast %cst_99 : f32 to vector<8x32xf32>
    %294 = arith.subf %293, %291 : vector<8x32xf32>
    %295 = arith.mulf %294, %254 : vector<8x32xf32>
    %296 = arith.addf %292, %295 : vector<8x32xf32>
    %297 = vector.extract_strided_slice %296 {offsets = [0, 0], sizes = [8, 16], strides = [1, 1]} : vector<8x32xf32> to vector<8x16xf32>
    %c48_100 = arith.constant 48 : index
    %c0_101 = arith.constant 0 : index
    %298 = vector.load %arg26[%c48_100, %c0_101] : memref<64x32xf32, #tpu.memory_space<vmem>>, vector<8x16xf32>
    tpu.vector_store %arg26[%c48_100, %c0_101], %297 {strides = array<i32>} : memref<64x32xf32, #tpu.memory_space<vmem>>, vector<8x16xf32>,
    %299 = vector.extract_strided_slice %296 {offsets = [0, 16], sizes = [8, 16], strides = [1, 1]} : vector<8x32xf32> to vector<8x16xf32>
    %c8_102 = arith.constant 8 : index
    %c16_103 = arith.constant 16 : index
    %300 = vector.load %arg26[%c8_102, %c16_103] : memref<64x32xf32, #tpu.memory_space<vmem>>, vector<8x16xf32>
    tpu.vector_store %arg26[%c8_102, %c16_103], %299 {strides = array<i32>} : memref<64x32xf32, #tpu.memory_space<vmem>>, vector<8x16xf32>,
    %301 = vector.extract_strided_slice %5 {offsets = [56, 0], sizes = [8, 96], strides = [1, 1]} : vector<64x96xf32> to vector<8x96xf32>
    %c0_104 = arith.constant 0 : index
    %c0_105 = arith.constant 0 : index
    %302 = vector.load %arg7[%c0_104, %c0_105] : memref<32x96xf32, #tpu.memory_space<vmem>>, vector<32x96xf32>
    %cst_106 = arith.constant dense<0.000000e+00> : vector<8x96xf32>
    %303 = tpu.matmul %296, %302, %cst_106 {dimension_numbers = #tpu.dot_dimension_numbers<[1], [0], [0], [1], [0, 0, 1, 1], [], []>, precision = #tpu.contract_precision<fp32>} : vector<8x32xf32>, vector<32x96xf32>, vector<8x96xf32> -> vector<8x96xf32>
    %c0_107 = arith.constant 0 : index
    %c0_108 = arith.constant 0 : index
    %304 = vector.load %arg8[%c0_107, %c0_108] : memref<1x96xf32, #tpu.memory_space<vmem>>, vector<1x96xf32>
    %305 = vector.broadcast %304 : vector<1x96xf32> to vector<8x96xf32>
    %306 = arith.addf %303, %305 : vector<8x96xf32>
    %307 = vector.extract_strided_slice %301 {offsets = [0, 0], sizes = [8, 32], strides = [1, 1]} : vector<8x96xf32> to vector<8x32xf32>
    %308 = vector.extract_strided_slice %306 {offsets = [0, 0], sizes = [8, 32], strides = [1, 1]} : vector<8x96xf32> to vector<8x32xf32>
    %309 = arith.addf %307, %308 : vector<8x32xf32>
    %310 = arith.negf %309 : vector<8x32xf32>
    %311 = math.exp %310 : vector<8x32xf32>
    %cst_109 = arith.constant 1.000000e+00 : f32
    %312 = vector.broadcast %cst_109 : f32 to vector<8x32xf32>
    %313 = arith.addf %312, %311 : vector<8x32xf32>
    %314 = arith.divf %312, %313 : vector<8x32xf32>
    %315 = vector.extract_strided_slice %301 {offsets = [0, 32], sizes = [8, 32], strides = [1, 1]} : vector<8x96xf32> to vector<8x32xf32>
    %316 = vector.extract_strided_slice %306 {offsets = [0, 32], sizes = [8, 32], strides = [1, 1]} : vector<8x96xf32> to vector<8x32xf32>
    %317 = arith.addf %315, %316 : vector<8x32xf32>
    %318 = arith.negf %317 : vector<8x32xf32>
    %319 = math.exp %318 : vector<8x32xf32>
    %cst_110 = arith.constant 1.000000e+00 : f32
    %320 = vector.broadcast %cst_110 : f32 to vector<8x32xf32>
    %321 = arith.addf %320, %319 : vector<8x32xf32>
    %322 = arith.divf %320, %321 : vector<8x32xf32>
    %323 = vector.extract_strided_slice %301 {offsets = [0, 64], sizes = [8, 32], strides = [1, 1]} : vector<8x96xf32> to vector<8x32xf32>
    %324 = vector.extract_strided_slice %306 {offsets = [0, 64], sizes = [8, 32], strides = [1, 1]} : vector<8x96xf32> to vector<8x32xf32>
    %325 = arith.mulf %322, %324 : vector<8x32xf32>
    %326 = arith.addf %323, %325 : vector<8x32xf32>
    %327 = math.tanh %326 : vector<8x32xf32>
    %cst_111 = arith.constant 1.000000e+00 : f32
    %328 = vector.broadcast %cst_111 : f32 to vector<8x32xf32>
    %329 = arith.subf %328, %314 : vector<8x32xf32>
    %330 = arith.mulf %329, %296 : vector<8x32xf32>
    %331 = arith.mulf %314, %327 : vector<8x32xf32>
    %332 = arith.addf %330, %331 : vector<8x32xf32>
    %c56_112 = arith.constant 56 : index
    %c0_113 = arith.constant 0 : index
    %333 = vector.load %arg1[%c56_112, %c0_113] : memref<64x32xf32, #tpu.memory_space<vmem>>, vector<8x32xf32>
    %334 = arith.mulf %333, %332 : vector<8x32xf32>
    %cst_114 = arith.constant 1.000000e+00 : f32
    %335 = vector.broadcast %cst_114 : f32 to vector<8x32xf32>
    %336 = arith.subf %335, %333 : vector<8x32xf32>
    %337 = arith.mulf %336, %296 : vector<8x32xf32>
    %338 = arith.addf %334, %337 : vector<8x32xf32>
    %339 = vector.extract_strided_slice %338 {offsets = [0, 0], sizes = [8, 16], strides = [1, 1]} : vector<8x32xf32> to vector<8x16xf32>
    %c56_115 = arith.constant 56 : index
    %c0_116 = arith.constant 0 : index
    %340 = vector.load %arg26[%c56_115, %c0_116] : memref<64x32xf32, #tpu.memory_space<vmem>>, vector<8x16xf32>
    tpu.vector_store %arg26[%c56_115, %c0_116], %339 {strides = array<i32>} : memref<64x32xf32, #tpu.memory_space<vmem>>, vector<8x16xf32>,
    %341 = vector.extract_strided_slice %338 {offsets = [0, 16], sizes = [8, 16], strides = [1, 1]} : vector<8x32xf32> to vector<8x16xf32>
    %c0_117 = arith.constant 0 : index
    %c16_118 = arith.constant 16 : index
    %342 = vector.load %arg26[%c0_117, %c16_118] : memref<64x32xf32, #tpu.memory_space<vmem>>, vector<8x16xf32>
    tpu.vector_store %arg26[%c0_117, %c16_118], %341 {strides = array<i32>} : memref<64x32xf32, #tpu.memory_space<vmem>>, vector<8x16xf32>,
    %343 = vector.extract_strided_slice %338 {offsets = [0, 16], sizes = [8, 16], strides = [1, 1]} : vector<8x32xf32> to vector<8x16xf32>
    %c0_119 = arith.constant 0 : index
    %c0_120 = arith.constant 0 : index
    %344 = vector.load %arg9[%c0_119, %c0_120] : memref<16x32xf32, #tpu.memory_space<vmem>>, vector<16x32xf32>
    %cst_121 = arith.constant dense<0.000000e+00> : vector<8x32xf32>
    %345 = tpu.matmul %343, %344, %cst_121 {dimension_numbers = #tpu.dot_dimension_numbers<[1], [0], [0], [1], [0, 0, 1, 1], [], []>, precision = #tpu.contract_precision<fp32>} : vector<8x16xf32>, vector<16x32xf32>, vector<8x32xf32> -> vector<8x32xf32>
    %c0_122 = arith.constant 0 : index
    %c0_123 = arith.constant 0 : index
    %346 = vector.load %arg10[%c0_122, %c0_123] : memref<1x32xf32, #tpu.memory_space<vmem>>, vector<1x32xf32>
    %347 = vector.broadcast %346 : vector<1x32xf32> to vector<8x32xf32>
    %348 = arith.addf %345, %347 : vector<8x32xf32>
    %349 = math.tanh %348 : vector<8x32xf32>
    %c0_124 = arith.constant 0 : index
    %c0_125 = arith.constant 0 : index
    %350 = vector.load %arg26[%c0_124, %c0_125] : memref<64x32xf32, #tpu.memory_space<vmem>>, vector<64x32xf32>
    %c0_126 = arith.constant 0 : index
    %c0_127 = arith.constant 0 : index
    %351 = vector.load %arg11[%c0_126, %c0_127] : memref<32x16xf32, #tpu.memory_space<vmem>>, vector<32x16xf32>
    %cst_128 = arith.constant dense<0.000000e+00> : vector<64x16xf32>
    %352 = tpu.matmul %350, %351, %cst_128 {dimension_numbers = #tpu.dot_dimension_numbers<[1], [0], [0], [1], [0, 0, 1, 1], [], []>, precision = #tpu.contract_precision<fp32>} : vector<64x32xf32>, vector<32x16xf32>, vector<64x16xf32> -> vector<64x16xf32>
    %c0_129 = arith.constant 0 : index
    %c0_130 = arith.constant 0 : index
    %353 = vector.load %arg12[%c0_129, %c0_130] : memref<1x16xf32, #tpu.memory_space<vmem>>, vector<1x16xf32>
    %354 = vector.broadcast %353 : vector<1x16xf32> to vector<64x16xf32>
    %355 = arith.addf %352, %354 : vector<64x16xf32>
    %356 = vector.extract_strided_slice %355 {offsets = [0, 0], sizes = [8, 16], strides = [1, 1]} : vector<64x16xf32> to vector<8x16xf32>
    %c0_131 = arith.constant 0 : index
    %c0_132 = arith.constant 0 : index
    %357 = vector.load %arg27[%c0_131, %c0_132] : memref<8x128xf32, #tpu.memory_space<vmem>>, vector<8x16xf32>
    tpu.vector_store %arg27[%c0_131, %c0_132], %356 {strides = array<i32>} : memref<8x128xf32, #tpu.memory_space<vmem>>, vector<8x16xf32>,
    %358 = vector.extract_strided_slice %355 {offsets = [8, 0], sizes = [8, 16], strides = [1, 1]} : vector<64x16xf32> to vector<8x16xf32>
    %c0_133 = arith.constant 0 : index
    %c16_134 = arith.constant 16 : index
    %359 = vector.load %arg27[%c0_133, %c16_134] : memref<8x128xf32, #tpu.memory_space<vmem>>, vector<8x16xf32>
    tpu.vector_store %arg27[%c0_133, %c16_134], %358 {strides = array<i32>} : memref<8x128xf32, #tpu.memory_space<vmem>>, vector<8x16xf32>,
    %360 = vector.extract_strided_slice %355 {offsets = [16, 0], sizes = [8, 16], strides = [1, 1]} : vector<64x16xf32> to vector<8x16xf32>
    %c0_135 = arith.constant 0 : index
    %c32_136 = arith.constant 32 : index
    %361 = vector.load %arg27[%c0_135, %c32_136] : memref<8x128xf32, #tpu.memory_space<vmem>>, vector<8x16xf32>
    tpu.vector_store %arg27[%c0_135, %c32_136], %360 {strides = array<i32>} : memref<8x128xf32, #tpu.memory_space<vmem>>, vector<8x16xf32>,
    %362 = vector.extract_strided_slice %355 {offsets = [24, 0], sizes = [8, 16], strides = [1, 1]} : vector<64x16xf32> to vector<8x16xf32>
    %c0_137 = arith.constant 0 : index
    %c48_138 = arith.constant 48 : index
    %363 = vector.load %arg27[%c0_137, %c48_138] : memref<8x128xf32, #tpu.memory_space<vmem>>, vector<8x16xf32>
    tpu.vector_store %arg27[%c0_137, %c48_138], %362 {strides = array<i32>} : memref<8x128xf32, #tpu.memory_space<vmem>>, vector<8x16xf32>,
    %364 = vector.extract_strided_slice %355 {offsets = [32, 0], sizes = [8, 16], strides = [1, 1]} : vector<64x16xf32> to vector<8x16xf32>
    %c0_139 = arith.constant 0 : index
    %c64 = arith.constant 64 : index
    %365 = vector.load %arg27[%c0_139, %c64] : memref<8x128xf32, #tpu.memory_space<vmem>>, vector<8x16xf32>
    tpu.vector_store %arg27[%c0_139, %c64], %364 {strides = array<i32>} : memref<8x128xf32, #tpu.memory_space<vmem>>, vector<8x16xf32>,
    %366 = vector.extract_strided_slice %355 {offsets = [40, 0], sizes = [8, 16], strides = [1, 1]} : vector<64x16xf32> to vector<8x16xf32>
    %c0_140 = arith.constant 0 : index
    %c80 = arith.constant 80 : index
    %367 = vector.load %arg27[%c0_140, %c80] : memref<8x128xf32, #tpu.memory_space<vmem>>, vector<8x16xf32>
    tpu.vector_store %arg27[%c0_140, %c80], %366 {strides = array<i32>} : memref<8x128xf32, #tpu.memory_space<vmem>>, vector<8x16xf32>,
    %368 = vector.extract_strided_slice %355 {offsets = [48, 0], sizes = [8, 16], strides = [1, 1]} : vector<64x16xf32> to vector<8x16xf32>
    %c0_141 = arith.constant 0 : index
    %c96 = arith.constant 96 : index
    %369 = vector.load %arg27[%c0_141, %c96] : memref<8x128xf32, #tpu.memory_space<vmem>>, vector<8x16xf32>
    tpu.vector_store %arg27[%c0_141, %c96], %368 {strides = array<i32>} : memref<8x128xf32, #tpu.memory_space<vmem>>, vector<8x16xf32>,
    %370 = vector.extract_strided_slice %355 {offsets = [56, 0], sizes = [8, 16], strides = [1, 1]} : vector<64x16xf32> to vector<8x16xf32>
    %c0_142 = arith.constant 0 : index
    %c112 = arith.constant 112 : index
    %371 = vector.load %arg27[%c0_142, %c112] : memref<8x128xf32, #tpu.memory_space<vmem>>, vector<8x16xf32>
    tpu.vector_store %arg27[%c0_142, %c112], %370 {strides = array<i32>} : memref<8x128xf32, #tpu.memory_space<vmem>>, vector<8x16xf32>,
    %c0_143 = arith.constant 0 : index
    %c0_144 = arith.constant 0 : index
    %372 = vector.load %arg2[%c0_143, %c0_144] : memref<48x16xf32, #tpu.memory_space<vmem>>, vector<48x16xf32>
    %c0_145 = arith.constant 0 : index
    %c0_146 = arith.constant 0 : index
    %373 = vector.load %arg17[%c0_145, %c0_146] : memref<16x96xf32, #tpu.memory_space<vmem>>, vector<16x96xf32>
    %cst_147 = arith.constant dense<0.000000e+00> : vector<48x96xf32>
    %374 = tpu.matmul %372, %373, %cst_147 {dimension_numbers = #tpu.dot_dimension_numbers<[1], [0], [0], [1], [0, 0, 1, 1], [], []>, precision = #tpu.contract_precision<fp32>} : vector<48x16xf32>, vector<16x96xf32>, vector<48x96xf32> -> vector<48x96xf32>
    %c0_148 = arith.constant 0 : index
    %c0_149 = arith.constant 0 : index
    %375 = vector.load %arg18[%c0_148, %c0_149] : memref<1x96xf32, #tpu.memory_space<vmem>>, vector<1x96xf32>
    %376 = vector.broadcast %375 : vector<1x96xf32> to vector<48x96xf32>
    %377 = arith.addf %374, %376 : vector<48x96xf32>
    %c0_150 = arith.constant 0 : index
    %c64_151 = arith.constant 64 : index
    %378 = vector.load %arg28[%c0_150, %c64_151] : memref<48x80xf32, #tpu.memory_space<vmem>>, vector<48x16xf32>
    tpu.vector_store %arg28[%c0_150, %c64_151], %372 {strides = array<i32>} : memref<48x80xf32, #tpu.memory_space<vmem>>, vector<48x16xf32>,
    %c0_152 = arith.constant 0 : index
    %c0_153 = arith.constant 0 : index
    %379 = vector.load %arg4[%c0_152, %c0_153] : memref<8x8xf32, #tpu.memory_space<vmem>>, vector<8x8xf32>
    %c0_154 = arith.constant 0 : index
    %c0_155 = arith.constant 0 : index
    %380 = vector.load %arg13[%c0_154, %c0_155] : memref<32x128xf32, #tpu.memory_space<vmem>>, vector<32x128xf32>
    %cst_156 = arith.constant dense<0.000000e+00> : vector<8x128xf32>
    %381 = tpu.matmul %349, %380, %cst_156 {dimension_numbers = #tpu.dot_dimension_numbers<[1], [0], [0], [1], [0, 0, 1, 1], [], []>, precision = #tpu.contract_precision<fp32>} : vector<8x32xf32>, vector<32x128xf32>, vector<8x128xf32> -> vector<8x128xf32>
    %c0_157 = arith.constant 0 : index
    %c0_158 = arith.constant 0 : index
    %382 = vector.load %arg14[%c0_157, %c0_158] : memref<1x128xf32, #tpu.memory_space<vmem>>, vector<1x128xf32>
    %383 = vector.broadcast %382 : vector<1x128xf32> to vector<8x128xf32>
    %384 = arith.addf %381, %383 : vector<8x128xf32>
    %c0_159 = arith.constant 0 : index
    %c0_160 = arith.constant 0 : index
    %385 = vector.load %arg27[%c0_159, %c0_160] : memref<8x128xf32, #tpu.memory_space<vmem>>, vector<8x128xf32>
    %386 = arith.addf %384, %385 : vector<8x128xf32>
    %387 = math.tanh %386 : vector<8x128xf32>
    %c0_161 = arith.constant 0 : index
    %c0_162 = arith.constant 0 : index
    %388 = vector.load %arg15[%c0_161, %c0_162] : memref<128x8xf32, #tpu.memory_space<vmem>>, vector<128x8xf32>
    %cst_163 = arith.constant dense<0.000000e+00> : vector<8x8xf32>
    %389 = tpu.matmul %387, %388, %cst_163 {dimension_numbers = #tpu.dot_dimension_numbers<[1], [0], [0], [1], [0, 0, 1, 1], [], []>, precision = #tpu.contract_precision<fp32>} : vector<8x128xf32>, vector<128x8xf32>, vector<8x8xf32> -> vector<8x8xf32>
    %c0_164 = arith.constant 0 : index
    %c0_165 = arith.constant 0 : index
    %390 = vector.load %arg16[%c0_164, %c0_165] : memref<1x1xf32, #tpu.memory_space<vmem>>, vector<1x1xf32>
    %391 = vector.broadcast %390 : vector<1x1xf32> to vector<8x8xf32>
    %392 = arith.addf %389, %391 : vector<8x8xf32>
    %cst_166 = arith.constant dense<0xFF800000> : vector<8xf32>
    %393 = vector.multi_reduction <maximumf>, %392, %cst_166 [1] : vector<8x8xf32> to vector<8xf32>
    %394 = vector.shape_cast %393 : vector<8xf32> to vector<8x1xf32>
    %395 = vector.broadcast %394 : vector<8x1xf32> to vector<8x8xf32>
    %396 = arith.subf %392, %395 : vector<8x8xf32>
    %397 = math.exp %396 : vector<8x8xf32>
    %398 = arith.mulf %397, %379 : vector<8x8xf32>
    %cst_167 = arith.constant dense<0.000000e+00> : vector<8xf32>
    %399 = vector.multi_reduction <add>, %398, %cst_167 [1] : vector<8x8xf32> to vector<8xf32>
    %400 = vector.shape_cast %399 : vector<8xf32> to vector<8x1xf32>
    %401 = tpu.reciprocal %400 {approx = true} : vector<8x1xf32> -> vector<8x1xf32>
    %402 = vector.broadcast %401 : vector<8x1xf32> to vector<8x8xf32>
    %403 = arith.mulf %398, %402 : vector<8x8xf32>
    %404 = vector.extract_strided_slice %403 {offsets = [0, 0], sizes = [8, 1], strides = [1, 1]} : vector<8x8xf32> to vector<8x1xf32>
    %c0_168 = arith.constant 0 : index
    %c0_169 = arith.constant 0 : index
    %405 = vector.load %arg26[%c0_168, %c0_169] : memref<64x32xf32, #tpu.memory_space<vmem>>, vector<8x32xf32>
    %406 = vector.broadcast %404 : vector<8x1xf32> to vector<8x32xf32>
    %407 = arith.mulf %406, %405 : vector<8x32xf32>
    %408 = vector.extract_strided_slice %403 {offsets = [0, 1], sizes = [8, 1], strides = [1, 1]} : vector<8x8xf32> to vector<8x1xf32>
    %c8_170 = arith.constant 8 : index
    %c0_171 = arith.constant 0 : index
    %409 = vector.load %arg26[%c8_170, %c0_171] : memref<64x32xf32, #tpu.memory_space<vmem>>, vector<8x32xf32>
    %410 = vector.broadcast %408 : vector<8x1xf32> to vector<8x32xf32>
    %411 = arith.mulf %410, %409 : vector<8x32xf32>
    %412 = arith.addf %407, %411 : vector<8x32xf32>
    %413 = vector.extract_strided_slice %403 {offsets = [0, 2], sizes = [8, 1], strides = [1, 1]} : vector<8x8xf32> to vector<8x1xf32>
    %c16_172 = arith.constant 16 : index
    %c0_173 = arith.constant 0 : index
    %414 = vector.load %arg26[%c16_172, %c0_173] : memref<64x32xf32, #tpu.memory_space<vmem>>, vector<8x32xf32>
    %415 = vector.broadcast %413 : vector<8x1xf32> to vector<8x32xf32>
    %416 = arith.mulf %415, %414 : vector<8x32xf32>
    %417 = arith.addf %412, %416 : vector<8x32xf32>
    %418 = vector.extract_strided_slice %403 {offsets = [0, 3], sizes = [8, 1], strides = [1, 1]} : vector<8x8xf32> to vector<8x1xf32>
    %c24_174 = arith.constant 24 : index
    %c0_175 = arith.constant 0 : index
    %419 = vector.load %arg26[%c24_174, %c0_175] : memref<64x32xf32, #tpu.memory_space<vmem>>, vector<8x32xf32>
    %420 = vector.broadcast %418 : vector<8x1xf32> to vector<8x32xf32>
    %421 = arith.mulf %420, %419 : vector<8x32xf32>
    %422 = arith.addf %417, %421 : vector<8x32xf32>
    %423 = vector.extract_strided_slice %403 {offsets = [0, 4], sizes = [8, 1], strides = [1, 1]} : vector<8x8xf32> to vector<8x1xf32>
    %c32_176 = arith.constant 32 : index
    %c0_177 = arith.constant 0 : index
    %424 = vector.load %arg26[%c32_176, %c0_177] : memref<64x32xf32, #tpu.memory_space<vmem>>, vector<8x32xf32>
    %425 = vector.broadcast %423 : vector<8x1xf32> to vector<8x32xf32>
    %426 = arith.mulf %425, %424 : vector<8x32xf32>
    %427 = arith.addf %422, %426 : vector<8x32xf32>
    %428 = vector.extract_strided_slice %403 {offsets = [0, 5], sizes = [8, 1], strides = [1, 1]} : vector<8x8xf32> to vector<8x1xf32>
    %c40_178 = arith.constant 40 : index
    %c0_179 = arith.constant 0 : index
    %429 = vector.load %arg26[%c40_178, %c0_179] : memref<64x32xf32, #tpu.memory_space<vmem>>, vector<8x32xf32>
    %430 = vector.broadcast %428 : vector<8x1xf32> to vector<8x32xf32>
    %431 = arith.mulf %430, %429 : vector<8x32xf32>
    %432 = arith.addf %427, %431 : vector<8x32xf32>
    %433 = vector.extract_strided_slice %403 {offsets = [0, 6], sizes = [8, 1], strides = [1, 1]} : vector<8x8xf32> to vector<8x1xf32>
    %c48_180 = arith.constant 48 : index
    %c0_181 = arith.constant 0 : index
    %434 = vector.load %arg26[%c48_180, %c0_181] : memref<64x32xf32, #tpu.memory_space<vmem>>, vector<8x32xf32>
    %435 = vector.broadcast %433 : vector<8x1xf32> to vector<8x32xf32>
    %436 = arith.mulf %435, %434 : vector<8x32xf32>
    %437 = arith.addf %432, %436 : vector<8x32xf32>
    %438 = vector.extract_strided_slice %403 {offsets = [0, 7], sizes = [8, 1], strides = [1, 1]} : vector<8x8xf32> to vector<8x1xf32>
    %c56_182 = arith.constant 56 : index
    %c0_183 = arith.constant 0 : index
    %439 = vector.load %arg26[%c56_182, %c0_183] : memref<64x32xf32, #tpu.memory_space<vmem>>, vector<8x32xf32>
    %440 = vector.broadcast %438 : vector<8x1xf32> to vector<8x32xf32>
    %441 = arith.mulf %440, %439 : vector<8x32xf32>
    %442 = arith.addf %437, %441 : vector<8x32xf32>
    %c0_184 = arith.constant 0 : index
    %c0_185 = arith.constant 0 : index
    %443 = vector.load %arg19[%c0_184, %c0_185] : memref<32x96xf32, #tpu.memory_space<vmem>>, vector<32x96xf32>
    %cst_186 = arith.constant dense<0.000000e+00> : vector<8x96xf32>
    %444 = tpu.matmul %349, %443, %cst_186 {dimension_numbers = #tpu.dot_dimension_numbers<[1], [0], [0], [1], [0, 0, 1, 1], [], []>, precision = #tpu.contract_precision<fp32>} : vector<8x32xf32>, vector<32x96xf32>, vector<8x96xf32> -> vector<8x96xf32>
    %c0_187 = arith.constant 0 : index
    %c0_188 = arith.constant 0 : index
    %445 = vector.load %arg20[%c0_187, %c0_188] : memref<1x96xf32, #tpu.memory_space<vmem>>, vector<1x96xf32>
    %446 = vector.broadcast %445 : vector<1x96xf32> to vector<8x96xf32>
    %447 = arith.addf %444, %446 : vector<8x96xf32>
    %c0_189 = arith.constant 0 : index
    %c0_190 = arith.constant 0 : index
    %448 = vector.load %arg21[%c0_189, %c0_190] : memref<32x96xf32, #tpu.memory_space<vmem>>, vector<32x96xf32>
    %cst_191 = arith.constant dense<0.000000e+00> : vector<8x96xf32>
    %449 = tpu.matmul %442, %448, %cst_191 {dimension_numbers = #tpu.dot_dimension_numbers<[1], [0], [0], [1], [0, 0, 1, 1], [], []>, precision = #tpu.contract_precision<fp32>} : vector<8x32xf32>, vector<32x96xf32>, vector<8x96xf32> -> vector<8x96xf32>
    %c0_192 = arith.constant 0 : index
    %c0_193 = arith.constant 0 : index
    %450 = vector.load %arg22[%c0_192, %c0_193] : memref<1x96xf32, #tpu.memory_space<vmem>>, vector<1x96xf32>
    %451 = vector.broadcast %450 : vector<1x96xf32> to vector<8x96xf32>
    %452 = arith.addf %449, %451 : vector<8x96xf32>
    %453 = vector.extract_strided_slice %377 {offsets = [0, 0], sizes = [8, 96], strides = [1, 1]} : vector<48x96xf32> to vector<8x96xf32>
    %454 = vector.extract_strided_slice %453 {offsets = [0, 0], sizes = [8, 32], strides = [1, 1]} : vector<8x96xf32> to vector<8x32xf32>
    %455 = vector.extract_strided_slice %447 {offsets = [0, 0], sizes = [8, 32], strides = [1, 1]} : vector<8x96xf32> to vector<8x32xf32>
    %456 = arith.addf %454, %455 : vector<8x32xf32>
    %457 = vector.extract_strided_slice %452 {offsets = [0, 0], sizes = [8, 32], strides = [1, 1]} : vector<8x96xf32> to vector<8x32xf32>
    %458 = arith.addf %456, %457 : vector<8x32xf32>
    %459 = arith.negf %458 : vector<8x32xf32>
    %460 = math.exp %459 : vector<8x32xf32>
    %cst_194 = arith.constant 1.000000e+00 : f32
    %461 = vector.broadcast %cst_194 : f32 to vector<8x32xf32>
    %462 = arith.addf %461, %460 : vector<8x32xf32>
    %463 = arith.divf %461, %462 : vector<8x32xf32>
    %464 = vector.extract_strided_slice %453 {offsets = [0, 32], sizes = [8, 32], strides = [1, 1]} : vector<8x96xf32> to vector<8x32xf32>
    %465 = vector.extract_strided_slice %447 {offsets = [0, 32], sizes = [8, 32], strides = [1, 1]} : vector<8x96xf32> to vector<8x32xf32>
    %466 = arith.addf %464, %465 : vector<8x32xf32>
    %467 = vector.extract_strided_slice %452 {offsets = [0, 32], sizes = [8, 32], strides = [1, 1]} : vector<8x96xf32> to vector<8x32xf32>
    %468 = arith.addf %466, %467 : vector<8x32xf32>
    %469 = arith.negf %468 : vector<8x32xf32>
    %470 = math.exp %469 : vector<8x32xf32>
    %cst_195 = arith.constant 1.000000e+00 : f32
    %471 = vector.broadcast %cst_195 : f32 to vector<8x32xf32>
    %472 = arith.addf %471, %470 : vector<8x32xf32>
    %473 = arith.divf %471, %472 : vector<8x32xf32>
    %474 = vector.extract_strided_slice %453 {offsets = [0, 64], sizes = [8, 32], strides = [1, 1]} : vector<8x96xf32> to vector<8x32xf32>
    %475 = vector.extract_strided_slice %447 {offsets = [0, 64], sizes = [8, 32], strides = [1, 1]} : vector<8x96xf32> to vector<8x32xf32>
    %476 = arith.mulf %473, %475 : vector<8x32xf32>
    %477 = arith.addf %474, %476 : vector<8x32xf32>
    %478 = vector.extract_strided_slice %452 {offsets = [0, 64], sizes = [8, 32], strides = [1, 1]} : vector<8x96xf32> to vector<8x32xf32>
    %479 = arith.addf %477, %478 : vector<8x32xf32>
    %480 = math.tanh %479 : vector<8x32xf32>
    %cst_196 = arith.constant 1.000000e+00 : f32
    %481 = vector.broadcast %cst_196 : f32 to vector<8x32xf32>
    %482 = arith.subf %481, %463 : vector<8x32xf32>
    %483 = arith.mulf %482, %349 : vector<8x32xf32>
    %484 = arith.mulf %463, %480 : vector<8x32xf32>
    %485 = arith.addf %483, %484 : vector<8x32xf32>
    %c0_197 = arith.constant 0 : index
    %c0_198 = arith.constant 0 : index
    %486 = vector.load %arg3[%c0_197, %c0_198] : memref<48x1xf32, #tpu.memory_space<vmem>>, vector<8x1xf32>
    %487 = vector.broadcast %486 : vector<8x1xf32> to vector<8x32xf32>
    %488 = arith.mulf %487, %485 : vector<8x32xf32>
    %cst_199 = arith.constant 1.000000e+00 : f32
    %489 = vector.broadcast %cst_199 : f32 to vector<8x1xf32>
    %490 = arith.subf %489, %486 : vector<8x1xf32>
    %491 = vector.broadcast %490 : vector<8x1xf32> to vector<8x32xf32>
    %492 = arith.mulf %491, %349 : vector<8x32xf32>
    %493 = arith.addf %488, %492 : vector<8x32xf32>
    %c0_200 = arith.constant 0 : index
    %c0_201 = arith.constant 0 : index
    %494 = vector.load %arg28[%c0_200, %c0_201] : memref<48x80xf32, #tpu.memory_space<vmem>>, vector<8x32xf32>
    tpu.vector_store %arg28[%c0_200, %c0_201], %493 {strides = array<i32>} : memref<48x80xf32, #tpu.memory_space<vmem>>, vector<8x32xf32>,
    %c0_202 = arith.constant 0 : index
    %c32_203 = arith.constant 32 : index
    %495 = vector.load %arg28[%c0_202, %c32_203] : memref<48x80xf32, #tpu.memory_space<vmem>>, vector<8x32xf32>
    tpu.vector_store %arg28[%c0_202, %c32_203], %442 {strides = array<i32>} : memref<48x80xf32, #tpu.memory_space<vmem>>, vector<8x32xf32>,
    %c0_204 = arith.constant 0 : index
    %c0_205 = arith.constant 0 : index
    %496 = vector.load %arg13[%c0_204, %c0_205] : memref<32x128xf32, #tpu.memory_space<vmem>>, vector<32x128xf32>
    %cst_206 = arith.constant dense<0.000000e+00> : vector<8x128xf32>
    %497 = tpu.matmul %493, %496, %cst_206 {dimension_numbers = #tpu.dot_dimension_numbers<[1], [0], [0], [1], [0, 0, 1, 1], [], []>, precision = #tpu.contract_precision<fp32>} : vector<8x32xf32>, vector<32x128xf32>, vector<8x128xf32> -> vector<8x128xf32>
    %c0_207 = arith.constant 0 : index
    %c0_208 = arith.constant 0 : index
    %498 = vector.load %arg14[%c0_207, %c0_208] : memref<1x128xf32, #tpu.memory_space<vmem>>, vector<1x128xf32>
    %499 = vector.broadcast %498 : vector<1x128xf32> to vector<8x128xf32>
    %500 = arith.addf %497, %499 : vector<8x128xf32>
    %c0_209 = arith.constant 0 : index
    %c0_210 = arith.constant 0 : index
    %501 = vector.load %arg27[%c0_209, %c0_210] : memref<8x128xf32, #tpu.memory_space<vmem>>, vector<8x128xf32>
    %502 = arith.addf %500, %501 : vector<8x128xf32>
    %503 = math.tanh %502 : vector<8x128xf32>
    %c0_211 = arith.constant 0 : index
    %c0_212 = arith.constant 0 : index
    %504 = vector.load %arg15[%c0_211, %c0_212] : memref<128x8xf32, #tpu.memory_space<vmem>>, vector<128x8xf32>
    %cst_213 = arith.constant dense<0.000000e+00> : vector<8x8xf32>
    %505 = tpu.matmul %503, %504, %cst_213 {dimension_numbers = #tpu.dot_dimension_numbers<[1], [0], [0], [1], [0, 0, 1, 1], [], []>, precision = #tpu.contract_precision<fp32>} : vector<8x128xf32>, vector<128x8xf32>, vector<8x8xf32> -> vector<8x8xf32>
    %c0_214 = arith.constant 0 : index
    %c0_215 = arith.constant 0 : index
    %506 = vector.load %arg16[%c0_214, %c0_215] : memref<1x1xf32, #tpu.memory_space<vmem>>, vector<1x1xf32>
    %507 = vector.broadcast %506 : vector<1x1xf32> to vector<8x8xf32>
    %508 = arith.addf %505, %507 : vector<8x8xf32>
    %cst_216 = arith.constant dense<0xFF800000> : vector<8xf32>
    %509 = vector.multi_reduction <maximumf>, %508, %cst_216 [1] : vector<8x8xf32> to vector<8xf32>
    %510 = vector.shape_cast %509 : vector<8xf32> to vector<8x1xf32>
    %511 = vector.broadcast %510 : vector<8x1xf32> to vector<8x8xf32>
    %512 = arith.subf %508, %511 : vector<8x8xf32>
    %513 = math.exp %512 : vector<8x8xf32>
    %514 = arith.mulf %513, %379 : vector<8x8xf32>
    %cst_217 = arith.constant dense<0.000000e+00> : vector<8xf32>
    %515 = vector.multi_reduction <add>, %514, %cst_217 [1] : vector<8x8xf32> to vector<8xf32>
    %516 = vector.shape_cast %515 : vector<8xf32> to vector<8x1xf32>
    %517 = tpu.reciprocal %516 {approx = true} : vector<8x1xf32> -> vector<8x1xf32>
    %518 = vector.broadcast %517 : vector<8x1xf32> to vector<8x8xf32>
    %519 = arith.mulf %514, %518 : vector<8x8xf32>
    %520 = vector.extract_strided_slice %519 {offsets = [0, 0], sizes = [8, 1], strides = [1, 1]} : vector<8x8xf32> to vector<8x1xf32>
    %c0_218 = arith.constant 0 : index
    %c0_219 = arith.constant 0 : index
    %521 = vector.load %arg26[%c0_218, %c0_219] : memref<64x32xf32, #tpu.memory_space<vmem>>, vector<8x32xf32>
    %522 = vector.broadcast %520 : vector<8x1xf32> to vector<8x32xf32>
    %523 = arith.mulf %522, %521 : vector<8x32xf32>
    %524 = vector.extract_strided_slice %519 {offsets = [0, 1], sizes = [8, 1], strides = [1, 1]} : vector<8x8xf32> to vector<8x1xf32>
    %c8_220 = arith.constant 8 : index
    %c0_221 = arith.constant 0 : index
    %525 = vector.load %arg26[%c8_220, %c0_221] : memref<64x32xf32, #tpu.memory_space<vmem>>, vector<8x32xf32>
    %526 = vector.broadcast %524 : vector<8x1xf32> to vector<8x32xf32>
    %527 = arith.mulf %526, %525 : vector<8x32xf32>
    %528 = arith.addf %523, %527 : vector<8x32xf32>
    %529 = vector.extract_strided_slice %519 {offsets = [0, 2], sizes = [8, 1], strides = [1, 1]} : vector<8x8xf32> to vector<8x1xf32>
    %c16_222 = arith.constant 16 : index
    %c0_223 = arith.constant 0 : index
    %530 = vector.load %arg26[%c16_222, %c0_223] : memref<64x32xf32, #tpu.memory_space<vmem>>, vector<8x32xf32>
    %531 = vector.broadcast %529 : vector<8x1xf32> to vector<8x32xf32>
    %532 = arith.mulf %531, %530 : vector<8x32xf32>
    %533 = arith.addf %528, %532 : vector<8x32xf32>
    %534 = vector.extract_strided_slice %519 {offsets = [0, 3], sizes = [8, 1], strides = [1, 1]} : vector<8x8xf32> to vector<8x1xf32>
    %c24_224 = arith.constant 24 : index
    %c0_225 = arith.constant 0 : index
    %535 = vector.load %arg26[%c24_224, %c0_225] : memref<64x32xf32, #tpu.memory_space<vmem>>, vector<8x32xf32>
    %536 = vector.broadcast %534 : vector<8x1xf32> to vector<8x32xf32>
    %537 = arith.mulf %536, %535 : vector<8x32xf32>
    %538 = arith.addf %533, %537 : vector<8x32xf32>
    %539 = vector.extract_strided_slice %519 {offsets = [0, 4], sizes = [8, 1], strides = [1, 1]} : vector<8x8xf32> to vector<8x1xf32>
    %c32_226 = arith.constant 32 : index
    %c0_227 = arith.constant 0 : index
    %540 = vector.load %arg26[%c32_226, %c0_227] : memref<64x32xf32, #tpu.memory_space<vmem>>, vector<8x32xf32>
    %541 = vector.broadcast %539 : vector<8x1xf32> to vector<8x32xf32>
    %542 = arith.mulf %541, %540 : vector<8x32xf32>
    %543 = arith.addf %538, %542 : vector<8x32xf32>
    %544 = vector.extract_strided_slice %519 {offsets = [0, 5], sizes = [8, 1], strides = [1, 1]} : vector<8x8xf32> to vector<8x1xf32>
    %c40_228 = arith.constant 40 : index
    %c0_229 = arith.constant 0 : index
    %545 = vector.load %arg26[%c40_228, %c0_229] : memref<64x32xf32, #tpu.memory_space<vmem>>, vector<8x32xf32>
    %546 = vector.broadcast %544 : vector<8x1xf32> to vector<8x32xf32>
    %547 = arith.mulf %546, %545 : vector<8x32xf32>
    %548 = arith.addf %543, %547 : vector<8x32xf32>
    %549 = vector.extract_strided_slice %519 {offsets = [0, 6], sizes = [8, 1], strides = [1, 1]} : vector<8x8xf32> to vector<8x1xf32>
    %c48_230 = arith.constant 48 : index
    %c0_231 = arith.constant 0 : index
    %550 = vector.load %arg26[%c48_230, %c0_231] : memref<64x32xf32, #tpu.memory_space<vmem>>, vector<8x32xf32>
    %551 = vector.broadcast %549 : vector<8x1xf32> to vector<8x32xf32>
    %552 = arith.mulf %551, %550 : vector<8x32xf32>
    %553 = arith.addf %548, %552 : vector<8x32xf32>
    %554 = vector.extract_strided_slice %519 {offsets = [0, 7], sizes = [8, 1], strides = [1, 1]} : vector<8x8xf32> to vector<8x1xf32>
    %c56_232 = arith.constant 56 : index
    %c0_233 = arith.constant 0 : index
    %555 = vector.load %arg26[%c56_232, %c0_233] : memref<64x32xf32, #tpu.memory_space<vmem>>, vector<8x32xf32>
    %556 = vector.broadcast %554 : vector<8x1xf32> to vector<8x32xf32>
    %557 = arith.mulf %556, %555 : vector<8x32xf32>
    %558 = arith.addf %553, %557 : vector<8x32xf32>
    %c0_234 = arith.constant 0 : index
    %c0_235 = arith.constant 0 : index
    %559 = vector.load %arg19[%c0_234, %c0_235] : memref<32x96xf32, #tpu.memory_space<vmem>>, vector<32x96xf32>
    %cst_236 = arith.constant dense<0.000000e+00> : vector<8x96xf32>
    %560 = tpu.matmul %493, %559, %cst_236 {dimension_numbers = #tpu.dot_dimension_numbers<[1], [0], [0], [1], [0, 0, 1, 1], [], []>, precision = #tpu.contract_precision<fp32>} : vector<8x32xf32>, vector<32x96xf32>, vector<8x96xf32> -> vector<8x96xf32>
    %c0_237 = arith.constant 0 : index
    %c0_238 = arith.constant 0 : index
    %561 = vector.load %arg20[%c0_237, %c0_238] : memref<1x96xf32, #tpu.memory_space<vmem>>, vector<1x96xf32>
    %562 = vector.broadcast %561 : vector<1x96xf32> to vector<8x96xf32>
    %563 = arith.addf %560, %562 : vector<8x96xf32>
    %c0_239 = arith.constant 0 : index
    %c0_240 = arith.constant 0 : index
    %564 = vector.load %arg21[%c0_239, %c0_240] : memref<32x96xf32, #tpu.memory_space<vmem>>, vector<32x96xf32>
    %cst_241 = arith.constant dense<0.000000e+00> : vector<8x96xf32>
    %565 = tpu.matmul %558, %564, %cst_241 {dimension_numbers = #tpu.dot_dimension_numbers<[1], [0], [0], [1], [0, 0, 1, 1], [], []>, precision = #tpu.contract_precision<fp32>} : vector<8x32xf32>, vector<32x96xf32>, vector<8x96xf32> -> vector<8x96xf32>
    %c0_242 = arith.constant 0 : index
    %c0_243 = arith.constant 0 : index
    %566 = vector.load %arg22[%c0_242, %c0_243] : memref<1x96xf32, #tpu.memory_space<vmem>>, vector<1x96xf32>
    %567 = vector.broadcast %566 : vector<1x96xf32> to vector<8x96xf32>
    %568 = arith.addf %565, %567 : vector<8x96xf32>
    %569 = vector.extract_strided_slice %377 {offsets = [8, 0], sizes = [8, 96], strides = [1, 1]} : vector<48x96xf32> to vector<8x96xf32>
    %570 = vector.extract_strided_slice %569 {offsets = [0, 0], sizes = [8, 32], strides = [1, 1]} : vector<8x96xf32> to vector<8x32xf32>
    %571 = vector.extract_strided_slice %563 {offsets = [0, 0], sizes = [8, 32], strides = [1, 1]} : vector<8x96xf32> to vector<8x32xf32>
    %572 = arith.addf %570, %571 : vector<8x32xf32>
    %573 = vector.extract_strided_slice %568 {offsets = [0, 0], sizes = [8, 32], strides = [1, 1]} : vector<8x96xf32> to vector<8x32xf32>
    %574 = arith.addf %572, %573 : vector<8x32xf32>
    %575 = arith.negf %574 : vector<8x32xf32>
    %576 = math.exp %575 : vector<8x32xf32>
    %cst_244 = arith.constant 1.000000e+00 : f32
    %577 = vector.broadcast %cst_244 : f32 to vector<8x32xf32>
    %578 = arith.addf %577, %576 : vector<8x32xf32>
    %579 = arith.divf %577, %578 : vector<8x32xf32>
    %580 = vector.extract_strided_slice %569 {offsets = [0, 32], sizes = [8, 32], strides = [1, 1]} : vector<8x96xf32> to vector<8x32xf32>
    %581 = vector.extract_strided_slice %563 {offsets = [0, 32], sizes = [8, 32], strides = [1, 1]} : vector<8x96xf32> to vector<8x32xf32>
    %582 = arith.addf %580, %581 : vector<8x32xf32>
    %583 = vector.extract_strided_slice %568 {offsets = [0, 32], sizes = [8, 32], strides = [1, 1]} : vector<8x96xf32> to vector<8x32xf32>
    %584 = arith.addf %582, %583 : vector<8x32xf32>
    %585 = arith.negf %584 : vector<8x32xf32>
    %586 = math.exp %585 : vector<8x32xf32>
    %cst_245 = arith.constant 1.000000e+00 : f32
    %587 = vector.broadcast %cst_245 : f32 to vector<8x32xf32>
    %588 = arith.addf %587, %586 : vector<8x32xf32>
    %589 = arith.divf %587, %588 : vector<8x32xf32>
    %590 = vector.extract_strided_slice %569 {offsets = [0, 64], sizes = [8, 32], strides = [1, 1]} : vector<8x96xf32> to vector<8x32xf32>
    %591 = vector.extract_strided_slice %563 {offsets = [0, 64], sizes = [8, 32], strides = [1, 1]} : vector<8x96xf32> to vector<8x32xf32>
    %592 = arith.mulf %589, %591 : vector<8x32xf32>
    %593 = arith.addf %590, %592 : vector<8x32xf32>
    %594 = vector.extract_strided_slice %568 {offsets = [0, 64], sizes = [8, 32], strides = [1, 1]} : vector<8x96xf32> to vector<8x32xf32>
    %595 = arith.addf %593, %594 : vector<8x32xf32>
    %596 = math.tanh %595 : vector<8x32xf32>
    %cst_246 = arith.constant 1.000000e+00 : f32
    %597 = vector.broadcast %cst_246 : f32 to vector<8x32xf32>
    %598 = arith.subf %597, %579 : vector<8x32xf32>
    %599 = arith.mulf %598, %493 : vector<8x32xf32>
    %600 = arith.mulf %579, %596 : vector<8x32xf32>
    %601 = arith.addf %599, %600 : vector<8x32xf32>
    %c8_247 = arith.constant 8 : index
    %c0_248 = arith.constant 0 : index
    %602 = vector.load %arg3[%c8_247, %c0_248] : memref<48x1xf32, #tpu.memory_space<vmem>>, vector<8x1xf32>
    %603 = vector.broadcast %602 : vector<8x1xf32> to vector<8x32xf32>
    %604 = arith.mulf %603, %601 : vector<8x32xf32>
    %cst_249 = arith.constant 1.000000e+00 : f32
    %605 = vector.broadcast %cst_249 : f32 to vector<8x1xf32>
    %606 = arith.subf %605, %602 : vector<8x1xf32>
    %607 = vector.broadcast %606 : vector<8x1xf32> to vector<8x32xf32>
    %608 = arith.mulf %607, %493 : vector<8x32xf32>
    %609 = arith.addf %604, %608 : vector<8x32xf32>
    %c8_250 = arith.constant 8 : index
    %c0_251 = arith.constant 0 : index
    %610 = vector.load %arg28[%c8_250, %c0_251] : memref<48x80xf32, #tpu.memory_space<vmem>>, vector<8x32xf32>
    tpu.vector_store %arg28[%c8_250, %c0_251], %609 {strides = array<i32>} : memref<48x80xf32, #tpu.memory_space<vmem>>, vector<8x32xf32>,
    %c8_252 = arith.constant 8 : index
    %c32_253 = arith.constant 32 : index
    %611 = vector.load %arg28[%c8_252, %c32_253] : memref<48x80xf32, #tpu.memory_space<vmem>>, vector<8x32xf32>
    tpu.vector_store %arg28[%c8_252, %c32_253], %558 {strides = array<i32>} : memref<48x80xf32, #tpu.memory_space<vmem>>, vector<8x32xf32>,
    %c0_254 = arith.constant 0 : index
    %c0_255 = arith.constant 0 : index
    %612 = vector.load %arg13[%c0_254, %c0_255] : memref<32x128xf32, #tpu.memory_space<vmem>>, vector<32x128xf32>
    %cst_256 = arith.constant dense<0.000000e+00> : vector<8x128xf32>
    %613 = tpu.matmul %609, %612, %cst_256 {dimension_numbers = #tpu.dot_dimension_numbers<[1], [0], [0], [1], [0, 0, 1, 1], [], []>, precision = #tpu.contract_precision<fp32>} : vector<8x32xf32>, vector<32x128xf32>, vector<8x128xf32> -> vector<8x128xf32>
    %c0_257 = arith.constant 0 : index
    %c0_258 = arith.constant 0 : index
    %614 = vector.load %arg14[%c0_257, %c0_258] : memref<1x128xf32, #tpu.memory_space<vmem>>, vector<1x128xf32>
    %615 = vector.broadcast %614 : vector<1x128xf32> to vector<8x128xf32>
    %616 = arith.addf %613, %615 : vector<8x128xf32>
    %c0_259 = arith.constant 0 : index
    %c0_260 = arith.constant 0 : index
    %617 = vector.load %arg27[%c0_259, %c0_260] : memref<8x128xf32, #tpu.memory_space<vmem>>, vector<8x128xf32>
    %618 = arith.addf %616, %617 : vector<8x128xf32>
    %619 = math.tanh %618 : vector<8x128xf32>
    %c0_261 = arith.constant 0 : index
    %c0_262 = arith.constant 0 : index
    %620 = vector.load %arg15[%c0_261, %c0_262] : memref<128x8xf32, #tpu.memory_space<vmem>>, vector<128x8xf32>
    %cst_263 = arith.constant dense<0.000000e+00> : vector<8x8xf32>
    %621 = tpu.matmul %619, %620, %cst_263 {dimension_numbers = #tpu.dot_dimension_numbers<[1], [0], [0], [1], [0, 0, 1, 1], [], []>, precision = #tpu.contract_precision<fp32>} : vector<8x128xf32>, vector<128x8xf32>, vector<8x8xf32> -> vector<8x8xf32>
    %c0_264 = arith.constant 0 : index
    %c0_265 = arith.constant 0 : index
    %622 = vector.load %arg16[%c0_264, %c0_265] : memref<1x1xf32, #tpu.memory_space<vmem>>, vector<1x1xf32>
    %623 = vector.broadcast %622 : vector<1x1xf32> to vector<8x8xf32>
    %624 = arith.addf %621, %623 : vector<8x8xf32>
    %cst_266 = arith.constant dense<0xFF800000> : vector<8xf32>
    %625 = vector.multi_reduction <maximumf>, %624, %cst_266 [1] : vector<8x8xf32> to vector<8xf32>
    %626 = vector.shape_cast %625 : vector<8xf32> to vector<8x1xf32>
    %627 = vector.broadcast %626 : vector<8x1xf32> to vector<8x8xf32>
    %628 = arith.subf %624, %627 : vector<8x8xf32>
    %629 = math.exp %628 : vector<8x8xf32>
    %630 = arith.mulf %629, %379 : vector<8x8xf32>
    %cst_267 = arith.constant dense<0.000000e+00> : vector<8xf32>
    %631 = vector.multi_reduction <add>, %630, %cst_267 [1] : vector<8x8xf32> to vector<8xf32>
    %632 = vector.shape_cast %631 : vector<8xf32> to vector<8x1xf32>
    %633 = tpu.reciprocal %632 {approx = true} : vector<8x1xf32> -> vector<8x1xf32>
    %634 = vector.broadcast %633 : vector<8x1xf32> to vector<8x8xf32>
    %635 = arith.mulf %630, %634 : vector<8x8xf32>
    %636 = vector.extract_strided_slice %635 {offsets = [0, 0], sizes = [8, 1], strides = [1, 1]} : vector<8x8xf32> to vector<8x1xf32>
    %c0_268 = arith.constant 0 : index
    %c0_269 = arith.constant 0 : index
    %637 = vector.load %arg26[%c0_268, %c0_269] : memref<64x32xf32, #tpu.memory_space<vmem>>, vector<8x32xf32>
    %638 = vector.broadcast %636 : vector<8x1xf32> to vector<8x32xf32>
    %639 = arith.mulf %638, %637 : vector<8x32xf32>
    %640 = vector.extract_strided_slice %635 {offsets = [0, 1], sizes = [8, 1], strides = [1, 1]} : vector<8x8xf32> to vector<8x1xf32>
    %c8_270 = arith.constant 8 : index
    %c0_271 = arith.constant 0 : index
    %641 = vector.load %arg26[%c8_270, %c0_271] : memref<64x32xf32, #tpu.memory_space<vmem>>, vector<8x32xf32>
    %642 = vector.broadcast %640 : vector<8x1xf32> to vector<8x32xf32>
    %643 = arith.mulf %642, %641 : vector<8x32xf32>
    %644 = arith.addf %639, %643 : vector<8x32xf32>
    %645 = vector.extract_strided_slice %635 {offsets = [0, 2], sizes = [8, 1], strides = [1, 1]} : vector<8x8xf32> to vector<8x1xf32>
    %c16_272 = arith.constant 16 : index
    %c0_273 = arith.constant 0 : index
    %646 = vector.load %arg26[%c16_272, %c0_273] : memref<64x32xf32, #tpu.memory_space<vmem>>, vector<8x32xf32>
    %647 = vector.broadcast %645 : vector<8x1xf32> to vector<8x32xf32>
    %648 = arith.mulf %647, %646 : vector<8x32xf32>
    %649 = arith.addf %644, %648 : vector<8x32xf32>
    %650 = vector.extract_strided_slice %635 {offsets = [0, 3], sizes = [8, 1], strides = [1, 1]} : vector<8x8xf32> to vector<8x1xf32>
    %c24_274 = arith.constant 24 : index
    %c0_275 = arith.constant 0 : index
    %651 = vector.load %arg26[%c24_274, %c0_275] : memref<64x32xf32, #tpu.memory_space<vmem>>, vector<8x32xf32>
    %652 = vector.broadcast %650 : vector<8x1xf32> to vector<8x32xf32>
    %653 = arith.mulf %652, %651 : vector<8x32xf32>
    %654 = arith.addf %649, %653 : vector<8x32xf32>
    %655 = vector.extract_strided_slice %635 {offsets = [0, 4], sizes = [8, 1], strides = [1, 1]} : vector<8x8xf32> to vector<8x1xf32>
    %c32_276 = arith.constant 32 : index
    %c0_277 = arith.constant 0 : index
    %656 = vector.load %arg26[%c32_276, %c0_277] : memref<64x32xf32, #tpu.memory_space<vmem>>, vector<8x32xf32>
    %657 = vector.broadcast %655 : vector<8x1xf32> to vector<8x32xf32>
    %658 = arith.mulf %657, %656 : vector<8x32xf32>
    %659 = arith.addf %654, %658 : vector<8x32xf32>
    %660 = vector.extract_strided_slice %635 {offsets = [0, 5], sizes = [8, 1], strides = [1, 1]} : vector<8x8xf32> to vector<8x1xf32>
    %c40_278 = arith.constant 40 : index
    %c0_279 = arith.constant 0 : index
    %661 = vector.load %arg26[%c40_278, %c0_279] : memref<64x32xf32, #tpu.memory_space<vmem>>, vector<8x32xf32>
    %662 = vector.broadcast %660 : vector<8x1xf32> to vector<8x32xf32>
    %663 = arith.mulf %662, %661 : vector<8x32xf32>
    %664 = arith.addf %659, %663 : vector<8x32xf32>
    %665 = vector.extract_strided_slice %635 {offsets = [0, 6], sizes = [8, 1], strides = [1, 1]} : vector<8x8xf32> to vector<8x1xf32>
    %c48_280 = arith.constant 48 : index
    %c0_281 = arith.constant 0 : index
    %666 = vector.load %arg26[%c48_280, %c0_281] : memref<64x32xf32, #tpu.memory_space<vmem>>, vector<8x32xf32>
    %667 = vector.broadcast %665 : vector<8x1xf32> to vector<8x32xf32>
    %668 = arith.mulf %667, %666 : vector<8x32xf32>
    %669 = arith.addf %664, %668 : vector<8x32xf32>
    %670 = vector.extract_strided_slice %635 {offsets = [0, 7], sizes = [8, 1], strides = [1, 1]} : vector<8x8xf32> to vector<8x1xf32>
    %c56_282 = arith.constant 56 : index
    %c0_283 = arith.constant 0 : index
    %671 = vector.load %arg26[%c56_282, %c0_283] : memref<64x32xf32, #tpu.memory_space<vmem>>, vector<8x32xf32>
    %672 = vector.broadcast %670 : vector<8x1xf32> to vector<8x32xf32>
    %673 = arith.mulf %672, %671 : vector<8x32xf32>
    %674 = arith.addf %669, %673 : vector<8x32xf32>
    %c0_284 = arith.constant 0 : index
    %c0_285 = arith.constant 0 : index
    %675 = vector.load %arg19[%c0_284, %c0_285] : memref<32x96xf32, #tpu.memory_space<vmem>>, vector<32x96xf32>
    %cst_286 = arith.constant dense<0.000000e+00> : vector<8x96xf32>
    %676 = tpu.matmul %609, %675, %cst_286 {dimension_numbers = #tpu.dot_dimension_numbers<[1], [0], [0], [1], [0, 0, 1, 1], [], []>, precision = #tpu.contract_precision<fp32>} : vector<8x32xf32>, vector<32x96xf32>, vector<8x96xf32> -> vector<8x96xf32>
    %c0_287 = arith.constant 0 : index
    %c0_288 = arith.constant 0 : index
    %677 = vector.load %arg20[%c0_287, %c0_288] : memref<1x96xf32, #tpu.memory_space<vmem>>, vector<1x96xf32>
    %678 = vector.broadcast %677 : vector<1x96xf32> to vector<8x96xf32>
    %679 = arith.addf %676, %678 : vector<8x96xf32>
    %c0_289 = arith.constant 0 : index
    %c0_290 = arith.constant 0 : index
    %680 = vector.load %arg21[%c0_289, %c0_290] : memref<32x96xf32, #tpu.memory_space<vmem>>, vector<32x96xf32>
    %cst_291 = arith.constant dense<0.000000e+00> : vector<8x96xf32>
    %681 = tpu.matmul %674, %680, %cst_291 {dimension_numbers = #tpu.dot_dimension_numbers<[1], [0], [0], [1], [0, 0, 1, 1], [], []>, precision = #tpu.contract_precision<fp32>} : vector<8x32xf32>, vector<32x96xf32>, vector<8x96xf32> -> vector<8x96xf32>
    %c0_292 = arith.constant 0 : index
    %c0_293 = arith.constant 0 : index
    %682 = vector.load %arg22[%c0_292, %c0_293] : memref<1x96xf32, #tpu.memory_space<vmem>>, vector<1x96xf32>
    %683 = vector.broadcast %682 : vector<1x96xf32> to vector<8x96xf32>
    %684 = arith.addf %681, %683 : vector<8x96xf32>
    %685 = vector.extract_strided_slice %377 {offsets = [16, 0], sizes = [8, 96], strides = [1, 1]} : vector<48x96xf32> to vector<8x96xf32>
    %686 = vector.extract_strided_slice %685 {offsets = [0, 0], sizes = [8, 32], strides = [1, 1]} : vector<8x96xf32> to vector<8x32xf32>
    %687 = vector.extract_strided_slice %679 {offsets = [0, 0], sizes = [8, 32], strides = [1, 1]} : vector<8x96xf32> to vector<8x32xf32>
    %688 = arith.addf %686, %687 : vector<8x32xf32>
    %689 = vector.extract_strided_slice %684 {offsets = [0, 0], sizes = [8, 32], strides = [1, 1]} : vector<8x96xf32> to vector<8x32xf32>
    %690 = arith.addf %688, %689 : vector<8x32xf32>
    %691 = arith.negf %690 : vector<8x32xf32>
    %692 = math.exp %691 : vector<8x32xf32>
    %cst_294 = arith.constant 1.000000e+00 : f32
    %693 = vector.broadcast %cst_294 : f32 to vector<8x32xf32>
    %694 = arith.addf %693, %692 : vector<8x32xf32>
    %695 = arith.divf %693, %694 : vector<8x32xf32>
    %696 = vector.extract_strided_slice %685 {offsets = [0, 32], sizes = [8, 32], strides = [1, 1]} : vector<8x96xf32> to vector<8x32xf32>
    %697 = vector.extract_strided_slice %679 {offsets = [0, 32], sizes = [8, 32], strides = [1, 1]} : vector<8x96xf32> to vector<8x32xf32>
    %698 = arith.addf %696, %697 : vector<8x32xf32>
    %699 = vector.extract_strided_slice %684 {offsets = [0, 32], sizes = [8, 32], strides = [1, 1]} : vector<8x96xf32> to vector<8x32xf32>
    %700 = arith.addf %698, %699 : vector<8x32xf32>
    %701 = arith.negf %700 : vector<8x32xf32>
    %702 = math.exp %701 : vector<8x32xf32>
    %cst_295 = arith.constant 1.000000e+00 : f32
    %703 = vector.broadcast %cst_295 : f32 to vector<8x32xf32>
    %704 = arith.addf %703, %702 : vector<8x32xf32>
    %705 = arith.divf %703, %704 : vector<8x32xf32>
    %706 = vector.extract_strided_slice %685 {offsets = [0, 64], sizes = [8, 32], strides = [1, 1]} : vector<8x96xf32> to vector<8x32xf32>
    %707 = vector.extract_strided_slice %679 {offsets = [0, 64], sizes = [8, 32], strides = [1, 1]} : vector<8x96xf32> to vector<8x32xf32>
    %708 = arith.mulf %705, %707 : vector<8x32xf32>
    %709 = arith.addf %706, %708 : vector<8x32xf32>
    %710 = vector.extract_strided_slice %684 {offsets = [0, 64], sizes = [8, 32], strides = [1, 1]} : vector<8x96xf32> to vector<8x32xf32>
    %711 = arith.addf %709, %710 : vector<8x32xf32>
    %712 = math.tanh %711 : vector<8x32xf32>
    %cst_296 = arith.constant 1.000000e+00 : f32
    %713 = vector.broadcast %cst_296 : f32 to vector<8x32xf32>
    %714 = arith.subf %713, %695 : vector<8x32xf32>
    %715 = arith.mulf %714, %609 : vector<8x32xf32>
    %716 = arith.mulf %695, %712 : vector<8x32xf32>
    %717 = arith.addf %715, %716 : vector<8x32xf32>
    %c16_297 = arith.constant 16 : index
    %c0_298 = arith.constant 0 : index
    %718 = vector.load %arg3[%c16_297, %c0_298] : memref<48x1xf32, #tpu.memory_space<vmem>>, vector<8x1xf32>
    %719 = vector.broadcast %718 : vector<8x1xf32> to vector<8x32xf32>
    %720 = arith.mulf %719, %717 : vector<8x32xf32>
    %cst_299 = arith.constant 1.000000e+00 : f32
    %721 = vector.broadcast %cst_299 : f32 to vector<8x1xf32>
    %722 = arith.subf %721, %718 : vector<8x1xf32>
    %723 = vector.broadcast %722 : vector<8x1xf32> to vector<8x32xf32>
    %724 = arith.mulf %723, %609 : vector<8x32xf32>
    %725 = arith.addf %720, %724 : vector<8x32xf32>
    %c16_300 = arith.constant 16 : index
    %c0_301 = arith.constant 0 : index
    %726 = vector.load %arg28[%c16_300, %c0_301] : memref<48x80xf32, #tpu.memory_space<vmem>>, vector<8x32xf32>
    tpu.vector_store %arg28[%c16_300, %c0_301], %725 {strides = array<i32>} : memref<48x80xf32, #tpu.memory_space<vmem>>, vector<8x32xf32>,
    %c16_302 = arith.constant 16 : index
    %c32_303 = arith.constant 32 : index
    %727 = vector.load %arg28[%c16_302, %c32_303] : memref<48x80xf32, #tpu.memory_space<vmem>>, vector<8x32xf32>
    tpu.vector_store %arg28[%c16_302, %c32_303], %674 {strides = array<i32>} : memref<48x80xf32, #tpu.memory_space<vmem>>, vector<8x32xf32>,
    %c0_304 = arith.constant 0 : index
    %c0_305 = arith.constant 0 : index
    %728 = vector.load %arg13[%c0_304, %c0_305] : memref<32x128xf32, #tpu.memory_space<vmem>>, vector<32x128xf32>
    %cst_306 = arith.constant dense<0.000000e+00> : vector<8x128xf32>
    %729 = tpu.matmul %725, %728, %cst_306 {dimension_numbers = #tpu.dot_dimension_numbers<[1], [0], [0], [1], [0, 0, 1, 1], [], []>, precision = #tpu.contract_precision<fp32>} : vector<8x32xf32>, vector<32x128xf32>, vector<8x128xf32> -> vector<8x128xf32>
    %c0_307 = arith.constant 0 : index
    %c0_308 = arith.constant 0 : index
    %730 = vector.load %arg14[%c0_307, %c0_308] : memref<1x128xf32, #tpu.memory_space<vmem>>, vector<1x128xf32>
    %731 = vector.broadcast %730 : vector<1x128xf32> to vector<8x128xf32>
    %732 = arith.addf %729, %731 : vector<8x128xf32>
    %c0_309 = arith.constant 0 : index
    %c0_310 = arith.constant 0 : index
    %733 = vector.load %arg27[%c0_309, %c0_310] : memref<8x128xf32, #tpu.memory_space<vmem>>, vector<8x128xf32>
    %734 = arith.addf %732, %733 : vector<8x128xf32>
    %735 = math.tanh %734 : vector<8x128xf32>
    %c0_311 = arith.constant 0 : index
    %c0_312 = arith.constant 0 : index
    %736 = vector.load %arg15[%c0_311, %c0_312] : memref<128x8xf32, #tpu.memory_space<vmem>>, vector<128x8xf32>
    %cst_313 = arith.constant dense<0.000000e+00> : vector<8x8xf32>
    %737 = tpu.matmul %735, %736, %cst_313 {dimension_numbers = #tpu.dot_dimension_numbers<[1], [0], [0], [1], [0, 0, 1, 1], [], []>, precision = #tpu.contract_precision<fp32>} : vector<8x128xf32>, vector<128x8xf32>, vector<8x8xf32> -> vector<8x8xf32>
    %c0_314 = arith.constant 0 : index
    %c0_315 = arith.constant 0 : index
    %738 = vector.load %arg16[%c0_314, %c0_315] : memref<1x1xf32, #tpu.memory_space<vmem>>, vector<1x1xf32>
    %739 = vector.broadcast %738 : vector<1x1xf32> to vector<8x8xf32>
    %740 = arith.addf %737, %739 : vector<8x8xf32>
    %cst_316 = arith.constant dense<0xFF800000> : vector<8xf32>
    %741 = vector.multi_reduction <maximumf>, %740, %cst_316 [1] : vector<8x8xf32> to vector<8xf32>
    %742 = vector.shape_cast %741 : vector<8xf32> to vector<8x1xf32>
    %743 = vector.broadcast %742 : vector<8x1xf32> to vector<8x8xf32>
    %744 = arith.subf %740, %743 : vector<8x8xf32>
    %745 = math.exp %744 : vector<8x8xf32>
    %746 = arith.mulf %745, %379 : vector<8x8xf32>
    %cst_317 = arith.constant dense<0.000000e+00> : vector<8xf32>
    %747 = vector.multi_reduction <add>, %746, %cst_317 [1] : vector<8x8xf32> to vector<8xf32>
    %748 = vector.shape_cast %747 : vector<8xf32> to vector<8x1xf32>
    %749 = tpu.reciprocal %748 {approx = true} : vector<8x1xf32> -> vector<8x1xf32>
    %750 = vector.broadcast %749 : vector<8x1xf32> to vector<8x8xf32>
    %751 = arith.mulf %746, %750 : vector<8x8xf32>
    %752 = vector.extract_strided_slice %751 {offsets = [0, 0], sizes = [8, 1], strides = [1, 1]} : vector<8x8xf32> to vector<8x1xf32>
    %c0_318 = arith.constant 0 : index
    %c0_319 = arith.constant 0 : index
    %753 = vector.load %arg26[%c0_318, %c0_319] : memref<64x32xf32, #tpu.memory_space<vmem>>, vector<8x32xf32>
    %754 = vector.broadcast %752 : vector<8x1xf32> to vector<8x32xf32>
    %755 = arith.mulf %754, %753 : vector<8x32xf32>
    %756 = vector.extract_strided_slice %751 {offsets = [0, 1], sizes = [8, 1], strides = [1, 1]} : vector<8x8xf32> to vector<8x1xf32>
    %c8_320 = arith.constant 8 : index
    %c0_321 = arith.constant 0 : index
    %757 = vector.load %arg26[%c8_320, %c0_321] : memref<64x32xf32, #tpu.memory_space<vmem>>, vector<8x32xf32>
    %758 = vector.broadcast %756 : vector<8x1xf32> to vector<8x32xf32>
    %759 = arith.mulf %758, %757 : vector<8x32xf32>
    %760 = arith.addf %755, %759 : vector<8x32xf32>
    %761 = vector.extract_strided_slice %751 {offsets = [0, 2], sizes = [8, 1], strides = [1, 1]} : vector<8x8xf32> to vector<8x1xf32>
    %c16_322 = arith.constant 16 : index
    %c0_323 = arith.constant 0 : index
    %762 = vector.load %arg26[%c16_322, %c0_323] : memref<64x32xf32, #tpu.memory_space<vmem>>, vector<8x32xf32>
    %763 = vector.broadcast %761 : vector<8x1xf32> to vector<8x32xf32>
    %764 = arith.mulf %763, %762 : vector<8x32xf32>
    %765 = arith.addf %760, %764 : vector<8x32xf32>
    %766 = vector.extract_strided_slice %751 {offsets = [0, 3], sizes = [8, 1], strides = [1, 1]} : vector<8x8xf32> to vector<8x1xf32>
    %c24_324 = arith.constant 24 : index
    %c0_325 = arith.constant 0 : index
    %767 = vector.load %arg26[%c24_324, %c0_325] : memref<64x32xf32, #tpu.memory_space<vmem>>, vector<8x32xf32>
    %768 = vector.broadcast %766 : vector<8x1xf32> to vector<8x32xf32>
    %769 = arith.mulf %768, %767 : vector<8x32xf32>
    %770 = arith.addf %765, %769 : vector<8x32xf32>
    %771 = vector.extract_strided_slice %751 {offsets = [0, 4], sizes = [8, 1], strides = [1, 1]} : vector<8x8xf32> to vector<8x1xf32>
    %c32_326 = arith.constant 32 : index
    %c0_327 = arith.constant 0 : index
    %772 = vector.load %arg26[%c32_326, %c0_327] : memref<64x32xf32, #tpu.memory_space<vmem>>, vector<8x32xf32>
    %773 = vector.broadcast %771 : vector<8x1xf32> to vector<8x32xf32>
    %774 = arith.mulf %773, %772 : vector<8x32xf32>
    %775 = arith.addf %770, %774 : vector<8x32xf32>
    %776 = vector.extract_strided_slice %751 {offsets = [0, 5], sizes = [8, 1], strides = [1, 1]} : vector<8x8xf32> to vector<8x1xf32>
    %c40_328 = arith.constant 40 : index
    %c0_329 = arith.constant 0 : index
    %777 = vector.load %arg26[%c40_328, %c0_329] : memref<64x32xf32, #tpu.memory_space<vmem>>, vector<8x32xf32>
    %778 = vector.broadcast %776 : vector<8x1xf32> to vector<8x32xf32>
    %779 = arith.mulf %778, %777 : vector<8x32xf32>
    %780 = arith.addf %775, %779 : vector<8x32xf32>
    %781 = vector.extract_strided_slice %751 {offsets = [0, 6], sizes = [8, 1], strides = [1, 1]} : vector<8x8xf32> to vector<8x1xf32>
    %c48_330 = arith.constant 48 : index
    %c0_331 = arith.constant 0 : index
    %782 = vector.load %arg26[%c48_330, %c0_331] : memref<64x32xf32, #tpu.memory_space<vmem>>, vector<8x32xf32>
    %783 = vector.broadcast %781 : vector<8x1xf32> to vector<8x32xf32>
    %784 = arith.mulf %783, %782 : vector<8x32xf32>
    %785 = arith.addf %780, %784 : vector<8x32xf32>
    %786 = vector.extract_strided_slice %751 {offsets = [0, 7], sizes = [8, 1], strides = [1, 1]} : vector<8x8xf32> to vector<8x1xf32>
    %c56_332 = arith.constant 56 : index
    %c0_333 = arith.constant 0 : index
    %787 = vector.load %arg26[%c56_332, %c0_333] : memref<64x32xf32, #tpu.memory_space<vmem>>, vector<8x32xf32>
    %788 = vector.broadcast %786 : vector<8x1xf32> to vector<8x32xf32>
    %789 = arith.mulf %788, %787 : vector<8x32xf32>
    %790 = arith.addf %785, %789 : vector<8x32xf32>
    %c0_334 = arith.constant 0 : index
    %c0_335 = arith.constant 0 : index
    %791 = vector.load %arg19[%c0_334, %c0_335] : memref<32x96xf32, #tpu.memory_space<vmem>>, vector<32x96xf32>
    %cst_336 = arith.constant dense<0.000000e+00> : vector<8x96xf32>
    %792 = tpu.matmul %725, %791, %cst_336 {dimension_numbers = #tpu.dot_dimension_numbers<[1], [0], [0], [1], [0, 0, 1, 1], [], []>, precision = #tpu.contract_precision<fp32>} : vector<8x32xf32>, vector<32x96xf32>, vector<8x96xf32> -> vector<8x96xf32>
    %c0_337 = arith.constant 0 : index
    %c0_338 = arith.constant 0 : index
    %793 = vector.load %arg20[%c0_337, %c0_338] : memref<1x96xf32, #tpu.memory_space<vmem>>, vector<1x96xf32>
    %794 = vector.broadcast %793 : vector<1x96xf32> to vector<8x96xf32>
    %795 = arith.addf %792, %794 : vector<8x96xf32>
    %c0_339 = arith.constant 0 : index
    %c0_340 = arith.constant 0 : index
    %796 = vector.load %arg21[%c0_339, %c0_340] : memref<32x96xf32, #tpu.memory_space<vmem>>, vector<32x96xf32>
    %cst_341 = arith.constant dense<0.000000e+00> : vector<8x96xf32>
    %797 = tpu.matmul %790, %796, %cst_341 {dimension_numbers = #tpu.dot_dimension_numbers<[1], [0], [0], [1], [0, 0, 1, 1], [], []>, precision = #tpu.contract_precision<fp32>} : vector<8x32xf32>, vector<32x96xf32>, vector<8x96xf32> -> vector<8x96xf32>
    %c0_342 = arith.constant 0 : index
    %c0_343 = arith.constant 0 : index
    %798 = vector.load %arg22[%c0_342, %c0_343] : memref<1x96xf32, #tpu.memory_space<vmem>>, vector<1x96xf32>
    %799 = vector.broadcast %798 : vector<1x96xf32> to vector<8x96xf32>
    %800 = arith.addf %797, %799 : vector<8x96xf32>
    %801 = vector.extract_strided_slice %377 {offsets = [24, 0], sizes = [8, 96], strides = [1, 1]} : vector<48x96xf32> to vector<8x96xf32>
    %802 = vector.extract_strided_slice %801 {offsets = [0, 0], sizes = [8, 32], strides = [1, 1]} : vector<8x96xf32> to vector<8x32xf32>
    %803 = vector.extract_strided_slice %795 {offsets = [0, 0], sizes = [8, 32], strides = [1, 1]} : vector<8x96xf32> to vector<8x32xf32>
    %804 = arith.addf %802, %803 : vector<8x32xf32>
    %805 = vector.extract_strided_slice %800 {offsets = [0, 0], sizes = [8, 32], strides = [1, 1]} : vector<8x96xf32> to vector<8x32xf32>
    %806 = arith.addf %804, %805 : vector<8x32xf32>
    %807 = arith.negf %806 : vector<8x32xf32>
    %808 = math.exp %807 : vector<8x32xf32>
    %cst_344 = arith.constant 1.000000e+00 : f32
    %809 = vector.broadcast %cst_344 : f32 to vector<8x32xf32>
    %810 = arith.addf %809, %808 : vector<8x32xf32>
    %811 = arith.divf %809, %810 : vector<8x32xf32>
    %812 = vector.extract_strided_slice %801 {offsets = [0, 32], sizes = [8, 32], strides = [1, 1]} : vector<8x96xf32> to vector<8x32xf32>
    %813 = vector.extract_strided_slice %795 {offsets = [0, 32], sizes = [8, 32], strides = [1, 1]} : vector<8x96xf32> to vector<8x32xf32>
    %814 = arith.addf %812, %813 : vector<8x32xf32>
    %815 = vector.extract_strided_slice %800 {offsets = [0, 32], sizes = [8, 32], strides = [1, 1]} : vector<8x96xf32> to vector<8x32xf32>
    %816 = arith.addf %814, %815 : vector<8x32xf32>
    %817 = arith.negf %816 : vector<8x32xf32>
    %818 = math.exp %817 : vector<8x32xf32>
    %cst_345 = arith.constant 1.000000e+00 : f32
    %819 = vector.broadcast %cst_345 : f32 to vector<8x32xf32>
    %820 = arith.addf %819, %818 : vector<8x32xf32>
    %821 = arith.divf %819, %820 : vector<8x32xf32>
    %822 = vector.extract_strided_slice %801 {offsets = [0, 64], sizes = [8, 32], strides = [1, 1]} : vector<8x96xf32> to vector<8x32xf32>
    %823 = vector.extract_strided_slice %795 {offsets = [0, 64], sizes = [8, 32], strides = [1, 1]} : vector<8x96xf32> to vector<8x32xf32>
    %824 = arith.mulf %821, %823 : vector<8x32xf32>
    %825 = arith.addf %822, %824 : vector<8x32xf32>
    %826 = vector.extract_strided_slice %800 {offsets = [0, 64], sizes = [8, 32], strides = [1, 1]} : vector<8x96xf32> to vector<8x32xf32>
    %827 = arith.addf %825, %826 : vector<8x32xf32>
    %828 = math.tanh %827 : vector<8x32xf32>
    %cst_346 = arith.constant 1.000000e+00 : f32
    %829 = vector.broadcast %cst_346 : f32 to vector<8x32xf32>
    %830 = arith.subf %829, %811 : vector<8x32xf32>
    %831 = arith.mulf %830, %725 : vector<8x32xf32>
    %832 = arith.mulf %811, %828 : vector<8x32xf32>
    %833 = arith.addf %831, %832 : vector<8x32xf32>
    %c24_347 = arith.constant 24 : index
    %c0_348 = arith.constant 0 : index
    %834 = vector.load %arg3[%c24_347, %c0_348] : memref<48x1xf32, #tpu.memory_space<vmem>>, vector<8x1xf32>
    %835 = vector.broadcast %834 : vector<8x1xf32> to vector<8x32xf32>
    %836 = arith.mulf %835, %833 : vector<8x32xf32>
    %cst_349 = arith.constant 1.000000e+00 : f32
    %837 = vector.broadcast %cst_349 : f32 to vector<8x1xf32>
    %838 = arith.subf %837, %834 : vector<8x1xf32>
    %839 = vector.broadcast %838 : vector<8x1xf32> to vector<8x32xf32>
    %840 = arith.mulf %839, %725 : vector<8x32xf32>
    %841 = arith.addf %836, %840 : vector<8x32xf32>
    %c24_350 = arith.constant 24 : index
    %c0_351 = arith.constant 0 : index
    %842 = vector.load %arg28[%c24_350, %c0_351] : memref<48x80xf32, #tpu.memory_space<vmem>>, vector<8x32xf32>
    tpu.vector_store %arg28[%c24_350, %c0_351], %841 {strides = array<i32>} : memref<48x80xf32, #tpu.memory_space<vmem>>, vector<8x32xf32>,
    %c24_352 = arith.constant 24 : index
    %c32_353 = arith.constant 32 : index
    %843 = vector.load %arg28[%c24_352, %c32_353] : memref<48x80xf32, #tpu.memory_space<vmem>>, vector<8x32xf32>
    tpu.vector_store %arg28[%c24_352, %c32_353], %790 {strides = array<i32>} : memref<48x80xf32, #tpu.memory_space<vmem>>, vector<8x32xf32>,
    %c0_354 = arith.constant 0 : index
    %c0_355 = arith.constant 0 : index
    %844 = vector.load %arg13[%c0_354, %c0_355] : memref<32x128xf32, #tpu.memory_space<vmem>>, vector<32x128xf32>
    %cst_356 = arith.constant dense<0.000000e+00> : vector<8x128xf32>
    %845 = tpu.matmul %841, %844, %cst_356 {dimension_numbers = #tpu.dot_dimension_numbers<[1], [0], [0], [1], [0, 0, 1, 1], [], []>, precision = #tpu.contract_precision<fp32>} : vector<8x32xf32>, vector<32x128xf32>, vector<8x128xf32> -> vector<8x128xf32>
    %c0_357 = arith.constant 0 : index
    %c0_358 = arith.constant 0 : index
    %846 = vector.load %arg14[%c0_357, %c0_358] : memref<1x128xf32, #tpu.memory_space<vmem>>, vector<1x128xf32>
    %847 = vector.broadcast %846 : vector<1x128xf32> to vector<8x128xf32>
    %848 = arith.addf %845, %847 : vector<8x128xf32>
    %c0_359 = arith.constant 0 : index
    %c0_360 = arith.constant 0 : index
    %849 = vector.load %arg27[%c0_359, %c0_360] : memref<8x128xf32, #tpu.memory_space<vmem>>, vector<8x128xf32>
    %850 = arith.addf %848, %849 : vector<8x128xf32>
    %851 = math.tanh %850 : vector<8x128xf32>
    %c0_361 = arith.constant 0 : index
    %c0_362 = arith.constant 0 : index
    %852 = vector.load %arg15[%c0_361, %c0_362] : memref<128x8xf32, #tpu.memory_space<vmem>>, vector<128x8xf32>
    %cst_363 = arith.constant dense<0.000000e+00> : vector<8x8xf32>
    %853 = tpu.matmul %851, %852, %cst_363 {dimension_numbers = #tpu.dot_dimension_numbers<[1], [0], [0], [1], [0, 0, 1, 1], [], []>, precision = #tpu.contract_precision<fp32>} : vector<8x128xf32>, vector<128x8xf32>, vector<8x8xf32> -> vector<8x8xf32>
    %c0_364 = arith.constant 0 : index
    %c0_365 = arith.constant 0 : index
    %854 = vector.load %arg16[%c0_364, %c0_365] : memref<1x1xf32, #tpu.memory_space<vmem>>, vector<1x1xf32>
    %855 = vector.broadcast %854 : vector<1x1xf32> to vector<8x8xf32>
    %856 = arith.addf %853, %855 : vector<8x8xf32>
    %cst_366 = arith.constant dense<0xFF800000> : vector<8xf32>
    %857 = vector.multi_reduction <maximumf>, %856, %cst_366 [1] : vector<8x8xf32> to vector<8xf32>
    %858 = vector.shape_cast %857 : vector<8xf32> to vector<8x1xf32>
    %859 = vector.broadcast %858 : vector<8x1xf32> to vector<8x8xf32>
    %860 = arith.subf %856, %859 : vector<8x8xf32>
    %861 = math.exp %860 : vector<8x8xf32>
    %862 = arith.mulf %861, %379 : vector<8x8xf32>
    %cst_367 = arith.constant dense<0.000000e+00> : vector<8xf32>
    %863 = vector.multi_reduction <add>, %862, %cst_367 [1] : vector<8x8xf32> to vector<8xf32>
    %864 = vector.shape_cast %863 : vector<8xf32> to vector<8x1xf32>
    %865 = tpu.reciprocal %864 {approx = true} : vector<8x1xf32> -> vector<8x1xf32>
    %866 = vector.broadcast %865 : vector<8x1xf32> to vector<8x8xf32>
    %867 = arith.mulf %862, %866 : vector<8x8xf32>
    %868 = vector.extract_strided_slice %867 {offsets = [0, 0], sizes = [8, 1], strides = [1, 1]} : vector<8x8xf32> to vector<8x1xf32>
    %c0_368 = arith.constant 0 : index
    %c0_369 = arith.constant 0 : index
    %869 = vector.load %arg26[%c0_368, %c0_369] : memref<64x32xf32, #tpu.memory_space<vmem>>, vector<8x32xf32>
    %870 = vector.broadcast %868 : vector<8x1xf32> to vector<8x32xf32>
    %871 = arith.mulf %870, %869 : vector<8x32xf32>
    %872 = vector.extract_strided_slice %867 {offsets = [0, 1], sizes = [8, 1], strides = [1, 1]} : vector<8x8xf32> to vector<8x1xf32>
    %c8_370 = arith.constant 8 : index
    %c0_371 = arith.constant 0 : index
    %873 = vector.load %arg26[%c8_370, %c0_371] : memref<64x32xf32, #tpu.memory_space<vmem>>, vector<8x32xf32>
    %874 = vector.broadcast %872 : vector<8x1xf32> to vector<8x32xf32>
    %875 = arith.mulf %874, %873 : vector<8x32xf32>
    %876 = arith.addf %871, %875 : vector<8x32xf32>
    %877 = vector.extract_strided_slice %867 {offsets = [0, 2], sizes = [8, 1], strides = [1, 1]} : vector<8x8xf32> to vector<8x1xf32>
    %c16_372 = arith.constant 16 : index
    %c0_373 = arith.constant 0 : index
    %878 = vector.load %arg26[%c16_372, %c0_373] : memref<64x32xf32, #tpu.memory_space<vmem>>, vector<8x32xf32>
    %879 = vector.broadcast %877 : vector<8x1xf32> to vector<8x32xf32>
    %880 = arith.mulf %879, %878 : vector<8x32xf32>
    %881 = arith.addf %876, %880 : vector<8x32xf32>
    %882 = vector.extract_strided_slice %867 {offsets = [0, 3], sizes = [8, 1], strides = [1, 1]} : vector<8x8xf32> to vector<8x1xf32>
    %c24_374 = arith.constant 24 : index
    %c0_375 = arith.constant 0 : index
    %883 = vector.load %arg26[%c24_374, %c0_375] : memref<64x32xf32, #tpu.memory_space<vmem>>, vector<8x32xf32>
    %884 = vector.broadcast %882 : vector<8x1xf32> to vector<8x32xf32>
    %885 = arith.mulf %884, %883 : vector<8x32xf32>
    %886 = arith.addf %881, %885 : vector<8x32xf32>
    %887 = vector.extract_strided_slice %867 {offsets = [0, 4], sizes = [8, 1], strides = [1, 1]} : vector<8x8xf32> to vector<8x1xf32>
    %c32_376 = arith.constant 32 : index
    %c0_377 = arith.constant 0 : index
    %888 = vector.load %arg26[%c32_376, %c0_377] : memref<64x32xf32, #tpu.memory_space<vmem>>, vector<8x32xf32>
    %889 = vector.broadcast %887 : vector<8x1xf32> to vector<8x32xf32>
    %890 = arith.mulf %889, %888 : vector<8x32xf32>
    %891 = arith.addf %886, %890 : vector<8x32xf32>
    %892 = vector.extract_strided_slice %867 {offsets = [0, 5], sizes = [8, 1], strides = [1, 1]} : vector<8x8xf32> to vector<8x1xf32>
    %c40_378 = arith.constant 40 : index
    %c0_379 = arith.constant 0 : index
    %893 = vector.load %arg26[%c40_378, %c0_379] : memref<64x32xf32, #tpu.memory_space<vmem>>, vector<8x32xf32>
    %894 = vector.broadcast %892 : vector<8x1xf32> to vector<8x32xf32>
    %895 = arith.mulf %894, %893 : vector<8x32xf32>
    %896 = arith.addf %891, %895 : vector<8x32xf32>
    %897 = vector.extract_strided_slice %867 {offsets = [0, 6], sizes = [8, 1], strides = [1, 1]} : vector<8x8xf32> to vector<8x1xf32>
    %c48_380 = arith.constant 48 : index
    %c0_381 = arith.constant 0 : index
    %898 = vector.load %arg26[%c48_380, %c0_381] : memref<64x32xf32, #tpu.memory_space<vmem>>, vector<8x32xf32>
    %899 = vector.broadcast %897 : vector<8x1xf32> to vector<8x32xf32>
    %900 = arith.mulf %899, %898 : vector<8x32xf32>
    %901 = arith.addf %896, %900 : vector<8x32xf32>
    %902 = vector.extract_strided_slice %867 {offsets = [0, 7], sizes = [8, 1], strides = [1, 1]} : vector<8x8xf32> to vector<8x1xf32>
    %c56_382 = arith.constant 56 : index
    %c0_383 = arith.constant 0 : index
    %903 = vector.load %arg26[%c56_382, %c0_383] : memref<64x32xf32, #tpu.memory_space<vmem>>, vector<8x32xf32>
    %904 = vector.broadcast %902 : vector<8x1xf32> to vector<8x32xf32>
    %905 = arith.mulf %904, %903 : vector<8x32xf32>
    %906 = arith.addf %901, %905 : vector<8x32xf32>
    %c0_384 = arith.constant 0 : index
    %c0_385 = arith.constant 0 : index
    %907 = vector.load %arg19[%c0_384, %c0_385] : memref<32x96xf32, #tpu.memory_space<vmem>>, vector<32x96xf32>
    %cst_386 = arith.constant dense<0.000000e+00> : vector<8x96xf32>
    %908 = tpu.matmul %841, %907, %cst_386 {dimension_numbers = #tpu.dot_dimension_numbers<[1], [0], [0], [1], [0, 0, 1, 1], [], []>, precision = #tpu.contract_precision<fp32>} : vector<8x32xf32>, vector<32x96xf32>, vector<8x96xf32> -> vector<8x96xf32>
    %c0_387 = arith.constant 0 : index
    %c0_388 = arith.constant 0 : index
    %909 = vector.load %arg20[%c0_387, %c0_388] : memref<1x96xf32, #tpu.memory_space<vmem>>, vector<1x96xf32>
    %910 = vector.broadcast %909 : vector<1x96xf32> to vector<8x96xf32>
    %911 = arith.addf %908, %910 : vector<8x96xf32>
    %c0_389 = arith.constant 0 : index
    %c0_390 = arith.constant 0 : index
    %912 = vector.load %arg21[%c0_389, %c0_390] : memref<32x96xf32, #tpu.memory_space<vmem>>, vector<32x96xf32>
    %cst_391 = arith.constant dense<0.000000e+00> : vector<8x96xf32>
    %913 = tpu.matmul %906, %912, %cst_391 {dimension_numbers = #tpu.dot_dimension_numbers<[1], [0], [0], [1], [0, 0, 1, 1], [], []>, precision = #tpu.contract_precision<fp32>} : vector<8x32xf32>, vector<32x96xf32>, vector<8x96xf32> -> vector<8x96xf32>
    %c0_392 = arith.constant 0 : index
    %c0_393 = arith.constant 0 : index
    %914 = vector.load %arg22[%c0_392, %c0_393] : memref<1x96xf32, #tpu.memory_space<vmem>>, vector<1x96xf32>
    %915 = vector.broadcast %914 : vector<1x96xf32> to vector<8x96xf32>
    %916 = arith.addf %913, %915 : vector<8x96xf32>
    %917 = vector.extract_strided_slice %377 {offsets = [32, 0], sizes = [8, 96], strides = [1, 1]} : vector<48x96xf32> to vector<8x96xf32>
    %918 = vector.extract_strided_slice %917 {offsets = [0, 0], sizes = [8, 32], strides = [1, 1]} : vector<8x96xf32> to vector<8x32xf32>
    %919 = vector.extract_strided_slice %911 {offsets = [0, 0], sizes = [8, 32], strides = [1, 1]} : vector<8x96xf32> to vector<8x32xf32>
    %920 = arith.addf %918, %919 : vector<8x32xf32>
    %921 = vector.extract_strided_slice %916 {offsets = [0, 0], sizes = [8, 32], strides = [1, 1]} : vector<8x96xf32> to vector<8x32xf32>
    %922 = arith.addf %920, %921 : vector<8x32xf32>
    %923 = arith.negf %922 : vector<8x32xf32>
    %924 = math.exp %923 : vector<8x32xf32>
    %cst_394 = arith.constant 1.000000e+00 : f32
    %925 = vector.broadcast %cst_394 : f32 to vector<8x32xf32>
    %926 = arith.addf %925, %924 : vector<8x32xf32>
    %927 = arith.divf %925, %926 : vector<8x32xf32>
    %928 = vector.extract_strided_slice %917 {offsets = [0, 32], sizes = [8, 32], strides = [1, 1]} : vector<8x96xf32> to vector<8x32xf32>
    %929 = vector.extract_strided_slice %911 {offsets = [0, 32], sizes = [8, 32], strides = [1, 1]} : vector<8x96xf32> to vector<8x32xf32>
    %930 = arith.addf %928, %929 : vector<8x32xf32>
    %931 = vector.extract_strided_slice %916 {offsets = [0, 32], sizes = [8, 32], strides = [1, 1]} : vector<8x96xf32> to vector<8x32xf32>
    %932 = arith.addf %930, %931 : vector<8x32xf32>
    %933 = arith.negf %932 : vector<8x32xf32>
    %934 = math.exp %933 : vector<8x32xf32>
    %cst_395 = arith.constant 1.000000e+00 : f32
    %935 = vector.broadcast %cst_395 : f32 to vector<8x32xf32>
    %936 = arith.addf %935, %934 : vector<8x32xf32>
    %937 = arith.divf %935, %936 : vector<8x32xf32>
    %938 = vector.extract_strided_slice %917 {offsets = [0, 64], sizes = [8, 32], strides = [1, 1]} : vector<8x96xf32> to vector<8x32xf32>
    %939 = vector.extract_strided_slice %911 {offsets = [0, 64], sizes = [8, 32], strides = [1, 1]} : vector<8x96xf32> to vector<8x32xf32>
    %940 = arith.mulf %937, %939 : vector<8x32xf32>
    %941 = arith.addf %938, %940 : vector<8x32xf32>
    %942 = vector.extract_strided_slice %916 {offsets = [0, 64], sizes = [8, 32], strides = [1, 1]} : vector<8x96xf32> to vector<8x32xf32>
    %943 = arith.addf %941, %942 : vector<8x32xf32>
    %944 = math.tanh %943 : vector<8x32xf32>
    %cst_396 = arith.constant 1.000000e+00 : f32
    %945 = vector.broadcast %cst_396 : f32 to vector<8x32xf32>
    %946 = arith.subf %945, %927 : vector<8x32xf32>
    %947 = arith.mulf %946, %841 : vector<8x32xf32>
    %948 = arith.mulf %927, %944 : vector<8x32xf32>
    %949 = arith.addf %947, %948 : vector<8x32xf32>
    %c32_397 = arith.constant 32 : index
    %c0_398 = arith.constant 0 : index
    %950 = vector.load %arg3[%c32_397, %c0_398] : memref<48x1xf32, #tpu.memory_space<vmem>>, vector<8x1xf32>
    %951 = vector.broadcast %950 : vector<8x1xf32> to vector<8x32xf32>
    %952 = arith.mulf %951, %949 : vector<8x32xf32>
    %cst_399 = arith.constant 1.000000e+00 : f32
    %953 = vector.broadcast %cst_399 : f32 to vector<8x1xf32>
    %954 = arith.subf %953, %950 : vector<8x1xf32>
    %955 = vector.broadcast %954 : vector<8x1xf32> to vector<8x32xf32>
    %956 = arith.mulf %955, %841 : vector<8x32xf32>
    %957 = arith.addf %952, %956 : vector<8x32xf32>
    %c32_400 = arith.constant 32 : index
    %c0_401 = arith.constant 0 : index
    %958 = vector.load %arg28[%c32_400, %c0_401] : memref<48x80xf32, #tpu.memory_space<vmem>>, vector<8x32xf32>
    tpu.vector_store %arg28[%c32_400, %c0_401], %957 {strides = array<i32>} : memref<48x80xf32, #tpu.memory_space<vmem>>, vector<8x32xf32>,
    %c32_402 = arith.constant 32 : index
    %c32_403 = arith.constant 32 : index
    %959 = vector.load %arg28[%c32_402, %c32_403] : memref<48x80xf32, #tpu.memory_space<vmem>>, vector<8x32xf32>
    tpu.vector_store %arg28[%c32_402, %c32_403], %906 {strides = array<i32>} : memref<48x80xf32, #tpu.memory_space<vmem>>, vector<8x32xf32>,
    %c0_404 = arith.constant 0 : index
    %c0_405 = arith.constant 0 : index
    %960 = vector.load %arg13[%c0_404, %c0_405] : memref<32x128xf32, #tpu.memory_space<vmem>>, vector<32x128xf32>
    %cst_406 = arith.constant dense<0.000000e+00> : vector<8x128xf32>
    %961 = tpu.matmul %957, %960, %cst_406 {dimension_numbers = #tpu.dot_dimension_numbers<[1], [0], [0], [1], [0, 0, 1, 1], [], []>, precision = #tpu.contract_precision<fp32>} : vector<8x32xf32>, vector<32x128xf32>, vector<8x128xf32> -> vector<8x128xf32>
    %c0_407 = arith.constant 0 : index
    %c0_408 = arith.constant 0 : index
    %962 = vector.load %arg14[%c0_407, %c0_408] : memref<1x128xf32, #tpu.memory_space<vmem>>, vector<1x128xf32>
    %963 = vector.broadcast %962 : vector<1x128xf32> to vector<8x128xf32>
    %964 = arith.addf %961, %963 : vector<8x128xf32>
    %c0_409 = arith.constant 0 : index
    %c0_410 = arith.constant 0 : index
    %965 = vector.load %arg27[%c0_409, %c0_410] : memref<8x128xf32, #tpu.memory_space<vmem>>, vector<8x128xf32>
    %966 = arith.addf %964, %965 : vector<8x128xf32>
    %967 = math.tanh %966 : vector<8x128xf32>
    %c0_411 = arith.constant 0 : index
    %c0_412 = arith.constant 0 : index
    %968 = vector.load %arg15[%c0_411, %c0_412] : memref<128x8xf32, #tpu.memory_space<vmem>>, vector<128x8xf32>
    %cst_413 = arith.constant dense<0.000000e+00> : vector<8x8xf32>
    %969 = tpu.matmul %967, %968, %cst_413 {dimension_numbers = #tpu.dot_dimension_numbers<[1], [0], [0], [1], [0, 0, 1, 1], [], []>, precision = #tpu.contract_precision<fp32>} : vector<8x128xf32>, vector<128x8xf32>, vector<8x8xf32> -> vector<8x8xf32>
    %c0_414 = arith.constant 0 : index
    %c0_415 = arith.constant 0 : index
    %970 = vector.load %arg16[%c0_414, %c0_415] : memref<1x1xf32, #tpu.memory_space<vmem>>, vector<1x1xf32>
    %971 = vector.broadcast %970 : vector<1x1xf32> to vector<8x8xf32>
    %972 = arith.addf %969, %971 : vector<8x8xf32>
    %cst_416 = arith.constant dense<0xFF800000> : vector<8xf32>
    %973 = vector.multi_reduction <maximumf>, %972, %cst_416 [1] : vector<8x8xf32> to vector<8xf32>
    %974 = vector.shape_cast %973 : vector<8xf32> to vector<8x1xf32>
    %975 = vector.broadcast %974 : vector<8x1xf32> to vector<8x8xf32>
    %976 = arith.subf %972, %975 : vector<8x8xf32>
    %977 = math.exp %976 : vector<8x8xf32>
    %978 = arith.mulf %977, %379 : vector<8x8xf32>
    %cst_417 = arith.constant dense<0.000000e+00> : vector<8xf32>
    %979 = vector.multi_reduction <add>, %978, %cst_417 [1] : vector<8x8xf32> to vector<8xf32>
    %980 = vector.shape_cast %979 : vector<8xf32> to vector<8x1xf32>
    %981 = tpu.reciprocal %980 {approx = true} : vector<8x1xf32> -> vector<8x1xf32>
    %982 = vector.broadcast %981 : vector<8x1xf32> to vector<8x8xf32>
    %983 = arith.mulf %978, %982 : vector<8x8xf32>
    %984 = vector.extract_strided_slice %983 {offsets = [0, 0], sizes = [8, 1], strides = [1, 1]} : vector<8x8xf32> to vector<8x1xf32>
    %c0_418 = arith.constant 0 : index
    %c0_419 = arith.constant 0 : index
    %985 = vector.load %arg26[%c0_418, %c0_419] : memref<64x32xf32, #tpu.memory_space<vmem>>, vector<8x32xf32>
    %986 = vector.broadcast %984 : vector<8x1xf32> to vector<8x32xf32>
    %987 = arith.mulf %986, %985 : vector<8x32xf32>
    %988 = vector.extract_strided_slice %983 {offsets = [0, 1], sizes = [8, 1], strides = [1, 1]} : vector<8x8xf32> to vector<8x1xf32>
    %c8_420 = arith.constant 8 : index
    %c0_421 = arith.constant 0 : index
    %989 = vector.load %arg26[%c8_420, %c0_421] : memref<64x32xf32, #tpu.memory_space<vmem>>, vector<8x32xf32>
    %990 = vector.broadcast %988 : vector<8x1xf32> to vector<8x32xf32>
    %991 = arith.mulf %990, %989 : vector<8x32xf32>
    %992 = arith.addf %987, %991 : vector<8x32xf32>
    %993 = vector.extract_strided_slice %983 {offsets = [0, 2], sizes = [8, 1], strides = [1, 1]} : vector<8x8xf32> to vector<8x1xf32>
    %c16_422 = arith.constant 16 : index
    %c0_423 = arith.constant 0 : index
    %994 = vector.load %arg26[%c16_422, %c0_423] : memref<64x32xf32, #tpu.memory_space<vmem>>, vector<8x32xf32>
    %995 = vector.broadcast %993 : vector<8x1xf32> to vector<8x32xf32>
    %996 = arith.mulf %995, %994 : vector<8x32xf32>
    %997 = arith.addf %992, %996 : vector<8x32xf32>
    %998 = vector.extract_strided_slice %983 {offsets = [0, 3], sizes = [8, 1], strides = [1, 1]} : vector<8x8xf32> to vector<8x1xf32>
    %c24_424 = arith.constant 24 : index
    %c0_425 = arith.constant 0 : index
    %999 = vector.load %arg26[%c24_424, %c0_425] : memref<64x32xf32, #tpu.memory_space<vmem>>, vector<8x32xf32>
    %1000 = vector.broadcast %998 : vector<8x1xf32> to vector<8x32xf32>
    %1001 = arith.mulf %1000, %999 : vector<8x32xf32>
    %1002 = arith.addf %997, %1001 : vector<8x32xf32>
    %1003 = vector.extract_strided_slice %983 {offsets = [0, 4], sizes = [8, 1], strides = [1, 1]} : vector<8x8xf32> to vector<8x1xf32>
    %c32_426 = arith.constant 32 : index
    %c0_427 = arith.constant 0 : index
    %1004 = vector.load %arg26[%c32_426, %c0_427] : memref<64x32xf32, #tpu.memory_space<vmem>>, vector<8x32xf32>
    %1005 = vector.broadcast %1003 : vector<8x1xf32> to vector<8x32xf32>
    %1006 = arith.mulf %1005, %1004 : vector<8x32xf32>
    %1007 = arith.addf %1002, %1006 : vector<8x32xf32>
    %1008 = vector.extract_strided_slice %983 {offsets = [0, 5], sizes = [8, 1], strides = [1, 1]} : vector<8x8xf32> to vector<8x1xf32>
    %c40_428 = arith.constant 40 : index
    %c0_429 = arith.constant 0 : index
    %1009 = vector.load %arg26[%c40_428, %c0_429] : memref<64x32xf32, #tpu.memory_space<vmem>>, vector<8x32xf32>
    %1010 = vector.broadcast %1008 : vector<8x1xf32> to vector<8x32xf32>
    %1011 = arith.mulf %1010, %1009 : vector<8x32xf32>
    %1012 = arith.addf %1007, %1011 : vector<8x32xf32>
    %1013 = vector.extract_strided_slice %983 {offsets = [0, 6], sizes = [8, 1], strides = [1, 1]} : vector<8x8xf32> to vector<8x1xf32>
    %c48_430 = arith.constant 48 : index
    %c0_431 = arith.constant 0 : index
    %1014 = vector.load %arg26[%c48_430, %c0_431] : memref<64x32xf32, #tpu.memory_space<vmem>>, vector<8x32xf32>
    %1015 = vector.broadcast %1013 : vector<8x1xf32> to vector<8x32xf32>
    %1016 = arith.mulf %1015, %1014 : vector<8x32xf32>
    %1017 = arith.addf %1012, %1016 : vector<8x32xf32>
    %1018 = vector.extract_strided_slice %983 {offsets = [0, 7], sizes = [8, 1], strides = [1, 1]} : vector<8x8xf32> to vector<8x1xf32>
    %c56_432 = arith.constant 56 : index
    %c0_433 = arith.constant 0 : index
    %1019 = vector.load %arg26[%c56_432, %c0_433] : memref<64x32xf32, #tpu.memory_space<vmem>>, vector<8x32xf32>
    %1020 = vector.broadcast %1018 : vector<8x1xf32> to vector<8x32xf32>
    %1021 = arith.mulf %1020, %1019 : vector<8x32xf32>
    %1022 = arith.addf %1017, %1021 : vector<8x32xf32>
    %c0_434 = arith.constant 0 : index
    %c0_435 = arith.constant 0 : index
    %1023 = vector.load %arg19[%c0_434, %c0_435] : memref<32x96xf32, #tpu.memory_space<vmem>>, vector<32x96xf32>
    %cst_436 = arith.constant dense<0.000000e+00> : vector<8x96xf32>
    %1024 = tpu.matmul %957, %1023, %cst_436 {dimension_numbers = #tpu.dot_dimension_numbers<[1], [0], [0], [1], [0, 0, 1, 1], [], []>, precision = #tpu.contract_precision<fp32>} : vector<8x32xf32>, vector<32x96xf32>, vector<8x96xf32> -> vector<8x96xf32>
    %c0_437 = arith.constant 0 : index
    %c0_438 = arith.constant 0 : index
    %1025 = vector.load %arg20[%c0_437, %c0_438] : memref<1x96xf32, #tpu.memory_space<vmem>>, vector<1x96xf32>
    %1026 = vector.broadcast %1025 : vector<1x96xf32> to vector<8x96xf32>
    %1027 = arith.addf %1024, %1026 : vector<8x96xf32>
    %c0_439 = arith.constant 0 : index
    %c0_440 = arith.constant 0 : index
    %1028 = vector.load %arg21[%c0_439, %c0_440] : memref<32x96xf32, #tpu.memory_space<vmem>>, vector<32x96xf32>
    %cst_441 = arith.constant dense<0.000000e+00> : vector<8x96xf32>
    %1029 = tpu.matmul %1022, %1028, %cst_441 {dimension_numbers = #tpu.dot_dimension_numbers<[1], [0], [0], [1], [0, 0, 1, 1], [], []>, precision = #tpu.contract_precision<fp32>} : vector<8x32xf32>, vector<32x96xf32>, vector<8x96xf32> -> vector<8x96xf32>
    %c0_442 = arith.constant 0 : index
    %c0_443 = arith.constant 0 : index
    %1030 = vector.load %arg22[%c0_442, %c0_443] : memref<1x96xf32, #tpu.memory_space<vmem>>, vector<1x96xf32>
    %1031 = vector.broadcast %1030 : vector<1x96xf32> to vector<8x96xf32>
    %1032 = arith.addf %1029, %1031 : vector<8x96xf32>
    %1033 = vector.extract_strided_slice %377 {offsets = [40, 0], sizes = [8, 96], strides = [1, 1]} : vector<48x96xf32> to vector<8x96xf32>
    %1034 = vector.extract_strided_slice %1033 {offsets = [0, 0], sizes = [8, 32], strides = [1, 1]} : vector<8x96xf32> to vector<8x32xf32>
    %1035 = vector.extract_strided_slice %1027 {offsets = [0, 0], sizes = [8, 32], strides = [1, 1]} : vector<8x96xf32> to vector<8x32xf32>
    %1036 = arith.addf %1034, %1035 : vector<8x32xf32>
    %1037 = vector.extract_strided_slice %1032 {offsets = [0, 0], sizes = [8, 32], strides = [1, 1]} : vector<8x96xf32> to vector<8x32xf32>
    %1038 = arith.addf %1036, %1037 : vector<8x32xf32>
    %1039 = arith.negf %1038 : vector<8x32xf32>
    %1040 = math.exp %1039 : vector<8x32xf32>
    %cst_444 = arith.constant 1.000000e+00 : f32
    %1041 = vector.broadcast %cst_444 : f32 to vector<8x32xf32>
    %1042 = arith.addf %1041, %1040 : vector<8x32xf32>
    %1043 = arith.divf %1041, %1042 : vector<8x32xf32>
    %1044 = vector.extract_strided_slice %1033 {offsets = [0, 32], sizes = [8, 32], strides = [1, 1]} : vector<8x96xf32> to vector<8x32xf32>
    %1045 = vector.extract_strided_slice %1027 {offsets = [0, 32], sizes = [8, 32], strides = [1, 1]} : vector<8x96xf32> to vector<8x32xf32>
    %1046 = arith.addf %1044, %1045 : vector<8x32xf32>
    %1047 = vector.extract_strided_slice %1032 {offsets = [0, 32], sizes = [8, 32], strides = [1, 1]} : vector<8x96xf32> to vector<8x32xf32>
    %1048 = arith.addf %1046, %1047 : vector<8x32xf32>
    %1049 = arith.negf %1048 : vector<8x32xf32>
    %1050 = math.exp %1049 : vector<8x32xf32>
    %cst_445 = arith.constant 1.000000e+00 : f32
    %1051 = vector.broadcast %cst_445 : f32 to vector<8x32xf32>
    %1052 = arith.addf %1051, %1050 : vector<8x32xf32>
    %1053 = arith.divf %1051, %1052 : vector<8x32xf32>
    %1054 = vector.extract_strided_slice %1033 {offsets = [0, 64], sizes = [8, 32], strides = [1, 1]} : vector<8x96xf32> to vector<8x32xf32>
    %1055 = vector.extract_strided_slice %1027 {offsets = [0, 64], sizes = [8, 32], strides = [1, 1]} : vector<8x96xf32> to vector<8x32xf32>
    %1056 = arith.mulf %1053, %1055 : vector<8x32xf32>
    %1057 = arith.addf %1054, %1056 : vector<8x32xf32>
    %1058 = vector.extract_strided_slice %1032 {offsets = [0, 64], sizes = [8, 32], strides = [1, 1]} : vector<8x96xf32> to vector<8x32xf32>
    %1059 = arith.addf %1057, %1058 : vector<8x32xf32>
    %1060 = math.tanh %1059 : vector<8x32xf32>
    %cst_446 = arith.constant 1.000000e+00 : f32
    %1061 = vector.broadcast %cst_446 : f32 to vector<8x32xf32>
    %1062 = arith.subf %1061, %1043 : vector<8x32xf32>
    %1063 = arith.mulf %1062, %957 : vector<8x32xf32>
    %1064 = arith.mulf %1043, %1060 : vector<8x32xf32>
    %1065 = arith.addf %1063, %1064 : vector<8x32xf32>
    %c40_447 = arith.constant 40 : index
    %c0_448 = arith.constant 0 : index
    %1066 = vector.load %arg3[%c40_447, %c0_448] : memref<48x1xf32, #tpu.memory_space<vmem>>, vector<8x1xf32>
    %1067 = vector.broadcast %1066 : vector<8x1xf32> to vector<8x32xf32>
    %1068 = arith.mulf %1067, %1065 : vector<8x32xf32>
    %cst_449 = arith.constant 1.000000e+00 : f32
    %1069 = vector.broadcast %cst_449 : f32 to vector<8x1xf32>
    %1070 = arith.subf %1069, %1066 : vector<8x1xf32>
    %1071 = vector.broadcast %1070 : vector<8x1xf32> to vector<8x32xf32>
    %1072 = arith.mulf %1071, %957 : vector<8x32xf32>
    %1073 = arith.addf %1068, %1072 : vector<8x32xf32>
    %c40_450 = arith.constant 40 : index
    %c0_451 = arith.constant 0 : index
    %1074 = vector.load %arg28[%c40_450, %c0_451] : memref<48x80xf32, #tpu.memory_space<vmem>>, vector<8x32xf32>
    tpu.vector_store %arg28[%c40_450, %c0_451], %1073 {strides = array<i32>} : memref<48x80xf32, #tpu.memory_space<vmem>>, vector<8x32xf32>,
    %c40_452 = arith.constant 40 : index
    %c32_453 = arith.constant 32 : index
    %1075 = vector.load %arg28[%c40_452, %c32_453] : memref<48x80xf32, #tpu.memory_space<vmem>>, vector<8x32xf32>
    tpu.vector_store %arg28[%c40_452, %c32_453], %1022 {strides = array<i32>} : memref<48x80xf32, #tpu.memory_space<vmem>>, vector<8x32xf32>,
    %c0_454 = arith.constant 0 : index
    %c0_455 = arith.constant 0 : index
    %1076 = vector.load %arg28[%c0_454, %c0_455] : memref<48x80xf32, #tpu.memory_space<vmem>>, vector<48x80xf32>
    %c0_456 = arith.constant 0 : index
    %c0_457 = arith.constant 0 : index
    %1077 = vector.load %arg23[%c0_456, %c0_457] : memref<80x32xf32, #tpu.memory_space<vmem>>, vector<80x32xf32>
    %cst_458 = arith.constant dense<0.000000e+00> : vector<48x32xf32>
    %1078 = tpu.matmul %1076, %1077, %cst_458 {dimension_numbers = #tpu.dot_dimension_numbers<[1], [0], [0], [1], [0, 0, 1, 1], [], []>, precision = #tpu.contract_precision<fp32>} : vector<48x80xf32>, vector<80x32xf32>, vector<48x32xf32> -> vector<48x32xf32>
    %c0_459 = arith.constant 0 : index
    %c0_460 = arith.constant 0 : index
    %1079 = vector.load %arg24[%c0_459, %c0_460] : memref<1x32xf32, #tpu.memory_space<vmem>>, vector<1x32xf32>
    %1080 = vector.broadcast %1079 : vector<1x32xf32> to vector<48x32xf32>
    %1081 = arith.addf %1078, %1080 : vector<48x32xf32>
    %1082 = vector.extract_strided_slice %1081 {offsets = [0, 0], sizes = [48, 16], strides = [1, 1]} : vector<48x32xf32> to vector<48x16xf32>
    %1083 = vector.extract_strided_slice %1081 {offsets = [0, 16], sizes = [48, 16], strides = [1, 1]} : vector<48x32xf32> to vector<48x16xf32>
    %1084 = arith.maximumf %1082, %1083 : vector<48x16xf32>
    %c0_461 = arith.constant 0 : index
    %c0_462 = arith.constant 0 : index
    %1085 = vector.load %arg3[%c0_461, %c0_462] : memref<48x1xf32, #tpu.memory_space<vmem>>, vector<48x1xf32>
    %1086 = vector.broadcast %1085 : vector<48x1xf32> to vector<48x16xf32>
    %1087 = arith.mulf %1084, %1086 : vector<48x16xf32>
    %c0_463 = arith.constant 0 : index
    %c0_464 = arith.constant 0 : index
    %1088 = vector.load %arg25[%c0_463, %c0_464] : memref<48x16xf32, #tpu.memory_space<vmem>>, vector<48x16xf32>
    tpu.vector_store %arg25[%c0_463, %c0_464], %1087 {strides = array<i32>} : memref<48x16xf32, #tpu.memory_space<vmem>>, vector<48x16xf32>,
    return
  }
}

</mosaic_0001>

<bundles_post_ra>
// kernel: tpu_custom_call.1
= control target key start
LH: loop header
LB: loop body
LE: loop exit
PB: predicated region body
PF: predicated region fallthrough
CT: control target
= control target key end

     0   :  { %vm101_vm0 = vcmask 261120   ;;  %v35173_v55 = vmov 0.0|0.0   ;;  %vm29826_vm1 = vmmov 0   ;;  %s29828_s27 = smov 96   ;;  %s29830_s29 = smov 64   ;;  %vm1442_vm2 = vcmask 130048   ;;  %s35089_s5 = inlined_call_operand.vmem [shape: f32[32,96], index: 5, kind: input, shape index: {}]   ;;  %s35090_s0 = inlined_call_operand.vmem [shape: f32[64,32], index: 0, kind: input, shape index: {}]   ;;  %s35091_s7 = inlined_call_operand.vmem [shape: f32[32,96], index: 7, kind: input, shape index: {}]   ;;  %s35092_s8 = inlined_call_operand.vmem [shape: f32[1,96], index: 8, kind: input, shape index: {}]   ;;  %s35093_s6 = inlined_call_operand.vmem [shape: f32[1,96], index: 6, kind: input, shape index: {}]   ;;  %s35094_s1 = inlined_call_operand.vmem [shape: f32[64,32], index: 1, kind: input, shape index: {}]   ;;  %s35095_s11 = inlined_call_operand.vmem [shape: f32[32,16], index: 11, kind: input, shape index: {}]   ;;  %s35096_s9 = inlined_call_operand.vmem [shape: f32[16,32], index: 9, kind: input, shape index: {}]   ;;  %s35097_s2 = inlined_call_operand.vmem [shape: f32[48,16], index: 2, kind: input, shape index: {}]   ;;  %s35098_s17 = inlined_call_operand.vmem [shape: f32[16,96], index: 17, kind: input, shape index: {}]   ;;  %s35099_s13 = inlined_call_operand.vmem [shape: f32[32,128], index: 13, kind: input, shape index: {}]   ;;  %s35100_s12 = inlined_call_operand.vmem [shape: f32[1,16], index: 12, kind: input, shape index: {}]   ;;  %s35101_s10 = inlined_call_operand.vmem [shape: f32[1,32], index: 10, kind: input, shape index: {}]   ;;  %s35102_s18 = inlined_call_operand.vmem [shape: f32[1,96], index: 18, kind: input, shape index: {}]   ;;  %s35103_s15 = inlined_call_operand.vmem [shape: f32[128,8], index: 15, kind: input, shape index: {}]   ;;  %s35104_s16 = inlined_call_operand.<no memory space> [shape: f32[1,1], index: 16, kind: input, shape index: {}]   ;;  %s35105_s14 = inlined_call_operand.vmem [shape: f32[1,128], index: 14, kind: input, shape index: {}]   ;;  %s35106_s19 = inlined_call_operand.vmem [shape: f32[32,96], index: 19, kind: input, shape index: {}]   ;;  %s35107_s4 = inlined_call_operand.vmem [shape: f32[8,8], index: 4, kind: input, shape index: {}]   ;;  %s35108_s20 = inlined_call_operand.vmem [shape: f32[1,96], index: 20, kind: input, shape index: {}]   ;;  %s35109_s21 = inlined_call_operand.vmem [shape: f32[32,96], index: 21, kind: input, shape index: {}]   ;;  %s35110_s3 = inlined_call_operand.vmem [shape: f32[48,1], index: 3, kind: input, shape index: {}]   ;;  %s35111_s22 = inlined_call_operand.vmem [shape: f32[1,96], index: 22, kind: input, shape index: {}]   ;;  %s35112_s23 = inlined_call_operand.vmem [shape: f32[80,32], index: 23, kind: input, shape index: {}]   ;;  %s35113_s24 = inlined_call_operand.vmem [shape: f32[1,32], index: 24, kind: input, shape index: {}]   ;;  %s35114_s25 = inlined_call_operand.vmem [shape: f32[48,16], index: 25, kind: output, shape index: {}]  }
   0x1   :  { %35266 = sst [smem:[#allocation17_spill]] %s35089_s5  ;;  %s29829_s5 = smov 32   ;;  %vm1444_vm3 = vcmask 261248   ;;  %vm6483_vm4 = vcmask 392448   ;;  %vm6489_vm5 = vcmask 523648   ;;  %vm6495_vm6 = vcmask 654848  }
   0x2   :  { %35267 = sst [smem:[#allocation18_spill]] %s35090_s0  ;;  %vm6501_vm7 = vcmask 786048   ;;  %vm6507_vm8 = vcmask 917248   ;;  %vm6513_vm9 = vcmask 1048448   ;;  %vm8416_vm10 = vcmask 64512  }
   0x3   :  { %35268 = sst [smem:[#allocation19_spill]] %s35091_s7  ;;  %s35277_s28 = sld [smem:[#allocation18_spill]]  ;;  %vm9527_vm11 = vcmask 523520   ;;  %vm20952_vm12 = vcmask 654336  }
   0x4   :  { %35269 = sst [smem:[#allocation20_spill]] %s35092_s8  ;;  %s35278_s8 = sld [smem:[#allocation19_spill]] }
   0x5   :  { %35270 = sst [smem:[#allocation21_spill]] %s35093_s6 }
   0x6   :  { %35271 = sst [smem:[#allocation22_spill]] %s35094_s1  ;;  %s35280_s1 = sld [smem:[#allocation21_spill]] }
   0x7   :  { %35272 = sst [smem:[#allocation23_spill]] %s35095_s11  ;;  %s35276_s11 = sld [smem:[#allocation17_spill]] }
   0x8   :  { %35273 = sst [smem:[#allocation24_spill]] %s35096_s9  ;;  %s35281_s30 = sld [smem:[#allocation22_spill]] }
   0x9   :  { %35274 = sst [smem:[#allocation25_spill]] %s35097_s2  ;;  %v82_v7 = vld [vmem:[%s35277_s28] sm:$0xff]  ;;  %v83_v12 = vld [vmem:[%s35277_s28 + $0x8] sm:$0xff]  ;;  %v84_v36 = vld [vmem:[%s35277_s28 + $0x10] sm:$0xff]  ;;  %s35279_s2 = sld [smem:[#allocation20_spill]] }
   0xa   :  { %35275 = sst [smem:[#allocation26_spill]] %s35098_s17  ;;  %v86_v8 = vld [vmem:[%s35277_s28 + $0x20] sm:$0xff]  ;;  %v103_v10 = vsel %vm101_vm0, %v82_v7, 0  ;;  %v87_v13 = vld [vmem:[%s35277_s28 + $0x28] sm:$0xff]  ;;  %v106_v17 = vsel %vm101_vm0, %v83_v12, 0  ;;  %v88_v45 = vld [vmem:[%s35277_s28 + $0x30] sm:$0xff] }
   0xb   :  { %v115_v11 = vsel %vm101_vm0, %v86_v8, 0  ;;  %v30007_v15 = vand.u32 4294901760, %v103_v10  ;;  %v912_v18 = vld [vmem:[%s35278_s8] sm:$0xff]  ;;  %v913_v19 = vld [vmem:[%s35278_s8 + $0x8] sm:$0xff]  ;;  %v30024_v21 = vand.u32 4294901760, %v106_v17  ;;  %v118_v22 = vsel %vm101_vm0, %v87_v13, 0 }
   0xc   :  { %v30009_v16 = vand.u32 4294901760, %v115_v11  ;;  %v30037_v26 = vand.u32 4294901760, %v118_v22  ;;  %v927_v30 = vand.u32 4294901760, %v912_v18  ;;  %v930_v31 = vand.u32 4294901760, %v913_v19  ;;  %v85_v46 = vld [vmem:[%s35277_s28 + $0x18] sm:$0xff]  ;;  %v914_v61 = vld [vmem:[%s35278_s8 + $0x10] sm:$0xff] }
   0xd   :  { %v90_v0 = vld [vmem:[%s35276_s11] sm:$0xff]  ;;  %v91_v1 = vld [vmem:[%s35276_s11 + $0x8] sm:$0xff]  ;;  %v29982_v2 = vld [vmem:[%s35276_s11 + $0x10] sm:$0xff]  ;;  %v30032_v24 = vsub.f32 %v103_v10, %v30007_v15  ;;  %v30044_v28 = vsub.f32 %v106_v17, %v30024_v21  ;;  %v109_v50 = vsel %vm101_vm0, %v84_v36, 0  ;;  %v121_v59 = vsel %vm101_vm0, %v88_v45, 0  ;;  %s35282_s6 = sld [smem:[#allocation23_spill]] }
   0xe   :  { %v127_v3 = vand.u32 4294901760, %v90_v0  ;;  %v130_v4 = vand.u32 4294901760, %v91_v1  ;;  %v29987_v5 = vld [vmem:[%s35276_s11 + $0x18] sm:$0xff]  ;;  %v133_v6 = vand.u32 4294901760, %v29982_v2  ;;  %v30035_v25 = vsub.f32 %v115_v11, %v30009_v16  ;;  %s35285_s9 = sld [smem:[#allocation26_spill]] }
   0xf   :  { %v136_v9 = vand.u32 4294901760, %v29987_v5  ;;  %v197_v32 = vand.u32 4294901760, %v30032_v24  ;;  %v30052_v34 = vsub.f32 %v118_v22, %v30037_v26  ;;  %v207_v37 = vand.u32 4294901760, %v30044_v28  ;;  %v89_v56 = vld [vmem:[%s35277_s28 + $0x38] sm:$0xff] }
  0x10   :  { %v30005_v14 = vpack.c.bf16 %v130_v4, %v127_v3  ;;  %v30027_v23 = vsub.f32 %v90_v0, %v127_v3  ;;  %v30039_v27 = vsub.f32 %v91_v1, %v130_v4  ;;  %v237_v33 = vand.u32 4294901760, %v30035_v25  ;;  %v915_v3 = vld [vmem:[%s35278_s8 + $0x18] sm:$0xff] }
  0x11   :  { %v30022_v20 = vpack.c.bf16 %v136_v9, %v133_v6  ;;  %v30062_v39 = vpack.c.bf16 %v930_v31, %v927_v30  ;;  %v30064_v40 = vsub.f32 %v912_v18, %v927_v30  ;;  %v198_v41 = vsub.f32 %v30032_v24, %v197_v32 }
  0x12   :  { %27091 = vmatprep.subr.bf16.mxu0 %v30005_v14  ;;  %29148 = vmatprep.subr.bf16.mxu1 %v30005_v14  ;;  %v278_v29 = vand.u32 4294901760, %v30027_v23  ;;  %v285_v35 = vand.u32 4294901760, %v30039_v27  ;;  %v238_v42 = vsub.f32 %v30035_v25, %v237_v33  ;;  %v247_v43 = vand.u32 4294901760, %v30052_v34 }
  0x13   :  { %27093 = vmatpush3.bf16.msra.mxu0 %v30005_v14  ;;  %29150 = vmatpush3.bf16.msra.mxu1 %v30005_v14  ;;  %v208_v47 = vsub.f32 %v30044_v28, %v207_v37  ;;  %v30087_v49 = vsub.f32 %v913_v19, %v930_v31  ;;  %v199_v51 = vand.u32 4294901760, %v198_v41  ;;  %v30097_v58 = vand.u32 4294901760, %v109_v50 }
  0x14   :  { %27095 = vmatprep.subr.bf16.mxu0 %v30022_v20  ;;  %29149 = vmatprep.subr.bf16.mxu1 %v30022_v20  ;;  %v279_v38 = vsub.f32 %v30027_v23, %v278_v29  ;;  %v286_v44 = vsub.f32 %v30039_v27, %v285_v35  ;;  %v239_v52 = vand.u32 4294901760, %v238_v42  ;;  %v248_v53 = vsub.f32 %v30052_v34, %v247_v43 }
  0x15   :  { %v209_v57 = vand.u32 4294901760, %v208_v47  ;;  %v112_v60 = vsel %vm101_vm0, %v85_v46, 0  ;;  %23588 = vmatprep.mubr.f32.mxu0 %v199_v51  ;;  %v30104_v0 = vand.u32 4294901760, %v121_v59  ;;  %v30112_v4 = vsub.f32 %v109_v50, %v30097_v58 }
  0x16   :  { %v280_v48 = vand.u32 4294901760, %v279_v38  ;;  %v287_v54 = vand.u32 4294901760, %v286_v44  ;;  %23594 = vmatprep.mubr.f32.mxu1 %v239_v52  ;;  %v249_v62 = vand.u32 4294901760, %v248_v53  ;;  %v30106_v1 = vand.u32 4294901760, %v112_v60 }
  0x17   :  { %27097 = vmatpush3.bf16.msra.mxu0 %v30022_v20  ;;  %29151 = vmatpush3.bf16.msra.mxu1 %v30022_v20  ;;  %v124_v7 = vsel %vm101_vm0, %v89_v56, 0  ;;  %v30118_v8 = vsub.f32 %v29982_v2, %v133_v6  ;;  %v30123_v10 = vsub.f32 %v29987_v5, %v136_v9  ;;  %v30126_v11 = vsub.f32 %v121_v59, %v30104_v0 }
  0x18   :  { %27138 = vmatprep.subr.bf16.mxu1 %v35173_v55  ;;  %v27098_v63 = vpack.c.bf16 %v287_v54, %v280_v48  ;;  %v30129_v12 = vsub.f32 %v112_v60, %v30106_v1  ;;  %v30131_v13 = vand.u32 4294901760, %v124_v7  ;;  %v933_v17 = vand.u32 4294901760, %v914_v61 }
  0x19   :  { %v217_v2 = vand.u32 4294901760, %v30112_v4  ;;  %v292_v6 = vand.u32 4294901760, %v30118_v8  ;;  %v299_v5 = vand.u32 4294901760, %v30123_v10  ;;  %v936_v9 = vand.u32 4294901760, %v915_v3 }
  0x1a   :  { %23589 = vmatmul.mubr.f32.vlgmr.msra.gmra.mrb[0].mxu0 %v209_v57  ;;  %23595 = vmatmul.mubr.f32.vlgmr.msra.gmra.mrb[0].mxu1 %v249_v62  ;;  %v257_v18 = vand.u32 4294901760, %v30126_v11  ;;  %v227_v19 = vand.u32 4294901760, %v30129_v12  ;;  %v30140_v22 = vsub.f32 %v124_v7, %v30131_v13  ;;  %v30143_v30 = vsub.f32 %v914_v61, %v933_v17 }
  0x1b   :  { %27099 = vmatprep.subr.bf16.mxu0 %v27098_v63  ;;  %27140 = vmatpush3.bf16.msra.mxu1 %v30062_v39  ;;  %v218_v31 = vsub.f32 %v30112_v4, %v217_v2  ;;  %v293_v36 = vsub.f32 %v30118_v8, %v292_v6  ;;  %v300_v38 = vsub.f32 %v30123_v10, %v299_v5  ;;  %v1008_v51 = vand.u32 4294901760, %v30064_v40 }
  0x1c   :  { %27101 = vmatpush3.bf16.msra.mxu0 %v27098_v63  ;;  %27141 = vmatprep.subr.bf16.mxu1 %v35173_v55  ;;  %v30154_v41 = vpack.c.bf16 %v936_v9, %v933_v17  ;;  %v258_v42 = vsub.f32 %v30126_v11, %v257_v18  ;;  %v228_v44 = vsub.f32 %v30129_v12, %v227_v19  ;;  %v267_v45 = vand.u32 4294901760, %v30140_v22 }
  0x1d   :  { %v30163_v46 = vsub.f32 %v915_v3, %v936_v9  ;;  %v219_v47 = vand.u32 4294901760, %v218_v31  ;;  %v294_v48 = vand.u32 4294901760, %v293_v36  ;;  %v301_v50 = vand.u32 4294901760, %v300_v38 }
  0x1e   :  { %v259_v52 = vand.u32 4294901760, %v258_v42  ;;  %v229_v53 = vand.u32 4294901760, %v228_v44  ;;  %v268_v54 = vsub.f32 %v30140_v22, %v267_v45  ;;  %v1015_v56 = vand.u32 4294901760, %v30087_v49 }
  0x1f   :  { %27143 = vmatpush3.bf16.msra.mxu1 %v30154_v41  ;;  %23591 = vmatprep.mubr.f32.mxu0 %v219_v47  ;;  %v27102_v57 = vpack.c.bf16 %v301_v50, %v294_v48  ;;  %v1009_v59 = vsub.f32 %v30064_v40, %v1008_v51  ;;  %v1022_v60 = vand.u32 4294901760, %v30143_v30  ;;  %v1029_v61 = vand.u32 4294901760, %v30163_v46 }
  0x20   :  { %27144 = vmatprep.subr.bf16.mxu1 %v35173_v55  ;;  %23597 = vmatprep.mubr.f32.mxu1 %v259_v52  ;;  %v269_v62 = vand.u32 4294901760, %v268_v54  ;;  %v1016_v63 = vsub.f32 %v30087_v49, %v1015_v56  ;;  %v27106_v3 = vpack.c.bf16 %v30039_v27, %v30027_v23  ;;  %v35175_v36 = vmov 0.0  }
  0x21   :  { %23592 = vmatmul.mubr.f32.gmra.mrb[2].mxu0 %v229_v53  ;;  %27103 = vmatprep.subr.bf16.mxu0 %v27102_v57  ;;  %v1010_v7 = vand.u32 4294901760, %v1009_v59  ;;  %v1023_v17 = vsub.f32 %v30143_v30, %v1022_v60  ;;  %v1030_v9 = vsub.f32 %v30163_v46, %v1029_v61  ;;  %v27110_v47 = vpack.c.bf16 %v30123_v10, %v30118_v8 }
  0x22   :  { %23608 = vmatprep.mubr.f32.mxu0 %v30007_v15  ;;  %23598 = vmatmul.mubr.f32.gmra.mrb[2].mxu1 %v269_v62  ;;  %v1017_v31 = vand.u32 4294901760, %v1016_v63  ;;  %v30209_v50 = vpack.c.bf16 %v30087_v49, %v30064_v40  ;;  %v30219_v52 = vpack.c.bf16 %v30163_v46, %v30143_v30  ;;  %v27122_v53 = vpack.c.bf16 %v285_v35, %v278_v29 }
  0x23   :  { %27105 = vmatpush3.bf16.msra.mxu0 %v27102_v57  ;;  %23708 = vmatprep.mubr.msk.f32.mxu1 %vm29826_vm1, %v35175_v36  ;;  %v1024_v38 = vand.u32 4294901760, %v1023_v17  ;;  %v1031_v42 = vand.u32 4294901760, %v1030_v9  ;;  %v30248_v54 = vpack.c.bf16 %v1015_v56, %v1008_v51  ;;  %v30260_v23 = vpack.c.bf16 %v1029_v61, %v1022_v60  ;;  %v1437_v51 = vld [vmem:[%s35281_s30] sm:$0xff] }
  0x24   :  { %27107 = vmatprep.subr.bf16.mxu0 %v27106_v3  ;;  %v30191_v44 = vpack.c.bf16 %v1017_v31, %v1010_v7  ;;  %v27126_v27 = vpack.c.bf16 %v299_v5, %v292_v6  ;;  %v1439_v57 = vsub.f32 1.0, %v1437_v51 }
  0x25   :  { %v30199_v48 = vpack.c.bf16 %v1031_v42, %v1024_v38 }
  0x26   :  { %23609 = vmatmul.mubr.f32.vlgmr.msra.gmra.mrb[0].mxu0 %v30024_v21  ;;  %23709 = vmatmul.mubr.f32.vlgmr.msra.gmra.mrb[4].mxu1 %v35175_v36  ;;  %v1440_v62 = vmul.f32 0.0, %v1439_v57 }
  0x27   :  { %23611 = vmatprep.mubr.f32.mxu0 %v30097_v58  ;;  %27146 = vmatpush3.bf16.msra.mxu1 %v30191_v44 }
  0x28   :  { %23719 = vmatprep.mubr.msk.f32.mxu1 %vm29826_vm1, %v35175_v36  ;;  %27147 = vmatprep.subr.bf16.mxu1 %v35173_v55 }
  0x29   :  { %27109 = vmatpush3.bf16.msra.mxu0 %v27106_v3 }
  0x2a   :  { %23612 = vmatmul.mubr.f32.gmra.mrb[2].mxu0 %v30106_v1  ;;  %27111 = vmatprep.subr.bf16.mxu0 %v27110_v47 }
  0x2b   :  { %23614 = vmatprep.mubr.f32.mxu0 %v30009_v16  ;;  %27149 = vmatpush3.bf16.msra.mxu1 %v30199_v48 }
  0x2c   :  { %27150 = vmatprep.subr.bf16.mxu1 %v35173_v55 }
  0x2d   :  { %27113 = vmatpush3.bf16.msra.mxu0 %v27110_v47 }
  0x2e   :  { %23615 = vmatmul.mubr.f32.gmra.mrb[4].mxu0 %v30037_v26  ;;  %27115 = vmatprep.subr.bf16.mxu0 %v30005_v14 }
  0x2f   :  { %23720 = vmatmul.mubr.f32.vlgmr.msra.gmra.mrb[4].mxu1 %v35175_v36  ;;  %23617 = vmatprep.mubr.f32.mxu0 %v30104_v0 }
  0x30   :  { %27152 = vmatpush3.bf16.msra.mxu1 %v30209_v50  ;;  %23730 = vmatprep.mubr.msk.f32.mxu1 %vm29826_vm1, %v35175_v36 }
  0x31   :  { %27153 = vmatprep.subr.bf16.mxu1 %v35173_v55 }
  0x32   :  { %23618 = vmatmul.mubr.f32.gmra.mrb[6].mxu0 %v30131_v13 }
  0x33   :  { %23628 = vmatprep.mubr.f32.mxu0 %v30032_v24 }
  0x34   :  { %27155 = vmatpush3.bf16.msra.mxu1 %v30219_v52 }
  0x35   :  { %27156 = vmatprep.subr.bf16.mxu1 %v35173_v55 }
  0x36   :  { %23629 = vmatmul.mubr.f32.vlgmr.msra.gmra.mrb[0].mxu0 %v30044_v28 }
  0x37   :  { %23731 = vmatmul.mubr.f32.vlgmr.msra.gmra.mrb[4].mxu1 %v35175_v36  ;;  %23631 = vmatprep.mubr.f32.mxu0 %v30112_v4 }
  0x38   :  { %27158 = vmatpush3.bf16.msra.mxu1 %v30062_v39  ;;  %23741 = vmatprep.mubr.msk.f32.mxu1 %vm29826_vm1, %v35175_v36 }
  0x39   :  { %27159 = vmatprep.subr.bf16.mxu1 %v35173_v55  ;;  %27117 = vmatpush3.bf16.msra.mxu0 %v30005_v14 }
  0x3a   :  { %23632 = vmatmul.mubr.f32.gmra.mrb[2].mxu0 %v30129_v12  ;;  %27119 = vmatprep.subr.bf16.mxu0 %v30022_v20 }
  0x3b   :  { %23634 = vmatprep.mubr.f32.mxu0 %v30035_v25 }
  0x3c   :  { %27161 = vmatpush3.bf16.msra.mxu1 %v30154_v41 }
  0x3d   :  { %27162 = vmatprep.subr.bf16.mxu1 %v35173_v55  ;;  %27121 = vmatpush3.bf16.msra.mxu0 %v30022_v20 }
  0x3e   :  { %23635 = vmatmul.mubr.f32.gmra.mrb[4].mxu0 %v30052_v34  ;;  %27123 = vmatprep.subr.bf16.mxu0 %v27122_v53 }
  0x3f   :  { %23742 = vmatmul.mubr.f32.vlgmr.msra.gmra.mrb[4].mxu1 %v35175_v36  ;;  %23637 = vmatprep.mubr.f32.mxu0 %v30126_v11 }
  0x40   :  { %27164 = vmatpush3.bf16.msra.mxu1 %v30248_v54  ;;  %23752 = vmatprep.mubr.msk.f32.mxu1 %vm29826_vm1, %v35175_v36 }
  0x41   :  { %27165 = vmatprep.subr.bf16.mxu1 %v35173_v55 }
  0x42   :  { %23638 = vmatmul.mubr.f32.gmra.mrb[6].mxu0 %v30140_v22 }
  0x43   :  { %23648 = vmatprep.mubr.f32.mxu0 %v197_v32  ;;  %v30341_v32 = vld [vmem:[%s35280_s1] ss:$0 sm:$0xff] }
  0x44   :  { %27167 = vmatpush3.bf16.msra.mxu1 %v30260_v23 }
  0x45   :  { %27168 = vmatprep.subr.bf16.mxu1 %v35173_v55 }
  0x46   :  { %23649 = vmatmul.mubr.f32.vlgmr.msra.gmra.mrb[0].mxu0 %v207_v37 }
  0x47   :  { %23753 = vmatmul.mubr.f32.vlgmr.msra.gmra.mrb[4].mxu1 %v35175_v36  ;;  %23651 = vmatprep.mubr.f32.mxu0 %v217_v2 }
  0x48   :  { %27170 = vmatpush3.bf16.msra.mxu1 %v30062_v39  ;;  %23763 = vmatprep.mubr.msk.f32.mxu1 %vm29826_vm1, %v35175_v36 }
  0x49   :  { %27171 = vmatprep.subr.bf16.mxu1 %v35173_v55  ;;  %27125 = vmatpush3.bf16.msra.mxu0 %v27122_v53 }
  0x4a   :  { %23652 = vmatmul.mubr.f32.gmra.mrb[2].mxu0 %v227_v19  ;;  %27127 = vmatprep.subr.bf16.mxu0 %v27126_v27 }
  0x4b   :  { %23654 = vmatprep.mubr.f32.mxu0 %v237_v33 }
  0x4c   :  { %27173 = vmatpush3.bf16.msra.mxu1 %v30154_v41 }
  0x4d   :  { %27129 = vmatpush3.bf16.msra.mxu0 %v27126_v27  ;;  %27174 = vmatprep.subr.bf16.mxu1 %v35173_v55 }
  0x4e   :  { %23655 = vmatmul.mubr.f32.gmra.mrb[4].mxu0 %v247_v43  ;;  %27131 = vmatprep.subr.bf16.mxu0 %v30005_v14 }
  0x4f   :  { %23764 = vmatmul.mubr.f32.vlgmr.msra.gmra.mrb[4].mxu1 %v35175_v36  ;;  %23657 = vmatprep.mubr.f32.mxu0 %v257_v18 }
  0x50   :  { %27176 = vmatpush3.bf16.msra.mxu1 %v30062_v39  ;;  %23774 = vmatprep.mubr.msk.f32.mxu1 %vm29826_vm1, %v35175_v36 }
  0x51   :  { %27177 = vmatprep.subr.bf16.mxu1 %v35173_v55 }
  0x52   :  { %23658 = vmatmul.mubr.f32.gmra.mrb[6].mxu0 %v267_v45 }
  0x53   :  { %23668 = vmatprep.mubr.f32.mxu0 %v30007_v15 }
  0x54   :  { %27179 = vmatpush3.bf16.msra.mxu1 %v30154_v41 }
  0x55   :  { %27180 = vmatprep.subr.bf16.mxu1 %v35173_v55 }
  0x56   :  { %23669 = vmatmul.mubr.f32.vlgmr.msra.gmra.mrb[0].mxu0 %v30024_v21 }
  0x57   :  { %23671 = vmatprep.mubr.f32.mxu0 %v30097_v58  ;;  %27133 = vmatpush3.bf16.msra.mxu0 %v30005_v14 }
  0x58   :  { %27135 = vmatprep.subr.bf16.mxu0 %v30022_v20 }
  0x5a   :  { %23672 = vmatmul.mubr.f32.gmra.mrb[2].mxu0 %v30106_v1 }
  0x5b   :  { %23674 = vmatprep.mubr.f32.mxu0 %v30009_v16  ;;  %27137 = vmatpush3.bf16.msra.mxu0 %v30022_v20 }
  0x5c   :  { %27210 = vmatprep.subr.bf16.mxu0 %v35173_v55 }
  0x5e   :  { %23675 = vmatmul.mubr.f32.gmra.mrb[4].mxu0 %v30037_v26 }
  0x5f   :  { %23677 = vmatprep.mubr.f32.mxu0 %v30104_v0 }
  0x62   :  { %23678 = vmatmul.mubr.f32.gmra.mrb[6].mxu0 %v30131_v13 }
  0x63   :  { %23688 = vmatprep.mubr.f32.mxu0 %v30007_v15 }
  0x66   :  { %23689 = vmatmul.mubr.f32.vlgmr.msra.gmra.mrb[0].mxu0 %v30024_v21 }
  0x67   :  { %23691 = vmatprep.mubr.f32.mxu0 %v30097_v58  ;;  %27212 = vmatpush3.bf16.msra.mxu0 %v30062_v39 }
  0x68   :  { %27213 = vmatprep.subr.bf16.mxu0 %v35173_v55 }
  0x6a   :  { %23692 = vmatmul.mubr.f32.gmra.mrb[2].mxu0 %v30106_v1 }
  0x6b   :  { %23694 = vmatprep.mubr.f32.mxu0 %v30009_v16  ;;  %27215 = vmatpush3.bf16.msra.mxu0 %v30154_v41  ;;  %v30332_v16 = vld [vmem:[%s35279_s2] ss:$0 sm:$0xff] }
  0x6c   :  { %27216 = vmatprep.subr.bf16.mxu0 %v35173_v55 }
  0x6e   :  { %23695 = vmatmul.mubr.f32.gmra.mrb[4].mxu0 %v30037_v26 }
  0x6f   :  { %23697 = vmatprep.mubr.f32.mxu0 %v30104_v0 }
  0x72   :  { %23698 = vmatmul.mubr.f32.gmra.mrb[6].mxu0 %v30131_v13 }
  0x73   :  { %23840 = vmatprep.mubr.msk.f32.mxu0 %vm29826_vm1, %v35175_v36 }
  0xed   :  { %v23596_v14 = vpop.f32.mrb[0].mxu1 }
  0xee   :  { %v241_v15 = vpop.f32.mrb[1].mxu1  ;;  %v252_v35 = vadd.f32 %v23596_v14, %v30341_v32 }
  0xef   :  { %v242_v37 = vadd.f32 %v30341_v32, %v241_v15 }
  0xf5   :  { %v23599_v20 = vpop.f32.mrb[2].mxu1 }
  0xf6   :  { %v261_v21 = vpop.f32.mrb[3].mxu1  ;;  %v272_v0 = vadd.f32 %v23599_v20, %v30341_v32 }
  0xf7   :  { %v262_v1 = vadd.f32 %v30341_v32, %v261_v21 }
 0x122   :  { %v1407_v24 = vpop.f32.mrb[4].mxu1 }
 0x123   :  { %v29164_v25 = vadd.f32 %v30332_v16, %v1407_v24  ;;  %v23765_v26 = vpop.f32.mrb[5].mxu1 }
 0x125   :  { %1419 = vrot.lane.b32.xlu0 %v29164_v25, %s29828_s27 }
 0x139   :  { %v30336_v28 = vpop.f32.mrb[0].mxu0 }
 0x13a   :  { %v866_v29 = vpop.f32.mrb[1].mxu0  ;;  %v29152_v15 = vadd.f32 %v30336_v28, %v30341_v32  ;;  %v1971_v28 = vld [vmem:[%s35281_s30 + $0x8] sm:$0xff] }
 0x13b   :  { %v29153_v12 = vadd.f32 %v30341_v32, %v866_v29 }
 0x13d   :  { %v30343_v33 = vpop.f32.mrb[2].mxu0  ;;  %v1411_v13 = vadd.f32 %v29164_v25, %v29153_v12 }
 0x13e   :  { %v30345_v34 = vpop.f32.mrb[3].mxu0 }
 0x13f   :  { %v21833_v2 = vmul.f32 -1.442695, %v1411_v13 }
 0x141   :  { %v23696_v40 = vpop.f32.mrb[4].mxu0  ;;  %29690 = vpow2.f32 %v21833_v2 }
 0x142   :  { %v30349_v43 = vadd.f32 %v23696_v40, %v252_v35  ;;  %v890_v49 = vpop.f32.mrb[5].mxu0 }
 0x143   :  { %v30351_v58 = vadd.f32 %v890_v49, %v242_v37 }
 0x145   :  { %v23699_v4 = vpop.f32.mrb[6].mxu0 }
 0x146   :  { %v30355_v8 = vadd.f32 %v23699_v4, %v272_v0  ;;  %v902_v10 = vpop.f32.mrb[7].mxu0 }
 0x147   :  { %v30357_v11 = vadd.f32 %v902_v10, %v262_v1  ;;  %v1973_v10 = vsub.f32 1.0, %v1971_v28 }
 0x14b   :  { %v29691_v6 = vpop.eup %29690 }
 0x14c   :  { %v1415_v5 = vadd.f32 1.0, %v29691_v6 }
 0x14e   :  { %29692 = vrcp.f32 %v1415_v5 }
 0x158   :  { %v29693_v18 = vpop.eup %29692 }
 0x159   :  { %v1429_v56 = vsub.f32 1.0, %v29693_v18 }
 0x15b   :  { %v1430_v60 = vmul.f32 0.0, %v1429_v56 }
 0x197   :  { %v1420_v19 = vpop.permute.xlu0 %1419 }
 0x198   :  { %v1422_v22 = vmul.f32 %v29693_v18, %v1420_v19 }
 0x19a   :  { %1424 = vrot.lane.b32.xlu0 %v1422_v22, %s29829_s5 }
 0x20c   :  { %v1425_v30 = vpop.permute.xlu0 %1424 }
 0x20d   :  { %v1427_v45 = vadd.f32 %v29153_v12, %v1425_v30 }
 0x20f   :  { %29694 = vtanh.f32 %v1427_v45 }
 0x219   :  { %v29695_v46 = vpop.eup %29694 }
 0x21a   :  { %1432 = vrot.lane.b32.xlu1 %v29695_v46, %s29830_s29 }
 0x28c   :  { %v1433_v59 = vpop.permute.xlu1 %1432 }
 0x28d   :  { %v1435_v61 = vmul.f32 %v29693_v18, %v1433_v59  ;;  %v29155_v59 = vadd.f32 %v30341_v32, %v30345_v34  ;;  %v2503_v34 = vld [vmem:[%s35281_s30 + $0x10] sm:$0xff] }
 0x28f   :  { %v1436_v63 = vadd.f32 %v1435_v61, %v1430_v60 }
 0x291   :  { %v1438_v3 = vmul.f32 %v1437_v51, %v1436_v63 }
 0x293   :  { %v30365_v7 = vadd.f32 %v1440_v62, %v1438_v3 }
 0x295   :  { %v1458_v17 = vsel %vm101_vm0, %v30365_v7, 0  ;;  %1443 = vst.msk [vmem:[#allocation2] sm:$0xff] %vm1442_vm2, %v30365_v7  ;;  %v1974_v2 = vmul.f32 %v1973_v10, %v30365_v7 }
 0x296   :  { %1445 = vst.msk [vmem:[#allocation2 + $0x38] sm:$0xff] %vm1444_vm3, %v30365_v7  ;;  %v1529_v9 = vand.u32 4294901760, %v1458_v17 }
 0x298   :  { %v1530_v31 = vsub.f32 %v1458_v17, %v1529_v9 }
 0x29a   :  { %v1531_v38 = vand.u32 4294901760, %v1530_v31 }
 0x29c   :  { %v1532_v42 = vsub.f32 %v1530_v31, %v1531_v38 }
 0x29e   :  { %v1533_v47 = vand.u32 4294901760, %v1532_v42 }
 0x2a0   :  { %23775 = vmatmul.mubr.f32.vlgmr.msra.gmra.mrb[6].mxu1 %v1533_v47 }
 0x2a1   :  { %27182 = vmatpush3.bf16.msra.mxu1 %v30191_v44  ;;  %23785 = vmatprep.mubr.msk.f32.mxu1 %vm29826_vm1, %v35175_v36 }
 0x2a2   :  { %27183 = vmatprep.subr.bf16.mxu1 %v35173_v55 }
 0x2a5   :  { %27185 = vmatpush3.bf16.msra.mxu1 %v30199_v48 }
 0x2a6   :  { %27186 = vmatprep.subr.bf16.mxu1 %v35173_v55 }
 0x2a8   :  { %23786 = vmatmul.mubr.f32.vlgmr.msra.gmra.mrb[6].mxu1 %v1529_v9 }
 0x2a9   :  { %27188 = vmatpush3.bf16.msra.mxu1 %v30209_v50  ;;  %23796 = vmatprep.mubr.msk.f32.mxu1 %vm29826_vm1, %v35175_v36 }
 0x2aa   :  { %27189 = vmatprep.subr.bf16.mxu1 %v35173_v55 }
 0x2ad   :  { %27191 = vmatpush3.bf16.msra.mxu1 %v30219_v52 }
 0x2ae   :  { %27192 = vmatprep.subr.bf16.mxu1 %v35173_v55 }
 0x2b0   :  { %23797 = vmatmul.mubr.f32.vlgmr.msra.gmra.mrb[6].mxu1 %v1530_v31 }
 0x2b1   :  { %27194 = vmatpush3.bf16.msra.mxu1 %v30062_v39  ;;  %23807 = vmatprep.mubr.msk.f32.mxu1 %vm29826_vm1, %v35175_v36 }
 0x2b2   :  { %27195 = vmatprep.subr.bf16.mxu1 %v35173_v55 }
 0x2b5   :  { %27197 = vmatpush3.bf16.msra.mxu1 %v30154_v41 }
 0x2b6   :  { %27198 = vmatprep.subr.bf16.mxu1 %v35173_v55 }
 0x2b8   :  { %23808 = vmatmul.mubr.f32.vlgmr.msra.gmra.mrb[6].mxu1 %v1531_v38 }
 0x2b9   :  { %27200 = vmatpush3.bf16.msra.mxu1 %v30248_v54  ;;  %23818 = vmatprep.mubr.msk.f32.mxu1 %vm29826_vm1, %v35175_v36 }
 0x2ba   :  { %27201 = vmatprep.subr.bf16.mxu1 %v35173_v55 }
 0x2bd   :  { %27203 = vmatpush3.bf16.msra.mxu1 %v30260_v23 }
 0x2be   :  { %27204 = vmatprep.subr.bf16.mxu1 %v35173_v55 }
 0x2c0   :  { %23819 = vmatmul.mubr.f32.vlgmr.msra.gmra.mrb[6].mxu1 %v1529_v9 }
 0x2c1   :  { %27206 = vmatpush3.bf16.msra.mxu1 %v30062_v39  ;;  %23829 = vmatprep.mubr.msk.f32.mxu1 %vm29826_vm1, %v35175_v36 }
 0x2c2   :  { %27207 = vmatprep.subr.bf16.mxu1 %v35173_v55 }
 0x2c5   :  { %27209 = vmatpush3.bf16.msra.mxu1 %v30154_v41 }
 0x2c6   :  { %27246 = vmatprep.subr.bf16.mxu1 %v35173_v55 }
 0x2c8   :  { %23830 = vmatmul.mubr.f32.vlgmr.msra.gmra.mrb[6].mxu1 %v1529_v9 }
 0x2c9   :  { %27248 = vmatpush3.bf16.msra.mxu1 %v30062_v39  ;;  %23906 = vmatprep.mubr.msk.f32.mxu1 %vm29826_vm1, %v35175_v36 }
 0x2ca   :  { %27249 = vmatprep.subr.bf16.mxu1 %v35173_v55 }
 0x2cd   :  { %27251 = vmatpush3.bf16.msra.mxu1 %v30154_v41 }
 0x2ce   :  { %27252 = vmatprep.subr.bf16.mxu1 %v35173_v55 }
 0x39b   :  { %v1941_v53 = vpop.f32.mrb[6].mxu1 }
 0x39c   :  { %v29165_v27 = vadd.f32 %v30332_v16, %v1941_v53  ;;  %v23831_v14 = vpop.f32.mrb[7].mxu1 }
 0x39e   :  { %1953 = vrot.lane.b32.xlu1 %v29165_v27, %s29828_s27  ;;  %v1945_v20 = vadd.f32 %v29165_v27, %v29152_v15  ;;  %v2505_v27 = vsub.f32 1.0, %v2503_v34 }
 0x3a0   :  { %v21835_v21 = vmul.f32 -1.442695, %v1945_v20 }
 0x3a2   :  { %29696 = vpow2.f32 %v21835_v21 }
 0x3ac   :  { %v29697_v24 = vpop.eup %29696 }
 0x3ad   :  { %v1949_v25 = vadd.f32 1.0, %v29697_v24 }
 0x3af   :  { %29698 = vrcp.f32 %v1949_v25 }
 0x3b9   :  { %v29699_v26 = vpop.eup %29698 }
 0x3ba   :  { %v1963_v0 = vsub.f32 1.0, %v29699_v26 }
 0x3bc   :  { %v1964_v4 = vmul.f32 %v1963_v0, %v30365_v7 }
 0x410   :  { %v1954_v29 = vpop.permute.xlu1 %1953 }
 0x411   :  { %v1956_v35 = vmul.f32 %v29699_v26, %v1954_v29 }
 0x413   :  { %1958 = vrot.lane.b32.xlu0 %v1956_v35, %s29829_s5 }
 0x485   :  { %v1959_v37 = vpop.permute.xlu0 %1958 }
 0x486   :  { %v1961_v40 = vadd.f32 %v29152_v15, %v1959_v37 }
 0x488   :  { %29700 = vtanh.f32 %v1961_v40 }
 0x492   :  { %v29701_v49 = vpop.eup %29700 }
 0x493   :  { %1966 = vrot.lane.b32.xlu1 %v29701_v49, %s29830_s29 }
 0x505   :  { %v1967_v1 = vpop.permute.xlu1 %1966 }
 0x506   :  { %v1969_v12 = vmul.f32 %v29699_v26, %v1967_v1 }
 0x508   :  { %v1970_v13 = vadd.f32 %v1969_v12, %v1964_v4 }
 0x50a   :  { %v1972_v6 = vmul.f32 %v1971_v28, %v1970_v13 }
 0x50c   :  { %v30420_v5 = vadd.f32 %v1974_v2, %v1972_v6  ;;  %v3042_v6 = vld [vmem:[%s35278_s8] sm:$0xff] }
 0x50e   :  { %1976 = vst.msk [vmem:[#allocation2 + $0x8] sm:$0xff] %vm1442_vm2, %v30420_v5  ;;  %v1990_v18 = vsel %vm101_vm0, %v30420_v5, 0  ;;  %v2506_v20 = vmul.f32 %v2505_v27, %v30420_v5 }
 0x50f   :  { %1977 = vst.msk [vmem:[#allocation2 + $0x30] sm:$0xff] %vm1444_vm3, %v30420_v5  ;;  %v2061_v19 = vand.u32 4294901760, %v1990_v18 }
 0x511   :  { %v2062_v22 = vsub.f32 %v1990_v18, %v2061_v19 }
 0x513   :  { %v2063_v30 = vand.u32 4294901760, %v2062_v22 }
 0x515   :  { %v2064_v45 = vsub.f32 %v2062_v22, %v2063_v30 }
 0x517   :  { %v2065_v46 = vand.u32 4294901760, %v2064_v45 }
 0x519   :  { %23841 = vmatmul.mubr.f32.vlgmr.msra.gmra.mrb[8].mxu0 %v2065_v46 }
 0x51a   :  { %27218 = vmatpush3.bf16.msra.mxu0 %v30191_v44  ;;  %23851 = vmatprep.mubr.msk.f32.mxu0 %vm29826_vm1, %v35175_v36 }
 0x51b   :  { %27219 = vmatprep.subr.bf16.mxu0 %v35173_v55 }
 0x51e   :  { %27221 = vmatpush3.bf16.msra.mxu0 %v30199_v48 }
 0x51f   :  { %27222 = vmatprep.subr.bf16.mxu0 %v35173_v55 }
 0x521   :  { %23852 = vmatmul.mubr.f32.vlgmr.msra.gmra.mrb[8].mxu0 %v2061_v19 }
 0x522   :  { %27224 = vmatpush3.bf16.msra.mxu0 %v30209_v50  ;;  %23862 = vmatprep.mubr.msk.f32.mxu0 %vm29826_vm1, %v35175_v36 }
 0x523   :  { %27225 = vmatprep.subr.bf16.mxu0 %v35173_v55 }
 0x526   :  { %27227 = vmatpush3.bf16.msra.mxu0 %v30219_v52 }
 0x527   :  { %27228 = vmatprep.subr.bf16.mxu0 %v35173_v55 }
 0x529   :  { %23863 = vmatmul.mubr.f32.vlgmr.msra.gmra.mrb[8].mxu0 %v2062_v22 }
 0x52a   :  { %27230 = vmatpush3.bf16.msra.mxu0 %v30062_v39  ;;  %23873 = vmatprep.mubr.msk.f32.mxu0 %vm29826_vm1, %v35175_v36 }
 0x52b   :  { %27231 = vmatprep.subr.bf16.mxu0 %v35173_v55 }
 0x52e   :  { %27233 = vmatpush3.bf16.msra.mxu0 %v30154_v41 }
 0x52f   :  { %27234 = vmatprep.subr.bf16.mxu0 %v35173_v55 }
 0x531   :  { %23874 = vmatmul.mubr.f32.vlgmr.msra.gmra.mrb[8].mxu0 %v2063_v30 }
 0x532   :  { %27236 = vmatpush3.bf16.msra.mxu0 %v30248_v54  ;;  %23884 = vmatprep.mubr.msk.f32.mxu0 %vm29826_vm1, %v35175_v36 }
 0x533   :  { %27237 = vmatprep.subr.bf16.mxu0 %v35173_v55 }
 0x536   :  { %27239 = vmatpush3.bf16.msra.mxu0 %v30260_v23 }
 0x537   :  { %27240 = vmatprep.subr.bf16.mxu0 %v35173_v55 }
 0x539   :  { %23885 = vmatmul.mubr.f32.vlgmr.msra.gmra.mrb[8].mxu0 %v2061_v19 }
 0x53a   :  { %27242 = vmatpush3.bf16.msra.mxu0 %v30062_v39  ;;  %23895 = vmatprep.mubr.msk.f32.mxu0 %vm29826_vm1, %v35175_v36 }
 0x53b   :  { %27243 = vmatprep.subr.bf16.mxu0 %v35173_v55 }
 0x53e   :  { %27245 = vmatpush3.bf16.msra.mxu0 %v30154_v41 }
 0x53f   :  { %27282 = vmatprep.subr.bf16.mxu0 %v35173_v55 }
 0x541   :  { %23896 = vmatmul.mubr.f32.vlgmr.msra.gmra.mrb[8].mxu0 %v2061_v19 }
 0x542   :  { %23972 = vmatprep.mubr.msk.f32.mxu0 %vm29826_vm1, %v35175_v36 }
 0x614   :  { %v2473_v51 = vpop.f32.mrb[8].mxu0 }
 0x615   :  { %v29166_v56 = vadd.f32 %v30332_v16, %v2473_v51  ;;  %v23897_v57 = vpop.f32.mrb[9].mxu0 }
 0x617   :  { %2485 = vrot.lane.b32.xlu0 %v29166_v56, %s29828_s27  ;;  %v2477_v60 = vadd.f32 %v29166_v56, %v29155_v59 }
 0x619   :  { %v21837_v61 = vmul.f32 -1.442695, %v2477_v60 }
 0x61b   :  { %29702 = vpow2.f32 %v21837_v61 }
 0x625   :  { %v29703_v62 = vpop.eup %29702 }
 0x626   :  { %v2481_v63 = vadd.f32 1.0, %v29703_v62 }
 0x628   :  { %29704 = vrcp.f32 %v2481_v63 }
 0x632   :  { %v29705_v3 = vpop.eup %29704 }
 0x633   :  { %v2495_v42 = vsub.f32 1.0, %v29705_v3 }
 0x635   :  { %v2496_v53 = vmul.f32 %v2495_v42, %v30420_v5 }
 0x689   :  { %v2486_v7 = vpop.permute.xlu0 %2485 }
 0x68a   :  { %v2488_v17 = vmul.f32 %v29705_v3, %v2486_v7 }
 0x68c   :  { %2490 = vrot.lane.b32.xlu1 %v2488_v17, %s29829_s5 }
 0x6fe   :  { %v2491_v9 = vpop.permute.xlu1 %2490 }
 0x6ff   :  { %v2493_v31 = vadd.f32 %v29155_v59, %v2491_v9 }
 0x701   :  { %29706 = vtanh.f32 %v2493_v31 }
 0x70b   :  { %v29707_v38 = vpop.eup %29706 }
 0x70c   :  { %2498 = vrot.lane.b32.xlu0 %v29707_v38, %s29830_s29 }
 0x77e   :  { %v2499_v47 = vpop.permute.xlu0 %2498 }
 0x77f   :  { %v2501_v14 = vmul.f32 %v29705_v3, %v2499_v47  ;;  %v3035_v3 = vld [vmem:[%s35281_s30 + $0x18] sm:$0xff] }
 0x780   :  { %v3037_v9 = vsub.f32 1.0, %v3035_v3 }
 0x781   :  { %v2502_v15 = vadd.f32 %v2501_v14, %v2496_v53 }
 0x783   :  { %v2504_v21 = vmul.f32 %v2503_v34, %v2502_v15 }
 0x785   :  { %v30471_v24 = vadd.f32 %v2506_v20, %v2504_v21 }
 0x787   :  { %2508 = vst.msk [vmem:[#allocation2 + $0x10] sm:$0xff] %vm1442_vm2, %v30471_v24  ;;  %v2522_v25 = vsel %vm101_vm0, %v30471_v24, 0  ;;  %v3038_v42 = vmul.f32 %v3037_v9, %v30471_v24 }
 0x788   :  { %2509 = vst.msk [vmem:[#allocation2 + $0x28] sm:$0xff] %vm1444_vm3, %v30471_v24  ;;  %v2593_v26 = vand.u32 4294901760, %v2522_v25 }
 0x78a   :  { %v2594_v29 = vsub.f32 %v2522_v25, %v2593_v26 }
 0x78c   :  { %v2595_v35 = vand.u32 4294901760, %v2594_v29 }
 0x78e   :  { %v2596_v37 = vsub.f32 %v2594_v29, %v2595_v35 }
 0x790   :  { %v2597_v40 = vand.u32 4294901760, %v2596_v37 }
 0x792   :  { %23907 = vmatmul.mubr.f32.vlgmr.msra.gmra.mrb[8].mxu1 %v2597_v40 }
 0x793   :  { %27254 = vmatpush3.bf16.msra.mxu1 %v30191_v44  ;;  %23917 = vmatprep.mubr.msk.f32.mxu1 %vm29826_vm1, %v35175_v36 }
 0x794   :  { %27255 = vmatprep.subr.bf16.mxu1 %v35173_v55 }
 0x797   :  { %27257 = vmatpush3.bf16.msra.mxu1 %v30199_v48 }
 0x798   :  { %27258 = vmatprep.subr.bf16.mxu1 %v35173_v55 }
 0x79a   :  { %23918 = vmatmul.mubr.f32.vlgmr.msra.gmra.mrb[8].mxu1 %v2593_v26 }
 0x79b   :  { %27260 = vmatpush3.bf16.msra.mxu1 %v30209_v50  ;;  %23928 = vmatprep.mubr.msk.f32.mxu1 %vm29826_vm1, %v35175_v36 }
 0x79c   :  { %27261 = vmatprep.subr.bf16.mxu1 %v35173_v55 }
 0x79f   :  { %27263 = vmatpush3.bf16.msra.mxu1 %v30219_v52 }
 0x7a0   :  { %27264 = vmatprep.subr.bf16.mxu1 %v35173_v55 }
 0x7a2   :  { %23929 = vmatmul.mubr.f32.vlgmr.msra.gmra.mrb[8].mxu1 %v2594_v29 }
 0x7a3   :  { %27266 = vmatpush3.bf16.msra.mxu1 %v30062_v39  ;;  %23939 = vmatprep.mubr.msk.f32.mxu1 %vm29826_vm1, %v35175_v36 }
 0x7a4   :  { %27267 = vmatprep.subr.bf16.mxu1 %v35173_v55 }
 0x7a7   :  { %27269 = vmatpush3.bf16.msra.mxu1 %v30154_v41 }
 0x7a8   :  { %27270 = vmatprep.subr.bf16.mxu1 %v35173_v55 }
 0x7aa   :  { %23940 = vmatmul.mubr.f32.vlgmr.msra.gmra.mrb[8].mxu1 %v2595_v35 }
 0x7ab   :  { %27272 = vmatpush3.bf16.msra.mxu1 %v30248_v54  ;;  %23950 = vmatprep.mubr.msk.f32.mxu1 %vm29826_vm1, %v35175_v36 }
 0x7ac   :  { %27273 = vmatprep.subr.bf16.mxu1 %v35173_v55 }
 0x7af   :  { %27275 = vmatpush3.bf16.msra.mxu1 %v30260_v23 }
 0x7b0   :  { %27276 = vmatprep.subr.bf16.mxu1 %v35173_v55 }
 0x7b2   :  { %23951 = vmatmul.mubr.f32.vlgmr.msra.gmra.mrb[8].mxu1 %v2593_v26 }
 0x7b3   :  { %27278 = vmatpush3.bf16.msra.mxu1 %v30062_v39  ;;  %23961 = vmatprep.mubr.msk.f32.mxu1 %vm29826_vm1, %v35175_v36  ;;  %v29154_v39 = vadd.f32 %v30343_v33, %v30341_v32  ;;  %v3043_v32 = vld [vmem:[%s35278_s8 + $0x8] sm:$0xff]  ;;  %v3057_v33 = vand.u32 4294901760, %v3042_v6 }
 0x7b4   :  { %27279 = vmatprep.subr.bf16.mxu1 %v35173_v55  ;;  %v3060_v5 = vand.u32 4294901760, %v3043_v32 }
 0x7b5   :  { %v3137_v19 = vsub.f32 %v3042_v6, %v3057_v33 }
 0x7b6   :  { %v30522_v18 = vpack.c.bf16 %v3060_v5, %v3057_v33  ;;  %v3144_v22 = vsub.f32 %v3043_v32, %v3060_v5 }
 0x7b7   :  { %27281 = vmatpush3.bf16.msra.mxu1 %v30154_v41  ;;  %v3138_v45 = vand.u32 4294901760, %v3137_v19 }
 0x7b8   :  { %27318 = vmatprep.subr.bf16.mxu1 %v35173_v55  ;;  %27284 = vmatpush3.bf16.msra.mxu0 %v30522_v18  ;;  %v3145_v46 = vand.u32 4294901760, %v3144_v22  ;;  %v30533_v61 = vpack.c.bf16 %v3144_v22, %v3137_v19 }
 0x7b9   :  { %27285 = vmatprep.subr.bf16.mxu0 %v35173_v55  ;;  %v3139_v51 = vsub.f32 %v3137_v19, %v3138_v45  ;;  %v3567_v19 = vld [vmem:[%s35281_s30 + $0x20] sm:$0xff] }
 0x7ba   :  { %23962 = vmatmul.mubr.f32.vlgmr.msra.gmra.mrb[8].mxu1 %v2593_v26  ;;  %v3146_v56 = vsub.f32 %v3144_v22, %v3145_v46  ;;  %v30535_v62 = vpack.c.bf16 %v3145_v46, %v3138_v45  ;;  %v3569_v45 = vsub.f32 1.0, %v3567_v19 }
 0x7bb   :  { %24038 = vmatprep.mubr.msk.f32.mxu1 %vm29826_vm1, %v35175_v36  ;;  %27320 = vmatpush3.bf16.msra.mxu1 %v30522_v18  ;;  %v3140_v57 = vand.u32 4294901760, %v3139_v51 }
 0x7bc   :  { %27321 = vmatprep.subr.bf16.mxu1 %v35173_v55  ;;  %27287 = vmatpush3.bf16.msra.mxu0 %v30154_v41  ;;  %v3147_v59 = vand.u32 4294901760, %v3146_v56 }
 0x7bd   :  { %27288 = vmatprep.subr.bf16.mxu0 %v35173_v55 }
 0x7be   :  { %v30531_v60 = vpack.c.bf16 %v3147_v59, %v3140_v57 }
 0x88d   :  { %v3005_v44 = vpop.f32.mrb[8].mxu1 }
 0x88e   :  { %v29167_v50 = vadd.f32 %v30332_v16, %v3005_v44  ;;  %v23963_v54 = vpop.f32.mrb[9].mxu1 }
 0x890   :  { %3017 = vrot.lane.b32.xlu1 %v29167_v50, %s29828_s27  ;;  %v3009_v49 = vadd.f32 %v29167_v50, %v29154_v39  ;;  %v3577_v50 = vld [vmem:[%s35278_s8 + $0x18] sm:$0xff] }
 0x892   :  { %v21839_v0 = vmul.f32 -1.442695, %v3009_v49 }
 0x894   :  { %29708 = vpow2.f32 %v21839_v0 }
 0x89e   :  { %v29709_v28 = vpop.eup %29708 }
 0x89f   :  { %v3013_v1 = vadd.f32 1.0, %v29709_v28 }
 0x8a1   :  { %29710 = vrcp.f32 %v3013_v1 }
 0x8ab   :  { %v29711_v4 = vpop.eup %29710 }
 0x8ac   :  { %v3027_v63 = vsub.f32 1.0, %v29711_v4 }
 0x8ae   :  { %v3028_v17 = vmul.f32 %v3027_v63, %v30471_v24 }
 0x902   :  { %v3018_v10 = vpop.permute.xlu1 %3017 }
 0x903   :  { %v3020_v12 = vmul.f32 %v29711_v4, %v3018_v10 }
 0x905   :  { %3022 = vrot.lane.b32.xlu0 %v3020_v12, %s29829_s5 }
 0x977   :  { %v3023_v13 = vpop.permute.xlu0 %3022 }
 0x978   :  { %v3025_v2 = vadd.f32 %v29154_v39, %v3023_v13  ;;  %v3598_v39 = vand.u32 4294901760, %v3577_v50 }
 0x97a   :  { %29712 = vtanh.f32 %v3025_v2  ;;  %v3690_v28 = vsub.f32 %v3577_v50, %v3598_v39 }
 0x984   :  { %v29713_v30 = vpop.eup %29712 }
 0x985   :  { %3030 = vrot.lane.b32.xlu1 %v29713_v30, %s29830_s29 }
 0x9f7   :  { %v3031_v7 = vpop.permute.xlu1 %3030 }
 0x9f8   :  { %v3033_v31 = vmul.f32 %v29711_v4, %v3031_v7  ;;  %v3691_v4 = vand.u32 4294901760, %v3690_v28 }
 0x9fa   :  { %v3034_v38 = vadd.f32 %v3033_v31, %v3028_v17  ;;  %v3692_v12 = vsub.f32 %v3690_v28, %v3691_v4 }
 0x9fc   :  { %v3036_v34 = vmul.f32 %v3035_v3, %v3034_v38  ;;  %v3693_v2 = vand.u32 4294901760, %v3692_v12  ;;  %v30660_v38 = vld [vmem:[%s35279_s2] ss:$0 sm:$0xff]  ;;  %s35284_s2 = sld [smem:[#allocation25_spill]] }
 0x9fe   :  { %v30542_v47 = vadd.f32 %v3038_v42, %v3036_v34 }
 0xa00   :  { %3040 = vst.msk [vmem:[#allocation2 + $0x18] sm:$0xff] %vm1442_vm2, %v30542_v47  ;;  %v3054_v53 = vsel %vm101_vm0, %v30542_v47, 0  ;;  %v3570_v56 = vmul.f32 %v3569_v45, %v30542_v47 }
 0xa01   :  { %3041 = vst.msk [vmem:[#allocation2 + $0x20] sm:$0xff] %vm1444_vm3, %v30542_v47  ;;  %v3125_v27 = vand.u32 4294901760, %v3054_v53 }
 0xa03   :  { %v3126_v14 = vsub.f32 %v3054_v53, %v3125_v27 }
 0xa05   :  { %v3127_v15 = vand.u32 4294901760, %v3126_v14 }
 0xa07   :  { %v3128_v20 = vsub.f32 %v3126_v14, %v3127_v15 }
 0xa09   :  { %v3129_v21 = vand.u32 4294901760, %v3128_v20 }
 0xa0b   :  { %23973 = vmatmul.mubr.f32.vlgmr.msra.gmra.mrb[10].mxu0 %v3129_v21 }
 0xa0c   :  { %27290 = vmatpush3.bf16.msra.mxu0 %v30531_v60  ;;  %23983 = vmatprep.mubr.msk.f32.mxu0 %vm29826_vm1, %v35175_v36 }
 0xa0d   :  { %27291 = vmatprep.subr.bf16.mxu0 %v35173_v55 }
 0xa10   :  { %27293 = vmatpush3.bf16.msra.mxu0 %v30199_v48 }
 0xa11   :  { %27294 = vmatprep.subr.bf16.mxu0 %v35173_v55 }
 0xa13   :  { %23984 = vmatmul.mubr.f32.vlgmr.msra.gmra.mrb[10].mxu0 %v3125_v27 }
 0xa14   :  { %27296 = vmatpush3.bf16.msra.mxu0 %v30533_v61  ;;  %23994 = vmatprep.mubr.msk.f32.mxu0 %vm29826_vm1, %v35175_v36 }
 0xa15   :  { %27297 = vmatprep.subr.bf16.mxu0 %v35173_v55 }
 0xa18   :  { %27299 = vmatpush3.bf16.msra.mxu0 %v30219_v52 }
 0xa19   :  { %27300 = vmatprep.subr.bf16.mxu0 %v35173_v55 }
 0xa1b   :  { %23995 = vmatmul.mubr.f32.vlgmr.msra.gmra.mrb[10].mxu0 %v3126_v14 }
 0xa1c   :  { %27302 = vmatpush3.bf16.msra.mxu0 %v30522_v18  ;;  %24005 = vmatprep.mubr.msk.f32.mxu0 %vm29826_vm1, %v35175_v36 }
 0xa1d   :  { %27303 = vmatprep.subr.bf16.mxu0 %v35173_v55 }
 0xa20   :  { %27305 = vmatpush3.bf16.msra.mxu0 %v30154_v41 }
 0xa21   :  { %27306 = vmatprep.subr.bf16.mxu0 %v35173_v55 }
 0xa23   :  { %24006 = vmatmul.mubr.f32.vlgmr.msra.gmra.mrb[10].mxu0 %v3127_v15 }
 0xa24   :  { %27308 = vmatpush3.bf16.msra.mxu0 %v30535_v62  ;;  %24016 = vmatprep.mubr.msk.f32.mxu0 %vm29826_vm1, %v35175_v36 }
 0xa25   :  { %27309 = vmatprep.subr.bf16.mxu0 %v35173_v55 }
 0xa28   :  { %27311 = vmatpush3.bf16.msra.mxu0 %v30260_v23 }
 0xa29   :  { %27312 = vmatprep.subr.bf16.mxu0 %v35173_v55 }
 0xa2b   :  { %24017 = vmatmul.mubr.f32.vlgmr.msra.gmra.mrb[10].mxu0 %v3125_v27 }
 0xa2c   :  { %27314 = vmatpush3.bf16.msra.mxu0 %v30522_v18  ;;  %24027 = vmatprep.mubr.msk.f32.mxu0 %vm29826_vm1, %v35175_v36 }
 0xa2d   :  { %27315 = vmatprep.subr.bf16.mxu0 %v35173_v55 }
 0xa30   :  { %27317 = vmatpush3.bf16.msra.mxu0 %v30154_v41 }
 0xa31   :  { %27354 = vmatprep.subr.bf16.mxu0 %v35173_v55 }
 0xa33   :  { %24028 = vmatmul.mubr.f32.vlgmr.msra.gmra.mrb[10].mxu0 %v3125_v27 }
 0xa34   :  { %27356 = vmatpush3.bf16.msra.mxu0 %v30522_v18  ;;  %24104 = vmatprep.mubr.msk.f32.mxu0 %vm29826_vm1, %v35175_v36 }
 0xa35   :  { %27357 = vmatprep.subr.bf16.mxu0 %v35173_v55 }
 0xb06   :  { %v3537_v48 = vpop.f32.mrb[10].mxu0 }
 0xb07   :  { %v29168_v52 = vadd.f32 %v30332_v16, %v3537_v48  ;;  %v24029_v23 = vpop.f32.mrb[11].mxu0  ;;  %v3576_v16 = vld [vmem:[%s35278_s8 + $0x10] sm:$0xff]  ;;  %s29833_s8 = smov 48  }
 0xb08   :  { %v3595_v54 = vand.u32 4294901760, %v3576_v16 }
 0xb09   :  { %3549 = vrot.lane.b32.xlu0 %v29168_v52, %s29828_s27  ;;  %v3541_v24 = vadd.f32 %v29168_v52, %v30351_v58 }
 0xb0a   :  { %v30595_v49 = vpack.c.bf16 %v3598_v39, %v3595_v54  ;;  %v3683_v0 = vsub.f32 %v3576_v16, %v3595_v54 }
 0xb0b   :  { %v21841_v25 = vmul.f32 -1.442695, %v3541_v24 }
 0xb0c   :  { %27323 = vmatpush3.bf16.msra.mxu1 %v30595_v49  ;;  %27359 = vmatpush3.bf16.msra.mxu0 %v30595_v49  ;;  %v30604_v32 = vpack.c.bf16 %v3690_v28, %v3683_v0 }
 0xb0d   :  { %29714 = vpow2.f32 %v21841_v25  ;;  %27324 = vmatprep.subr.bf16.mxu1 %v35173_v55  ;;  %27360 = vmatprep.subr.bf16.mxu0 %v35173_v55 }
 0xb17   :  { %v29715_v41 = vpop.eup %29714 }
 0xb18   :  { %v3545_v26 = vadd.f32 1.0, %v29715_v41  ;;  %v4099_v41 = vld [vmem:[%s35281_s30 + $0x28] sm:$0xff] }
 0xb1a   :  { %29716 = vrcp.f32 %v3545_v26 }
 0xb24   :  { %v29717_v29 = vpop.eup %29716 }
 0xb25   :  { %v3559_v5 = vsub.f32 1.0, %v29717_v29 }
 0xb27   :  { %v3560_v30 = vmul.f32 %v3559_v5, %v30542_v47 }
 0xb7b   :  { %v3550_v35 = vpop.permute.xlu0 %3549 }
 0xb7c   :  { %v3552_v37 = vmul.f32 %v29717_v29, %v3550_v35  ;;  %v4101_v35 = vsub.f32 1.0, %v4099_v41 }
 0xb7e   :  { %3554 = vrot.lane.b32.xlu1 %v3552_v37, %s29829_s5 }
 0xbf0   :  { %v3555_v40 = vpop.permute.xlu1 %3554 }
 0xbf1   :  { %v3557_v44 = vadd.f32 %v30351_v58, %v3555_v40  ;;  %v3684_v58 = vand.u32 4294901760, %v3683_v0 }
 0xbf3   :  { %29718 = vtanh.f32 %v3557_v44  ;;  %v3685_v10 = vsub.f32 %v3683_v0, %v3684_v58  ;;  %v30606_v33 = vpack.c.bf16 %v3691_v4, %v3684_v58 }
 0xbf5   :  { %v3686_v13 = vand.u32 4294901760, %v3685_v10 }
 0xbf7   :  { %v30602_v6 = vpack.c.bf16 %v3693_v2, %v3686_v13 }
 0xbfd   :  { %v29719_v1 = vpop.eup %29718 }
 0xbfe   :  { %3562 = vrot.lane.b32.xlu0 %v29719_v1, %s29830_s29 }
 0xc70   :  { %v3563_v22 = vpop.permute.xlu0 %3562 }
 0xc71   :  { %v3565_v46 = vmul.f32 %v29717_v29, %v3563_v22 }
 0xc73   :  { %v3566_v51 = vadd.f32 %v3565_v46, %v3560_v30 }
 0xc75   :  { %v3568_v57 = vmul.f32 %v3567_v19, %v3566_v51 }
 0xc77   :  { %v30613_v59 = vadd.f32 %v3570_v56, %v3568_v57  ;;  %v4631_v57 = vld [vmem:[%s35281_s30 + $0x30] sm:$0xff] }
 0xc79   :  { %3572 = vst.msk [vmem:[#allocation2 + $0x20] sm:$0xff] %vm1442_vm2, %v30613_v59  ;;  %v3586_v63 = vsel %vm101_vm0, %v30613_v59, 0  ;;  %v4102_v44 = vmul.f32 %v4101_v35, %v30613_v59 }
 0xc7a   :  { %3573 = vst.msk [vmem:[#allocation2 + $0x18] sm:$0xff] %vm1444_vm3, %v30613_v59  ;;  %v3657_v3 = vand.u32 4294901760, %v3586_v63 }
 0xc7c   :  { %v3658_v7 = vsub.f32 %v3586_v63, %v3657_v3 }
 0xc7e   :  { %v3659_v17 = vand.u32 4294901760, %v3658_v7 }
 0xc80   :  { %v3660_v9 = vsub.f32 %v3658_v7, %v3659_v17 }
 0xc82   :  { %v3661_v31 = vand.u32 4294901760, %v3660_v9 }
 0xc84   :  { %24039 = vmatmul.mubr.f32.vlgmr.msra.gmra.mrb[10].mxu1 %v3661_v31 }
 0xc85   :  { %27326 = vmatpush3.bf16.msra.mxu1 %v30531_v60  ;;  %24049 = vmatprep.mubr.msk.f32.mxu1 %vm29826_vm1, %v35175_v36 }
 0xc86   :  { %27327 = vmatprep.subr.bf16.mxu1 %v35173_v55 }
 0xc89   :  { %27329 = vmatpush3.bf16.msra.mxu1 %v30602_v6 }
 0xc8a   :  { %27330 = vmatprep.subr.bf16.mxu1 %v35173_v55 }
 0xc8c   :  { %24050 = vmatmul.mubr.f32.vlgmr.msra.gmra.mrb[10].mxu1 %v3657_v3 }
 0xc8d   :  { %27332 = vmatpush3.bf16.msra.mxu1 %v30533_v61  ;;  %24060 = vmatprep.mubr.msk.f32.mxu1 %vm29826_vm1, %v35175_v36 }
 0xc8e   :  { %27333 = vmatprep.subr.bf16.mxu1 %v35173_v55 }
 0xc91   :  { %27335 = vmatpush3.bf16.msra.mxu1 %v30604_v32 }
 0xc92   :  { %27336 = vmatprep.subr.bf16.mxu1 %v35173_v55 }
 0xc94   :  { %24061 = vmatmul.mubr.f32.vlgmr.msra.gmra.mrb[10].mxu1 %v3658_v7 }
 0xc95   :  { %27338 = vmatpush3.bf16.msra.mxu1 %v30522_v18  ;;  %24071 = vmatprep.mubr.msk.f32.mxu1 %vm29826_vm1, %v35175_v36 }
 0xc96   :  { %27339 = vmatprep.subr.bf16.mxu1 %v35173_v55 }
 0xc99   :  { %27341 = vmatpush3.bf16.msra.mxu1 %v30595_v49 }
 0xc9a   :  { %27342 = vmatprep.subr.bf16.mxu1 %v35173_v55 }
 0xc9c   :  { %24072 = vmatmul.mubr.f32.vlgmr.msra.gmra.mrb[10].mxu1 %v3659_v17 }
 0xc9d   :  { %27344 = vmatpush3.bf16.msra.mxu1 %v30535_v62  ;;  %24082 = vmatprep.mubr.msk.f32.mxu1 %vm29826_vm1, %v35175_v36 }
 0xc9e   :  { %27345 = vmatprep.subr.bf16.mxu1 %v35173_v55 }
 0xca1   :  { %27347 = vmatpush3.bf16.msra.mxu1 %v30606_v33 }
 0xca2   :  { %27348 = vmatprep.subr.bf16.mxu1 %v35173_v55 }
 0xca4   :  { %24083 = vmatmul.mubr.f32.vlgmr.msra.gmra.mrb[10].mxu1 %v3657_v3 }
 0xca5   :  { %27350 = vmatpush3.bf16.msra.mxu1 %v30522_v18  ;;  %24093 = vmatprep.mubr.msk.f32.mxu1 %vm29826_vm1, %v35175_v36 }
 0xca6   :  { %27351 = vmatprep.subr.bf16.mxu1 %v35173_v55 }
 0xca9   :  { %27353 = vmatpush3.bf16.msra.mxu1 %v30595_v49 }
 0xcaa   :  { %27390 = vmatprep.subr.bf16.mxu1 %v35173_v55 }
 0xcac   :  { %24094 = vmatmul.mubr.f32.vlgmr.msra.gmra.mrb[10].mxu1 %v3657_v3  ;;  %v4633_v3 = vsub.f32 1.0, %v4631_v57 }
 0xcad   :  { %27392 = vmatpush3.bf16.msra.mxu1 %v30522_v18  ;;  %24170 = vmatprep.mubr.msk.f32.mxu1 %vm29826_vm1, %v35175_v36 }
 0xcae   :  { %27393 = vmatprep.subr.bf16.mxu1 %v35173_v55 }
 0xcb1   :  { %27395 = vmatpush3.bf16.msra.mxu1 %v30595_v49 }
 0xcb2   :  { %27396 = vmatprep.subr.bf16.mxu1 %v35173_v55 }
 0xd7f   :  { %v4069_v42 = vpop.f32.mrb[10].mxu1 }
 0xd80   :  { %v29169_v34 = vadd.f32 %v30660_v38, %v4069_v42  ;;  %v24095_v47 = vpop.f32.mrb[11].mxu1 }
 0xd82   :  { %4081 = vrot.lane.b32.xlu1 %v29169_v34, %s29828_s27  ;;  %v4073_v53 = vadd.f32 %v29169_v34, %v30349_v43 }
 0xd84   :  { %v21843_v27 = vmul.f32 -1.442695, %v4073_v53 }
 0xd86   :  { %29720 = vpow2.f32 %v21843_v27 }
 0xd90   :  { %v29721_v14 = vpop.eup %29720 }
 0xd91   :  { %v4077_v15 = vadd.f32 1.0, %v29721_v14 }
 0xd93   :  { %29722 = vrcp.f32 %v4077_v15 }
 0xd9d   :  { %v29723_v20 = vpop.eup %29722 }
 0xd9e   :  { %v4091_v25 = vsub.f32 1.0, %v29723_v20 }
 0xda0   :  { %v4092_v29 = vmul.f32 %v4091_v25, %v30613_v59 }
 0xdf4   :  { %v4082_v21 = vpop.permute.xlu1 %4081 }
 0xdf5   :  { %v4084_v48 = vmul.f32 %v29723_v20, %v4082_v21 }
 0xdf7   :  { %4086 = vrot.lane.b32.xlu0 %v4084_v48, %s29829_s5 }
 0xe69   :  { %v4087_v52 = vpop.permute.xlu0 %4086 }
 0xe6a   :  { %v4089_v23 = vadd.f32 %v30349_v43, %v4087_v52  ;;  %v5653_v52 = vld [vmem:[%s35282_s6 + $0x8] sm:$0xff] }
 0xe6b   :  { %v5691_v25 = vand.u32 4294901760, %v5653_v52 }
 0xe6c   :  { %29724 = vtanh.f32 %v4089_v23  ;;  %v5654_v23 = vld [vmem:[%s35282_s6 + $0x10] sm:$0xff] }
 0xe76   :  { %v29725_v24 = vpop.eup %29724 }
 0xe77   :  { %4094 = vrot.lane.b32.xlu1 %v29725_v24, %s29830_s29 }
 0xee9   :  { %v4095_v26 = vpop.permute.xlu1 %4094 }
 0xeea   :  { %v4097_v37 = vmul.f32 %v29723_v20, %v4095_v26 }
 0xeec   :  { %v4098_v40 = vadd.f32 %v4097_v37, %v4092_v29 }
 0xeee   :  { %v4100_v16 = vmul.f32 %v4099_v41, %v4098_v40  ;;  %v5655_v41 = vld [vmem:[%s35282_s6 + $0x18] sm:$0xff] }
 0xeef   :  { %v5697_v26 = vand.u32 4294901760, %v5655_v41 }
 0xef0   :  { %v30673_v50 = vadd.f32 %v4102_v44, %v4100_v16  ;;  %v5845_v44 = vsub.f32 %v5653_v52, %v5691_v25 }
 0xef2   :  { %4104 = vst.msk [vmem:[#allocation2 + $0x28] sm:$0xff] %vm1442_vm2, %v30673_v50  ;;  %v4118_v43 = vsel %vm101_vm0, %v30673_v50, 0  ;;  %v4634_v9 = vmul.f32 %v4633_v3, %v30673_v50 }
 0xef3   :  { %4105 = vst.msk [vmem:[#allocation2 + $0x10] sm:$0xff] %vm1444_vm3, %v30673_v50  ;;  %v4189_v54 = vand.u32 4294901760, %v4118_v43 }
 0xef5   :  { %v4190_v39 = vsub.f32 %v4118_v43, %v4189_v54 }
 0xef7   :  { %v4191_v0 = vand.u32 4294901760, %v4190_v39 }
 0xef9   :  { %v4192_v28 = vsub.f32 %v4190_v39, %v4191_v0 }
 0xefb   :  { %v4193_v1 = vand.u32 4294901760, %v4192_v28 }
 0xefd   :  { %24105 = vmatmul.mubr.f32.vlgmr.msra.gmra.mrb[12].mxu0 %v4193_v1 }
 0xefe   :  { %27362 = vmatpush3.bf16.msra.mxu0 %v30531_v60  ;;  %24115 = vmatprep.mubr.msk.f32.mxu0 %vm29826_vm1, %v35175_v36 }
 0xeff   :  { %27363 = vmatprep.subr.bf16.mxu0 %v35173_v55 }
 0xf02   :  { %27365 = vmatpush3.bf16.msra.mxu0 %v30602_v6 }
 0xf03   :  { %27366 = vmatprep.subr.bf16.mxu0 %v35173_v55 }
 0xf05   :  { %24116 = vmatmul.mubr.f32.vlgmr.msra.gmra.mrb[12].mxu0 %v4189_v54 }
 0xf06   :  { %27368 = vmatpush3.bf16.msra.mxu0 %v30533_v61  ;;  %24126 = vmatprep.mubr.msk.f32.mxu0 %vm29826_vm1, %v35175_v36 }
 0xf07   :  { %27369 = vmatprep.subr.bf16.mxu0 %v35173_v55 }
 0xf0a   :  { %27371 = vmatpush3.bf16.msra.mxu0 %v30604_v32 }
 0xf0b   :  { %27372 = vmatprep.subr.bf16.mxu0 %v35173_v55 }
 0xf0d   :  { %24127 = vmatmul.mubr.f32.vlgmr.msra.gmra.mrb[12].mxu0 %v4190_v39 }
 0xf0e   :  { %27374 = vmatpush3.bf16.msra.mxu0 %v30522_v18  ;;  %24137 = vmatprep.mubr.msk.f32.mxu0 %vm29826_vm1, %v35175_v36 }
 0xf0f   :  { %27375 = vmatprep.subr.bf16.mxu0 %v35173_v55 }
 0xf12   :  { %27377 = vmatpush3.bf16.msra.mxu0 %v30595_v49 }
 0xf13   :  { %27378 = vmatprep.subr.bf16.mxu0 %v35173_v55 }
 0xf15   :  { %24138 = vmatmul.mubr.f32.vlgmr.msra.gmra.mrb[12].mxu0 %v4191_v0  ;;  %v5859_v0 = vsub.f32 %v5655_v41, %v5697_v26  ;;  %v5649_v41 = vld [vmem:[#allocation2 + $0x28] sm:$0xff] }
 0xf16   :  { %27380 = vmatpush3.bf16.msra.mxu0 %v30535_v62  ;;  %24148 = vmatprep.mubr.msk.f32.mxu0 %vm29826_vm1, %v35175_v36 }
 0xf17   :  { %27381 = vmatprep.subr.bf16.mxu0 %v35173_v55 }
 0xf1a   :  { %27383 = vmatpush3.bf16.msra.mxu0 %v30606_v33 }
 0xf1b   :  { %27384 = vmatprep.subr.bf16.mxu0 %v35173_v55 }
 0xf1d   :  { %24149 = vmatmul.mubr.f32.vlgmr.msra.gmra.mrb[12].mxu0 %v4189_v54 }
 0xf1e   :  { %27386 = vmatpush3.bf16.msra.mxu0 %v30522_v18  ;;  %24159 = vmatprep.mubr.msk.f32.mxu0 %vm29826_vm1, %v35175_v36 }
 0xf1f   :  { %27387 = vmatprep.subr.bf16.mxu0 %v35173_v55 }
 0xf22   :  { %27389 = vmatpush3.bf16.msra.mxu0 %v30595_v49 }
 0xf23   :  { %27426 = vmatprep.subr.bf16.mxu0 %v35173_v55 }
 0xf25   :  { %24160 = vmatmul.mubr.f32.vlgmr.msra.gmra.mrb[12].mxu0 %v4189_v54 }
 0xf26   :  { %24232 = vmatprep.mubr.msk.f32.mxu0 %vm29826_vm1, %v35175_v36 }
 0xff8   :  { %v4601_v58 = vpop.f32.mrb[12].mxu0 }
 0xff9   :  { %v29170_v4 = vadd.f32 %v30660_v38, %v4601_v58  ;;  %v24161_v10 = vpop.f32.mrb[13].mxu0 }
 0xffb   :  { %4613 = vrot.lane.b32.xlu0 %v29170_v4, %s29828_s27  ;;  %v4605_v12 = vadd.f32 %v29170_v4, %v30357_v11  ;;  %v5860_v4 = vand.u32 4294901760, %v5859_v0 }
 0xffd   :  { %v21845_v13 = vmul.f32 -1.442695, %v4605_v12 }
 0xfff   :  { %29726 = vpow2.f32 %v21845_v13  ;;  %v5861_v13 = vsub.f32 %v5859_v0, %v5860_v4 }
0x1009   :  { %v29727_v2 = vpop.eup %29726 }
0x100a   :  { %v4609_v5 = vadd.f32 1.0, %v29727_v2 }
0x100c   :  { %29728 = vrcp.f32 %v4609_v5  ;;  %v5862_v5 = vand.u32 4294901760, %v5861_v13 }
0x1016   :  { %v29729_v19 = vpop.eup %29728 }
0x1017   :  { %v4623_v56 = vsub.f32 1.0, %v29729_v19 }
0x1019   :  { %v4624_v63 = vmul.f32 %v4623_v56, %v30673_v50  ;;  %v5846_v50 = vand.u32 4294901760, %v5845_v44  ;;  %v5163_v56 = vld [vmem:[%s35281_s30 + $0x38] sm:$0xff]  ;;  %s29831_s30 = smov 112  }
0x101b   :  { %v5847_v54 = vsub.f32 %v5845_v44, %v5846_v50 }
0x101d   :  { %v5848_v1 = vand.u32 4294901760, %v5847_v54 }
0x106d   :  { %v4614_v22 = vpop.permute.xlu0 %4613 }
0x106e   :  { %v4616_v30 = vmul.f32 %v29729_v19, %v4614_v22 }
0x1070   :  { %4618 = vrot.lane.b32.xlu1 %v4616_v30, %s29829_s5 }
0x10e2   :  { %v4619_v45 = vpop.permute.xlu1 %4618 }
0x10e3   :  { %v4621_v46 = vadd.f32 %v30357_v11, %v4619_v45 }
0x10e5   :  { %29730 = vtanh.f32 %v4621_v46 }
0x10ef   :  { %v29731_v51 = vpop.eup %29730 }
0x10f0   :  { %4626 = vrot.lane.b32.xlu0 %v29731_v51, %s29830_s29 }
0x1162   :  { %v4627_v59 = vpop.permute.xlu0 %4626 }
0x1163   :  { %v4629_v7 = vmul.f32 %v29729_v19, %v4627_v59 }
0x1165   :  { %v4630_v17 = vadd.f32 %v4629_v7, %v4624_v63 }
0x1167   :  { %v4632_v31 = vmul.f32 %v4631_v57, %v4630_v17 }
0x1169   :  { %v30724_v42 = vadd.f32 %v4634_v9, %v4632_v31  ;;  %v5165_v9 = vsub.f32 1.0, %v5163_v56 }
0x116b   :  { %4636 = vst.msk [vmem:[#allocation2 + $0x30] sm:$0xff] %vm1442_vm2, %v30724_v42  ;;  %v4650_v11 = vsel %vm101_vm0, %v30724_v42, 0 }
0x116c   :  { %4637 = vst.msk [vmem:[#allocation2 + $0x8] sm:$0xff] %vm1444_vm3, %v30724_v42  ;;  %v4721_v34 = vand.u32 4294901760, %v4650_v11 }
0x116e   :  { %v4722_v47 = vsub.f32 %v4650_v11, %v4721_v34 }
0x1170   :  { %v4723_v53 = vand.u32 4294901760, %v4722_v47 }
0x1172   :  { %v4724_v27 = vsub.f32 %v4722_v47, %v4723_v53 }
0x1174   :  { %v4725_v14 = vand.u32 4294901760, %v4724_v27 }
0x1176   :  { %24171 = vmatmul.mubr.f32.vlgmr.msra.gmra.mrb[12].mxu1 %v4725_v14 }
0x1177   :  { %27398 = vmatpush3.bf16.msra.mxu1 %v30531_v60  ;;  %24181 = vmatprep.mubr.msk.f32.mxu1 %vm29826_vm1, %v35175_v36 }
0x1178   :  { %27399 = vmatprep.subr.bf16.mxu1 %v35173_v55 }
0x117b   :  { %27401 = vmatpush3.bf16.msra.mxu1 %v30602_v6 }
0x117c   :  { %27402 = vmatprep.subr.bf16.mxu1 %v35173_v55 }
0x117e   :  { %24182 = vmatmul.mubr.f32.vlgmr.msra.gmra.mrb[12].mxu1 %v4721_v34 }
0x117f   :  { %27404 = vmatpush3.bf16.msra.mxu1 %v30533_v61  ;;  %24192 = vmatprep.mubr.msk.f32.mxu1 %vm29826_vm1, %v35175_v36 }
0x1180   :  { %27405 = vmatprep.subr.bf16.mxu1 %v35173_v55 }
0x1183   :  { %27407 = vmatpush3.bf16.msra.mxu1 %v30604_v32 }
0x1184   :  { %27408 = vmatprep.subr.bf16.mxu1 %v35173_v55 }
0x1186   :  { %24193 = vmatmul.mubr.f32.vlgmr.msra.gmra.mrb[12].mxu1 %v4722_v47 }
0x1187   :  { %27410 = vmatpush3.bf16.msra.mxu1 %v30522_v18  ;;  %24203 = vmatprep.mubr.msk.f32.mxu1 %vm29826_vm1, %v35175_v36 }
0x1188   :  { %27411 = vmatprep.subr.bf16.mxu1 %v35173_v55 }
0x118b   :  { %27413 = vmatpush3.bf16.msra.mxu1 %v30595_v49 }
0x118c   :  { %27414 = vmatprep.subr.bf16.mxu1 %v35173_v55 }
0x118e   :  { %24204 = vmatmul.mubr.f32.vlgmr.msra.gmra.mrb[12].mxu1 %v4723_v53 }
0x118f   :  { %27416 = vmatpush3.bf16.msra.mxu1 %v30535_v62  ;;  %24214 = vmatprep.mubr.msk.f32.mxu1 %vm29826_vm1, %v35175_v36 }
0x1190   :  { %27417 = vmatprep.subr.bf16.mxu1 %v35173_v55 }
0x1193   :  { %27419 = vmatpush3.bf16.msra.mxu1 %v30606_v33 }
0x1194   :  { %27420 = vmatprep.subr.bf16.mxu1 %v35173_v55 }
0x1196   :  { %24215 = vmatmul.mubr.f32.vlgmr.msra.gmra.mrb[12].mxu1 %v4721_v34 }
0x1197   :  { %27422 = vmatpush3.bf16.msra.mxu1 %v30522_v18  ;;  %24225 = vmatprep.mubr.msk.f32.mxu1 %vm29826_vm1, %v35175_v36 }
0x1198   :  { %27423 = vmatprep.subr.bf16.mxu1 %v35173_v55 }
0x119b   :  { %27425 = vmatpush3.bf16.msra.mxu1 %v30595_v49 }
0x119e   :  { %24226 = vmatmul.mubr.f32.vlgmr.msra.gmra.mrb[12].mxu1 %v4721_v34 }
0x1271   :  { %v5133_v60 = vpop.f32.mrb[12].mxu1 }
0x1272   :  { %v29171_v61 = vadd.f32 %v30660_v38, %v5133_v60  ;;  %v24227_v62 = vpop.f32.mrb[13].mxu1  ;;  %v5652_v38 = vld [vmem:[%s35282_s6] sm:$0xff]  ;;  %s35283_s6 = sld [smem:[#allocation24_spill]] }
0x1273   :  { %v5688_v24 = vand.u32 4294901760, %v5652_v38  ;;  %v5645_v62 = vld [vmem:[#allocation2 + $0x8] sm:$0xff] }
0x1274   :  { %5145 = vrot.lane.b32.xlu1 %v29171_v61, %s29828_s27  ;;  %v5137_v6 = vadd.f32 %v29171_v61, %v30355_v8  ;;  %v5166_v61 = vmul.f32 %v5165_v9, %v30724_v42 }
0x1275   :  { %v30778_v35 = vpack.c.bf16 %v5691_v25, %v5688_v24  ;;  %v5838_v40 = vsub.f32 %v5652_v38, %v5688_v24 }
0x1276   :  { %v21847_v32 = vmul.f32 -1.442695, %v5137_v6  ;;  %v5646_v6 = vld [vmem:[#allocation2 + $0x10] sm:$0xff] }
0x1277   :  { %27445 = vmatprep.subr.bf16.mxu1 %v30778_v35  ;;  %v5839_v16 = vand.u32 4294901760, %v5838_v40  ;;  %v30792_v22 = vpack.c.bf16 %v5845_v44, %v5838_v40 }
0x1278   :  { %29732 = vpow2.f32 %v21847_v32  ;;  %27447 = vmatpush3.bf16.msra.mxu1 %v30778_v35  ;;  %v5170_v57 = vld [vmem:[%s35283_s6] sm:$0xff]  ;;  %v5171_v59 = vld [vmem:[%s35283_s6 + $0x8] sm:$0xff]  ;;  %s29832_s6 = smov 16  }
0x1279   :  { %v5840_v43 = vsub.f32 %v5838_v40, %v5839_v16  ;;  %v30796_v45 = vpack.c.bf16 %v5846_v50, %v5839_v16  ;;  %v5185_v3 = vand.u32 4294901760, %v5170_v57  ;;  %v5188_v7 = vand.u32 4294901760, %v5171_v59 }
0x127b   :  { %v5841_v28 = vand.u32 4294901760, %v5840_v43  ;;  %v30810_v11 = vpack.c.bf16 %v5188_v7, %v5185_v3  ;;  %v30812_v34 = vsub.f32 %v5170_v57, %v5185_v3  ;;  %v30814_v47 = vsub.f32 %v5171_v59, %v5188_v7 }
0x127c   :  { %v5679_v43 = vsel %vm101_vm0, %v5649_v41, 0 }
0x127d   :  { %v30787_v10 = vpack.c.bf16 %v5848_v1, %v5841_v28  ;;  %27428 = vmatpush3.bf16.msra.mxu0 %v30810_v11  ;;  %v5264_v27 = vand.u32 4294901760, %v30812_v34  ;;  %v5271_v14 = vand.u32 4294901760, %v30814_v47  ;;  %v27433_v44 = vpack.c.bf16 %v30814_v47, %v30812_v34 }
0x127e   :  { %27429 = vmatprep.subr.bf16.mxu0 %v35173_v55 }
0x127f   :  { %v5265_v32 = vsub.f32 %v30812_v34, %v5264_v27  ;;  %v6521_v34 = vld [vmem:[%s35285_s9] sm:$0xff] }
0x1282   :  { %v29733_v33 = vpop.eup %29732 }
0x1283   :  { %v5141_v18 = vadd.f32 1.0, %v29733_v33  ;;  %v5272_v33 = vsub.f32 %v30814_v47, %v5271_v14  ;;  %v6522_v47 = vld [vmem:[%s35285_s9 + $0x8] sm:$0xff] }
0x1285   :  { %29734 = vrcp.f32 %v5141_v18 }
0x128f   :  { %v29735_v15 = vpop.eup %29734 }
0x1290   :  { %v5155_v51 = vsub.f32 1.0, %v29735_v15 }
0x1292   :  { %v5156_v17 = vmul.f32 %v5155_v51, %v30724_v42  ;;  %v5670_v42 = vsel %vm101_vm0, %v5646_v6, 0 }
0x12e6   :  { %v5146_v20 = vpop.permute.xlu1 %5145 }
0x12e7   :  { %v5148_v21 = vmul.f32 %v29735_v15, %v5146_v20  ;;  %v5266_v20 = vand.u32 4294901760, %v5265_v32 }
0x12e9   :  { %5150 = vrot.lane.b32.xlu0 %v5148_v21, %s29829_s5  ;;  %v5273_v21 = vand.u32 4294901760, %v5272_v33 }
0x12eb   :  { %v30832_v38 = vpack.c.bf16 %v5273_v21, %v5266_v20 }
0x135b   :  { %v5151_v49 = vpop.permute.xlu0 %5150 }
0x135c   :  { %v5153_v48 = vadd.f32 %v30355_v8, %v5151_v49  ;;  %v5694_v8 = vand.u32 4294901760, %v5654_v23  ;;  %v5647_v49 = vld [vmem:[#allocation2 + $0x18] sm:$0xff] }
0x135d   :  { %v5673_v24 = vsel %vm101_vm0, %v5647_v49, 0 }
0x135e   :  { %29736 = vtanh.f32 %v5153_v48  ;;  %v30781_v37 = vpack.c.bf16 %v5697_v26, %v5694_v8  ;;  %v5852_v39 = vsub.f32 %v5654_v23, %v5694_v8  ;;  %v5648_v48 = vld [vmem:[#allocation2 + $0x20] sm:$0xff]  ;;  %v30836_v23 = vand.u32 4294901760, %v5670_v42  ;;  %v5650_v8 = vld [vmem:[#allocation2 + $0x30] sm:$0xff] }
0x135f   :  { %v5676_v25 = vsel %vm101_vm0, %v5648_v48, 0 }
0x1360   :  { %27449 = vmatprep.subr.bf16.mxu1 %v30781_v37  ;;  %v5853_v58 = vand.u32 4294901760, %v5852_v39  ;;  %v30794_v30 = vpack.c.bf16 %v5859_v0, %v5852_v39  ;;  %v30845_v40 = vand.u32 4294901760, %v5676_v25  ;;  %v30850_v50 = vsub.f32 %v5670_v42, %v30836_v23 }
0x1361   :  { %27451 = vmatpush3.bf16.msra.mxu1 %v30781_v37  ;;  %v30905_v42 = vpack.c.bf16 %v5271_v14, %v5264_v27  ;;  %v6515_v27 = vld [vmem:[%s35284_s2] sm:$0xff] }
0x1362   :  { %v5854_v12 = vsub.f32 %v5852_v39, %v5853_v58  ;;  %27453 = vmatprep.subr.bf16.mxu1 %v30787_v10  ;;  %v30798_v46 = vpack.c.bf16 %v5860_v4, %v5853_v58  ;;  %v5682_v39 = vsel %vm101_vm0, %v5650_v8, 0  ;;  %v30862_v4 = vsub.f32 %v5676_v25, %v30845_v40 }
0x1363   :  { %v6531_v14 = vsel %vm1442_vm2, %v6515_v27, 0  ;;  %v6552_v8 = vand.u32 4294901760, %v6522_v47 }
0x1364   :  { %v5855_v2 = vand.u32 4294901760, %v5854_v12  ;;  %v30864_v12 = vand.u32 4294901760, %v5679_v43  ;;  %v5798_v9 = vand.u32 4294901760, %v30862_v4 }
0x1366   :  { %v30790_v19 = vpack.c.bf16 %v5862_v5, %v5855_v2  ;;  %v5778_v2 = vand.u32 4294901760, %v30850_v50  ;;  %v30870_v5 = vand.u32 4294901760, %v5682_v39  ;;  %v5799_v33 = vsub.f32 %v30862_v4, %v5798_v9 }
0x1368   :  { %v29737_v29 = vpop.eup %29736  ;;  %v5800_v49 = vand.u32 4294901760, %v5799_v33 }
0x1369   :  { %5158 = vrot.lane.b32.xlu1 %v29737_v29, %s29830_s29  ;;  %v30843_v29 = vand.u32 4294901760, %v5673_v24 }
0x136b   :  { %v30859_v58 = vsub.f32 %v5673_v24, %v30843_v29 }
0x136d   :  { %v5788_v59 = vand.u32 4294901760, %v30859_v58 }
0x13db   :  { %v5159_v63 = vpop.permute.xlu1 %5158 }
0x13dc   :  { %v5161_v31 = vmul.f32 %v29735_v15, %v5159_v63  ;;  %v5667_v15 = vsel %vm101_vm0, %v5645_v62, 0  ;;  %v30879_v63 = vsub.f32 %v5679_v43, %v30864_v12  ;;  %v6519_v43 = vld [vmem:[%s35284_s2 + $0x20] sm:$0xff] }
0x13dd   :  { %v30834_v52 = vand.u32 4294901760, %v5667_v15 }
0x13de   :  { %v5162_v53 = vadd.f32 %v5161_v31, %v5156_v17  ;;  %v5779_v17 = vsub.f32 %v30850_v50, %v5778_v2  ;;  %v30889_v31 = vsub.f32 %v5682_v39, %v30870_v5  ;;  %v5808_v62 = vand.u32 4294901760, %v30879_v63 }
0x13df   :  { %v30841_v26 = vsub.f32 %v5667_v15, %v30834_v52 }
0x13e0   :  { %v5164_v60 = vmul.f32 %v5163_v56, %v5162_v53  ;;  %v5780_v32 = vand.u32 4294901760, %v5779_v17  ;;  %v5809_v20 = vsub.f32 %v30879_v63, %v5808_v62 }
0x13e1   :  { %v5768_v1 = vand.u32 4294901760, %v30841_v26 }
0x13e2   :  { %v5167_v18 = vadd.f32 %v5166_v61, %v5164_v60  ;;  %v5789_v61 = vsub.f32 %v30859_v58, %v5788_v59 }
0x13e3   :  { %v5769_v57 = vsub.f32 %v30841_v26, %v5768_v1 }
0x13e4   :  { %5180 = vrot.lane.b32.xlu0 %v5167_v18, %s29831_s30  ;;  %5168 = vst.msk [vmem:[#allocation2 + $0x38] sm:$0xff] %vm1442_vm2, %v5167_v18  ;;  %v5790_v15 = vand.u32 4294901760, %v5789_v61 }
0x13e5   :  { %5169 = vst.msk [vmem:[#allocation2] sm:$0xff] %vm1444_vm3, %v5167_v18  ;;  %v5770_v60 = vand.u32 4294901760, %v5769_v57  ;;  %v5818_v18 = vand.u32 4294901760, %v30889_v31 }
0x13e7   :  { %v5819_v48 = vsub.f32 %v30889_v31, %v5818_v18 }
0x13e9   :  { %v5820_v25 = vand.u32 4294901760, %v5819_v48 }
0x13eb   :  { %v5651_v0 = vld [vmem:[#allocation2 + $0x38] sm:$0xff] }
0x13ec   :  { %v5644_v16 = vld [vmem:[#allocation2] sm:$0xff]  ;;  %v5685_v51 = vsel %vm101_vm0, %v5651_v0, 0 }
0x13ed   :  { %v5664_v54 = vsel %vm101_vm0, %v5644_v16, 0  ;;  %v30881_v3 = vand.u32 4294901760, %v5685_v51 }
0x13ee   :  { %v30855_v28 = vand.u32 4294901760, %v5664_v54 }
0x13ef   :  { %v5827_v6 = vsub.f32 %v5685_v51, %v30881_v3 }
0x13f0   :  { %v30867_v13 = vsub.f32 %v5664_v54, %v30855_v28 }
0x13f1   :  { %v5828_v21 = vand.u32 4294901760, %v5827_v6 }
0x13f2   :  { %v5758_v56 = vand.u32 4294901760, %v30867_v13 }
0x13f3   :  { %v5829_v24 = vsub.f32 %v5827_v6, %v5828_v21 }
0x13f4   :  { %v5759_v7 = vsub.f32 %v30867_v13, %v5758_v56 }
0x13f5   :  { %v5830_v41 = vand.u32 4294901760, %v5829_v24 }
0x13f6   :  { %v5760_v53 = vand.u32 4294901760, %v5759_v7 }
0x13f8   :  { %24278 = vmatprep.mubr.f32.mxu1 %v5760_v53 }
0x13f9   :  { %24279 = vmatmul.mubr.f32.vlgmr.msra.gmra.mrb[14].mxu1 %v5770_v60 }
0x13fa   :  { %24281 = vmatprep.mubr.f32.mxu1 %v5780_v32  ;;  %27455 = vmatpush3.bf16.msra.mxu1 %v30787_v10  ;;  %v5810_v10 = vand.u32 4294901760, %v5809_v20 }
0x13fb   :  { %27457 = vmatprep.subr.bf16.mxu1 %v30790_v19 }
0x13fd   :  { %24282 = vmatmul.mubr.f32.gmra.mrb[16].mxu1 %v5790_v15 }
0x13fe   :  { %24284 = vmatprep.mubr.f32.mxu1 %v5800_v49  ;;  %27459 = vmatpush3.bf16.msra.mxu1 %v30790_v19 }
0x13ff   :  { %27461 = vmatprep.subr.bf16.mxu1 %v30792_v22 }
0x1401   :  { %24285 = vmatmul.mubr.f32.gmra.mrb[18].mxu1 %v5810_v10 }
0x1402   :  { %24287 = vmatprep.mubr.f32.mxu1 %v5820_v25 }
0x1405   :  { %24288 = vmatmul.mubr.f32.gmra.mrb[20].mxu1 %v5830_v41 }
0x1406   :  { %24298 = vmatprep.mubr.f32.mxu1 %v30855_v28 }
0x1409   :  { %24299 = vmatmul.mubr.f32.vlgmr.msra.gmra.mrb[14].mxu1 %v30834_v52 }
0x140a   :  { %24301 = vmatprep.mubr.f32.mxu1 %v30836_v23  ;;  %27463 = vmatpush3.bf16.msra.mxu1 %v30792_v22 }
0x140b   :  { %27465 = vmatprep.subr.bf16.mxu1 %v30794_v30 }
0x140d   :  { %24302 = vmatmul.mubr.f32.gmra.mrb[16].mxu1 %v30843_v29 }
0x140e   :  { %24304 = vmatprep.mubr.f32.mxu1 %v30845_v40  ;;  %27467 = vmatpush3.bf16.msra.mxu1 %v30794_v30 }
0x140f   :  { %27469 = vmatprep.subr.bf16.mxu1 %v30778_v35 }
0x1411   :  { %24305 = vmatmul.mubr.f32.gmra.mrb[18].mxu1 %v30864_v12 }
0x1412   :  { %24307 = vmatprep.mubr.f32.mxu1 %v30870_v5 }
0x1415   :  { %24308 = vmatmul.mubr.f32.gmra.mrb[20].mxu1 %v30881_v3 }
0x1416   :  { %24318 = vmatprep.mubr.f32.mxu1 %v30867_v13 }
0x1419   :  { %24319 = vmatmul.mubr.f32.vlgmr.msra.gmra.mrb[14].mxu1 %v30841_v26  ;;  %v31000_v26 = vand.u32 4294901760, %v6531_v14 }
0x141a   :  { %24321 = vmatprep.mubr.f32.mxu1 %v30850_v50  ;;  %27471 = vmatpush3.bf16.msra.mxu1 %v30778_v35  ;;  %v31009_v50 = vsub.f32 %v6522_v47, %v6552_v8  ;;  %v7249_v47 = vld [vmem:[%s35099_s13 + $0x10] sm:$0xff] }
0x141b   :  { %27473 = vmatprep.subr.bf16.mxu1 %v30781_v37  ;;  %v31020_v39 = vsub.f32 %v6531_v14, %v31000_v26  ;;  %v7250_v14 = vld [vmem:[%s35099_s13 + $0x18] sm:$0xff] }
0x141d   :  { %24322 = vmatmul.mubr.f32.gmra.mrb[16].mxu1 %v30859_v58  ;;  %v6520_v58 = vld [vmem:[%s35284_s2 + $0x28] sm:$0xff] }
0x141e   :  { %24324 = vmatprep.mubr.f32.mxu1 %v30862_v4  ;;  %27475 = vmatpush3.bf16.msra.mxu1 %v30781_v37  ;;  %v6546_v57 = vsel %vm1442_vm2, %v6520_v58, 0 }
0x141f   :  { %27477 = vmatprep.subr.bf16.mxu1 %v30796_v45 }
0x1421   :  { %24325 = vmatmul.mubr.f32.gmra.mrb[18].mxu1 %v30879_v63 }
0x1422   :  { %24327 = vmatprep.mubr.f32.mxu1 %v30889_v31 }
0x1425   :  { %24328 = vmatmul.mubr.f32.gmra.mrb[20].mxu1 %v5827_v6 }
0x1426   :  { %24338 = vmatprep.mubr.f32.mxu1 %v5758_v56 }
0x1429   :  { %24339 = vmatmul.mubr.f32.vlgmr.msra.gmra.mrb[14].mxu1 %v5768_v1  ;;  %v6543_v1 = vsel %vm1442_vm2, %v6519_v43, 0 }
0x142a   :  { %24341 = vmatprep.mubr.f32.mxu1 %v5778_v2  ;;  %27479 = vmatpush3.bf16.msra.mxu1 %v30796_v45  ;;  %v31041_v56 = vand.u32 4294901760, %v6543_v1 }
0x142b   :  { %27481 = vmatprep.subr.bf16.mxu1 %v30798_v46 }
0x142c   :  { %v6656_v60 = vsub.f32 %v6543_v1, %v31041_v56 }
0x142d   :  { %24342 = vmatmul.mubr.f32.gmra.mrb[16].mxu1 %v5788_v59 }
0x142e   :  { %24344 = vmatprep.mubr.f32.mxu1 %v5798_v9  ;;  %27483 = vmatpush3.bf16.msra.mxu1 %v30798_v46  ;;  %v31051_v9 = vand.u32 4294901760, %v6546_v57  ;;  %v6657_v15 = vand.u32 4294901760, %v6656_v60 }
0x142f   :  { %27485 = vmatprep.subr.bf16.mxu1 %v30778_v35 }
0x1430   :  { %v6658_v10 = vsub.f32 %v6656_v60, %v6657_v15 }
0x1431   :  { %24345 = vmatmul.mubr.f32.gmra.mrb[18].mxu1 %v5808_v62 }
0x1432   :  { %24347 = vmatprep.mubr.f32.mxu1 %v5818_v18 }
0x1435   :  { %24348 = vmatmul.mubr.f32.gmra.mrb[20].mxu1 %v5828_v21 }
0x1436   :  { %24358 = vmatprep.mubr.f32.mxu1 %v30855_v28 }
0x1439   :  { %24359 = vmatmul.mubr.f32.vlgmr.msra.gmra.mrb[14].mxu1 %v30834_v52 }
0x143a   :  { %24361 = vmatprep.mubr.f32.mxu1 %v30836_v23  ;;  %27487 = vmatpush3.bf16.msra.mxu1 %v30778_v35 }
0x143b   :  { %27489 = vmatprep.subr.bf16.mxu1 %v30781_v37 }
0x143d   :  { %24362 = vmatmul.mubr.f32.gmra.mrb[16].mxu1 %v30843_v29 }
0x143e   :  { %24364 = vmatprep.mubr.f32.mxu1 %v30845_v40  ;;  %27491 = vmatpush3.bf16.msra.mxu1 %v30781_v37 }
0x143f   :  { %27522 = vmatprep.subr.bf16.mxu1 %v35173_v55 }
0x1441   :  { %24365 = vmatmul.mubr.f32.gmra.mrb[18].mxu1 %v30864_v12 }
0x1442   :  { %24367 = vmatprep.mubr.f32.mxu1 %v30870_v5 }
0x1445   :  { %24368 = vmatmul.mubr.f32.gmra.mrb[20].mxu1 %v30881_v3 }
0x1446   :  { %24378 = vmatprep.mubr.f32.mxu1 %v30855_v28 }
0x1449   :  { %24379 = vmatmul.mubr.f32.vlgmr.msra.gmra.mrb[14].mxu1 %v30834_v52  ;;  %v6517_v52 = vld [vmem:[%s35284_s2 + $0x10] sm:$0xff] }
0x144a   :  { %24381 = vmatprep.mubr.f32.mxu1 %v30836_v23  ;;  %v6549_v23 = vand.u32 4294901760, %v6521_v34 }
0x144c   :  { %v31007_v16 = vsub.f32 %v6521_v34, %v6549_v23  ;;  %v31044_v59 = vpack.c.bf16 %v6552_v8, %v6549_v23  ;;  %v7268_v23 = vand.u32 4294901760, %v7249_v47  ;;  %v7271_v8 = vand.u32 4294901760, %v7250_v14 }
0x144d   :  { %24382 = vmatmul.mubr.f32.gmra.mrb[16].mxu1 %v30843_v29 }
0x144e   :  { %24384 = vmatprep.mubr.f32.mxu1 %v30845_v40  ;;  %v6537_v40 = vsel %vm1442_vm2, %v6517_v52, 0  ;;  %v6678_v4 = vand.u32 4294901760, %v31007_v16  ;;  %v27500_v24 = vpack.c.bf16 %v31009_v50, %v31007_v16 }
0x144f   :  { %v31022_v0 = vand.u32 4294901760, %v6537_v40 }
0x1450   :  { %v6679_v63 = vsub.f32 %v31007_v16, %v6678_v4 }
0x1451   :  { %24385 = vmatmul.mubr.f32.gmra.mrb[18].mxu1 %v30864_v12  ;;  %v6685_v12 = vand.u32 4294901760, %v31009_v50  ;;  %v31039_v51 = vsub.f32 %v6537_v40, %v31022_v0  ;;  %v31119_v40 = vsub.f32 %v7249_v47, %v7268_v23 }
0x1452   :  { %24387 = vmatprep.mubr.f32.mxu1 %v30870_v5  ;;  %v6617_v5 = vand.u32 4294901760, %v31020_v39  ;;  %v6680_v61 = vand.u32 4294901760, %v6679_v63 }
0x1453   :  { %v6637_v53 = vand.u32 4294901760, %v31039_v51 }
0x1454   :  { %v6618_v31 = vsub.f32 %v31020_v39, %v6617_v5 }
0x1455   :  { %24388 = vmatmul.mubr.f32.gmra.mrb[20].mxu1 %v30881_v3  ;;  %v6686_v3 = vsub.f32 %v31009_v50, %v6685_v12  ;;  %v6638_v18 = vsub.f32 %v31039_v51, %v6637_v53 }
0x1456   :  { %24487 = vmatprep.mubr.msk.f32.mxu1 %vm29826_vm1, %v35175_v36  ;;  %v5181_v35 = vpop.permute.xlu0 %5180  ;;  %v6619_v33 = vand.u32 4294901760, %v6618_v31 }
0x1457   :  { %v5182_v37 = vsel %vm1442_vm2, %v5181_v35, 0  ;;  %v6687_v62 = vand.u32 4294901760, %v6686_v3  ;;  %v6639_v48 = vand.u32 4294901760, %v6638_v18  ;;  %v6659_v35 = vand.u32 4294901760, %v6658_v10 }
0x1458   :  { %v30966_v19 = vand.u32 4294901760, %v5182_v37 }
0x1459   :  { %v27496_v20 = vpack.c.bf16 %v6687_v62, %v6680_v61 }
0x145a   :  { %v5252_v22 = vsub.f32 %v5182_v37, %v30966_v19 }
0x145c   :  { %v5253_v30 = vand.u32 4294901760, %v5252_v22 }
0x145e   :  { %v5254_v45 = vsub.f32 %v5252_v22, %v5253_v30 }
0x1460   :  { %v5255_v46 = vand.u32 4294901760, %v5254_v45 }
0x1462   :  { %24233 = vmatmul.mubr.f32.vlgmr.msra.gmra.mrb[14].mxu0 %v5255_v46 }
0x1463   :  { %27431 = vmatpush3.bf16.msra.mxu0 %v30832_v38  ;;  %24239 = vmatprep.mubr.msk.f32.mxu0 %vm29826_vm1, %v35175_v36  ;;  %v6516_v38 = vld [vmem:[%s35284_s2 + $0x8] sm:$0xff] }
0x1464   :  { %27432 = vmatprep.subr.bf16.mxu0 %v35173_v55  ;;  %v6534_v29 = vsel %vm1442_vm2, %v6516_v38, 0 }
0x1465   :  { %v31014_v54 = vand.u32 4294901760, %v6534_v29 }
0x1467   :  { %v31033_v13 = vsub.f32 %v6534_v29, %v31014_v54 }
0x1469   :  { %v6627_v7 = vand.u32 4294901760, %v31033_v13 }
0x146a   :  { %24240 = vmatmul.mubr.f32.vlgmr.msra.gmra.mrb[14].mxu0 %v30966_v19 }
0x146b   :  { %27434 = vmatpush3.bf16.msra.mxu0 %v27433_v44  ;;  %24246 = vmatprep.mubr.msk.f32.mxu0 %vm29826_vm1, %v35175_v36  ;;  %v6518_v44 = vld [vmem:[%s35284_s2 + $0x18] sm:$0xff]  ;;  %v6628_v6 = vsub.f32 %v31033_v13, %v6627_v7 }
0x146c   :  { %27435 = vmatprep.subr.bf16.mxu0 %v35173_v55  ;;  %v6540_v28 = vsel %vm1442_vm2, %v6518_v44, 0  ;;  %v31121_v44 = vsub.f32 %v7250_v14, %v7271_v8 }
0x146d   :  { %v31035_v2 = vand.u32 4294901760, %v6540_v28  ;;  %v6629_v21 = vand.u32 4294901760, %v6628_v6 }
0x146f   :  { %v6646_v17 = vsub.f32 %v6540_v28, %v31035_v2 }
0x1471   :  { %v6647_v32 = vand.u32 4294901760, %v6646_v17 }
0x1472   :  { %24247 = vmatmul.mubr.f32.vlgmr.msra.gmra.mrb[14].mxu0 %v5252_v22  ;;  %v7247_v22 = vld [vmem:[%s35099_s13] sm:$0xff] }
0x1473   :  { %27437 = vmatpush3.bf16.msra.mxu0 %v30810_v11  ;;  %24253 = vmatprep.mubr.msk.f32.mxu0 %vm29826_vm1, %v35175_v36  ;;  %v7262_v45 = vand.u32 4294901760, %v7247_v22 }
0x1474   :  { %27438 = vmatprep.subr.bf16.mxu0 %v35173_v55 }
0x1475   :  { %v31105_v27 = vsub.f32 %v7247_v22, %v7262_v45 }
0x1477   :  { %v7343_v38 = vand.u32 4294901760, %v31105_v27 }
0x147a   :  { %24254 = vmatmul.mubr.f32.vlgmr.msra.gmra.mrb[14].mxu0 %v5253_v30  ;;  %v7248_v30 = vld [vmem:[%s35099_s13 + $0x8] sm:$0xff] }
0x147b   :  { %27440 = vmatpush3.bf16.msra.mxu0 %v30905_v42  ;;  %24260 = vmatprep.mubr.msk.f32.mxu0 %vm29826_vm1, %v35175_v36  ;;  %v6648_v42 = vsub.f32 %v6646_v17, %v6647_v32  ;;  %v7265_v46 = vand.u32 4294901760, %v7248_v30 }
0x147c   :  { %27441 = vmatprep.subr.bf16.mxu0 %v35173_v55 }
0x147d   :  { %v6649_v25 = vand.u32 4294901760, %v6648_v42  ;;  %v31107_v34 = vsub.f32 %v7248_v30, %v7265_v46  ;;  %v31123_v16 = vpack.c.bf16 %v7265_v46, %v7262_v45  ;;  %v21850_v46 = vld [vmem:[%s35102_s18] ss:$0 sm:$0xff] }
0x147f   :  { %v7350_v52 = vand.u32 4294901760, %v31107_v34 }
0x1481   :  { %v7351_v29 = vsub.f32 %v31107_v34, %v7350_v52 }
0x1482   :  { %24261 = vmatmul.mubr.f32.vlgmr.msra.gmra.mrb[14].mxu0 %v30966_v19 }
0x1483   :  { %27443 = vmatpush3.bf16.msra.mxu0 %v30810_v11  ;;  %24267 = vmatprep.mubr.msk.f32.mxu0 %vm29826_vm1, %v35175_v36  ;;  %v6666_v11 = vsub.f32 %v6546_v57, %v31051_v9  ;;  %v7352_v43 = vand.u32 4294901760, %v7351_v29  ;;  %v21849_v57 = vld [vmem:[%s35100_s12] ss:$0 sm:$0xff]  ;;  %s29834_s12 = smov 80  }
0x1484   :  { %27493 = vmatprep.subr.bf16.mxu0 %v31044_v59 }
0x1485   :  { %v6667_v49 = vand.u32 4294901760, %v6666_v11 }
0x1487   :  { %v6668_v41 = vsub.f32 %v6666_v11, %v6667_v49 }
0x1489   :  { %v6669_v37 = vand.u32 4294901760, %v6668_v41 }
0x148a   :  { %24268 = vmatmul.mubr.f32.vlgmr.msra.gmra.mrb[14].mxu0 %v30966_v19  ;;  %v27508_v19 = vpack.c.bf16 %v6685_v12, %v6678_v4 }
0x148b   :  { %27495 = vmatpush3.bf16.msra.mxu0 %v31044_v59  ;;  %24394 = vmatprep.mubr.f32.mxu0 %v6619_v33 }
0x148c   :  { %27497 = vmatprep.subr.bf16.mxu0 %v27496_v20 }
0x148e   :  { %24395 = vmatmul.mubr.f32.vlgmr.msra.gmra.mrb[16].mxu0 %v6629_v21 }
0x148f   :  { %24397 = vmatprep.mubr.f32.mxu0 %v6639_v48  ;;  %27499 = vmatpush3.bf16.msra.mxu0 %v27496_v20 }
0x1490   :  { %27501 = vmatprep.subr.bf16.mxu0 %v27500_v24 }
0x1492   :  { %24398 = vmatmul.mubr.f32.gmra.mrb[18].mxu0 %v6649_v25 }
0x1493   :  { %24400 = vmatprep.mubr.f32.mxu0 %v6659_v35 }
0x1496   :  { %24401 = vmatmul.mubr.f32.gmra.mrb[20].mxu0 %v6669_v37 }
0x1497   :  { %24407 = vmatprep.mubr.f32.mxu0 %v31000_v26 }
0x149a   :  { %24408 = vmatmul.mubr.f32.vlgmr.msra.gmra.mrb[16].mxu0 %v31014_v54 }
0x149b   :  { %24410 = vmatprep.mubr.f32.mxu0 %v31022_v0  ;;  %27503 = vmatpush3.bf16.msra.mxu0 %v27500_v24 }
0x149c   :  { %27505 = vmatprep.subr.bf16.mxu0 %v31044_v59 }
0x149e   :  { %24411 = vmatmul.mubr.f32.gmra.mrb[18].mxu0 %v31035_v2 }
0x149f   :  { %24413 = vmatprep.mubr.f32.mxu0 %v31041_v56 }
0x14a2   :  { %24414 = vmatmul.mubr.f32.gmra.mrb[20].mxu0 %v31051_v9 }
0x14a3   :  { %24420 = vmatprep.mubr.f32.mxu0 %v31020_v39  ;;  %v7364_v39 = vand.u32 4294901760, %v31121_v44 }
0x14a5   :  { %v7365_v1 = vsub.f32 %v31121_v44, %v7364_v39 }
0x14a6   :  { %24421 = vmatmul.mubr.f32.vlgmr.msra.gmra.mrb[16].mxu0 %v31033_v13  ;;  %v31133_v13 = vpack.c.bf16 %v7271_v8, %v7268_v23 }
0x14a7   :  { %24423 = vmatprep.mubr.f32.mxu0 %v31039_v51  ;;  %27507 = vmatpush3.bf16.msra.mxu0 %v31044_v59  ;;  %v7366_v4 = vand.u32 4294901760, %v7365_v1  ;;  %v31141_v51 = vpack.c.bf16 %v7350_v52, %v7343_v38  ;;  %v31234_v1 = vld [vmem:[%s35103_s15 + $0x10] sm:$0xff] }
0x14a8   :  { %27509 = vmatprep.subr.bf16.mxu0 %v27508_v19 }
0x14aa   :  { %24424 = vmatmul.mubr.f32.gmra.mrb[18].mxu0 %v6646_v17 }
0x14ab   :  { %24426 = vmatprep.mubr.f32.mxu0 %v6656_v60 }
0x14ae   :  { %24427 = vmatmul.mubr.f32.gmra.mrb[20].mxu0 %v6666_v11 }
0x14af   :  { %24433 = vmatprep.mubr.f32.mxu0 %v6617_v5  ;;  %v27532_v5 = vpack.c.bf16 %v31121_v44, %v31119_v40 }
0x14b2   :  { %24434 = vmatmul.mubr.f32.vlgmr.msra.gmra.mrb[16].mxu0 %v6627_v7 }
0x14b3   :  { %24436 = vmatprep.mubr.f32.mxu0 %v6637_v53  ;;  %27511 = vmatpush3.bf16.msra.mxu0 %v27508_v19 }
0x14b4   :  { %27513 = vmatprep.subr.bf16.mxu0 %v31044_v59 }
0x14b6   :  { %24437 = vmatmul.mubr.f32.gmra.mrb[18].mxu0 %v6647_v32 }
0x14b7   :  { %24439 = vmatprep.mubr.f32.mxu0 %v6657_v15  ;;  %v21848_v15 = vld [vmem:[%s35101_s10] ss:$0 sm:$0xff] }
0x14ba   :  { %24440 = vmatmul.mubr.f32.gmra.mrb[20].mxu0 %v6667_v49 }
0x14bb   :  { %24446 = vmatprep.mubr.f32.mxu0 %v31000_v26 }
0x14be   :  { %24447 = vmatmul.mubr.f32.vlgmr.msra.gmra.mrb[16].mxu0 %v31014_v54 }
0x14bf   :  { %24449 = vmatprep.mubr.f32.mxu0 %v31022_v0  ;;  %27515 = vmatpush3.bf16.msra.mxu0 %v31044_v59 }
0x14c0   :  { %27516 = vmatprep.subr.bf16.mxu0 %v35173_v55 }
0x14c2   :  { %24450 = vmatmul.mubr.f32.gmra.mrb[18].mxu0 %v31035_v2 }
0x14c3   :  { %24452 = vmatprep.mubr.f32.mxu0 %v31041_v56 }
0x14c6   :  { %24453 = vmatmul.mubr.f32.gmra.mrb[20].mxu0 %v31051_v9 }
0x14c7   :  { %24459 = vmatprep.mubr.f32.mxu0 %v31000_v26  ;;  %v7344_v26 = vsub.f32 %v31105_v27, %v7343_v38 }
0x14c9   :  { %v7345_v50 = vand.u32 4294901760, %v7344_v26 }
0x14ca   :  { %24460 = vmatmul.mubr.f32.vlgmr.msra.gmra.mrb[16].mxu0 %v31014_v54  ;;  %v7357_v54 = vand.u32 4294901760, %v31119_v40 }
0x14cb   :  { %24462 = vmatprep.mubr.f32.mxu0 %v31022_v0  ;;  %27518 = vmatpush3.bf16.msra.mxu0 %v31123_v16  ;;  %v27523_v0 = vpack.c.bf16 %v7352_v43, %v7345_v50  ;;  %v7749_v50 = vld [vmem:[%s35103_s15] sm:$0xff]  ;;  %v7750_v43 = vld [vmem:[%s35103_s15 + $0x8] sm:$0xff] }
0x14cc   :  { %v7358_v28 = vsub.f32 %v31119_v40, %v7357_v54  ;;  %27519 = vmatprep.subr.bf16.mxu0 %v35173_v55 }
0x14cd   :  { %27524 = vmatpush3.bf16.msra.mxu1 %v27523_v0 }
0x14ce   :  { %24463 = vmatmul.mubr.f32.gmra.mrb[18].mxu0 %v31035_v2  ;;  %v7359_v58 = vand.u32 4294901760, %v7358_v28  ;;  %27525 = vmatprep.subr.bf16.mxu1 %v35173_v55  ;;  %v27529_v2 = vpack.c.bf16 %v31107_v34, %v31105_v27 }
0x14cf   :  { %24465 = vmatprep.mubr.f32.mxu0 %v31041_v56  ;;  %27521 = vmatpush3.bf16.msra.mxu0 %v31133_v13  ;;  %v31143_v56 = vpack.c.bf16 %v7364_v39, %v7357_v54  ;;  %v7776_v54 = vand.u32 4294901760, %v7749_v50  ;;  %v7779_v39 = vand.u32 4294901760, %v7750_v43 }
0x14d0   :  { %v27526_v12 = vpack.c.bf16 %v7366_v4, %v7359_v58  ;;  %27528 = vmatprep.subr.bf16.mxu0 %v35173_v55  ;;  %v31239_v58 = vld [vmem:[%s35103_s15 + $0x18] sm:$0xff] }
0x14d1   :  { %v31227_v0 = vsub.f32 %v7749_v50, %v7776_v54  ;;  %v31229_v28 = vsub.f32 %v7750_v43, %v7779_v39 }
0x14d2   :  { %24466 = vmatmul.mubr.f32.gmra.mrb[20].mxu0 %v31051_v9  ;;  %27527 = vmatpush3.bf16.msra.mxu1 %v27526_v12 }
0x14d3   :  { %24476 = vmatprep.mubr.msk.f32.mxu0 %vm29826_vm1, %v35175_v36  ;;  %27534 = vmatprep.subr.bf16.mxu1 %v35173_v55  ;;  %v35139_v4 = vand.u32 4294901760, %v31227_v0  ;;  %v35138_v12 = vand.u32 4294901760, %v31229_v28 }
0x151c   :  { %v24380_v59 = vpop.f32.mrb[14].mxu1 }
0x151d   :  { %v29173_v63 = vadd.f32 %v24380_v59, %v21849_v57  ;;  %v6427_v3 = vpop.f32.mrb[15].mxu1  ;;  %v31260_v59 = vld [vmem:[%s35103_s15 + $0x20] sm:$0xff] }
0x151e   :  { %v29174_v7 = vadd.f32 %v21849_v57, %v6427_v3 }
0x151f   :  { %6475 = vrot.lane.b32.xlu1 %v29173_v63, %s29832_s6  ;;  %v31265_v63 = vld [vmem:[%s35103_s15 + $0x28] sm:$0xff] }
0x1520   :  { %6473 = vst.msk [vmem:[#allocation3] sm:$0xff] %vm1442_vm2, %v29174_v7  ;;  %v24383_v17 = vpop.f32.mrb[16].mxu1 }
0x1521   :  { %v29175_v9 = vadd.f32 %v24383_v17, %v21849_v57  ;;  %v6439_v31 = vpop.f32.mrb[17].mxu1 }
0x1522   :  { %v29176_v53 = vadd.f32 %v21849_v57, %v6439_v31  ;;  %v7788_v31 = vand.u32 4294901760, %v31260_v59 }
0x1523   :  { %6486 = vrot.lane.b32.xlu1 %v29175_v9, %s29833_s8 }
0x1524   :  { %v24386_v60 = vpop.f32.mrb[18].mxu1  ;;  %6480 = vrot.lane.b32.xlu0 %v29176_v53, %s29829_s5  ;;  %v7791_v53 = vand.u32 4294901760, %v31265_v63 }
0x1525   :  { %v29177_v61 = vadd.f32 %v24386_v60, %v21849_v57  ;;  %v6451_v62 = vpop.f32.mrb[19].mxu1 }
0x1526   :  { %v29178_v6 = vadd.f32 %v21849_v57, %v6451_v62 }
0x1527   :  { %6498 = vrot.lane.b32.xlu1 %v29177_v61, %s29834_s12 }
0x1528   :  { %v24389_v32 = vpop.f32.mrb[20].mxu1  ;;  %6492 = vrot.lane.b32.xlu0 %v29178_v6, %s29830_s29  ;;  %v31280_v6 = vsub.f32 %v31260_v59, %v7788_v31  ;;  %v7763_v59 = vld [vmem:[%s35103_s15 + $0x70] sm:$0xff] }
0x1529   :  { %v29179_v11 = vadd.f32 %v24389_v32, %v21849_v57  ;;  %v6463_v33 = vpop.f32.mrb[21].mxu1  ;;  %v31285_v32 = vsub.f32 %v31265_v63, %v7791_v53  ;;  %v7764_v63 = vld [vmem:[%s35103_s15 + $0x78] sm:$0xff] }
0x152a   :  { %v29180_v18 = vadd.f32 %v21849_v57, %v6463_v33  ;;  %v31295_v33 = vld [vmem:[%s35103_s15 + $0x38] sm:$0xff] }
0x152b   :  { %6510 = vrot.lane.b32.xlu1 %v29179_v11, %s29831_s30  ;;  %v31290_v11 = vld [vmem:[%s35103_s15 + $0x30] sm:$0xff] }
0x152c   :  { %6504 = vrot.lane.b32.xlu0 %v29180_v18, %s29828_s27 }
0x155d   :  { %v5639_v20 = vpop.f32.mrb[14].mxu0 }
0x155e   :  { %v29172_v21 = vadd.f32 %v21848_v15, %v5639_v20  ;;  %v24269_v42 = vpop.f32.mrb[15].mxu0  ;;  %v7794_v20 = vand.u32 4294901760, %v31290_v11 }
0x155f   :  { %v35135_v42 = vand.u32 4294901760, %v31280_v6 }
0x1560   :  { %29738 = vtanh.f32 %v29172_v21  ;;  %v7797_v21 = vand.u32 4294901760, %v31295_v33 }
0x156a   :  { %v31156_v49 = vpop.eup %29738 }
0x156b   :  { %v7259_v48 = vsel %vm101_vm0, %v31156_v49, 0 }
0x156c   :  { %v31160_v10 = vand.u32 4294901760, %v7259_v48 }
0x156e   :  { %24488 = vmatmul.mubr.f32.vlgmr.msra.gmra.mrb[22].mxu1 %v31160_v10  ;;  %v31164_v24 = vsub.f32 %v7259_v48, %v31160_v10  ;;  %v35134_v48 = vand.u32 4294901760, %v31285_v32 }
0x156f   :  { %27536 = vmatpush3.bf16.msra.mxu1 %v31123_v16  ;;  %24509 = vmatprep.mubr.msk.f32.mxu1 %vm29826_vm1, %v35175_v36 }
0x1570   :  { %27537 = vmatprep.subr.bf16.mxu1 %v35173_v55  ;;  %v31171_v25 = vand.u32 4294901760, %v31164_v24 }
0x1572   :  { %v7333_v41 = vsub.f32 %v31164_v24, %v31171_v25 }
0x1573   :  { %27539 = vmatpush3.bf16.msra.mxu1 %v31133_v13 }
0x1574   :  { %27546 = vmatprep.subr.bf16.mxu1 %v35173_v55  ;;  %v31177_v35 = vand.u32 4294901760, %v7333_v41 }
0x1576   :  { %24510 = vmatmul.mubr.f32.vlgmr.msra.gmra.mrb[24].mxu1 %v31171_v25  ;;  %24477 = vmatmul.mubr.f32.vlgmr.msra.gmra.mrb[22].mxu0 %v31177_v35 }
0x1577   :  { %27530 = vmatpush3.bf16.msra.mxu0 %v27529_v2  ;;  %27548 = vmatpush3.bf16.msra.mxu1 %v31123_v16  ;;  %v7785_v2 = vand.u32 4294901760, %v31239_v58 }
0x1578   :  { %27531 = vmatprep.subr.bf16.mxu0 %v35173_v55  ;;  %27549 = vmatprep.subr.bf16.mxu1 %v35173_v55 }
0x1579   :  { %24498 = vmatprep.mubr.msk.f32.mxu0 %vm29826_vm1, %v35175_v36  ;;  %24531 = vmatprep.mubr.msk.f32.mxu1 %vm29826_vm1, %v35175_v36  ;;  %v31255_v57 = vsub.f32 %v31239_v58, %v7785_v2  ;;  %v31355_v58 = vld [vmem:[%s35103_s15 + $0x50] sm:$0xff] }
0x157b   :  { %27533 = vmatpush3.bf16.msra.mxu0 %v27532_v5  ;;  %27551 = vmatpush3.bf16.msra.mxu1 %v31133_v13  ;;  %v7782_v13 = vand.u32 4294901760, %v31234_v1  ;;  %v7870_v5 = vsub.f32 %v31227_v0, %v35139_v4  ;;  %v35136_v9 = vand.u32 4294901760, %v31255_v57 }
0x157c   :  { %27540 = vmatprep.subr.bf16.mxu0 %v35173_v55  ;;  %27552 = vmatprep.subr.bf16.mxu1 %v35173_v55 }
0x157d   :  { %v7871_v3 = vand.u32 4294901760, %v7870_v5  ;;  %v7891_v62 = vsub.f32 %v31255_v57, %v35136_v9  ;;  %v31360_v5 = vld [vmem:[%s35103_s15 + $0x58] sm:$0xff] }
0x157e   :  { %24499 = vmatmul.mubr.f32.vlgmr.msra.gmra.mrb[24].mxu0 %v31164_v24  ;;  %24532 = vmatmul.mubr.f32.vlgmr.msra.gmra.mrb[26].mxu1 %v31160_v10 }
0x157f   :  { %27542 = vmatpush3.bf16.msra.mxu0 %v31141_v51  ;;  %24520 = vmatprep.mubr.msk.f32.mxu0 %vm29826_vm1, %v35175_v36  ;;  %v7877_v51 = vsub.f32 %v31229_v28, %v35138_v12  ;;  %v7892_v15 = vand.u32 4294901760, %v7891_v62  ;;  %v7809_v62 = vand.u32 4294901760, %v31360_v5 }
0x1580   :  { %27543 = vmatprep.subr.bf16.mxu0 %v35173_v55  ;;  %24566 = vmatprep.mubr.msk.f32.mxu1 %vm29826_vm1, %v35175_v36 }
0x1581   :  { %v7878_v7 = vand.u32 4294901760, %v7877_v51 }
0x1583   :  { %27545 = vmatpush3.bf16.msra.mxu0 %v31143_v56  ;;  %v31252_v56 = vsub.f32 %v31234_v1, %v7782_v13  ;;  %v27577_v60 = vpack.c.bf16 %v7878_v7, %v7871_v3 }
0x1584   :  { %27576 = vmatprep.subr.bf16.mxu0 %v35173_v55 }
0x1585   :  { %v35137_v17 = vand.u32 4294901760, %v31252_v56 }
0x1586   :  { %24521 = vmatmul.mubr.f32.vlgmr.msra.gmra.mrb[26].mxu0 %v31160_v10 }
0x1587   :  { %24601 = vmatprep.mubr.msk.f32.mxu0 %vm29826_vm1, %v35175_v36  ;;  %v7884_v61 = vsub.f32 %v31252_v56, %v35137_v17  ;;  %27578 = vmatpush3.bf16.msra.mxu0 %v27577_v60 }
0x1588   :  { %27579 = vmatprep.subr.bf16.mxu0 %v35173_v55 }
0x1589   :  { %v7885_v18 = vand.u32 4294901760, %v7884_v61  ;;  %v7806_v61 = vand.u32 4294901760, %v31355_v58 }
0x158b   :  { %v27580_v41 = vpack.c.bf16 %v7892_v15, %v7885_v18  ;;  %v31368_v18 = vpack.c.bf16 %v7785_v2, %v7782_v13  ;;  %v7761_v13 = vld [vmem:[%s35103_s15 + $0x60] sm:$0xff]  ;;  %v7762_v2 = vld [vmem:[%s35103_s15 + $0x68] sm:$0xff] }
0x158d   :  { %27581 = vmatpush3.bf16.msra.mxu0 %v27580_v41 }
0x158e   :  { %27582 = vmatprep.subr.bf16.mxu0 %v35173_v55 }
0x1591   :  { %v6476_v37 = vpop.permute.xlu1 %6475 }
0x1592   :  { %6478 = vst.msk [vmem:[#allocation3] sm:$0xff] %vm1444_vm3, %v6476_v37  ;;  %v31305_v37 = vsub.f32 %v31290_v11, %v7794_v20 }
0x1595   :  { %v6487_v19 = vpop.permute.xlu1 %6486 }
0x1596   :  { %v6481_v22 = vpop.permute.xlu0 %6480 }
0x1597   :  { %6484 = vst.msk [vmem:[#allocation3] sm:$0xff] %vm6483_vm4, %v6481_v22  ;;  %v7898_v22 = vsub.f32 %v31280_v6, %v35135_v42 }
0x1598   :  { %6490 = vst.msk [vmem:[#allocation3] sm:$0xff] %vm6489_vm5, %v6487_v19  ;;  %v31310_v19 = vsub.f32 %v31295_v33, %v7797_v21 }
0x1599   :  { %v6499_v30 = vpop.permute.xlu1 %6498 }
0x159a   :  { %v6493_v45 = vpop.permute.xlu0 %6492 }
0x159b   :  { %6496 = vst.msk [vmem:[#allocation3] sm:$0xff] %vm6495_vm6, %v6493_v45  ;;  %v31321_v45 = vld [vmem:[%s35103_s15 + $0x40] sm:$0xff] }
0x159c   :  { %6502 = vst.msk [vmem:[#allocation3] sm:$0xff] %vm6501_vm7, %v6499_v30  ;;  %v7905_v30 = vsub.f32 %v31285_v32, %v35134_v48 }
0x159d   :  { %v24461_v34 = vpop.f32.mrb[16].mxu0  ;;  %v6511_v47 = vpop.permute.xlu1 %6510 }
0x159e   :  { %v6505_v27 = vpop.permute.xlu0 %6504  ;;  %v31209_v14 = vadd.f32 %v24461_v34, %v21850_v46  ;;  %v31211_v38 = vpop.f32.mrb[17].mxu0  ;;  %v35132_v34 = vand.u32 4294901760, %v31310_v19 }
0x159f   :  { %6508 = vst.msk [vmem:[#allocation3] sm:$0xff] %vm6507_vm8, %v6505_v27  ;;  %v35133_v27 = vand.u32 4294901760, %v31305_v37 }
0x15a0   :  { %6514 = vst.msk [vmem:[#allocation3] sm:$0xff] %vm6513_vm9, %v6511_v47  ;;  %v7800_v47 = vand.u32 4294901760, %v31321_v45  ;;  %v7919_v43 = vsub.f32 %v31310_v19, %v35132_v34 }
0x15a1   :  { %v24464_v52 = vpop.f32.mrb[18].mxu0  ;;  %v7912_v50 = vsub.f32 %v31305_v37, %v35133_v27 }
0x15a2   :  { %v31213_v23 = vadd.f32 %v24464_v52, %v21850_v46  ;;  %v7200_v8 = vpop.f32.mrb[19].mxu0  ;;  %v31344_v1 = vsub.f32 %v31321_v45, %v7800_v47  ;;  %v7920_v3 = vand.u32 4294901760, %v7919_v43  ;;  %v7812_v43 = vand.u32 4294901760, %v7761_v13 }
0x15a3   :  { %v31215_v26 = vadd.f32 %v21850_v46, %v7200_v8  ;;  %v31333_v8 = vpack.c.bf16 %v7779_v39, %v7776_v54  ;;  %v7913_v51 = vand.u32 4294901760, %v7912_v50 }
0x15a4   :  { %35286 = vst [vmem:[#allocation6_spill] sm:$0xff] %v31213_v23  ;;  %v35127_v7 = vand.u32 4294901760, %v31344_v1 }
0x15a5   :  { %35287 = vst [vmem:[#allocation7_spill] sm:$0xff] %v31215_v26  ;;  %v24467_v29 = vpop.f32.mrb[20].mxu0  ;;  %27554 = vmatpush3.bf16.msra.mxu1 %v31333_v8  ;;  %v27586_v15 = vpack.c.bf16 %v7920_v3, %v7913_v51  ;;  %v31397_v51 = vpack.c.bf16 %v7791_v53, %v7788_v31 }
0x15a6   :  { %v31217_v40 = vadd.f32 %v24467_v29, %v21850_v46  ;;  %v7212_v44 = vpop.f32.mrb[21].mxu0  ;;  %v7899_v29 = vand.u32 4294901760, %v7898_v22  ;;  %27555 = vmatprep.subr.bf16.mxu1 %v35173_v55  ;;  %v7926_v41 = vsub.f32 %v31344_v1, %v35127_v7 }
0x15a7   :  { %v31219_v16 = vadd.f32 %v21850_v46, %v7212_v44  ;;  %v31326_v46 = vld [vmem:[%s35103_s15 + $0x48] sm:$0xff]  ;;  %v7906_v44 = vand.u32 4294901760, %v7905_v30  ;;  %v31377_v30 = vsub.f32 %v31355_v58, %v7806_v61 }
0x15a8   :  { %35288 = vst [vmem:[#allocation8_spill] sm:$0xff] %v31217_v40  ;;  %v7803_v52 = vand.u32 4294901760, %v31326_v46 }
0x15a9   :  { %35289 = vst [vmem:[#allocation9_spill] sm:$0xff] %v31219_v16  ;;  %v27583_v39 = vpack.c.bf16 %v7906_v44, %v7899_v29  ;;  %v31380_v29 = vsub.f32 %v31360_v5, %v7809_v62  ;;  %27557 = vmatpush3.bf16.msra.mxu1 %v31368_v18  ;;  %v7927_v44 = vand.u32 4294901760, %v7926_v41  ;;  %v35126_v58 = vand.u32 4294901760, %v31377_v30  ;;  %v10028_v16 = vld [vmem:[#allocation3] sm:$0xff] }
0x15aa   :  { %v31349_v54 = vsub.f32 %v31326_v46, %v7803_v52  ;;  %27558 = vmatprep.subr.bf16.mxu1 %v35173_v55  ;;  %v31399_v41 = vsub.f32 %v7761_v13, %v7812_v43  ;;  %v7818_v13 = vand.u32 4294901760, %v7763_v59  ;;  %v31441_v11 = vpack.c.bf16 %v7803_v52, %v7800_v47 }
0x15ab   :  { %27584 = vmatpush3.bf16.msra.mxu0 %v27583_v39  ;;  %v7815_v39 = vand.u32 4294901760, %v7762_v2  ;;  %v35125_v5 = vand.u32 4294901760, %v31380_v29  ;;  %v31454_v47 = vpack.c.bf16 %v7809_v62, %v7806_v61  ;;  %v27601_v61 = vpack.c.bf16 %v31229_v28, %v31227_v0 }
0x15ac   :  { %v35124_v60 = vand.u32 4294901760, %v31349_v54  ;;  %27585 = vmatprep.subr.bf16.mxu0 %v35173_v55  ;;  %v35131_v31 = vand.u32 4294901760, %v31399_v41  ;;  %v31432_v7 = vsub.f32 %v7763_v59, %v7818_v13 }
0x15ad   :  { %27560 = vmatpush3.bf16.msra.mxu1 %v31397_v51 }
0x15ae   :  { %v7933_v22 = vsub.f32 %v31349_v54, %v35124_v60  ;;  %v7947_v60 = vsub.f32 %v31380_v29, %v35125_v5  ;;  %27561 = vmatprep.subr.bf16.mxu1 %v35173_v55  ;;  %v31424_v5 = vpack.c.bf16 %v7797_v21, %v7794_v20  ;;  %v35129_v21 = vand.u32 4294901760, %v31432_v7 }
0x15af   :  { %27587 = vmatpush3.bf16.msra.mxu0 %v27586_v15  ;;  %v7940_v15 = vsub.f32 %v31377_v30, %v35126_v58  ;;  %v7954_v58 = vsub.f32 %v31399_v41, %v35131_v31 }
0x15b0   :  { %v7934_v50 = vand.u32 4294901760, %v7933_v22  ;;  %27588 = vmatprep.subr.bf16.mxu0 %v35173_v55  ;;  %v31401_v22 = vsub.f32 %v7762_v2, %v7815_v39  ;;  %v7821_v2 = vand.u32 4294901760, %v7764_v63  ;;  %v7968_v45 = vsub.f32 %v31432_v7, %v35129_v21 }
0x15b1   :  { %27563 = vmatpush3.bf16.msra.mxu1 %v31424_v5  ;;  %v7955_v33 = vand.u32 4294901760, %v7954_v58 }
0x15b2   :  { %v27589_v3 = vpack.c.bf16 %v7934_v50, %v7927_v44  ;;  %v35130_v53 = vand.u32 4294901760, %v31401_v22  ;;  %v7941_v44 = vand.u32 4294901760, %v7940_v15  ;;  %v7948_v50 = vand.u32 4294901760, %v7947_v60  ;;  %27564 = vmatprep.subr.bf16.mxu1 %v35173_v55 }
0x15b3   :  { %v31434_v60 = vsub.f32 %v7764_v63, %v7821_v2  ;;  %v7969_v52 = vand.u32 4294901760, %v7968_v45  ;;  %v31467_v62 = vpack.c.bf16 %v7821_v2, %v7818_v13  ;;  %v27616_v13 = vpack.c.bf16 %v31380_v29, %v31377_v30 }
0x15b4   :  { %27590 = vmatpush3.bf16.msra.mxu0 %v27589_v3  ;;  %v7961_v3 = vsub.f32 %v31401_v22, %v35130_v53  ;;  %v27592_v15 = vpack.c.bf16 %v7948_v50, %v7941_v44  ;;  %v31459_v50 = vpack.c.bf16 %v7815_v39, %v7812_v43  ;;  %v27607_v43 = vpack.c.bf16 %v31285_v32, %v31280_v6 }
0x15b5   :  { %27591 = vmatprep.subr.bf16.mxu0 %v35173_v55  ;;  %v35128_v59 = vand.u32 4294901760, %v31434_v60  ;;  %27566 = vmatpush3.bf16.msra.mxu1 %v31441_v11  ;;  %v27610_v39 = vpack.c.bf16 %v31310_v19, %v31305_v37 }
0x15b6   :  { %v7962_v20 = vand.u32 4294901760, %v7961_v3  ;;  %27567 = vmatprep.subr.bf16.mxu1 %v35173_v55  ;;  %v27604_v3 = vpack.c.bf16 %v31255_v57, %v31252_v56 }
0x15b7   :  { %v7975_v46 = vsub.f32 %v31434_v60, %v35128_v59 }
0x15b8   :  { %27593 = vmatpush3.bf16.msra.mxu0 %v27592_v15  ;;  %v27595_v63 = vpack.c.bf16 %v7962_v20, %v7955_v33  ;;  %v27613_v15 = vpack.c.bf16 %v31349_v54, %v31344_v1  ;;  %v7746_v33 = vld [vmem:[#allocation3] sm:$0xff] }
0x15b9   :  { %27594 = vmatprep.subr.bf16.mxu0 %v35173_v55  ;;  %v7976_v58 = vand.u32 4294901760, %v7975_v46  ;;  %27569 = vmatpush3.bf16.msra.mxu1 %v31454_v47  ;;  %v21851_v46 = vld [vmem:[%s35105_s14] ss:$0 sm:$0xff] }
0x15ba   :  { %27570 = vmatprep.subr.bf16.mxu1 %v35173_v55 }
0x15bb   :  { %v27598_v44 = vpack.c.bf16 %v7976_v58, %v7969_v52  ;;  %v35140_v52 = vmov 0  }
0x15bc   :  { %27596 = vmatpush3.bf16.msra.mxu0 %v27595_v63  ;;  %v30_v63 = vstv %s35104_s16  ;;  %29634 = vset.pattern.permute.xlu0 %v35140_v52 }
0x15bd   :  { %27597 = vmatprep.subr.bf16.mxu0 %v35173_v55  ;;  %27572 = vmatpush3.bf16.msra.mxu1 %v31459_v50  ;;  %31 = vst [vmem:[#allocation5] sm:$0x1] %v30_v63 }
0x15be   :  { %27573 = vmatprep.subr.bf16.mxu1 %v35173_v55  ;;  %29635 = vset.pattern.permute.xlu1 %v35140_v52 }
0x15c0   :  { %27599 = vmatpush3.bf16.msra.mxu0 %v27598_v44 }
0x15c1   :  { %27600 = vmatprep.subr.bf16.mxu0 %v35173_v55  ;;  %27575 = vmatpush3.bf16.msra.mxu1 %v31467_v62 }
0x15c2   :  { %27696 = vmatprep.subr.bf16.mxu1 %v35173_v55 }
0x15c4   :  { %v31493_v59 = vld [vmem:[#allocation5] ss:$0 sm:$0xff] }
0x15c5   :  { %7772 = vperm.xlu0 %29634, %v31493_v59  }
0x1641   :  { %v7427_v20 = vpop.f32.mrb[22].mxu1 }
0x1642   :  { %v24489_v45 = vpop.f32.mrb[23].mxu1 }
0x1649   :  { %v7584_v58 = vpop.f32.mrb[24].mxu1  ;;  %v7336_v44 = vpop.f32.mrb[22].mxu0 }
0x164a   :  { %v7337_v21 = vadd.f32 %v21851_v46, %v7336_v44  ;;  %v24511_v53 = vpop.f32.mrb[25].mxu1  ;;  %v24478_v31 = vpop.f32.mrb[23].mxu0 }
0x164b   :  { %v8485_v31 = vld [vmem:[%s35106_s19] sm:$0xff]  ;;  %v8486_v53 = vld [vmem:[%s35106_s19 + $0x8] sm:$0xff] }
0x164c   :  { %v7428_v45 = vadd.f32 %v7427_v20, %v7337_v21  ;;  %v8497_v21 = vand.u32 4294901760, %v8485_v31  ;;  %v8500_v20 = vand.u32 4294901760, %v8486_v53 }
0x1651   :  { %v7507_v63 = vpop.f32.mrb[24].mxu0  ;;  %v7742_v34 = vpop.f32.mrb[26].mxu1 }
0x1652   :  { %v7508_v27 = vadd.f32 %v7507_v63, %v7428_v45  ;;  %v24500_v48 = vpop.f32.mrb[25].mxu0  ;;  %v24533_v42 = vpop.f32.mrb[27].mxu1 }
0x1653   :  { %v8487_v42 = vld [vmem:[%s35106_s19 + $0x10] sm:$0xff] }
0x1654   :  { %v7585_v9 = vadd.f32 %v7584_v58, %v7508_v27  ;;  %v8503_v48 = vand.u32 4294901760, %v8487_v42 }
0x1659   :  { %v7667_v17 = vpop.f32.mrb[26].mxu0 }
0x165a   :  { %v7668_v12 = vadd.f32 %v7667_v17, %v7585_v9  ;;  %v24522_v4 = vpop.f32.mrb[27].mxu0  ;;  %v31508_v17 = vsub.f32 %v8485_v31, %v8497_v21  ;;  %v31510_v9 = vsub.f32 %v8486_v53, %v8500_v20 }
0x165b   :  { %v8488_v4 = vld [vmem:[%s35106_s19 + $0x18] sm:$0xff] }
0x165c   :  { %v7743_v52 = vadd.f32 %v7742_v34, %v7668_v12  ;;  %v8506_v27 = vand.u32 4294901760, %v8488_v4  ;;  %v8585_v58 = vand.u32 4294901760, %v31510_v9 }
0x165e   :  { %v7747_v2 = vadd.f32 %v7746_v33, %v7743_v52  ;;  %v31518_v33 = vsub.f32 %v8487_v42, %v8503_v48  ;;  %v31520_v46 = vsub.f32 %v8488_v4, %v8506_v27  ;;  %v8578_v52 = vand.u32 4294901760, %v31508_v17 }
0x165f   :  { %v8586_v31 = vsub.f32 %v31510_v9, %v8585_v58 }
0x1660   :  { %29740 = vtanh.f32 %v7747_v2  ;;  %v8579_v63 = vsub.f32 %v31508_v17, %v8578_v52  ;;  %v8592_v53 = vand.u32 4294901760, %v31518_v33  ;;  %v8599_v42 = vand.u32 4294901760, %v31520_v46 }
0x1661   :  { %v8587_v4 = vand.u32 4294901760, %v8586_v31  ;;  %v35302_v31 = vand.u32 4294901760, %v31349_v54  ;;  %v35308_v54 = vand.u32 4294901760, %v31434_v60 }
0x166a   :  { %v29741_v12 = vpop.eup %29740 }
0x166b   :  { %v31512_v34 = vand.u32 4294901760, %v29741_v12 }
0x166d   :  { %24602 = vmatmul.mubr.f32.vlgmr.msra.gmra.mrb[28].mxu0 %v31512_v34  ;;  %v31516_v2 = vsub.f32 %v29741_v12, %v31512_v34  ;;  %v8593_v12 = vsub.f32 %v31518_v33, %v8592_v53 }
0x166e   :  { %27602 = vmatpush3.bf16.msra.mxu0 %v27601_v61  ;;  %24636 = vmatprep.mubr.msk.f32.mxu0 %vm29826_vm1, %v35175_v36  ;;  %v31531_v61 = vpack.c.bf16 %v8500_v20, %v8497_v21  ;;  %v31545_v20 = vpack.c.bf16 %v8506_v27, %v8503_v48 }
0x166f   :  { %27603 = vmatprep.subr.bf16.mxu0 %v35173_v55  ;;  %v35142_v44 = vand.u32 4294901760, %v31516_v2  ;;  %v8594_v48 = vand.u32 4294901760, %v8593_v12 }
0x1671   :  { %v7859_v45 = vsub.f32 %v31516_v2, %v35142_v44  ;;  %v8600_v44 = vsub.f32 %v31520_v46, %v8599_v42 }
0x1672   :  { %27605 = vmatpush3.bf16.msra.mxu0 %v27604_v3  ;;  %v8580_v3 = vand.u32 4294901760, %v8579_v63  ;;  %v35301_v63 = vand.u32 4294901760, %v31344_v1  ;;  %v35307_v1 = vand.u32 4294901760, %v31432_v7 }
0x1673   :  { %27606 = vmatprep.subr.bf16.mxu0 %v35173_v55  ;;  %v7860_v21 = vand.u32 4294901760, %v7859_v45  ;;  %v8601_v27 = vand.u32 4294901760, %v8600_v44 }
0x1675   :  { %24567 = vmatmul.mubr.f32.vlgmr.msra.gmra.mrb[28].mxu1 %v7860_v21  ;;  %v31570_v45 = vpack.c.bf16 %v8601_v27, %v8594_v48  ;;  %v35143_v48 = vmov 1  }
0x1676   :  { %27608 = vmatpush3.bf16.msra.mxu0 %v27607_v43  ;;  %27698 = vmatpush3.bf16.msra.mxu1 %v31531_v61  ;;  %v31561_v43 = vpack.c.bf16 %v8587_v4, %v8580_v3  ;;  %v27670_v3 = vpack.c.bf16 %v35308_v54, %v35307_v1 }
0x1677   :  { %27609 = vmatprep.subr.bf16.mxu0 %v35173_v55  ;;  %27699 = vmatprep.subr.bf16.mxu1 %v35173_v55 }
0x1678   :  { %24752 = vmatprep.mubr.msk.f32.mxu1 %vm29826_vm1, %v35175_v36  ;;  %29636 = vset.pattern.permute.xlu0 %v35143_v48 }
0x167a   :  { %27611 = vmatpush3.bf16.msra.mxu0 %v27610_v39  ;;  %27701 = vmatpush3.bf16.msra.mxu1 %v31545_v20  ;;  %v35290_v39 = vpack.c.bf16 %v31401_v22, %v31399_v41 }
0x167b   :  { %27612 = vmatprep.subr.bf16.mxu0 %v35173_v55  ;;  %27702 = vmatprep.subr.bf16.mxu1 %v35173_v55 }
0x167d   :  { %24753 = vmatmul.mubr.f32.vlgmr.msra.gmra.mrb[30].mxu1 %v31177_v35  ;;  %v31582_v35 = vpack.c.bf16 %v31510_v9, %v31508_v17  ;;  %v35293_v17 = vand.u32 4294901760, %v31229_v28  ;;  %v35298_v28 = vand.u32 4294901760, %v31285_v32  ;;  %v35304_v32 = vand.u32 4294901760, %v31380_v29  ;;  %v7773_v29 = vpop.permute.xlu0 %7772 }
0x167e   :  { %27614 = vmatpush3.bf16.msra.mxu0 %v27613_v15  ;;  %27704 = vmatpush3.bf16.msra.mxu1 %v31561_v43  ;;  %v31593_v15 = vpack.c.bf16 %v31520_v46, %v31518_v33  ;;  %v31628_v33 = vpack.c.bf16 %v8599_v42, %v8592_v53  ;;  %v35294_v46 = vand.u32 4294901760, %v31516_v2  ;;  %v27661_v53 = vpack.c.bf16 %v35302_v31, %v35301_v63 }
0x167f   :  { %27615 = vmatprep.subr.bf16.mxu0 %v35173_v55  ;;  %27705 = vmatprep.subr.bf16.mxu1 %v35173_v55 }
0x1680   :  { %24763 = vmatprep.mubr.msk.f32.mxu1 %vm29826_vm1, %v35175_v36 }
0x1682   :  { %27617 = vmatpush3.bf16.msra.mxu0 %v27616_v13  ;;  %27707 = vmatpush3.bf16.msra.mxu1 %v31570_v45  ;;  %v35291_v13 = vpack.c.bf16 %v31434_v60, %v31432_v7 }
0x1683   :  { %27618 = vmatprep.subr.bf16.mxu0 %v35173_v55  ;;  %27708 = vmatprep.subr.bf16.mxu1 %v35173_v55 }
0x1685   :  { %24764 = vmatmul.mubr.f32.vlgmr.msra.gmra.mrb[30].mxu1 %v31160_v10 }
0x1686   :  { %27620 = vmatpush3.bf16.msra.mxu0 %v35290_v39  ;;  %27710 = vmatpush3.bf16.msra.mxu1 %v31582_v35 }
0x1687   :  { %27621 = vmatprep.subr.bf16.mxu0 %v35173_v55  ;;  %27711 = vmatprep.subr.bf16.mxu1 %v35173_v55 }
0x1688   :  { %24774 = vmatprep.mubr.msk.f32.mxu1 %vm29826_vm1, %v35175_v36 }
0x168a   :  { %27623 = vmatpush3.bf16.msra.mxu0 %v35291_v13  ;;  %27713 = vmatpush3.bf16.msra.mxu1 %v31593_v15 }
0x168b   :  { %27624 = vmatprep.subr.bf16.mxu0 %v35173_v55  ;;  %27714 = vmatprep.subr.bf16.mxu1 %v35173_v55 }
0x168d   :  { %24637 = vmatmul.mubr.f32.vlgmr.msra.gmra.mrb[28].mxu0 %v31516_v2  ;;  %24775 = vmatmul.mubr.f32.vlgmr.msra.gmra.mrb[30].mxu1 %v31164_v24  ;;  %v31621_v24 = vpack.c.bf16 %v8585_v58, %v8578_v52  ;;  %v35296_v52 = vand.u32 4294901760, %v31255_v57  ;;  %v35299_v2 = vand.u32 4294901760, %v31305_v37  ;;  %v35305_v37 = vand.u32 4294901760, %v31399_v41 }
0x168e   :  { %27626 = vmatpush3.bf16.msra.mxu0 %v31333_v8  ;;  %27716 = vmatpush3.bf16.msra.mxu1 %v31531_v61 }
0x168f   :  { %27627 = vmatprep.subr.bf16.mxu0 %v35173_v55  ;;  %27717 = vmatprep.subr.bf16.mxu1 %v35173_v55 }
0x1690   :  { %24785 = vmatprep.mubr.msk.f32.mxu1 %vm29826_vm1, %v35175_v36  ;;  %24671 = vmatprep.mubr.msk.f32.mxu0 %vm29826_vm1, %v35175_v36 }
0x1692   :  { %27629 = vmatpush3.bf16.msra.mxu0 %v31368_v18  ;;  %27719 = vmatpush3.bf16.msra.mxu1 %v31545_v20 }
0x1693   :  { %27630 = vmatprep.subr.bf16.mxu0 %v35173_v55  ;;  %27720 = vmatprep.subr.bf16.mxu1 %v35173_v55 }
0x1695   :  { %24786 = vmatmul.mubr.f32.vlgmr.msra.gmra.mrb[30].mxu1 %v31171_v25  ;;  %v35292_v25 = vand.u32 4294901760, %v31227_v0  ;;  %v35297_v0 = vand.u32 4294901760, %v31280_v6  ;;  %v35303_v6 = vand.u32 4294901760, %v31377_v30 }
0x1696   :  { %27632 = vmatpush3.bf16.msra.mxu0 %v31397_v51  ;;  %27722 = vmatpush3.bf16.msra.mxu1 %v31621_v24 }
0x1697   :  { %27633 = vmatprep.subr.bf16.mxu0 %v35173_v55  ;;  %27723 = vmatprep.subr.bf16.mxu1 %v35173_v55  ;;  %v27649_v9 = vpack.c.bf16 %v35293_v17, %v35292_v25  ;;  %v27655_v44 = vpack.c.bf16 %v35298_v28, %v35297_v0  ;;  %v27664_v42 = vpack.c.bf16 %v35304_v32, %v35303_v6  ;;  %v35155_v25 = vmov 2   ;;  %v8983_v6 = vld [vmem:[%s35109_s21 + $0x10] sm:$0xff]  ;;  %v8984_v32 = vld [vmem:[%s35109_s21 + $0x18] sm:$0xff] }
0x1698   :  { %24796 = vmatprep.mubr.msk.f32.mxu1 %vm29826_vm1, %v35175_v36  ;;  %v35309_v17 = vmov 0   ;;  %v35145_v0 = vmov 7  }
0x169a   :  { %27635 = vmatpush3.bf16.msra.mxu0 %v31424_v5  ;;  %27725 = vmatpush3.bf16.msra.mxu1 %v31628_v33 }
0x169b   :  { %27636 = vmatprep.subr.bf16.mxu0 %v35173_v55  ;;  %27726 = vmatprep.subr.bf16.mxu1 %v35173_v55 }
0x169d   :  { %24797 = vmatmul.mubr.f32.vlgmr.msra.gmra.mrb[30].mxu1 %v31160_v10 }
0x169e   :  { %27638 = vmatpush3.bf16.msra.mxu0 %v31441_v11  ;;  %27728 = vmatpush3.bf16.msra.mxu1 %v31531_v61 }
0x169f   :  { %27639 = vmatprep.subr.bf16.mxu0 %v35173_v55  ;;  %27729 = vmatprep.subr.bf16.mxu1 %v35173_v55 }
0x16a0   :  { %24807 = vmatprep.mubr.msk.f32.mxu1 %vm29826_vm1, %v35175_v36 }
0x16a2   :  { %27641 = vmatpush3.bf16.msra.mxu0 %v31454_v47  ;;  %27731 = vmatpush3.bf16.msra.mxu1 %v31545_v20 }
0x16a3   :  { %27642 = vmatprep.subr.bf16.mxu0 %v35173_v55  ;;  %27732 = vmatprep.subr.bf16.mxu1 %v35173_v55 }
0x16a5   :  { %24808 = vmatmul.mubr.f32.vlgmr.msra.gmra.mrb[30].mxu1 %v31160_v10  ;;  %v35295_v10 = vand.u32 4294901760, %v31252_v56  ;;  %v35300_v56 = vand.u32 4294901760, %v31310_v19  ;;  %v35306_v19 = vand.u32 4294901760, %v31401_v22 }
0x16a6   :  { %27644 = vmatpush3.bf16.msra.mxu0 %v31459_v50  ;;  %24818 = vmatprep.mubr.msk.f32.mxu1 %vm29826_vm1, %v35175_v36 }
0x16a7   :  { %27645 = vmatprep.subr.bf16.mxu0 %v35173_v55  ;;  %v27652_v58 = vpack.c.bf16 %v35296_v52, %v35295_v10  ;;  %v27658_v57 = vpack.c.bf16 %v35300_v56, %v35299_v2  ;;  %v27667_v21 = vpack.c.bf16 %v35306_v19, %v35305_v37  ;;  %v35147_v10 = vmov 5   ;;  %v8982_v2 = vld [vmem:[%s35109_s21 + $0x8] sm:$0xff] }
0x16a8   :  { %v35149_v52 = vmov 6   ;;  %v9005_v37 = vand.u32 4294901760, %v8984_v32 }
0x16aa   :  { %27647 = vmatpush3.bf16.msra.mxu0 %v31467_v62 }
0x16ab   :  { %27648 = vmatprep.subr.bf16.mxu0 %v35173_v55 }
0x16ad   :  { %24672 = vmatmul.mubr.f32.vlgmr.msra.gmra.mrb[28].mxu0 %v35294_v46  ;;  %v35151_v46 = vmov 4  }
0x16ae   :  { %27650 = vmatpush3.bf16.msra.mxu0 %v27649_v9  ;;  %24706 = vmatprep.mubr.msk.f32.mxu0 %vm29826_vm1, %v35175_v36  ;;  %v35153_v9 = vmov 3  }
0x16af   :  { %27651 = vmatprep.subr.bf16.mxu0 %v35173_v55 }
0x16b2   :  { %27653 = vmatpush3.bf16.msra.mxu0 %v27652_v58  ;;  %v21853_v58 = vld [vmem:[%s35108_s20] ss:$0 sm:$0xff] }
0x16b3   :  { %27654 = vmatprep.subr.bf16.mxu0 %v35173_v55 }
0x16b6   :  { %27656 = vmatpush3.bf16.msra.mxu0 %v27655_v44  ;;  %v8981_v44 = vld [vmem:[%s35109_s21] sm:$0xff] }
0x16b7   :  { %27657 = vmatprep.subr.bf16.mxu0 %v35173_v55  ;;  %v8996_v56 = vand.u32 4294901760, %v8981_v44 }
0x16b9   :  { %v31755_v31 = vsub.f32 %v8981_v44, %v8996_v56  ;;  %v8436_v44 = vld [vmem:[#allocation2 + $0x8] sm:$0xff] }
0x16ba   :  { %27659 = vmatpush3.bf16.msra.mxu0 %v27658_v57  ;;  %v8999_v57 = vand.u32 4294901760, %v8982_v2 }
0x16bb   :  { %27660 = vmatprep.subr.bf16.mxu0 %v35173_v55  ;;  %v9077_v19 = vand.u32 4294901760, %v31755_v31 }
0x16bc   :  { %v31753_v63 = vpack.c.bf16 %v8999_v57, %v8996_v56 }
0x16be   :  { %27662 = vmatpush3.bf16.msra.mxu0 %v27661_v53  ;;  %v31757_v53 = vsub.f32 %v8982_v2, %v8999_v57  ;;  %27734 = vmatpush3.bf16.msra.mxu1 %v31753_v63  ;;  %v8429_v2 = vld [vmem:[#allocation2] sm:$0xff] }
0x16bf   :  { %27663 = vmatprep.subr.bf16.mxu0 %v35173_v55  ;;  %27735 = vmatprep.subr.bf16.mxu1 %v35173_v55 }
0x16c2   :  { %27665 = vmatpush3.bf16.msra.mxu0 %v27664_v42  ;;  %v9002_v42 = vand.u32 4294901760, %v8983_v6 }
0x16c3   :  { %27666 = vmatprep.subr.bf16.mxu0 %v35173_v55 }
0x16c4   :  { %v31769_v1 = vpack.c.bf16 %v9005_v37, %v9002_v42  ;;  %v31771_v54 = vsub.f32 %v8983_v6, %v9002_v42  ;;  %v8443_v6 = vld [vmem:[#allocation2 + $0x10] sm:$0xff]  ;;  %v8450_v42 = vld [vmem:[#allocation2 + $0x18] sm:$0xff] }
0x16c6   :  { %27668 = vmatpush3.bf16.msra.mxu0 %v27667_v21  ;;  %v9084_v21 = vand.u32 4294901760, %v31757_v53  ;;  %27737 = vmatpush3.bf16.msra.mxu1 %v31769_v1 }
0x16c7   :  { %27669 = vmatprep.subr.bf16.mxu0 %v35173_v55  ;;  %27738 = vmatprep.subr.bf16.mxu1 %v35173_v55 }
0x16ca   :  { %27671 = vmatpush3.bf16.msra.mxu0 %v27670_v3  ;;  %v31773_v3 = vsub.f32 %v8984_v32, %v9005_v37 }
0x16cb   :  { %27672 = vmatprep.subr.bf16.mxu0 %v35173_v55 }
0x16cd   :  { %24707 = vmatmul.mubr.f32.vlgmr.msra.gmra.mrb[28].mxu0 %v31512_v34 }
0x16ce   :  { %27674 = vmatpush3.bf16.msra.mxu0 %v31333_v8  ;;  %24741 = vmatprep.mubr.msk.f32.mxu0 %vm29826_vm1, %v35175_v36 }
0x16cf   :  { %27675 = vmatprep.subr.bf16.mxu0 %v35173_v55 }
0x16d2   :  { %27677 = vmatpush3.bf16.msra.mxu0 %v31368_v18 }
0x16d3   :  { %27678 = vmatprep.subr.bf16.mxu0 %v35173_v55 }
0x16d6   :  { %27680 = vmatpush3.bf16.msra.mxu0 %v31397_v51 }
0x16d7   :  { %27681 = vmatprep.subr.bf16.mxu0 %v35173_v55 }
0x16da   :  { %27683 = vmatpush3.bf16.msra.mxu0 %v31424_v5 }
0x16db   :  { %27684 = vmatprep.subr.bf16.mxu0 %v35173_v55 }
0x16de   :  { %27686 = vmatpush3.bf16.msra.mxu0 %v31441_v11 }
0x16df   :  { %27687 = vmatprep.subr.bf16.mxu0 %v35173_v55 }
0x16e2   :  { %27689 = vmatpush3.bf16.msra.mxu0 %v31454_v47 }
0x16e3   :  { %27690 = vmatprep.subr.bf16.mxu0 %v35173_v55 }
0x16e6   :  { %27692 = vmatpush3.bf16.msra.mxu0 %v31459_v50 }
0x16e7   :  { %27693 = vmatprep.subr.bf16.mxu0 %v35173_v55 }
0x16ea   :  { %27695 = vmatpush3.bf16.msra.mxu0 %v31467_v62  ;;  %v7246_v62 = vld [vmem:[%s35107_s4] sm:$0xff] }
0x16eb   :  { %27948 = vmatprep.subr.bf16.mxu0 %v35173_v55 }
0x16ed   :  { %24742 = vmatmul.mubr.f32.vlgmr.msra.gmra.mrb[28].mxu0 %v31512_v34 }
0x16ee   :  { %27950 = vmatpush3.bf16.msra.mxu0 %v31531_v61  ;;  %25160 = vmatprep.mubr.msk.f32.mxu0 %vm29826_vm1, %v35175_v36 }
0x16ef   :  { %27951 = vmatprep.subr.bf16.mxu0 %v35173_v55 }
0x16f2   :  { %27953 = vmatpush3.bf16.msra.mxu0 %v31545_v20 }
0x16f3   :  { %27954 = vmatprep.subr.bf16.mxu0 %v35173_v55 }
0x1748   :  { %v7862_v8 = vpop.f32.mrb[28].mxu1 }
0x1749   :  { %v24568_v7 = vpop.f32.mrb[29].mxu1  ;;  %v7863_v5 = vadd.f32 %v7862_v8, %v7773_v29  ;;  %v9078_v8 = vsub.f32 %v31755_v31, %v9077_v19  ;;  %v9098_v29 = vand.u32 4294901760, %v31773_v3 }
0x174a   :  { %v9085_v7 = vsub.f32 %v31757_v53, %v9084_v21 }
0x1778   :  { %v8977_v18 = vpop.f32.mrb[30].mxu1 }
0x1779   :  { %v24809_v30 = vpop.f32.mrb[31].mxu1  ;;  %v31742_v28 = vadd.f32 %v21853_v58, %v8977_v18  ;;  %v9079_v18 = vand.u32 4294901760, %v9078_v8 }
0x177a   :  { %v9091_v30 = vand.u32 4294901760, %v31771_v54 }
0x17c0   :  { %v8412_v51 = vpop.f32.mrb[28].mxu0 }
0x17c1   :  { %v29188_v41 = vadd.f32 %v8412_v51, %v7863_v5  ;;  %v24743_v22 = vpop.f32.mrb[29].mxu0  ;;  %v9086_v5 = vand.u32 4294901760, %v9085_v7  ;;  %v9092_v51 = vsub.f32 %v31771_v54, %v9091_v30 }
0x17c3   :  { %v8417_v60 = vsel %vm8416_vm10, %v29188_v41, -inf  ;;  %v27739_v22 = vpack.c.bf16 %v9086_v5, %v9079_v18 }
0x17c4   :  { %8418 = vmax.xlane.f32.xlu1 %v8417_v60  ;;  %v9093_v60 = vand.u32 4294901760, %v9092_v51 }
0x1851   :  { %v8419_v11 = vpop.xlane.xlu1 %8418 }
0x1852   :  { %v8420_v47 = vsub.f32 %v29188_v41, %v8419_v11  ;;  %v9099_v41 = vsub.f32 %v31773_v3, %v9098_v29 }
0x1854   :  { %v8421_v50 = vmul.f32 1.442695, %v8420_v47  ;;  %v9100_v11 = vand.u32 4294901760, %v9099_v41  ;;  %v8478_v41 = vld [vmem:[#allocation2 + $0x38] sm:$0xff] }
0x1856   :  { %29742 = vpow2.f32 %v8421_v50  ;;  %v27742_v47 = vpack.c.bf16 %v9100_v11, %v9093_v60  ;;  %v27745_v50 = vpack.c.bf16 %v31757_v53, %v31755_v31  ;;  %v8457_v53 = vld [vmem:[#allocation2 + $0x20] sm:$0xff] }
0x1860   :  { %v29743_v34 = vpop.eup %29742 }
0x1861   :  { %v8423_v4 = vmul.f32 %v29743_v34, %v7246_v62  ;;  %v27748_v62 = vpack.c.bf16 %v31773_v3, %v31771_v54  ;;  %v27757_v34 = vpack.c.bf16 %v9084_v21, %v9077_v19  ;;  %v8464_v19 = vld [vmem:[#allocation2 + $0x28] sm:$0xff] }
0x1863   :  { %v8424_v12 = vsel %vm8416_vm10, %v8423_v4, 0.0 }
0x1864   :  { %8425 = vadd.xlane.f32.xlu0 %v8424_v12 }
0x18f1   :  { %v8426_v27 = vpop.xlane.xlu0 %8425 }
0x18f2   :  { %29744 = vrcp.f32 %v8426_v27 }
0x18fc   :  { %v29745_v39 = vpop.eup %29744 }
0x18fd   :  { %v8428_v13 = vmul.f32 %v29745_v39, %v8423_v4  ;;  %v27760_v4 = vpack.c.bf16 %v9098_v29, %v9091_v30  ;;  %v8471_v30 = vld [vmem:[#allocation2 + $0x30] sm:$0xff] }
0x18ff   :  { %8438 = vperm.xlu0 %29636, %v8428_v13   ;;  %8432 = vperm.xlu1 %29635, %v8428_v13  }
0x1903   :  { %29637 = vset.pattern.permute.xlu1 %v35155_v25  ;;  %29643 = vset.pattern.permute.xlu0 %v35309_v17 }
0x1904   :  { %8445 = vperm.xlu1 %29637, %v8428_v13  }
0x1908   :  { %29638 = vset.pattern.permute.xlu1 %v35153_v9 }
0x1909   :  { %8452 = vperm.xlu1 %29638, %v8428_v13  }
0x190d   :  { %29639 = vset.pattern.permute.xlu1 %v35151_v46 }
0x190e   :  { %8459 = vperm.xlu1 %29639, %v8428_v13  }
0x1912   :  { %29640 = vset.pattern.permute.xlu1 %v35147_v10 }
0x1913   :  { %8466 = vperm.xlu1 %29640, %v8428_v13  }
0x1917   :  { %29641 = vset.pattern.permute.xlu1 %v35149_v52 }
0x1918   :  { %8473 = vperm.xlu1 %29641, %v8428_v13  }
0x191c   :  { %29642 = vset.pattern.permute.xlu1 %v35145_v0 }
0x191d   :  { %8480 = vperm.xlu1 %29642, %v8428_v13  }
0x1921   :  { %9489 = vrot.lane.b32.xlu1 %v31742_v28, %s29828_s27 }
0x1922   :  { %29644 = vset.pattern.permute.xlu1 %v35309_v17 }
0x197e   :  { %v8433_v12 = vpop.permute.xlu1 %8432  ;;  %v8439_v13 = vpop.permute.xlu0 %8438 }
0x197f   :  { %v8441_v56 = vmul.f32 %v8439_v13, %v8436_v44  ;;  %v8435_v57 = vmul.f32 %v8433_v12, %v8429_v2 }
0x1981   :  { %v8442_v8 = vadd.f32 %v8441_v56, %v8435_v57 }
0x1983   :  { %v8446_v27 = vpop.permute.xlu1 %8445 }
0x1984   :  { %v8448_v32 = vmul.f32 %v8446_v27, %v8443_v6 }
0x1986   :  { %v8449_v7 = vadd.f32 %v8448_v32, %v8442_v8 }
0x1988   :  { %v8453_v39 = vpop.permute.xlu1 %8452 }
0x1989   :  { %v8455_v31 = vmul.f32 %v8453_v39, %v8450_v42 }
0x198b   :  { %v8456_v21 = vadd.f32 %v8455_v31, %v8449_v7  ;;  %v9529_v7 = vld [vmem:[%s35099_s13] sm:$0xff] }
0x198d   :  { %v8460_v58 = vpop.permute.xlu1 %8459 }
0x198e   :  { %v8462_v54 = vmul.f32 %v8460_v58, %v8457_v53 }
0x1990   :  { %v8463_v29 = vadd.f32 %v8462_v54, %v8456_v21  ;;  %v9530_v54 = vld [vmem:[%s35099_s13 + $0x8] sm:$0xff] }
0x1991   :  { %v9547_v21 = vand.u32 4294901760, %v9530_v54 }
0x1992   :  { %v8467_v37 = vpop.permute.xlu1 %8466 }
0x1993   :  { %v8469_v3 = vmul.f32 %v8467_v37, %v8464_v19  ;;  %v9544_v19 = vand.u32 4294901760, %v9529_v7 }
0x1995   :  { %v8470_v51 = vadd.f32 %v8469_v3, %v8463_v29  ;;  %v31837_v3 = vpack.c.bf16 %v9547_v21, %v9544_v19  ;;  %v9531_v29 = vld [vmem:[%s35099_s13 + $0x10] sm:$0xff] }
0x1997   :  { %v8474_v18 = vpop.permute.xlu1 %8473 }
0x1998   :  { %v8476_v5 = vmul.f32 %v8474_v18, %v8471_v30  ;;  %v31839_v18 = vsub.f32 %v9529_v7, %v9544_v19  ;;  %v9631_v30 = vsub.f32 %v9530_v54, %v9547_v21 }
0x199a   :  { %v8477_v11 = vadd.f32 %v8476_v5, %v8470_v51  ;;  %v9532_v5 = vld [vmem:[%s35099_s13 + $0x18] sm:$0xff]  ;;  %v9550_v51 = vand.u32 4294901760, %v9531_v29 }
0x199c   :  { %v8481_v60 = vpop.permute.xlu1 %8480 }
0x199d   :  { %v8483_v12 = vmul.f32 %v8481_v60, %v8478_v41  ;;  %v9553_v41 = vand.u32 4294901760, %v9532_v5  ;;  %v9625_v60 = vand.u32 4294901760, %v31839_v18 }
0x199f   :  { %v31787_v27 = vadd.f32 %v8483_v12, %v8477_v11  ;;  %v9632_v11 = vand.u32 4294901760, %v9631_v30 }
0x19a0   :  { %v9490_v37 = vpop.permute.xlu1 %9489 }
0x19a1   :  { %35310 = vst [vmem:[#allocation10_spill] sm:$0xff] %v31787_v27  ;;  %v8993_v39 = vsel %vm101_vm0, %v31787_v27, 0 }
0x19a2   :  { %v9064_v13 = vand.u32 4294901760, %v8993_v39 }
0x19a4   :  { %v9065_v44 = vsub.f32 %v8993_v39, %v9064_v13  ;;  %v31851_v39 = vpack.c.bf16 %v9553_v41, %v9550_v51 }
0x19a6   :  { %v9066_v58 = vand.u32 4294901760, %v9065_v44 }
0x19a8   :  { %v9067_v2 = vsub.f32 %v9065_v44, %v9066_v58 }
0x19aa   :  { %v9068_v56 = vand.u32 4294901760, %v9067_v2  ;;  %v9633_v2 = vsub.f32 %v9631_v30, %v9632_v11 }
0x19ac   :  { %24819 = vmatmul.mubr.f32.vlgmr.msra.gmra.mrb[32].mxu1 %v9068_v56 }
0x19ad   :  { %27740 = vmatpush3.bf16.msra.mxu1 %v27739_v22  ;;  %24829 = vmatprep.mubr.msk.f32.mxu1 %vm29826_vm1, %v35175_v36  ;;  %v9508_v22 = vld [vmem:[%s35110_s3] sm:$0xff] }
0x19ae   :  { %27741 = vmatprep.subr.bf16.mxu1 %v35173_v55  ;;  %9511 = vperm.xlu0 %29643, %v9508_v22   ;;  %v9515_v31 = vsub.f32 1.0, %v9508_v22  ;;  %v9634_v22 = vand.u32 4294901760, %v9633_v2 }
0x19b1   :  { %27743 = vmatpush3.bf16.msra.mxu1 %v27742_v47 }
0x19b2   :  { %27744 = vmatprep.subr.bf16.mxu1 %v35173_v55  ;;  %10054 = vperm.xlu0 %29643, %v31493_v59  }
0x19b4   :  { %24830 = vmatmul.mubr.f32.vlgmr.msra.gmra.mrb[32].mxu1 %v9064_v13 }
0x19b5   :  { %27746 = vmatpush3.bf16.msra.mxu1 %v27745_v50  ;;  %24840 = vmatprep.mubr.msk.f32.mxu1 %vm29826_vm1, %v35175_v36 }
0x19b6   :  { %27747 = vmatprep.subr.bf16.mxu1 %v35173_v55 }
0x19b9   :  { %27749 = vmatpush3.bf16.msra.mxu1 %v27748_v62 }
0x19ba   :  { %27750 = vmatprep.subr.bf16.mxu1 %v35173_v55 }
0x19bc   :  { %24841 = vmatmul.mubr.f32.vlgmr.msra.gmra.mrb[32].mxu1 %v9065_v44  ;;  %v9645_v44 = vsub.f32 %v9532_v5, %v9553_v41 }
0x19bd   :  { %27752 = vmatpush3.bf16.msra.mxu1 %v31753_v63  ;;  %24851 = vmatprep.mubr.msk.f32.mxu1 %vm29826_vm1, %v35175_v36 }
0x19be   :  { %27753 = vmatprep.subr.bf16.mxu1 %v35173_v55 }
0x19c1   :  { %27755 = vmatpush3.bf16.msra.mxu1 %v31769_v1 }
0x19c2   :  { %27756 = vmatprep.subr.bf16.mxu1 %v35173_v55 }
0x19c4   :  { %24852 = vmatmul.mubr.f32.vlgmr.msra.gmra.mrb[32].mxu1 %v9066_v58  ;;  %v9626_v58 = vsub.f32 %v31839_v18, %v9625_v60 }
0x19c5   :  { %27758 = vmatpush3.bf16.msra.mxu1 %v27757_v34  ;;  %24862 = vmatprep.mubr.msk.f32.mxu1 %vm29826_vm1, %v35175_v36 }
0x19c6   :  { %27759 = vmatprep.subr.bf16.mxu1 %v35173_v55  ;;  %v9627_v56 = vand.u32 4294901760, %v9626_v58 }
0x19c9   :  { %27761 = vmatpush3.bf16.msra.mxu1 %v27760_v4 }
0x19ca   :  { %27762 = vmatprep.subr.bf16.mxu1 %v35173_v55 }
0x19cc   :  { %24863 = vmatmul.mubr.f32.vlgmr.msra.gmra.mrb[32].mxu1 %v9064_v13 }
0x19cd   :  { %27764 = vmatpush3.bf16.msra.mxu1 %v31753_v63  ;;  %24873 = vmatprep.mubr.msk.f32.mxu1 %vm29826_vm1, %v35175_v36  ;;  %v21854_v63 = vld [vmem:[%s35111_s22] ss:$0 sm:$0xff] }
0x19ce   :  { %27765 = vmatprep.subr.bf16.mxu1 %v35173_v55 }
0x19d1   :  { %27767 = vmatpush3.bf16.msra.mxu1 %v31769_v1  ;;  %v29812_v1 = vld [vmem:[%s35102_s18] ss:$0 sm:$0xff] }
0x19d2   :  { %27768 = vmatprep.subr.bf16.mxu1 %v35173_v55  ;;  %v29182_v47 = vadd.f32 %v29812_v1, %v31211_v38  ;;  %v9646_v1 = vand.u32 4294901760, %v9645_v44 }
0x19d4   :  { %24874 = vmatmul.mubr.f32.vlgmr.msra.gmra.mrb[32].mxu1 %v9064_v13  ;;  %v9480_v62 = vadd.f32 %v31742_v28, %v29182_v47  ;;  %v9638_v13 = vsub.f32 %v9531_v29, %v9550_v51 }
0x19d5   :  { %24884 = vmatprep.mubr.msk.f32.mxu1 %vm29826_vm1, %v35175_v36  ;;  %27770 = vmatpush3.bf16.msra.mxu1 %v31837_v3 }
0x19d6   :  { %27771 = vmatprep.subr.bf16.mxu1 %v35173_v55 }
0x19d9   :  { %27773 = vmatpush3.bf16.msra.mxu1 %v31851_v39 }
0x19da   :  { %27774 = vmatprep.subr.bf16.mxu1 %v35173_v55 }
0x1a2d   :  { %v9512_v54 = vpop.permute.xlu0 %9511 }
0x1aa7   :  { %v9476_v50 = vpop.f32.mrb[32].mxu1 }
0x1aa8   :  { %v29190_v34 = vadd.f32 %v21854_v63, %v9476_v50  ;;  %v24875_v4 = vpop.f32.mrb[33].mxu1  ;;  %v9639_v63 = vand.u32 4294901760, %v9638_v13 }
0x1aaa   :  { %v9481_v57 = vadd.f32 %v29190_v34, %v9480_v62  ;;  %v9640_v50 = vsub.f32 %v9638_v13, %v9639_v63  ;;  %v9647_v62 = vsub.f32 %v9645_v44, %v9646_v1 }
0x1aac   :  { %v21855_v6 = vmul.f32 -1.442695, %v9481_v57  ;;  %v9648_v4 = vand.u32 4294901760, %v9647_v62  ;;  %v10039_v62 = vld [vmem:[%s35103_s15 + $0x40] sm:$0xff] }
0x1aae   :  { %29746 = vpow2.f32 %v21855_v6  ;;  %v27781_v6 = vpack.c.bf16 %v9631_v30, %v31839_v18 }
0x1ab8   :  { %v29747_v32 = vpop.eup %29746 }
0x1ab9   :  { %v9485_v59 = vadd.f32 1.0, %v29747_v32  ;;  %v27784_v32 = vpack.c.bf16 %v9645_v44, %v9638_v13  ;;  %v10035_v13 = vld [vmem:[%s35103_s15 + $0x20] sm:$0xff]  ;;  %v10036_v44 = vld [vmem:[%s35103_s15 + $0x28] sm:$0xff] }
0x1aba   :  { %v10070_v58 = vand.u32 4294901760, %v10035_v13  ;;  %v10073_v2 = vand.u32 4294901760, %v10036_v44 }
0x1abb   :  { %29748 = vrcp.f32 %v9485_v59  ;;  %v27793_v59 = vpack.c.bf16 %v9632_v11, %v9625_v60 }
0x1ac5   :  { %v29749_v42 = vpop.eup %29748 }
0x1ac6   :  { %v9492_v8 = vmul.f32 %v29749_v42, %v9490_v37  ;;  %v27796_v37 = vpack.c.bf16 %v9646_v1, %v9639_v63  ;;  %v10038_v63 = vld [vmem:[%s35103_s15 + $0x38] sm:$0xff] }
0x1ac8   :  { %9494 = vrot.lane.b32.xlu1 %v9492_v8, %s29829_s5 }
0x1acc   :  { %9518 = vperm.xlu1 %29644, %v9515_v31   ;;  %v9500_v31 = vsub.f32 1.0, %v29749_v42 }
0x1ad0   :  { %29645 = vset.pattern.permute.xlu1 %v35143_v48 }
0x1b3a   :  { %v9495_v38 = vpop.permute.xlu1 %9494 }
0x1b3b   :  { %v9497_v53 = vadd.f32 %v29182_v47, %v9495_v38  ;;  %v27775_v47 = vpack.c.bf16 %v9634_v22, %v9627_v56  ;;  %v31964_v56 = vpack.c.bf16 %v10073_v2, %v10070_v58  ;;  %v10037_v22 = vld [vmem:[%s35103_s15 + $0x30] sm:$0xff] }
0x1b3c   :  { %v10076_v1 = vand.u32 4294901760, %v10037_v22 }
0x1b3d   :  { %v9498_v28 = vadd.f32 %v29190_v34, %v9497_v53  ;;  %v9641_v34 = vand.u32 4294901760, %v9640_v50 }
0x1b3f   :  { %29750 = vtanh.f32 %v9498_v28  ;;  %v27778_v57 = vpack.c.bf16 %v9648_v4, %v9641_v34  ;;  %v9501_v28 = vmul.f32 %v31156_v49, %v9500_v31  ;;  %v10040_v34 = vld [vmem:[%s35103_s15 + $0x48] sm:$0xff]  ;;  %v10082_v4 = vand.u32 4294901760, %v10039_v62 }
0x1b49   :  { %v29751_v12 = vpop.eup %29750 }
0x1b4a   :  { %9503 = vrot.lane.b32.xlu1 %v29751_v12, %s29830_s29 }
0x1b4b   :  { %v9519_v8 = vpop.permute.xlu1 %9518 }
0x1b4c   :  { %v9521_v19 = vmul.f32 %v31156_v49, %v9519_v8  ;;  %v10031_v49 = vld [vmem:[%s35103_s15] sm:$0xff] }
0x1bbc   :  { %v9504_v38 = vpop.permute.xlu1 %9503 }
0x1bbd   :  { %v9506_v53 = vmul.f32 %v29749_v42, %v9504_v38  ;;  %v10043_v38 = vld [vmem:[%s35103_s15 + $0x60] sm:$0xff] }
0x1bbf   :  { %v9507_v7 = vadd.f32 %v9506_v53, %v9501_v28  ;;  %v10044_v53 = vld [vmem:[%s35103_s15 + $0x68] sm:$0xff]  ;;  %v10094_v28 = vand.u32 4294901760, %v10043_v38 }
0x1bc1   :  { %v9514_v21 = vmul.f32 %v9512_v54, %v9507_v7  ;;  %v10097_v7 = vand.u32 4294901760, %v10044_v53  ;;  %v32004_v54 = vsub.f32 %v10035_v13, %v10070_v58 }
0x1bc3   :  { %v31859_v29 = vadd.f32 %v9521_v19, %v9514_v21  ;;  %v32006_v19 = vsub.f32 %v10036_v44, %v10073_v2  ;;  %v32008_v21 = vsub.f32 %v10037_v22, %v10076_v1 }
0x1bc5   :  { %35311 = vst [vmem:[#allocation11_spill] sm:$0xff] %v31859_v29  ;;  %v9541_v5 = vsel %vm101_vm0, %v31859_v29, 0 }
0x1bc6   :  { %v31863_v18 = vand.u32 4294901760, %v9541_v5 }
0x1bc8   :  { %v9613_v30 = vsub.f32 %v9541_v5, %v31863_v18 }
0x1bca   :  { %v9614_v51 = vand.u32 4294901760, %v9613_v30 }
0x1bcc   :  { %v9615_v41 = vsub.f32 %v9613_v30, %v9614_v51 }
0x1bce   :  { %v9616_v60 = vand.u32 4294901760, %v9615_v41 }
0x1bd0   :  { %24885 = vmatmul.mubr.f32.vlgmr.msra.gmra.mrb[34].mxu1 %v9616_v60  ;;  %25161 = vmatmul.mubr.f32.vlgmr.msra.gmra.mrb[30].mxu0 %v9616_v60 }
0x1bd1   :  { %27776 = vmatpush3.bf16.msra.mxu1 %v27775_v47  ;;  %27956 = vmatpush3.bf16.msra.mxu0 %v31561_v43  ;;  %v10079_v47 = vand.u32 4294901760, %v10038_v63 }
0x1bd2   :  { %27777 = vmatprep.subr.bf16.mxu1 %v35173_v55  ;;  %27957 = vmatprep.subr.bf16.mxu0 %v35173_v55 }
0x1bd3   :  { %24895 = vmatprep.mubr.msk.f32.mxu1 %vm29826_vm1, %v35175_v36  ;;  %25171 = vmatprep.mubr.msk.f32.mxu0 %vm29826_vm1, %v35175_v36  ;;  %v31974_v50 = vpack.c.bf16 %v10079_v47, %v10076_v1  ;;  %v32010_v5 = vsub.f32 %v10038_v63, %v10079_v47 }
0x1bd5   :  { %27779 = vmatpush3.bf16.msra.mxu1 %v27778_v57  ;;  %27959 = vmatpush3.bf16.msra.mxu0 %v31570_v45  ;;  %v10085_v57 = vand.u32 4294901760, %v10040_v34 }
0x1bd6   :  { %27780 = vmatprep.subr.bf16.mxu1 %v35173_v55  ;;  %27960 = vmatprep.subr.bf16.mxu0 %v35173_v55 }
0x1bd7   :  { %v32020_v41 = vsub.f32 %v10040_v34, %v10085_v57 }
0x1bd8   :  { %24896 = vmatmul.mubr.f32.vlgmr.msra.gmra.mrb[36].mxu1 %v31863_v18  ;;  %25172 = vmatmul.mubr.f32.vlgmr.msra.gmra.mrb[30].mxu0 %v31863_v18 }
0x1bd9   :  { %27782 = vmatpush3.bf16.msra.mxu1 %v27781_v6  ;;  %27962 = vmatpush3.bf16.msra.mxu0 %v31582_v35  ;;  %v31984_v6 = vpack.c.bf16 %v10085_v57, %v10082_v4 }
0x1bda   :  { %27783 = vmatprep.subr.bf16.mxu1 %v35173_v55  ;;  %27963 = vmatprep.subr.bf16.mxu0 %v35173_v55 }
0x1bdb   :  { %24906 = vmatprep.mubr.msk.f32.mxu1 %vm29826_vm1, %v35175_v36  ;;  %25182 = vmatprep.mubr.msk.f32.mxu0 %vm29826_vm1, %v35175_v36 }
0x1bdd   :  { %27785 = vmatpush3.bf16.msra.mxu1 %v27784_v32  ;;  %27965 = vmatpush3.bf16.msra.mxu0 %v31593_v15  ;;  %v10041_v32 = vld [vmem:[%s35103_s15 + $0x50] sm:$0xff] }
0x1bde   :  { %27786 = vmatprep.subr.bf16.mxu1 %v35173_v55  ;;  %27966 = vmatprep.subr.bf16.mxu0 %v35173_v55 }
0x1be0   :  { %24907 = vmatmul.mubr.f32.vlgmr.msra.gmra.mrb[38].mxu1 %v9613_v30  ;;  %25183 = vmatmul.mubr.f32.vlgmr.msra.gmra.mrb[30].mxu0 %v9613_v30  ;;  %v10046_v30 = vld [vmem:[%s35103_s15 + $0x78] sm:$0xff] }
0x1be1   :  { %27788 = vmatpush3.bf16.msra.mxu1 %v31837_v3  ;;  %27968 = vmatpush3.bf16.msra.mxu0 %v31531_v61 }
0x1be2   :  { %27789 = vmatprep.subr.bf16.mxu1 %v35173_v55  ;;  %27969 = vmatprep.subr.bf16.mxu0 %v35173_v55 }
0x1be3   :  { %24917 = vmatprep.mubr.msk.f32.mxu1 %vm29826_vm1, %v35175_v36  ;;  %25193 = vmatprep.mubr.msk.f32.mxu0 %vm29826_vm1, %v35175_v36 }
0x1be5   :  { %27791 = vmatpush3.bf16.msra.mxu1 %v31851_v39  ;;  %27971 = vmatpush3.bf16.msra.mxu0 %v31545_v20 }
0x1be6   :  { %27792 = vmatprep.subr.bf16.mxu1 %v35173_v55  ;;  %27972 = vmatprep.subr.bf16.mxu0 %v35173_v55 }
0x1be8   :  { %24918 = vmatmul.mubr.f32.vlgmr.msra.gmra.mrb[40].mxu1 %v9614_v51  ;;  %25194 = vmatmul.mubr.f32.vlgmr.msra.gmra.mrb[30].mxu0 %v9614_v51  ;;  %v32018_v51 = vsub.f32 %v10039_v62, %v10082_v4 }
0x1be9   :  { %27794 = vmatpush3.bf16.msra.mxu1 %v27793_v59  ;;  %27974 = vmatpush3.bf16.msra.mxu0 %v31621_v24  ;;  %v10033_v24 = vld [vmem:[%s35103_s15 + $0x10] sm:$0xff]  ;;  %v10042_v59 = vld [vmem:[%s35103_s15 + $0x58] sm:$0xff] }
0x1bea   :  { %27795 = vmatprep.subr.bf16.mxu1 %v35173_v55  ;;  %27975 = vmatprep.subr.bf16.mxu0 %v35173_v55  ;;  %v10064_v42 = vand.u32 4294901760, %v10033_v24  ;;  %v10091_v8 = vand.u32 4294901760, %v10042_v59 }
0x1beb   :  { %24928 = vmatprep.mubr.msk.f32.mxu1 %vm29826_vm1, %v35175_v36  ;;  %25204 = vmatprep.mubr.msk.f32.mxu0 %vm29826_vm1, %v35175_v36 }
0x1bec   :  { %v31952_v12 = vsub.f32 %v10033_v24, %v10064_v42 }
0x1bed   :  { %27797 = vmatpush3.bf16.msra.mxu1 %v27796_v37  ;;  %27977 = vmatpush3.bf16.msra.mxu0 %v31628_v33  ;;  %v10034_v33 = vld [vmem:[%s35103_s15 + $0x18] sm:$0xff]  ;;  %v10088_v37 = vand.u32 4294901760, %v10041_v32 }
0x1bee   :  { %27798 = vmatprep.subr.bf16.mxu1 %v35173_v55  ;;  %27978 = vmatprep.subr.bf16.mxu0 %v35173_v55  ;;  %v35170_v47 = vand.u32 4294901760, %v31952_v12 }
0x1bef   :  { %v31994_v31 = vpack.c.bf16 %v10091_v8, %v10088_v37  ;;  %v32022_v60 = vsub.f32 %v10041_v32, %v10088_v37  ;;  %v35168_v37 = vand.u32 4294901760, %v32004_v54 }
0x1bf0   :  { %24929 = vmatmul.mubr.f32.vlgmr.msra.gmra.mrb[42].mxu1 %v31863_v18  ;;  %25205 = vmatmul.mubr.f32.vlgmr.msra.gmra.mrb[30].mxu0 %v31863_v18  ;;  %v10166_v4 = vsub.f32 %v31952_v12, %v35170_v47 }
0x1bf1   :  { %27800 = vmatpush3.bf16.msra.mxu1 %v31837_v3  ;;  %27980 = vmatpush3.bf16.msra.mxu0 %v31531_v61  ;;  %v10032_v61 = vld [vmem:[%s35103_s15 + $0x8] sm:$0xff]  ;;  %v10067_v3 = vand.u32 4294901760, %v10034_v33 }
0x1bf2   :  { %27801 = vmatprep.subr.bf16.mxu1 %v35173_v55  ;;  %27981 = vmatprep.subr.bf16.mxu0 %v35173_v55  ;;  %v10061_v43 = vand.u32 4294901760, %v10032_v61  ;;  %v10167_v32 = vand.u32 4294901760, %v10166_v4  ;;  %v35164_v4 = vand.u32 4294901760, %v32018_v51 }
0x1bf3   :  { %24939 = vmatprep.mubr.msk.f32.mxu1 %vm29826_vm1, %v35175_v36  ;;  %25215 = vmatprep.mubr.msk.f32.mxu0 %vm29826_vm1, %v35175_v36  ;;  %v31950_v11 = vpack.c.bf16 %v10067_v3, %v10064_v42 }
0x1bf4   :  { %v31940_v15 = vsub.f32 %v10032_v61, %v10061_v43  ;;  %v32026_v61 = vpack.c.bf16 %v10097_v7, %v10094_v28 }
0x1bf5   :  { %27803 = vmatpush3.bf16.msra.mxu1 %v31851_v39  ;;  %27983 = vmatpush3.bf16.msra.mxu0 %v31545_v20  ;;  %v10058_v20 = vand.u32 4294901760, %v10031_v49  ;;  %v31954_v39 = vsub.f32 %v10034_v33, %v10067_v3  ;;  %v10103_v33 = vand.u32 4294901760, %v10046_v30 }
0x1bf6   :  { %27804 = vmatprep.subr.bf16.mxu1 %v35173_v55  ;;  %27984 = vmatprep.subr.bf16.mxu0 %v35173_v55  ;;  %v35171_v3 = vand.u32 4294901760, %v31940_v15 }
0x1bf7   :  { %v31936_v45 = vpack.c.bf16 %v10061_v43, %v10058_v20  ;;  %v31938_v35 = vsub.f32 %v10031_v49, %v10058_v20  ;;  %v32024_v49 = vsub.f32 %v10042_v59, %v10091_v8  ;;  %v32028_v20 = vsub.f32 %v10043_v38, %v10094_v28 }
0x1bf8   :  { %24940 = vmatmul.mubr.f32.vlgmr.msra.gmra.mrb[44].mxu1 %v31863_v18  ;;  %25216 = vmatmul.mubr.f32.vlgmr.msra.gmra.mrb[30].mxu0 %v31863_v18  ;;  %v10045_v18 = vld [vmem:[%s35103_s15 + $0x70] sm:$0xff]  ;;  %v32030_v43 = vsub.f32 %v10044_v53, %v10097_v7  ;;  %v32040_v58 = vsub.f32 %v10046_v30, %v10103_v33  ;;  %v10159_v22 = vsub.f32 %v31940_v15, %v35171_v3  ;;  %v35169_v62 = vand.u32 4294901760, %v31954_v39 }
0x1bf9   :  { %24974 = vmatprep.mubr.msk.f32.mxu1 %vm29826_vm1, %v35175_v36  ;;  %25226 = vmatprep.mubr.msk.f32.mxu0 %vm29826_vm1, %v35175_v36  ;;  %v10100_v24 = vand.u32 4294901760, %v10045_v18  ;;  %v35172_v42 = vand.u32 4294901760, %v31938_v35  ;;  %v35167_v8 = vand.u32 4294901760, %v32006_v19  ;;  %v10180_v53 = vsub.f32 %v32004_v54, %v35168_v37 }
0x1bfa   :  { %27806 = vmatpush3.bf16.msra.mxu1 %v31936_v45  ;;  %v10160_v1 = vand.u32 4294901760, %v10159_v22  ;;  %v10173_v57 = vsub.f32 %v31954_v39, %v35169_v62  ;;  %v35166_v30 = vand.u32 4294901760, %v32008_v21  ;;  %v35157_v10 = vand.u32 4294901760, %v32028_v20 }
0x1bfb   :  { %27807 = vmatprep.subr.bf16.mxu1 %v35173_v55  ;;  %v32035_v13 = vsub.f32 %v10045_v18, %v10100_v24  ;;  %v32038_v44 = vpack.c.bf16 %v10103_v33, %v10100_v24  ;;  %v10152_v2 = vsub.f32 %v31938_v35, %v35172_v42  ;;  %v10187_v28 = vsub.f32 %v32006_v19, %v35167_v8 }
0x1bfc   :  { %v10174_v59 = vand.u32 4294901760, %v10173_v57  ;;  %v10181_v7 = vand.u32 4294901760, %v10180_v53  ;;  %v35165_v24 = vand.u32 4294901760, %v32010_v5  ;;  %v35163_v57 = vand.u32 4294901760, %v32020_v41 }
0x1bfd   :  { %v10153_v63 = vand.u32 4294901760, %v10152_v2  ;;  %v10188_v18 = vand.u32 4294901760, %v10187_v28  ;;  %v10194_v2 = vsub.f32 %v32008_v21, %v35166_v30  ;;  %v35159_v9 = vand.u32 4294901760, %v32035_v13 }
0x1bfe   :  { %27809 = vmatpush3.bf16.msra.mxu1 %v31950_v11  ;;  %v32062_v38 = vpack.c.bf16 %v10174_v59, %v10167_v32  ;;  %v10201_v22 = vsub.f32 %v32010_v5, %v35165_v24  ;;  %v10208_v59 = vsub.f32 %v32018_v51, %v35164_v4  ;;  %v10215_v53 = vsub.f32 %v32020_v41, %v35163_v57 }
0x1bff   :  { %27810 = vmatprep.subr.bf16.mxu1 %v35173_v55  ;;  %v32052_v34 = vpack.c.bf16 %v10160_v1, %v10153_v63  ;;  %v32072_v33 = vpack.c.bf16 %v10188_v18, %v10181_v7  ;;  %v10195_v63 = vand.u32 4294901760, %v10194_v2  ;;  %v35162_v18 = vand.u32 4294901760, %v32022_v60 }
0x1c00   :  { %v10202_v1 = vand.u32 4294901760, %v10201_v22  ;;  %v10209_v28 = vand.u32 4294901760, %v10208_v59  ;;  %v10216_v7 = vand.u32 4294901760, %v10215_v53  ;;  %v35158_v2 = vand.u32 4294901760, %v32024_v49 }
0x1c01   :  { %v35161_v59 = vand.u32 4294901760, %v32030_v43  ;;  %v10250_v25 = vsub.f32 %v32035_v13, %v35159_v9  ;;  %v27865_v9 = vpack.c.bf16 %v32020_v41, %v32018_v51 }
0x1c02   :  { %27812 = vmatpush3.bf16.msra.mxu1 %v31964_v56  ;;  %v32082_v32 = vpack.c.bf16 %v10202_v1, %v10195_v63  ;;  %v32092_v22 = vpack.c.bf16 %v10216_v7, %v10209_v28  ;;  %v10222_v63 = vsub.f32 %v32022_v60, %v35162_v18  ;;  %v10229_v1 = vsub.f32 %v32024_v49, %v35158_v2 }
0x1c03   :  { %27813 = vmatprep.subr.bf16.mxu1 %v35173_v55  ;;  %v10236_v28 = vsub.f32 %v32028_v20, %v35157_v10  ;;  %v10243_v7 = vsub.f32 %v32030_v43, %v35161_v59  ;;  %v21856_v59 = vld [vmem:[%s35105_s14] ss:$0 sm:$0xff] }
0x1c04   :  { %v10223_v48 = vand.u32 4294901760, %v10222_v63  ;;  %v10230_v0 = vand.u32 4294901760, %v10229_v1  ;;  %v35160_v63 = vand.u32 4294901760, %v32040_v58 }
0x1c05   :  { %v10237_v52 = vand.u32 4294901760, %v10236_v28  ;;  %v10244_v46 = vand.u32 4294901760, %v10243_v7  ;;  %v27853_v28 = vpack.c.bf16 %v31940_v15, %v31938_v35  ;;  %v27856_v7 = vpack.c.bf16 %v31954_v39, %v31952_v12 }
0x1c06   :  { %27815 = vmatpush3.bf16.msra.mxu1 %v31974_v50  ;;  %v27844_v53 = vpack.c.bf16 %v10230_v0, %v10223_v48  ;;  %v10257_v48 = vsub.f32 %v32040_v58, %v35160_v63  ;;  %v10251_v0 = vand.u32 4294901760, %v10250_v25  ;;  %v27868_v25 = vpack.c.bf16 %v32024_v49, %v32022_v60 }
0x1c07   :  { %27816 = vmatprep.subr.bf16.mxu1 %v35173_v55  ;;  %v27847_v1 = vpack.c.bf16 %v10244_v46, %v10237_v52  ;;  %v27859_v46 = vpack.c.bf16 %v32006_v19, %v32004_v54  ;;  %v27862_v52 = vpack.c.bf16 %v32010_v5, %v32008_v21 }
0x1c08   :  { %v10258_v10 = vand.u32 4294901760, %v10257_v48 }
0x1c0a   :  { %27818 = vmatpush3.bf16.msra.mxu1 %v31984_v6  ;;  %v27850_v2 = vpack.c.bf16 %v10258_v10, %v10251_v0 }
0x1c0b   :  { %27819 = vmatprep.subr.bf16.mxu1 %v35173_v55 }
0x1c0e   :  { %27821 = vmatpush3.bf16.msra.mxu1 %v31994_v31 }
0x1c0f   :  { %27822 = vmatprep.subr.bf16.mxu1 %v35173_v55 }
0x1c12   :  { %27824 = vmatpush3.bf16.msra.mxu1 %v32026_v61 }
0x1c13   :  { %27825 = vmatprep.subr.bf16.mxu1 %v35173_v55 }
0x1c16   :  { %27827 = vmatpush3.bf16.msra.mxu1 %v32038_v44 }
0x1c17   :  { %27828 = vmatprep.subr.bf16.mxu1 %v35173_v55 }
0x1ca3   :  { %v9618_v0 = vpop.f32.mrb[34].mxu1 }
0x1ca4   :  { %v24886_v63 = vpop.f32.mrb[35].mxu1  ;;  %v9619_v18 = vadd.f32 %v21856_v59, %v9618_v0  ;;  %v29814_v0 = vld [vmem:[%s35108_s20] ss:$0 sm:$0xff] }
0x1cab   :  { %v9709_v57 = vpop.f32.mrb[36].mxu1 }
0x1cac   :  { %v9710_v4 = vadd.f32 %v9709_v57, %v9619_v18  ;;  %v24897_v24 = vpop.f32.mrb[37].mxu1  ;;  %v35325_v18 = vand.u32 4294901760, %v32020_v41  ;;  %v35331_v41 = vand.u32 4294901760, %v32040_v58 }
0x1cb3   :  { %v9789_v30 = vpop.f32.mrb[38].mxu1 }
0x1cb4   :  { %v9790_v8 = vadd.f32 %v9789_v30, %v9710_v4  ;;  %v24908_v37 = vpop.f32.mrb[39].mxu1  ;;  %v35322_v4 = vand.u32 4294901760, %v32008_v21  ;;  %v35328_v21 = vand.u32 4294901760, %v32028_v20 }
0x1cbb   :  { %v9866_v62 = vpop.f32.mrb[40].mxu1 }
0x1cbc   :  { %v9867_v47 = vadd.f32 %v9866_v62, %v9790_v8  ;;  %v24919_v3 = vpop.f32.mrb[41].mxu1  ;;  %v35319_v8 = vand.u32 4294901760, %v31954_v39 }
0x1cc3   :  { %v9949_v42 = vpop.f32.mrb[42].mxu1 }
0x1cc4   :  { %v9950_v10 = vadd.f32 %v9949_v42, %v9867_v47  ;;  %v24930_v55 = vpop.f32.mrb[43].mxu1  ;;  %v35313_v42 = vmov 0.0|0.0  }
0x1cc5   :  { %v35312_v55 = vmov 0.0  }
0x1ccb   :  { %v10024_v48 = vpop.f32.mrb[44].mxu1  ;;  %v32135_v36 = vpop.f32.mrb[30].mxu0 }
0x1ccc   :  { %v10025_v63 = vadd.f32 %v10024_v48, %v9950_v10  ;;  %v24941_v40 = vpop.f32.mrb[45].mxu1  ;;  %v25217_v27 = vpop.f32.mrb[31].mxu0  ;;  %v35336_v10 = vmov 5   ;;  %v35337_v48 = vmov 7  }
0x1ccd   :  { %v35314_v40 = vpack.c.bf16 %v32030_v43, %v32028_v20  ;;  %v35317_v27 = vand.u32 4294901760, %v31940_v15  ;;  %v35321_v15 = vand.u32 4294901760, %v32006_v19  ;;  %v35327_v19 = vand.u32 4294901760, %v32024_v49  ;;  %v29813_v20 = vld [vmem:[%s35107_s4] sm:$0xff] }
0x1cce   :  { %v10029_v59 = vadd.f32 %v10028_v16, %v10025_v63  ;;  %v35315_v16 = vpack.c.bf16 %v32040_v58, %v32035_v13  ;;  %v32270_v63 = vadd.f32 %v29814_v0, %v32135_v36 }
0x1cd0   :  { %29752 = vtanh.f32 %v10029_v59  ;;  %v11262_v59 = vld [vmem:[%s35109_s21] sm:$0xff] }
0x1cda   :  { %v29753_v57 = vpop.eup %29752 }
0x1cdb   :  { %v32137_v24 = vand.u32 4294901760, %v29753_v57 }
0x1cdd   :  { %v10139_v37 = vsub.f32 %v29753_v57, %v32137_v24  ;;  %v11263_v57 = vld [vmem:[%s35109_s21 + $0x8] sm:$0xff] }
0x1cdf   :  { %v10140_v30 = vand.u32 4294901760, %v10139_v37 }
0x1ce1   :  { %v10141_v62 = vsub.f32 %v10139_v37, %v10140_v30 }
0x1ce3   :  { %v10142_v3 = vand.u32 4294901760, %v10141_v62 }
0x1ce5   :  { %24975 = vmatmul.mubr.f32.vlgmr.msra.gmra.mrb[46].mxu1 %v10142_v3  ;;  %v11264_v3 = vld [vmem:[%s35109_s21 + $0x10] sm:$0xff] }
0x1ce6   :  { %27830 = vmatpush3.bf16.msra.mxu1 %v32052_v34  ;;  %25009 = vmatprep.mubr.msk.f32.mxu1 %vm29826_vm1, %v35312_v55  ;;  %v35318_v34 = vand.u32 4294901760, %v31952_v12  ;;  %v35323_v12 = vand.u32 4294901760, %v32010_v5  ;;  %v35329_v5 = vand.u32 4294901760, %v32030_v43 }
0x1ce7   :  { %27831 = vmatprep.subr.bf16.mxu1 %v35313_v42 }
0x1ce8   :  { %v27910_v39 = vpack.c.bf16 %v35323_v12, %v35322_v4 }
0x1cea   :  { %27833 = vmatpush3.bf16.msra.mxu1 %v32062_v38  ;;  %v27904_v38 = vpack.c.bf16 %v35319_v8, %v35318_v34 }
0x1ceb   :  { %27834 = vmatprep.subr.bf16.mxu1 %v35313_v42 }
0x1cee   :  { %27836 = vmatpush3.bf16.msra.mxu1 %v32072_v33 }
0x1cef   :  { %27837 = vmatprep.subr.bf16.mxu1 %v35313_v42 }
0x1cf2   :  { %27839 = vmatpush3.bf16.msra.mxu1 %v32082_v32  ;;  %v35324_v32 = vand.u32 4294901760, %v32018_v51  ;;  %v35330_v51 = vand.u32 4294901760, %v32035_v13 }
0x1cf3   :  { %27840 = vmatprep.subr.bf16.mxu1 %v35313_v42 }
0x1cf6   :  { %27842 = vmatpush3.bf16.msra.mxu1 %v32092_v22 }
0x1cf7   :  { %27843 = vmatprep.subr.bf16.mxu1 %v35313_v42 }
0x1cfa   :  { %27845 = vmatpush3.bf16.msra.mxu1 %v27844_v53  ;;  %v27919_v53 = vpack.c.bf16 %v35329_v5, %v35328_v21 }
0x1cfb   :  { %27846 = vmatprep.subr.bf16.mxu1 %v35313_v42 }
0x1cfe   :  { %27848 = vmatpush3.bf16.msra.mxu1 %v27847_v1  ;;  %v27922_v1 = vpack.c.bf16 %v35331_v41, %v35330_v51 }
0x1cff   :  { %27849 = vmatprep.subr.bf16.mxu1 %v35313_v42 }
0x1d02   :  { %27851 = vmatpush3.bf16.msra.mxu1 %v27850_v2  ;;  %v27913_v2 = vpack.c.bf16 %v35325_v18, %v35324_v32 }
0x1d03   :  { %27852 = vmatprep.subr.bf16.mxu1 %v35313_v42 }
0x1d05   :  { %25010 = vmatmul.mubr.f32.vlgmr.msra.gmra.mrb[46].mxu1 %v32137_v24 }
0x1d06   :  { %27854 = vmatpush3.bf16.msra.mxu1 %v27853_v28  ;;  %25044 = vmatprep.mubr.msk.f32.mxu1 %vm29826_vm1, %v35312_v55 }
0x1d07   :  { %27855 = vmatprep.subr.bf16.mxu1 %v35313_v42 }
0x1d0a   :  { %27857 = vmatpush3.bf16.msra.mxu1 %v27856_v7  ;;  %v35332_v7 = vmov 2  }
0x1d0b   :  { %27858 = vmatprep.subr.bf16.mxu1 %v35313_v42 }
0x1d0e   :  { %27860 = vmatpush3.bf16.msra.mxu1 %v27859_v46  ;;  %v35333_v46 = vmov 3  }
0x1d0f   :  { %27861 = vmatprep.subr.bf16.mxu1 %v35313_v42 }
0x1d12   :  { %27863 = vmatpush3.bf16.msra.mxu1 %v27862_v52  ;;  %v35334_v52 = vmov 4  }
0x1d13   :  { %27864 = vmatprep.subr.bf16.mxu1 %v35313_v42 }
0x1d16   :  { %27866 = vmatpush3.bf16.msra.mxu1 %v27865_v9  ;;  %v35316_v9 = vand.u32 4294901760, %v31938_v35  ;;  %v35320_v35 = vand.u32 4294901760, %v32004_v54  ;;  %v35326_v54 = vand.u32 4294901760, %v32022_v60 }
0x1d17   :  { %27867 = vmatprep.subr.bf16.mxu1 %v35313_v42 }
0x1d18   :  { %v27901_v47 = vpack.c.bf16 %v35317_v27, %v35316_v9  ;;  %v27907_v33 = vpack.c.bf16 %v35321_v15, %v35320_v35  ;;  %v27916_v22 = vpack.c.bf16 %v35327_v19, %v35326_v54 }
0x1d1a   :  { %27869 = vmatpush3.bf16.msra.mxu1 %v27868_v25  ;;  %v35335_v25 = vmov 6  }
0x1d1b   :  { %27870 = vmatprep.subr.bf16.mxu1 %v35313_v42 }
0x1d1e   :  { %27872 = vmatpush3.bf16.msra.mxu1 %v35314_v40  ;;  %v11265_v40 = vld [vmem:[%s35109_s21 + $0x18] sm:$0xff] }
0x1d1f   :  { %27873 = vmatprep.subr.bf16.mxu1 %v35313_v42  ;;  %v11286_v9 = vand.u32 4294901760, %v11265_v40 }
0x1d22   :  { %27875 = vmatpush3.bf16.msra.mxu1 %v35315_v16  ;;  %v11283_v16 = vand.u32 4294901760, %v11264_v3 }
0x1d23   :  { %27876 = vmatprep.subr.bf16.mxu1 %v35313_v42 }
0x1d24   :  { %v32297_v34 = vpack.c.bf16 %v11286_v9, %v11283_v16  ;;  %v32299_v8 = vsub.f32 %v11264_v3, %v11283_v16  ;;  %v10759_v16 = vld [vmem:[#allocation2 + $0x38] sm:$0xff] }
0x1d25   :  { %25045 = vmatmul.mubr.f32.vlgmr.msra.gmra.mrb[46].mxu1 %v10139_v37  ;;  %v11280_v37 = vand.u32 4294901760, %v11263_v57 }
0x1d26   :  { %27878 = vmatpush3.bf16.msra.mxu1 %v31936_v45  ;;  %25079 = vmatprep.mubr.msk.f32.mxu1 %vm29826_vm1, %v35312_v55  ;;  %v11372_v4 = vand.u32 4294901760, %v32299_v8 }
0x1d27   :  { %27879 = vmatprep.subr.bf16.mxu1 %v35313_v42  ;;  %v32285_v36 = vsub.f32 %v11263_v57, %v11280_v37  ;;  %v10745_v57 = vld [vmem:[#allocation2 + $0x28] sm:$0xff] }
0x1d28   :  { %v11373_v32 = vsub.f32 %v32299_v8, %v11372_v4 }
0x1d2a   :  { %27881 = vmatpush3.bf16.msra.mxu1 %v31950_v11  ;;  %v11374_v54 = vand.u32 4294901760, %v11373_v32 }
0x1d2b   :  { %27882 = vmatprep.subr.bf16.mxu1 %v35313_v42 }
0x1d2e   :  { %27884 = vmatpush3.bf16.msra.mxu1 %v31964_v56 }
0x1d2f   :  { %27885 = vmatprep.subr.bf16.mxu1 %v35313_v42 }
0x1d32   :  { %27887 = vmatpush3.bf16.msra.mxu1 %v31974_v50 }
0x1d33   :  { %27888 = vmatprep.subr.bf16.mxu1 %v35313_v42 }
0x1d36   :  { %27890 = vmatpush3.bf16.msra.mxu1 %v31984_v6 }
0x1d37   :  { %27891 = vmatprep.subr.bf16.mxu1 %v35313_v42 }
0x1d3a   :  { %27893 = vmatpush3.bf16.msra.mxu1 %v31994_v31 }
0x1d3b   :  { %27894 = vmatprep.subr.bf16.mxu1 %v35313_v42 }
0x1d3e   :  { %27896 = vmatpush3.bf16.msra.mxu1 %v32026_v61 }
0x1d3f   :  { %27897 = vmatprep.subr.bf16.mxu1 %v35313_v42 }
0x1d42   :  { %27899 = vmatpush3.bf16.msra.mxu1 %v32038_v44 }
0x1d43   :  { %27900 = vmatprep.subr.bf16.mxu1 %v35313_v42 }
0x1d45   :  { %25080 = vmatmul.mubr.f32.vlgmr.msra.gmra.mrb[46].mxu1 %v10140_v30 }
0x1d46   :  { %27902 = vmatpush3.bf16.msra.mxu1 %v27901_v47  ;;  %25114 = vmatprep.mubr.msk.f32.mxu1 %vm29826_vm1, %v35312_v55  ;;  %v11365_v47 = vand.u32 4294901760, %v32285_v36 }
0x1d47   :  { %27903 = vmatprep.subr.bf16.mxu1 %v35313_v42 }
0x1d48   :  { %v11366_v15 = vsub.f32 %v32285_v36, %v11365_v47 }
0x1d4a   :  { %27905 = vmatpush3.bf16.msra.mxu1 %v27904_v38  ;;  %v32301_v38 = vsub.f32 %v11265_v40, %v11286_v9 }
0x1d4b   :  { %27906 = vmatprep.subr.bf16.mxu1 %v35313_v42 }
0x1d4c   :  { %v11379_v12 = vand.u32 4294901760, %v32301_v38  ;;  %v28000_v5 = vpack.c.bf16 %v32301_v38, %v32299_v8 }
0x1d4e   :  { %27908 = vmatpush3.bf16.msra.mxu1 %v27907_v33  ;;  %v11380_v18 = vsub.f32 %v32301_v38, %v11379_v12  ;;  %v28012_v51 = vpack.c.bf16 %v11379_v12, %v11372_v4 }
0x1d4f   :  { %27909 = vmatprep.subr.bf16.mxu1 %v35313_v42 }
0x1d50   :  { %v11381_v19 = vand.u32 4294901760, %v11380_v18  ;;  %v11761_v18 = vadd.f32 %v32270_v63, %v31209_v14 }
0x1d52   :  { %27911 = vmatpush3.bf16.msra.mxu1 %v27910_v39  ;;  %v11367_v39 = vand.u32 4294901760, %v11366_v15 }
0x1d53   :  { %27912 = vmatprep.subr.bf16.mxu1 %v35313_v42 }
0x1d56   :  { %27914 = vmatpush3.bf16.msra.mxu1 %v27913_v2 }
0x1d57   :  { %27915 = vmatprep.subr.bf16.mxu1 %v35313_v42 }
0x1d5a   :  { %27917 = vmatpush3.bf16.msra.mxu1 %v27916_v22  ;;  %v27994_v22 = vpack.c.bf16 %v11381_v19, %v11374_v54 }
0x1d5b   :  { %27918 = vmatprep.subr.bf16.mxu1 %v35313_v42 }
0x1d5e   :  { %27920 = vmatpush3.bf16.msra.mxu1 %v27919_v53 }
0x1d5f   :  { %27921 = vmatprep.subr.bf16.mxu1 %v35313_v42 }
0x1d62   :  { %27923 = vmatpush3.bf16.msra.mxu1 %v27922_v1 }
0x1d63   :  { %27924 = vmatprep.subr.bf16.mxu1 %v35313_v42 }
0x1d65   :  { %25115 = vmatmul.mubr.f32.vlgmr.msra.gmra.mrb[46].mxu1 %v32137_v24 }
0x1d66   :  { %27926 = vmatpush3.bf16.msra.mxu1 %v31936_v45  ;;  %25149 = vmatprep.mubr.msk.f32.mxu1 %vm29826_vm1, %v35312_v55  ;;  %v10055_v45 = vpop.permute.xlu0 %10054 }
0x1d67   :  { %27927 = vmatprep.subr.bf16.mxu1 %v35313_v42 }
0x1d6a   :  { %27929 = vmatpush3.bf16.msra.mxu1 %v31950_v11 }
0x1d6b   :  { %27930 = vmatprep.subr.bf16.mxu1 %v35313_v42 }
0x1d6e   :  { %27932 = vmatpush3.bf16.msra.mxu1 %v31964_v56 }
0x1d6f   :  { %27933 = vmatprep.subr.bf16.mxu1 %v35313_v42 }
0x1d72   :  { %27935 = vmatpush3.bf16.msra.mxu1 %v31974_v50 }
0x1d73   :  { %27936 = vmatprep.subr.bf16.mxu1 %v35313_v42 }
0x1d76   :  { %27938 = vmatpush3.bf16.msra.mxu1 %v31984_v6 }
0x1d77   :  { %27939 = vmatprep.subr.bf16.mxu1 %v35313_v42 }
0x1d7a   :  { %27941 = vmatpush3.bf16.msra.mxu1 %v31994_v31 }
0x1d7b   :  { %27942 = vmatprep.subr.bf16.mxu1 %v35313_v42 }
0x1d7e   :  { %27944 = vmatpush3.bf16.msra.mxu1 %v32026_v61 }
0x1d7f   :  { %27945 = vmatprep.subr.bf16.mxu1 %v35313_v42 }
0x1d82   :  { %27947 = vmatpush3.bf16.msra.mxu1 %v32038_v44 }
0x1d83   :  { %28200 = vmatprep.subr.bf16.mxu1 %v35313_v42 }
0x1d85   :  { %25150 = vmatmul.mubr.f32.vlgmr.msra.gmra.mrb[46].mxu1 %v32137_v24  ;;  %v11277_v24 = vand.u32 4294901760, %v11262_v59 }
0x1d86   :  { %25568 = vmatprep.mubr.msk.f32.mxu1 %vm29826_vm1, %v35312_v55 }
0x1d87   :  { %v32281_v30 = vpack.c.bf16 %v11280_v37, %v11277_v24  ;;  %v32283_v62 = vsub.f32 %v11262_v59, %v11277_v24 }
0x1d89   :  { %27986 = vmatpush3.bf16.msra.mxu0 %v32281_v30  ;;  %v11358_v27 = vand.u32 4294901760, %v32283_v62  ;;  %v27997_v21 = vpack.c.bf16 %v32285_v36, %v32283_v62  ;;  %v10752_v36 = vld [vmem:[#allocation2 + $0x30] sm:$0xff] }
0x1d8a   :  { %27987 = vmatprep.subr.bf16.mxu0 %v35313_v42 }
0x1d8b   :  { %v11359_v35 = vsub.f32 %v32283_v62, %v11358_v27  ;;  %v28009_v53 = vpack.c.bf16 %v11365_v47, %v11358_v27 }
0x1d8d   :  { %27989 = vmatpush3.bf16.msra.mxu0 %v32297_v34  ;;  %v11360_v33 = vand.u32 4294901760, %v11359_v35 }
0x1d8e   :  { %27990 = vmatprep.subr.bf16.mxu0 %v35313_v42 }
0x1d8f   :  { %v27991_v2 = vpack.c.bf16 %v11367_v39, %v11360_v33  ;;  %v11789_v39 = vld [vmem:[%s35110_s3 + $0x8] sm:$0xff] }
0x1e58   :  { %v10694_v11 = vpop.f32.mrb[46].mxu1 }
0x1e59   :  { %v29191_v56 = vadd.f32 %v10694_v11, %v10055_v45  ;;  %v25151_v50 = vpop.f32.mrb[47].mxu1  ;;  %v10717_v45 = vld [vmem:[#allocation2 + $0x8] sm:$0xff]  ;;  %v10710_v11 = vld [vmem:[#allocation2] sm:$0xff] }
0x1e5b   :  { %v10698_v6 = vsel %vm8416_vm10, %v29191_v56, -inf }
0x1e5c   :  { %10699 = vmax.xlane.f32.xlu1 %v10698_v6  ;;  %v10724_v6 = vld [vmem:[#allocation2 + $0x10] sm:$0xff] }
0x1ee9   :  { %v10700_v31 = vpop.xlane.xlu1 %10699 }
0x1eea   :  { %v10701_v60 = vsub.f32 %v29191_v56, %v10700_v31 }
0x1eec   :  { %v10702_v49 = vmul.f32 1.442695, %v10701_v60 }
0x1eee   :  { %29754 = vpow2.f32 %v10702_v49 }
0x1ef8   :  { %v29755_v61 = vpop.eup %29754 }
0x1ef9   :  { %v10704_v43 = vmul.f32 %v29813_v20, %v29755_v61 }
0x1efb   :  { %v10705_v13 = vsel %vm8416_vm10, %v10704_v43, 0.0 }
0x1efc   :  { %10706 = vadd.xlane.f32.xlu0 %v10705_v13 }
0x1f89   :  { %v10707_v44 = vpop.xlane.xlu0 %10706 }
0x1f8a   :  { %29756 = vrcp.f32 %v10707_v44 }
0x1f94   :  { %v29757_v58 = vpop.eup %29756 }
0x1f95   :  { %v10709_v28 = vmul.f32 %v29757_v58, %v10704_v43  ;;  %v10731_v43 = vld [vmem:[#allocation2 + $0x18] sm:$0xff]  ;;  %v10738_v58 = vld [vmem:[#allocation2 + $0x20] sm:$0xff] }
0x1f97   :  { %10719 = vperm.xlu1 %29645, %v10709_v28   ;;  %10713 = vperm.xlu0 %29643, %v10709_v28  }
0x1f9b   :  { %29646 = vset.pattern.permute.xlu1 %v35332_v7  ;;  %29647 = vset.pattern.permute.xlu0 %v35333_v46 }
0x1f9c   :  { %10726 = vperm.xlu1 %29646, %v10709_v28   ;;  %10733 = vperm.xlu0 %29647, %v10709_v28  }
0x1fa0   :  { %29648 = vset.pattern.permute.xlu1 %v35334_v52  ;;  %29650 = vset.pattern.permute.xlu0 %v35335_v25 }
0x1fa1   :  { %10740 = vperm.xlu1 %29648, %v10709_v28   ;;  %10754 = vperm.xlu0 %29650, %v10709_v28  }
0x1fa5   :  { %29649 = vset.pattern.permute.xlu1 %v35336_v10  ;;  %29653 = vset.pattern.permute.xlu0 %v35309_v17  ;;  %v12308_v10 = vld [vmem:[#allocation3] sm:$0xff] }
0x1fa6   :  { %10747 = vperm.xlu1 %29649, %v10709_v28  }
0x1faa   :  { %29651 = vset.pattern.permute.xlu1 %v35337_v48 }
0x1fab   :  { %10761 = vperm.xlu1 %29651, %v10709_v28  }
0x1faf   :  { %11770 = vrot.lane.b32.xlu1 %v32270_v63, %s29828_s27 }
0x1fb0   :  { %29652 = vset.pattern.permute.xlu1 %v35309_v17 }
0x1fb3   :  { %11792 = vperm.xlu1 %29652, %v11789_v39  }
0x2016   :  { %v10720_v41 = vpop.permute.xlu1 %10719  ;;  %v10714_v1 = vpop.permute.xlu0 %10713 }
0x2017   :  { %v10722_v56 = vmul.f32 %v10720_v41, %v10717_v45  ;;  %v10716_v50 = vmul.f32 %v10714_v1, %v10710_v11  ;;  %v11796_v41 = vsub.f32 1.0, %v11789_v39  ;;  %v11809_v11 = vld [vmem:[%s35099_s13] sm:$0xff] }
0x2019   :  { %v10723_v60 = vadd.f32 %v10722_v56, %v10716_v50  ;;  %v11810_v56 = vld [vmem:[%s35099_s13 + $0x8] sm:$0xff]  ;;  %v11824_v50 = vand.u32 4294901760, %v11809_v11 }
0x201b   :  { %v10727_v31 = vpop.permute.xlu1 %10726  ;;  %v10734_v61 = vpop.permute.xlu0 %10733 }
0x201c   :  { %v10729_v49 = vmul.f32 %v10727_v31, %v10724_v6  ;;  %v10736_v13 = vmul.f32 %v10734_v61, %v10731_v43  ;;  %v11827_v6 = vand.u32 4294901760, %v11810_v56  ;;  %v13046_v31 = vld [vmem:[%s35106_s19] sm:$0xff] }
0x201e   :  { %v10730_v20 = vadd.f32 %v10729_v49, %v10723_v60  ;;  %v13058_v60 = vand.u32 4294901760, %v13046_v31  ;;  %v32370_v61 = vpack.c.bf16 %v11827_v6, %v11824_v50  ;;  %v32374_v43 = vsub.f32 %v11810_v56, %v11827_v6 }
0x2020   :  { %v10741_v44 = vpop.permute.xlu1 %10740  ;;  %v10737_v28 = vadd.f32 %v10736_v13, %v10730_v20  ;;  %v10755_v59 = vpop.permute.xlu0 %10754  ;;  %v32372_v20 = vsub.f32 %v11809_v11, %v11824_v50  ;;  %v11811_v13 = vld [vmem:[%s35099_s13 + $0x10] sm:$0xff] }
0x2021   :  { %v10743_v0 = vmul.f32 %v10741_v44, %v10738_v58  ;;  %v10757_v3 = vmul.f32 %v10755_v59, %v10752_v36  ;;  %v11812_v44 = vld [vmem:[%s35099_s13 + $0x18] sm:$0xff]  ;;  %v13048_v58 = vld [vmem:[%s35106_s19 + $0x10] sm:$0xff] }
0x2023   :  { %v10744_v37 = vadd.f32 %v10743_v0, %v10737_v28  ;;  %v32387_v0 = vsub.f32 %v13046_v31, %v13058_v60 }
0x2025   :  { %v10748_v24 = vpop.permute.xlu1 %10747 }
0x2026   :  { %v10750_v62 = vmul.f32 %v10748_v24, %v10745_v57  ;;  %v11830_v57 = vand.u32 4294901760, %v11811_v13  ;;  %v13049_v24 = vld [vmem:[%s35106_s19 + $0x18] sm:$0xff] }
0x2027   :  { %v13067_v36 = vand.u32 4294901760, %v13049_v24 }
0x2028   :  { %v10751_v40 = vadd.f32 %v10750_v62, %v10744_v37  ;;  %v11833_v37 = vand.u32 4294901760, %v11812_v44  ;;  %v13064_v62 = vand.u32 4294901760, %v13048_v58 }
0x202a   :  { %v10762_v9 = vpop.permute.xlu1 %10761  ;;  %v10758_v27 = vadd.f32 %v10757_v3, %v10751_v40  ;;  %v11905_v3 = vand.u32 4294901760, %v32372_v20 }
0x202b   :  { %v10764_v47 = vmul.f32 %v10762_v9, %v10759_v16  ;;  %v32398_v16 = vsub.f32 %v11811_v13, %v11830_v57  ;;  %v11912_v9 = vand.u32 4294901760, %v32374_v43 }
0x202d   :  { %v32315_v8 = vadd.f32 %v10764_v47, %v10758_v27  ;;  %v32402_v27 = vpack.c.bf16 %v11833_v37, %v11830_v57  ;;  %v32404_v47 = vsub.f32 %v11812_v44, %v11833_v37  ;;  %v11913_v39 = vsub.f32 %v32374_v43, %v11912_v9 }
0x202e   :  { %v28033_v44 = vpack.c.bf16 %v32374_v43, %v32372_v20  ;;  %v28045_v37 = vpack.c.bf16 %v11912_v9, %v11905_v3 }
0x202f   :  { %35338 = vst [vmem:[#allocation12_spill] sm:$0xff] %v32315_v8  ;;  %v11274_v38 = vsel %vm101_vm0, %v32315_v8, 0  ;;  %v28036_v57 = vpack.c.bf16 %v32404_v47, %v32398_v16 }
0x2030   :  { %v11345_v35 = vand.u32 4294901760, %v11274_v38 }
0x2032   :  { %v11346_v15 = vsub.f32 %v11274_v38, %v11345_v35  ;;  %v32407_v38 = vpack.c.bf16 %v13067_v36, %v13064_v62 }
0x2034   :  { %v11347_v33 = vand.u32 4294901760, %v11346_v15 }
0x2036   :  { %v11348_v4 = vsub.f32 %v11346_v15, %v11347_v33 }
0x2038   :  { %v11349_v12 = vand.u32 4294901760, %v11348_v4  ;;  %v32412_v4 = vsub.f32 %v13049_v24, %v13067_v36 }
0x203a   :  { %25227 = vmatmul.mubr.f32.vlgmr.msra.gmra.mrb[32].mxu0 %v11349_v12  ;;  %v11906_v12 = vsub.f32 %v32372_v20, %v11905_v3 }
0x203b   :  { %27992 = vmatpush3.bf16.msra.mxu0 %v27991_v2  ;;  %25237 = vmatprep.mubr.msk.f32.mxu0 %vm29826_vm1, %v35312_v55 }
0x203c   :  { %27993 = vmatprep.subr.bf16.mxu0 %v35313_v42 }
0x203f   :  { %27995 = vmatpush3.bf16.msra.mxu0 %v27994_v22 }
0x2040   :  { %27996 = vmatprep.subr.bf16.mxu0 %v35313_v42 }
0x2042   :  { %25238 = vmatmul.mubr.f32.vlgmr.msra.gmra.mrb[32].mxu0 %v11345_v35 }
0x2043   :  { %27998 = vmatpush3.bf16.msra.mxu0 %v27997_v21  ;;  %25248 = vmatprep.mubr.msk.f32.mxu0 %vm29826_vm1, %v35312_v55 }
0x2044   :  { %27999 = vmatprep.subr.bf16.mxu0 %v35313_v42 }
0x2047   :  { %28001 = vmatpush3.bf16.msra.mxu0 %v28000_v5 }
0x2048   :  { %28002 = vmatprep.subr.bf16.mxu0 %v35313_v42 }
0x204a   :  { %25249 = vmatmul.mubr.f32.vlgmr.msra.gmra.mrb[32].mxu0 %v11346_v15  ;;  %v21862_v15 = vld [vmem:[#allocation5] ss:$0 sm:$0xff] }
0x204b   :  { %28004 = vmatpush3.bf16.msra.mxu0 %v32281_v30  ;;  %25259 = vmatprep.mubr.msk.f32.mxu0 %vm29826_vm1, %v35312_v55 }
0x204c   :  { %28005 = vmatprep.subr.bf16.mxu0 %v35313_v42 }
0x204f   :  { %28007 = vmatpush3.bf16.msra.mxu0 %v32297_v34 }
0x2050   :  { %28008 = vmatprep.subr.bf16.mxu0 %v35313_v42 }
0x2052   :  { %25260 = vmatmul.mubr.f32.vlgmr.msra.gmra.mrb[32].mxu0 %v11347_v33  ;;  %v32410_v33 = vsub.f32 %v13048_v58, %v13064_v62 }
0x2053   :  { %28010 = vmatpush3.bf16.msra.mxu0 %v28009_v53  ;;  %25270 = vmatprep.mubr.msk.f32.mxu0 %vm29826_vm1, %v35312_v55  ;;  %v11771_v53 = vpop.permute.xlu1 %11770 }
0x2054   :  { %28011 = vmatprep.subr.bf16.mxu0 %v35313_v42  ;;  %v28216_v24 = vpack.c.bf16 %v32412_v4, %v32410_v33 }
0x2057   :  { %28013 = vmatpush3.bf16.msra.mxu0 %v28012_v51 }
0x2058   :  { %28014 = vmatprep.subr.bf16.mxu0 %v35313_v42 }
0x205a   :  { %25271 = vmatmul.mubr.f32.vlgmr.msra.gmra.mrb[32].mxu0 %v11345_v35 }
0x205b   :  { %28016 = vmatpush3.bf16.msra.mxu0 %v32281_v30  ;;  %25281 = vmatprep.mubr.msk.f32.mxu0 %vm29826_vm1, %v35312_v55  ;;  %v21859_v30 = vld [vmem:[%s35111_s22] ss:$0 sm:$0xff] }
0x205c   :  { %28017 = vmatprep.subr.bf16.mxu0 %v35313_v42 }
0x205f   :  { %28019 = vmatpush3.bf16.msra.mxu0 %v32297_v34 }
0x2060   :  { %28020 = vmatprep.subr.bf16.mxu0 %v35313_v42 }
0x2062   :  { %25282 = vmatmul.mubr.f32.vlgmr.msra.gmra.mrb[32].mxu0 %v11345_v35  ;;  %v13139_v35 = vand.u32 4294901760, %v32387_v0 }
0x2063   :  { %25292 = vmatprep.mubr.msk.f32.mxu0 %vm29826_vm1, %v35312_v55  ;;  %28022 = vmatpush3.bf16.msra.mxu0 %v32370_v61 }
0x2064   :  { %28023 = vmatprep.subr.bf16.mxu0 %v35313_v42 }
0x2067   :  { %28025 = vmatpush3.bf16.msra.mxu0 %v32402_v27 }
0x2068   :  { %28026 = vmatprep.subr.bf16.mxu0 %v35313_v42 }
0x2135   :  { %v11757_v32 = vpop.f32.mrb[32].mxu0 }
0x2136   :  { %v29193_v34 = vadd.f32 %v21859_v30, %v11757_v32  ;;  %v25283_v2 = vpop.f32.mrb[33].mxu0  ;;  %v13140_v30 = vsub.f32 %v32387_v0, %v13139_v35 }
0x2137   :  { %v11919_v2 = vand.u32 4294901760, %v32398_v16 }
0x2138   :  { %v11762_v54 = vadd.f32 %v29193_v34, %v11761_v18  ;;  %v11907_v18 = vand.u32 4294901760, %v11906_v12 }
0x213a   :  { %v21860_v19 = vmul.f32 -1.442695, %v11762_v54  ;;  %v11926_v54 = vand.u32 4294901760, %v32404_v47 }
0x213c   :  { %29758 = vpow2.f32 %v21860_v19  ;;  %v13141_v19 = vand.u32 4294901760, %v13140_v30  ;;  %v28048_v36 = vpack.c.bf16 %v11926_v54, %v11919_v2 }
0x2146   :  { %v29759_v22 = vpop.eup %29758 }
0x2147   :  { %v11766_v21 = vadd.f32 1.0, %v29759_v22 }
0x2149   :  { %29760 = vrcp.f32 %v11766_v21  ;;  %v13153_v21 = vand.u32 4294901760, %v32410_v33 }
0x2153   :  { %v32353_v5 = vpop.eup %29760 }
0x2154   :  { %v11773_v51 = vmul.f32 %v32353_v5, %v11771_v53  ;;  %v13160_v53 = vand.u32 4294901760, %v32412_v4  ;;  %v11781_v12 = vsub.f32 1.0, %v32353_v5 }
0x2156   :  { %11775 = vrot.lane.b32.xlu0 %v11773_v51, %s29829_s5  ;;  %v13161_v11 = vsub.f32 %v32412_v4, %v13160_v53  ;;  %v11782_v30 = vmul.f32 %v11781_v12, %v31859_v29  ;;  %v12324_v12 = vld [vmem:[%s35103_s15 + $0x68] sm:$0xff] }
0x215a   :  { %11799 = vperm.xlu0 %29653, %v11796_v41   ;;  %v11920_v41 = vsub.f32 %v32398_v16, %v11919_v2  ;;  %v12313_v2 = vld [vmem:[%s35103_s15 + $0x10] sm:$0xff] }
0x215c   :  { %v11921_v56 = vand.u32 4294901760, %v11920_v41  ;;  %v12315_v41 = vld [vmem:[%s35103_s15 + $0x20] sm:$0xff] }
0x21c8   :  { %v11776_v1 = vpop.permute.xlu0 %11775 }
0x21c9   :  { %v11778_v63 = vadd.f32 %v31209_v14, %v11776_v1  ;;  %v13047_v14 = vld [vmem:[%s35106_s19 + $0x8] sm:$0xff]  ;;  %v11927_v1 = vsub.f32 %v32404_v47, %v11926_v54  ;;  %v12314_v54 = vld [vmem:[%s35103_s15 + $0x18] sm:$0xff] }
0x21ca   :  { %v13061_v49 = vand.u32 4294901760, %v13047_v14 }
0x21cb   :  { %v11779_v45 = vadd.f32 %v29193_v34, %v11778_v63  ;;  %v11914_v34 = vand.u32 4294901760, %v11913_v39  ;;  %v11928_v50 = vand.u32 4294901760, %v11927_v1  ;;  %v12316_v1 = vld [vmem:[%s35103_s15 + $0x28] sm:$0xff] }
0x21cc   :  { %v32385_v28 = vpack.c.bf16 %v13061_v49, %v13058_v60  ;;  %v32389_v59 = vsub.f32 %v13047_v14, %v13061_v49  ;;  %v13162_v14 = vand.u32 4294901760, %v13161_v11  ;;  %v35339_v60 = vmov 1  }
0x21cd   :  { %29762 = vtanh.f32 %v11779_v45  ;;  %v28027_v51 = vpack.c.bf16 %v11914_v34, %v11907_v18  ;;  %v13154_v45 = vsub.f32 %v32410_v33, %v13153_v21  ;;  %v28030_v49 = vpack.c.bf16 %v11928_v50, %v11921_v56  ;;  %v12317_v56 = vld [vmem:[%s35103_s15 + $0x30] sm:$0xff]  ;;  %v12318_v50 = vld [vmem:[%s35103_s15 + $0x38] sm:$0xff] }
0x21ce   :  { %28202 = vmatpush3.bf16.msra.mxu1 %v32385_v28  ;;  %v13146_v32 = vand.u32 4294901760, %v32389_v59  ;;  %v28213_v58 = vpack.c.bf16 %v32389_v59, %v32387_v0 }
0x21cf   :  { %28203 = vmatprep.subr.bf16.mxu1 %v35313_v42  ;;  %v13155_v31 = vand.u32 4294901760, %v13154_v45  ;;  %v12353_v45 = vand.u32 4294901760, %v12316_v1 }
0x21d0   :  { %v13147_v22 = vsub.f32 %v32389_v59, %v13146_v32  ;;  %v28225_v62 = vpack.c.bf16 %v13146_v32, %v13139_v35 }
0x21d1   :  { %v28210_v13 = vpack.c.bf16 %v13162_v14, %v13155_v31  ;;  %v12359_v31 = vand.u32 4294901760, %v12318_v50 }
0x21d2   :  { %28205 = vmatpush3.bf16.msra.mxu1 %v32407_v38  ;;  %v13148_v63 = vand.u32 4294901760, %v13147_v22  ;;  %v12347_v22 = vand.u32 4294901760, %v12314_v54 }
0x21d3   :  { %28206 = vmatprep.subr.bf16.mxu1 %v35313_v42 }
0x21d4   :  { %v28207_v6 = vpack.c.bf16 %v13148_v63, %v13141_v19  ;;  %v12344_v19 = vand.u32 4294901760, %v12313_v2  ;;  %v12350_v63 = vand.u32 4294901760, %v12315_v41 }
0x21d6   :  { %v32543_v11 = vpack.c.bf16 %v12353_v45, %v12350_v63 }
0x21d7   :  { %v29763_v40 = vpop.eup %29762 }
0x21d8   :  { %11784 = vrot.lane.b32.xlu1 %v29763_v40, %s29830_s29  ;;  %v28228_v40 = vpack.c.bf16 %v13160_v53, %v13153_v21  ;;  %v32529_v21 = vpack.c.bf16 %v12347_v22, %v12344_v19  ;;  %v32531_v53 = vsub.f32 %v12313_v2, %v12344_v19 }
0x21d9   :  { %v11800_v43 = vpop.permute.xlu0 %11799 }
0x21da   :  { %v11802_v59 = vmul.f32 %v11800_v43, %v31859_v29  ;;  %v32585_v43 = vsub.f32 %v12316_v1, %v12353_v45 }
0x21dc   :  { %12334 = vperm.xlu1 %29652, %v21862_v15   ;;  %v11793_v15 = vpop.permute.xlu1 %11792 }
0x21e0   :  { %29654 = vset.pattern.permute.xlu1 %v35339_v60 }
0x224a   :  { %v11785_v39 = vpop.permute.xlu1 %11784 }
0x224b   :  { %v11787_v20 = vmul.f32 %v32353_v5, %v11785_v39  ;;  %v12311_v5 = vld [vmem:[%s35103_s15] sm:$0xff] }
0x224d   :  { %v11788_v0 = vadd.f32 %v11787_v20, %v11782_v30  ;;  %v12377_v30 = vand.u32 4294901760, %v12324_v12  ;;  %v32583_v20 = vsub.f32 %v12315_v41, %v12350_v63 }
0x224f   :  { %v11795_v16 = vmul.f32 %v11793_v15, %v11788_v0  ;;  %v12323_v15 = vld [vmem:[%s35103_s15 + $0x60] sm:$0xff] }
0x2250   :  { %v12374_v39 = vand.u32 4294901760, %v12323_v15 }
0x2251   :  { %v32444_v47 = vadd.f32 %v11802_v59, %v11795_v16  ;;  %v32589_v59 = vsub.f32 %v12318_v50, %v12359_v31  ;;  %v12325_v16 = vld [vmem:[%s35103_s15 + $0x70] sm:$0xff]  ;;  %v35193_v50 = vand.u32 4294901760, %v32531_v53 }
0x2253   :  { %35340 = vst [vmem:[#allocation13_spill] sm:$0xff] %v32444_v47  ;;  %v11821_v3 = vsel %vm101_vm0, %v32444_v47, 0 }
0x2254   :  { %v32448_v9 = vand.u32 4294901760, %v11821_v3 }
0x2256   :  { %v11893_v35 = vsub.f32 %v11821_v3, %v32448_v9  ;;  %v12326_v3 = vld [vmem:[%s35103_s15 + $0x78] sm:$0xff] }
0x2258   :  { %v11894_v33 = vand.u32 4294901760, %v11893_v35 }
0x225a   :  { %v11895_v4 = vsub.f32 %v11893_v35, %v11894_v33 }
0x225c   :  { %v11896_v32 = vand.u32 4294901760, %v11895_v4 }
0x225e   :  { %25293 = vmatmul.mubr.f32.vlgmr.msra.gmra.mrb[34].mxu0 %v11896_v32  ;;  %25569 = vmatmul.mubr.f32.vlgmr.msra.gmra.mrb[48].mxu1 %v11896_v32  ;;  %v32605_v32 = vpack.c.bf16 %v12377_v30, %v12374_v39 }
0x225f   :  { %28028 = vmatpush3.bf16.msra.mxu0 %v28027_v51  ;;  %28208 = vmatpush3.bf16.msra.mxu1 %v28207_v6  ;;  %v32533_v51 = vsub.f32 %v12314_v54, %v12347_v22  ;;  %v12356_v6 = vand.u32 4294901760, %v12317_v56 }
0x2260   :  { %28029 = vmatprep.subr.bf16.mxu0 %v35313_v42  ;;  %28209 = vmatprep.subr.bf16.mxu1 %v35313_v42 }
0x2261   :  { %25303 = vmatprep.mubr.msk.f32.mxu0 %vm29826_vm1, %v35312_v55  ;;  %25579 = vmatprep.mubr.msk.f32.mxu1 %vm29826_vm1, %v35312_v55  ;;  %v32553_v14 = vpack.c.bf16 %v12359_v31, %v12356_v6  ;;  %v32587_v0 = vsub.f32 %v12317_v56, %v12356_v6  ;;  %v35192_v6 = vand.u32 4294901760, %v32533_v51 }
0x2263   :  { %28031 = vmatpush3.bf16.msra.mxu0 %v28030_v49  ;;  %28211 = vmatpush3.bf16.msra.mxu1 %v28210_v13  ;;  %v12319_v49 = vld [vmem:[%s35103_s15 + $0x40] sm:$0xff]  ;;  %v12320_v13 = vld [vmem:[%s35103_s15 + $0x48] sm:$0xff] }
0x2264   :  { %28032 = vmatprep.subr.bf16.mxu0 %v35313_v42  ;;  %28212 = vmatprep.subr.bf16.mxu1 %v35313_v42 }
0x2266   :  { %25304 = vmatmul.mubr.f32.vlgmr.msra.gmra.mrb[36].mxu0 %v32448_v9  ;;  %25580 = vmatmul.mubr.f32.vlgmr.msra.gmra.mrb[48].mxu1 %v32448_v9 }
0x2267   :  { %28034 = vmatpush3.bf16.msra.mxu0 %v28033_v44  ;;  %28214 = vmatpush3.bf16.msra.mxu1 %v28213_v58  ;;  %v12362_v44 = vand.u32 4294901760, %v12319_v49  ;;  %v12365_v58 = vand.u32 4294901760, %v12320_v13 }
0x2268   :  { %28035 = vmatprep.subr.bf16.mxu0 %v35313_v42  ;;  %28215 = vmatprep.subr.bf16.mxu1 %v35313_v42 }
0x2269   :  { %25314 = vmatprep.mubr.msk.f32.mxu0 %vm29826_vm1, %v35312_v55  ;;  %25590 = vmatprep.mubr.msk.f32.mxu1 %vm29826_vm1, %v35312_v55 }
0x226b   :  { %28037 = vmatpush3.bf16.msra.mxu0 %v28036_v57  ;;  %28217 = vmatpush3.bf16.msra.mxu1 %v28216_v24  ;;  %v32563_v57 = vpack.c.bf16 %v12365_v58, %v12362_v44  ;;  %v12321_v24 = vld [vmem:[%s35103_s15 + $0x50] sm:$0xff] }
0x226c   :  { %28038 = vmatprep.subr.bf16.mxu0 %v35313_v42  ;;  %28218 = vmatprep.subr.bf16.mxu1 %v35313_v42 }
0x226e   :  { %25315 = vmatmul.mubr.f32.vlgmr.msra.gmra.mrb[38].mxu0 %v11893_v35  ;;  %25591 = vmatmul.mubr.f32.vlgmr.msra.gmra.mrb[48].mxu1 %v11893_v35  ;;  %v32599_v35 = vsub.f32 %v12320_v13, %v12365_v58  ;;  %v12453_v13 = vsub.f32 %v32533_v51, %v35192_v6 }
0x226f   :  { %28040 = vmatpush3.bf16.msra.mxu0 %v32370_v61  ;;  %28220 = vmatpush3.bf16.msra.mxu1 %v32385_v28 }
0x2270   :  { %28041 = vmatprep.subr.bf16.mxu0 %v35313_v42  ;;  %28221 = vmatprep.subr.bf16.mxu1 %v35313_v42  ;;  %v12454_v58 = vand.u32 4294901760, %v12453_v13 }
0x2271   :  { %25325 = vmatprep.mubr.msk.f32.mxu0 %vm29826_vm1, %v35312_v55  ;;  %25601 = vmatprep.mubr.msk.f32.mxu1 %vm29826_vm1, %v35312_v55 }
0x2273   :  { %28043 = vmatpush3.bf16.msra.mxu0 %v32402_v27  ;;  %28223 = vmatpush3.bf16.msra.mxu1 %v32407_v38 }
0x2274   :  { %28044 = vmatprep.subr.bf16.mxu0 %v35313_v42  ;;  %28224 = vmatprep.subr.bf16.mxu1 %v35313_v42 }
0x2276   :  { %25326 = vmatmul.mubr.f32.vlgmr.msra.gmra.mrb[40].mxu0 %v11894_v33  ;;  %25602 = vmatmul.mubr.f32.vlgmr.msra.gmra.mrb[48].mxu1 %v11894_v33 }
0x2277   :  { %28046 = vmatpush3.bf16.msra.mxu0 %v28045_v37  ;;  %28226 = vmatpush3.bf16.msra.mxu1 %v28225_v62  ;;  %v12322_v37 = vld [vmem:[%s35103_s15 + $0x58] sm:$0xff]  ;;  %v12368_v62 = vand.u32 4294901760, %v12321_v24 }
0x2278   :  { %28047 = vmatprep.subr.bf16.mxu0 %v35313_v42  ;;  %28227 = vmatprep.subr.bf16.mxu1 %v35313_v42 }
0x2279   :  { %25336 = vmatprep.mubr.msk.f32.mxu0 %vm29826_vm1, %v35312_v55  ;;  %25612 = vmatprep.mubr.msk.f32.mxu1 %vm29826_vm1, %v35312_v55  ;;  %v32601_v33 = vsub.f32 %v12321_v24, %v12368_v62  ;;  %v35191_v24 = vand.u32 4294901760, %v32583_v20 }
0x227b   :  { %28049 = vmatpush3.bf16.msra.mxu0 %v28048_v36  ;;  %28229 = vmatpush3.bf16.msra.mxu1 %v28228_v40  ;;  %v12371_v36 = vand.u32 4294901760, %v12322_v37 }
0x227c   :  { %28050 = vmatprep.subr.bf16.mxu0 %v35313_v42  ;;  %28230 = vmatprep.subr.bf16.mxu1 %v35313_v42 }
0x227d   :  { %v32573_v40 = vpack.c.bf16 %v12371_v36, %v12368_v62  ;;  %v32603_v4 = vsub.f32 %v12322_v37, %v12371_v36  ;;  %v35190_v37 = vand.u32 4294901760, %v32585_v43  ;;  %v12460_v36 = vsub.f32 %v32583_v20, %v35191_v24 }
0x227e   :  { %25337 = vmatmul.mubr.f32.vlgmr.msra.gmra.mrb[42].mxu0 %v32448_v9  ;;  %25613 = vmatmul.mubr.f32.vlgmr.msra.gmra.mrb[48].mxu1 %v32448_v9 }
0x227f   :  { %28052 = vmatpush3.bf16.msra.mxu0 %v32370_v61  ;;  %28232 = vmatpush3.bf16.msra.mxu1 %v32385_v28  ;;  %v12312_v61 = vld [vmem:[%s35103_s15 + $0x8] sm:$0xff]  ;;  %v12338_v28 = vand.u32 4294901760, %v12311_v5 }
0x2280   :  { %28053 = vmatprep.subr.bf16.mxu0 %v35313_v42  ;;  %28233 = vmatprep.subr.bf16.mxu1 %v35313_v42 }
0x2281   :  { %25347 = vmatprep.mubr.msk.f32.mxu0 %vm29826_vm1, %v35312_v55  ;;  %25623 = vmatprep.mubr.msk.f32.mxu1 %vm29826_vm1, %v35312_v55  ;;  %v32517_v18 = vsub.f32 %v12311_v5, %v12338_v28  ;;  %v32607_v5 = vsub.f32 %v12323_v15, %v12374_v39  ;;  %v12467_v15 = vsub.f32 %v32585_v43, %v35190_v37 }
0x2283   :  { %28055 = vmatpush3.bf16.msra.mxu0 %v32402_v27  ;;  %28235 = vmatpush3.bf16.msra.mxu1 %v32407_v38  ;;  %v12341_v27 = vand.u32 4294901760, %v12312_v61  ;;  %v35195_v2 = vand.u32 4294901760, %v32517_v18  ;;  %v12468_v39 = vand.u32 4294901760, %v12467_v15  ;;  %v35181_v15 = vand.u32 4294901760, %v32601_v33 }
0x2284   :  { %28056 = vmatprep.subr.bf16.mxu0 %v35313_v42  ;;  %28236 = vmatprep.subr.bf16.mxu1 %v35313_v42 }
0x2285   :  { %v32515_v38 = vpack.c.bf16 %v12341_v27, %v12338_v28  ;;  %v32519_v34 = vsub.f32 %v12312_v61, %v12341_v27  ;;  %v32609_v61 = vsub.f32 %v12324_v12, %v12377_v30  ;;  %v12380_v28 = vand.u32 4294901760, %v12325_v16 }
0x2286   :  { %25348 = vmatmul.mubr.f32.vlgmr.msra.gmra.mrb[44].mxu0 %v32448_v9  ;;  %25624 = vmatmul.mubr.f32.vlgmr.msra.gmra.mrb[48].mxu1 %v32448_v9  ;;  %v32597_v9 = vsub.f32 %v12319_v49, %v12362_v44  ;;  %v12383_v27 = vand.u32 4294901760, %v12326_v3  ;;  %v12432_v1 = vsub.f32 %v32517_v18, %v35195_v2  ;;  %v12446_v49 = vsub.f32 %v32531_v53, %v35193_v50 }
0x2287   :  { %25382 = vmatprep.mubr.msk.f32.mxu0 %vm29826_vm1, %v35312_v55  ;;  %25634 = vmatprep.mubr.msk.f32.mxu1 %vm29826_vm1, %v35312_v55  ;;  %v35194_v54 = vand.u32 4294901760, %v32519_v34  ;;  %v32614_v19 = vsub.f32 %v12325_v16, %v12380_v28  ;;  %v12461_v12 = vand.u32 4294901760, %v12460_v36  ;;  %v35186_v30 = vand.u32 4294901760, %v32587_v0 }
0x2288   :  { %28058 = vmatpush3.bf16.msra.mxu0 %v32515_v38  ;;  %v32617_v22 = vpack.c.bf16 %v12383_v27, %v12380_v28  ;;  %v32619_v41 = vsub.f32 %v12326_v3, %v12383_v27  ;;  %v12433_v45 = vand.u32 4294901760, %v12432_v1  ;;  %v12447_v44 = vand.u32 4294901760, %v12446_v49 }
0x2289   :  { %28059 = vmatprep.subr.bf16.mxu0 %v35313_v42  ;;  %v12439_v63 = vsub.f32 %v32519_v34, %v35194_v54  ;;  %v35183_v16 = vand.u32 4294901760, %v32589_v59  ;;  %v32651_v3 = vpack.c.bf16 %v12468_v39, %v12461_v12  ;;  %v12474_v28 = vsub.f32 %v32587_v0, %v35186_v30 }
0x228a   :  { %v32641_v62 = vpack.c.bf16 %v12454_v58, %v12447_v44  ;;  %v35184_v12 = vand.u32 4294901760, %v32603_v4 }
0x228b   :  { %v12440_v56 = vand.u32 4294901760, %v12439_v63  ;;  %v12481_v27 = vsub.f32 %v32589_v59, %v35183_v16  ;;  %v12475_v1 = vand.u32 4294901760, %v12474_v28  ;;  %v12502_v28 = vsub.f32 %v32601_v33, %v35181_v15 }
0x228c   :  { %28061 = vmatpush3.bf16.msra.mxu0 %v32529_v21  ;;  %v35187_v16 = vand.u32 4294901760, %v32614_v19 }
0x228d   :  { %28062 = vmatprep.subr.bf16.mxu0 %v35313_v42  ;;  %v32631_v31 = vpack.c.bf16 %v12440_v56, %v12433_v45  ;;  %v12482_v63 = vand.u32 4294901760, %v12481_v27  ;;  %v35182_v45 = vand.u32 4294901760, %v32597_v9  ;;  %v35180_v56 = vand.u32 4294901760, %v32599_v35 }
0x228e   :  { %v12509_v27 = vsub.f32 %v32603_v4, %v35184_v12  ;;  %v12530_v12 = vsub.f32 %v32614_v19, %v35187_v16  ;;  %v28117_v16 = vpack.c.bf16 %v32599_v35, %v32597_v9 }
0x228f   :  { %v32661_v49 = vpack.c.bf16 %v12482_v63, %v12475_v1  ;;  %v12488_v13 = vsub.f32 %v32597_v9, %v35182_v45  ;;  %v12495_v44 = vsub.f32 %v32599_v35, %v35180_v56  ;;  %v12503_v1 = vand.u32 4294901760, %v12502_v28 }
0x2290   :  { %28064 = vmatpush3.bf16.msra.mxu0 %v32543_v11  ;;  %v12510_v63 = vand.u32 4294901760, %v12509_v27  ;;  %v35185_v56 = vand.u32 4294901760, %v32607_v5  ;;  %v35188_v28 = vand.u32 4294901760, %v32619_v41 }
0x2291   :  { %28065 = vmatprep.subr.bf16.mxu0 %v35313_v42  ;;  %v12489_v58 = vand.u32 4294901760, %v12488_v13  ;;  %v12496_v36 = vand.u32 4294901760, %v12495_v44  ;;  %v35189_v13 = vand.u32 4294901760, %v32609_v61 }
0x2292   :  { %v28096_v44 = vpack.c.bf16 %v12510_v63, %v12503_v1  ;;  %v12537_v1 = vsub.f32 %v32619_v41, %v35188_v28  ;;  %v12531_v63 = vand.u32 4294901760, %v12530_v12  ;;  %v28120_v12 = vpack.c.bf16 %v32603_v4, %v32601_v33 }
0x2293   :  { %v32671_v39 = vpack.c.bf16 %v12496_v36, %v12489_v58  ;;  %v12516_v58 = vsub.f32 %v32607_v5, %v35185_v56  ;;  %v12523_v36 = vsub.f32 %v32609_v61, %v35189_v13  ;;  %v21861_v13 = vld [vmem:[%s35105_s14] ss:$0 sm:$0xff] }
0x2294   :  { %28067 = vmatpush3.bf16.msra.mxu0 %v32553_v14  ;;  %v12538_v56 = vand.u32 4294901760, %v12537_v1 }
0x2295   :  { %28068 = vmatprep.subr.bf16.mxu0 %v35313_v42  ;;  %v12517_v15 = vand.u32 4294901760, %v12516_v58  ;;  %v12524_v45 = vand.u32 4294901760, %v12523_v36  ;;  %v28105_v58 = vpack.c.bf16 %v32519_v34, %v32517_v18  ;;  %v28108_v36 = vpack.c.bf16 %v32533_v51, %v32531_v53 }
0x2296   :  { %v28102_v30 = vpack.c.bf16 %v12538_v56, %v12531_v63 }
0x2297   :  { %v28099_v27 = vpack.c.bf16 %v12524_v45, %v12517_v15  ;;  %v28111_v45 = vpack.c.bf16 %v32585_v43, %v32583_v20  ;;  %v28114_v15 = vpack.c.bf16 %v32589_v59, %v32587_v0 }
0x2298   :  { %28070 = vmatpush3.bf16.msra.mxu0 %v32563_v57 }
0x2299   :  { %28071 = vmatprep.subr.bf16.mxu0 %v35313_v42 }
0x229c   :  { %28073 = vmatpush3.bf16.msra.mxu0 %v32573_v40 }
0x229d   :  { %28074 = vmatprep.subr.bf16.mxu0 %v35313_v42 }
0x22a0   :  { %28076 = vmatpush3.bf16.msra.mxu0 %v32605_v32 }
0x22a1   :  { %28077 = vmatprep.subr.bf16.mxu0 %v35313_v42 }
0x22a4   :  { %28079 = vmatpush3.bf16.msra.mxu0 %v32617_v22 }
0x22a5   :  { %28080 = vmatprep.subr.bf16.mxu0 %v35313_v42 }
0x2331   :  { %v11898_v63 = vpop.f32.mrb[34].mxu0 }
0x2332   :  { %v25294_v28 = vpop.f32.mrb[35].mxu0  ;;  %v11899_v37 = vadd.f32 %v21861_v13, %v11898_v63 }
0x2339   :  { %v11989_v24 = vpop.f32.mrb[36].mxu0 }
0x233a   :  { %v11990_v6 = vadd.f32 %v11989_v24, %v11899_v37  ;;  %v25305_v50 = vpop.f32.mrb[37].mxu0  ;;  %v35349_v37 = vand.u32 4294901760, %v32587_v0  ;;  %v35355_v0 = vand.u32 4294901760, %v32607_v5 }
0x2341   :  { %v12069_v54 = vpop.f32.mrb[38].mxu0 }
0x2342   :  { %v12070_v2 = vadd.f32 %v12069_v54, %v11990_v6  ;;  %v25316_v8 = vpop.f32.mrb[39].mxu0 }
0x2349   :  { %v12146_v29 = vpop.f32.mrb[40].mxu0 }
0x234a   :  { %v12147_v23 = vadd.f32 %v12146_v29, %v12070_v2  ;;  %v25327_v47 = vpop.f32.mrb[41].mxu0  ;;  %v35346_v2 = vand.u32 4294901760, %v32533_v51 }
0x2351   :  { %v12229_v56 = vpop.f32.mrb[42].mxu0 }
0x2352   :  { %v12230_v60 = vadd.f32 %v12229_v56, %v12147_v23  ;;  %v25338_v26 = vpop.f32.mrb[43].mxu0  ;;  %v35341_v23 = vpack.c.bf16 %v32609_v61, %v32607_v5  ;;  %v29815_v5 = vld [vmem:[%s35107_s4] sm:$0xff] }
0x2353   :  { %v35342_v26 = vpack.c.bf16 %v32619_v41, %v32614_v19  ;;  %v13542_v56 = vld [vmem:[%s35109_s21] sm:$0xff] }
0x2359   :  { %v12304_v1 = vpop.f32.mrb[44].mxu0  ;;  %v32714_v48 = vpop.f32.mrb[48].mxu1 }
0x235a   :  { %v12305_v28 = vadd.f32 %v12304_v1, %v12230_v60  ;;  %v25349_v17 = vpop.f32.mrb[45].mxu0  ;;  %v25625_v25 = vpop.f32.mrb[49].mxu1  ;;  %v35345_v60 = vand.u32 4294901760, %v32531_v53  ;;  %v35350_v53 = vand.u32 4294901760, %v32589_v59  ;;  %v35356_v59 = vand.u32 4294901760, %v32609_v61 }
0x235b   :  { %v35343_v17 = vand.u32 4294901760, %v32517_v18  ;;  %v35344_v25 = vand.u32 4294901760, %v32519_v34  ;;  %v35347_v18 = vand.u32 4294901760, %v32583_v20  ;;  %v35348_v34 = vand.u32 4294901760, %v32585_v43 }
0x235c   :  { %v12309_v13 = vadd.f32 %v12308_v10, %v12305_v28  ;;  %v28156_v6 = vpack.c.bf16 %v35346_v2, %v35345_v60  ;;  %v28162_v51 = vpack.c.bf16 %v35350_v53, %v35349_v37  ;;  %v35353_v20 = vand.u32 4294901760, %v32601_v33 }
0x235d   :  { %v28153_v10 = vpack.c.bf16 %v35344_v25, %v35343_v17  ;;  %v35354_v43 = vand.u32 4294901760, %v32603_v4  ;;  %v13557_v1 = vand.u32 4294901760, %v13542_v56 }
0x235e   :  { %29764 = vtanh.f32 %v12309_v13 }
0x235f   :  { %v32862_v13 = vsub.f32 %v13542_v56, %v13557_v1 }
0x2368   :  { %v29765_v24 = vpop.eup %29764 }
0x2369   :  { %v32716_v50 = vand.u32 4294901760, %v29765_v24 }
0x236b   :  { %v12419_v8 = vsub.f32 %v29765_v24, %v32716_v50 }
0x236d   :  { %v12420_v54 = vand.u32 4294901760, %v12419_v8 }
0x236f   :  { %v12421_v29 = vsub.f32 %v12419_v8, %v12420_v54 }
0x2371   :  { %v12422_v47 = vand.u32 4294901760, %v12421_v29 }
0x2373   :  { %25383 = vmatmul.mubr.f32.vlgmr.msra.gmra.mrb[46].mxu0 %v12422_v47  ;;  %v13638_v47 = vand.u32 4294901760, %v32862_v13 }
0x2374   :  { %28082 = vmatpush3.bf16.msra.mxu0 %v32631_v31  ;;  %25417 = vmatprep.mubr.msk.f32.mxu0 %vm29826_vm1, %v35312_v55  ;;  %v28159_v31 = vpack.c.bf16 %v35348_v34, %v35347_v18 }
0x2375   :  { %28083 = vmatprep.subr.bf16.mxu0 %v35313_v42 }
0x2378   :  { %28085 = vmatpush3.bf16.msra.mxu0 %v32641_v62  ;;  %v35351_v62 = vand.u32 4294901760, %v32597_v9  ;;  %v35357_v9 = vand.u32 4294901760, %v32614_v19 }
0x2379   :  { %28086 = vmatprep.subr.bf16.mxu0 %v35313_v42 }
0x237c   :  { %28088 = vmatpush3.bf16.msra.mxu0 %v32651_v3  ;;  %v28168_v3 = vpack.c.bf16 %v35354_v43, %v35353_v20 }
0x237d   :  { %28089 = vmatprep.subr.bf16.mxu0 %v35313_v42 }
0x2380   :  { %28091 = vmatpush3.bf16.msra.mxu0 %v32661_v49  ;;  %v28171_v49 = vpack.c.bf16 %v35356_v59, %v35355_v0 }
0x2381   :  { %28092 = vmatprep.subr.bf16.mxu0 %v35313_v42 }
0x2384   :  { %28094 = vmatpush3.bf16.msra.mxu0 %v32671_v39 }
0x2385   :  { %28095 = vmatprep.subr.bf16.mxu0 %v35313_v42 }
0x2388   :  { %28097 = vmatpush3.bf16.msra.mxu0 %v28096_v44 }
0x2389   :  { %28098 = vmatprep.subr.bf16.mxu0 %v35313_v42 }
0x238c   :  { %28100 = vmatpush3.bf16.msra.mxu0 %v28099_v27  ;;  %v21863_v27 = vld [vmem:[%s35108_s20] ss:$0 sm:$0xff] }
0x238d   :  { %28101 = vmatprep.subr.bf16.mxu0 %v35313_v42 }
0x2390   :  { %28103 = vmatpush3.bf16.msra.mxu0 %v28102_v30  ;;  %v35352_v30 = vand.u32 4294901760, %v32599_v35  ;;  %v35358_v35 = vand.u32 4294901760, %v32619_v41 }
0x2391   :  { %28104 = vmatprep.subr.bf16.mxu0 %v35313_v42 }
0x2392   :  { %v28174_v39 = vpack.c.bf16 %v35358_v35, %v35357_v9  ;;  %v12990_v9 = vld [vmem:[#allocation2] sm:$0xff] }
0x2393   :  { %25418 = vmatmul.mubr.f32.vlgmr.msra.gmra.mrb[46].mxu0 %v32716_v50 }
0x2394   :  { %28106 = vmatpush3.bf16.msra.mxu0 %v28105_v58  ;;  %25452 = vmatprep.mubr.msk.f32.mxu0 %vm29826_vm1, %v35312_v55  ;;  %v35359_v58 = vmov 5  }
0x2395   :  { %28107 = vmatprep.subr.bf16.mxu0 %v35313_v42 }
0x2398   :  { %28109 = vmatpush3.bf16.msra.mxu0 %v28108_v36  ;;  %v32846_v36 = vadd.f32 %v21863_v27, %v32714_v48  ;;  %v13543_v48 = vld [vmem:[%s35109_s21 + $0x8] sm:$0xff] }
0x2399   :  { %28110 = vmatprep.subr.bf16.mxu0 %v35313_v42  ;;  %v13560_v63 = vand.u32 4294901760, %v13543_v48 }
0x239b   :  { %v32860_v28 = vpack.c.bf16 %v13560_v63, %v13557_v1  ;;  %v32864_v24 = vsub.f32 %v13543_v48, %v13560_v63  ;;  %v13032_v48 = vld [vmem:[#allocation2 + $0x30] sm:$0xff] }
0x239c   :  { %28112 = vmatpush3.bf16.msra.mxu0 %v28111_v45  ;;  %v35360_v45 = vmov 6  }
0x239d   :  { %28113 = vmatprep.subr.bf16.mxu0 %v35313_v42  ;;  %28238 = vmatpush3.bf16.msra.mxu1 %v32860_v28 }
0x239e   :  { %28239 = vmatprep.subr.bf16.mxu1 %v35313_v42 }
0x23a0   :  { %28115 = vmatpush3.bf16.msra.mxu0 %v28114_v15  ;;  %v35361_v15 = vmov 0  }
0x23a1   :  { %28116 = vmatprep.subr.bf16.mxu0 %v35313_v42 }
0x23a4   :  { %28118 = vmatpush3.bf16.msra.mxu0 %v28117_v16  ;;  %v28165_v16 = vpack.c.bf16 %v35352_v30, %v35351_v62 }
0x23a5   :  { %28119 = vmatprep.subr.bf16.mxu0 %v35313_v42 }
0x23a8   :  { %28121 = vmatpush3.bf16.msra.mxu0 %v28120_v12  ;;  %v35362_v12 = vmov 7  }
0x23a9   :  { %28122 = vmatprep.subr.bf16.mxu0 %v35313_v42 }
0x23ac   :  { %28124 = vmatpush3.bf16.msra.mxu0 %v35341_v23  ;;  %v13645_v23 = vand.u32 4294901760, %v32864_v24 }
0x23ad   :  { %28125 = vmatprep.subr.bf16.mxu0 %v35313_v42 }
0x23ae   :  { %v13646_v60 = vsub.f32 %v32864_v24, %v13645_v23  ;;  %v28261_v43 = vpack.c.bf16 %v13645_v23, %v13638_v47 }
0x23b0   :  { %28127 = vmatpush3.bf16.msra.mxu0 %v35342_v26  ;;  %v13647_v34 = vand.u32 4294901760, %v13646_v60  ;;  %v14069_v60 = vld [vmem:[%s35110_s3 + $0x10] sm:$0xff] }
0x23b1   :  { %28128 = vmatprep.subr.bf16.mxu0 %v35313_v42 }
0x23b3   :  { %25453 = vmatmul.mubr.f32.vlgmr.msra.gmra.mrb[46].mxu0 %v12419_v8  ;;  %v13545_v8 = vld [vmem:[%s35109_s21 + $0x18] sm:$0xff] }
0x23b4   :  { %28130 = vmatpush3.bf16.msra.mxu0 %v32515_v38  ;;  %25487 = vmatprep.mubr.msk.f32.mxu0 %vm29826_vm1, %v35312_v55  ;;  %v13566_v29 = vand.u32 4294901760, %v13545_v8 }
0x23b5   :  { %28131 = vmatprep.subr.bf16.mxu0 %v35313_v42 }
0x23b6   :  { %v32880_v25 = vsub.f32 %v13545_v8, %v13566_v29 }
0x23b8   :  { %28133 = vmatpush3.bf16.msra.mxu0 %v32529_v21  ;;  %v13659_v18 = vand.u32 4294901760, %v32880_v25 }
0x23b9   :  { %28134 = vmatprep.subr.bf16.mxu0 %v35313_v42 }
0x23ba   :  { %v13660_v37 = vsub.f32 %v32880_v25, %v13659_v18 }
0x23bc   :  { %28136 = vmatpush3.bf16.msra.mxu0 %v32543_v11  ;;  %v13661_v62 = vand.u32 4294901760, %v13660_v37 }
0x23bd   :  { %28137 = vmatprep.subr.bf16.mxu0 %v35313_v42 }
0x23c0   :  { %28139 = vmatpush3.bf16.msra.mxu0 %v32553_v14 }
0x23c1   :  { %28140 = vmatprep.subr.bf16.mxu0 %v35313_v42 }
0x23c4   :  { %28142 = vmatpush3.bf16.msra.mxu0 %v32563_v57 }
0x23c5   :  { %28143 = vmatprep.subr.bf16.mxu0 %v35313_v42 }
0x23c8   :  { %28145 = vmatpush3.bf16.msra.mxu0 %v32573_v40 }
0x23c9   :  { %28146 = vmatprep.subr.bf16.mxu0 %v35313_v42 }
0x23cc   :  { %28148 = vmatpush3.bf16.msra.mxu0 %v32605_v32 }
0x23cd   :  { %28149 = vmatprep.subr.bf16.mxu0 %v35313_v42 }
0x23d0   :  { %28151 = vmatpush3.bf16.msra.mxu0 %v32617_v22 }
0x23d1   :  { %28152 = vmatprep.subr.bf16.mxu0 %v35313_v42 }
0x23d3   :  { %25488 = vmatmul.mubr.f32.vlgmr.msra.gmra.mrb[46].mxu0 %v12420_v54 }
0x23d4   :  { %28154 = vmatpush3.bf16.msra.mxu0 %v28153_v10  ;;  %25522 = vmatprep.mubr.msk.f32.mxu0 %vm29826_vm1, %v35312_v55  ;;  %v13639_v10 = vsub.f32 %v32862_v13, %v13638_v47 }
0x23d5   :  { %28155 = vmatprep.subr.bf16.mxu0 %v35313_v42 }
0x23d6   :  { %v13640_v2 = vand.u32 4294901760, %v13639_v10 }
0x23d8   :  { %28157 = vmatpush3.bf16.msra.mxu0 %v28156_v6  ;;  %v28243_v53 = vpack.c.bf16 %v13647_v34, %v13640_v2 }
0x23d9   :  { %28158 = vmatprep.subr.bf16.mxu0 %v35313_v42 }
0x23dc   :  { %28160 = vmatpush3.bf16.msra.mxu0 %v28159_v31 }
0x23dd   :  { %28161 = vmatprep.subr.bf16.mxu0 %v35313_v42 }
0x23e0   :  { %28163 = vmatpush3.bf16.msra.mxu0 %v28162_v51 }
0x23e1   :  { %28164 = vmatprep.subr.bf16.mxu0 %v35313_v42 }
0x23e4   :  { %28166 = vmatpush3.bf16.msra.mxu0 %v28165_v16  ;;  %v28249_v16 = vpack.c.bf16 %v32864_v24, %v32862_v13  ;;  %v13039_v13 = vld [vmem:[#allocation2 + $0x38] sm:$0xff] }
0x23e5   :  { %28167 = vmatprep.subr.bf16.mxu0 %v35313_v42 }
0x23e8   :  { %28169 = vmatpush3.bf16.msra.mxu0 %v28168_v3 }
0x23e9   :  { %28170 = vmatprep.subr.bf16.mxu0 %v35313_v42 }
0x23ec   :  { %28172 = vmatpush3.bf16.msra.mxu0 %v28171_v49  ;;  %v12997_v49 = vld [vmem:[#allocation2 + $0x8] sm:$0xff] }
0x23ed   :  { %28173 = vmatprep.subr.bf16.mxu0 %v35313_v42 }
0x23f0   :  { %28175 = vmatpush3.bf16.msra.mxu0 %v28174_v39 }
0x23f1   :  { %28176 = vmatprep.subr.bf16.mxu0 %v35313_v42 }
0x23f3   :  { %25523 = vmatmul.mubr.f32.vlgmr.msra.gmra.mrb[46].mxu0 %v32716_v50 }
0x23f4   :  { %28178 = vmatpush3.bf16.msra.mxu0 %v32515_v38  ;;  %25557 = vmatprep.mubr.msk.f32.mxu0 %vm29826_vm1, %v35312_v55  ;;  %v12335_v38 = vpop.permute.xlu1 %12334 }
0x23f5   :  { %28179 = vmatprep.subr.bf16.mxu0 %v35313_v42 }
0x23f8   :  { %28181 = vmatpush3.bf16.msra.mxu0 %v32529_v21 }
0x23f9   :  { %28182 = vmatprep.subr.bf16.mxu0 %v35313_v42 }
0x23fc   :  { %28184 = vmatpush3.bf16.msra.mxu0 %v32543_v11 }
0x23fd   :  { %28185 = vmatprep.subr.bf16.mxu0 %v35313_v42 }
0x2400   :  { %28187 = vmatpush3.bf16.msra.mxu0 %v32553_v14 }
0x2401   :  { %28188 = vmatprep.subr.bf16.mxu0 %v35313_v42 }
0x2404   :  { %28190 = vmatpush3.bf16.msra.mxu0 %v32563_v57 }
0x2405   :  { %28191 = vmatprep.subr.bf16.mxu0 %v35313_v42 }
0x2408   :  { %28193 = vmatpush3.bf16.msra.mxu0 %v32573_v40 }
0x2409   :  { %28194 = vmatprep.subr.bf16.mxu0 %v35313_v42 }
0x240c   :  { %28196 = vmatpush3.bf16.msra.mxu0 %v32605_v32 }
0x240d   :  { %28197 = vmatprep.subr.bf16.mxu0 %v35313_v42 }
0x2410   :  { %28199 = vmatpush3.bf16.msra.mxu0 %v32617_v22 }
0x2411   :  { %28452 = vmatprep.subr.bf16.mxu0 %v35313_v42 }
0x2413   :  { %25558 = vmatmul.mubr.f32.vlgmr.msra.gmra.mrb[46].mxu0 %v32716_v50  ;;  %v13544_v50 = vld [vmem:[%s35109_s21 + $0x10] sm:$0xff] }
0x2414   :  { %25976 = vmatprep.mubr.msk.f32.mxu0 %vm29826_vm1, %v35312_v55  ;;  %v13563_v54 = vand.u32 4294901760, %v13544_v50 }
0x2416   :  { %v32876_v26 = vpack.c.bf16 %v13566_v29, %v13563_v54  ;;  %v32878_v17 = vsub.f32 %v13544_v50, %v13563_v54 }
0x2418   :  { %28241 = vmatpush3.bf16.msra.mxu1 %v32876_v26  ;;  %v13652_v6 = vand.u32 4294901760, %v32878_v17  ;;  %v28252_v20 = vpack.c.bf16 %v32880_v25, %v32878_v17 }
0x2419   :  { %28242 = vmatprep.subr.bf16.mxu1 %v35313_v42 }
0x241a   :  { %v13653_v31 = vsub.f32 %v32878_v17, %v13652_v6  ;;  %v28264_v3 = vpack.c.bf16 %v13659_v18, %v13652_v6  ;;  %v35364_v6 = vld [vmem:[#allocation7_spill] sm:$0xff] }
0x241b   :  { %v14041_v18 = vadd.f32 %v32846_v36, %v35364_v6 }
0x241c   :  { %v13654_v51 = vand.u32 4294901760, %v13653_v31 }
0x241e   :  { %v28246_v30 = vpack.c.bf16 %v13661_v62, %v13654_v51  ;;  %v21867_v62 = vld [vmem:[#allocation5] ss:$0 sm:$0xff] }
0x24e6   :  { %v12974_v21 = vpop.f32.mrb[46].mxu0 }
0x24e7   :  { %v29194_v11 = vadd.f32 %v12974_v21, %v12335_v38  ;;  %v25559_v14 = vpop.f32.mrb[47].mxu0  ;;  %v13004_v21 = vld [vmem:[#allocation2 + $0x10] sm:$0xff] }
0x24e9   :  { %v12978_v57 = vsel %vm8416_vm10, %v29194_v11, -inf }
0x24ea   :  { %12979 = vmax.xlane.f32.xlu0 %v12978_v57 }
0x2577   :  { %v12980_v40 = vpop.xlane.xlu0 %12979 }
0x2578   :  { %v12981_v33 = vsub.f32 %v29194_v11, %v12980_v40  ;;  %v13011_v40 = vld [vmem:[#allocation2 + $0x18] sm:$0xff] }
0x257a   :  { %v12982_v4 = vmul.f32 1.442695, %v12981_v33 }
0x257c   :  { %29766 = vpow2.f32 %v12982_v4 }
0x2586   :  { %v29767_v32 = vpop.eup %29766 }
0x2587   :  { %v12984_v61 = vmul.f32 %v29815_v5, %v29767_v32  ;;  %v13018_v32 = vld [vmem:[#allocation2 + $0x20] sm:$0xff] }
0x2589   :  { %v12985_v19 = vsel %vm8416_vm10, %v12984_v61, 0.0 }
0x258a   :  { %12986 = vadd.xlane.f32.xlu1 %v12985_v19 }
0x2617   :  { %v12987_v22 = vpop.xlane.xlu1 %12986 }
0x2618   :  { %29768 = vrcp.f32 %v12987_v22 }
0x2622   :  { %v29769_v41 = vpop.eup %29768 }
0x2623   :  { %v12989_v44 = vmul.f32 %v29769_v41, %v12984_v61 }
0x2625   :  { %12999 = vperm.xlu1 %29654, %v12989_v44   ;;  %12993 = vperm.xlu0 %29653, %v12989_v44  }
0x2629   :  { %29656 = vset.pattern.permute.xlu1 %v35333_v46  ;;  %29655 = vset.pattern.permute.xlu0 %v35332_v7 }
0x262a   :  { %13013 = vperm.xlu1 %29656, %v12989_v44   ;;  %13006 = vperm.xlu0 %29655, %v12989_v44  }
0x262e   :  { %29657 = vset.pattern.permute.xlu1 %v35334_v52  ;;  %29658 = vset.pattern.permute.xlu0 %v35359_v58 }
0x262f   :  { %13020 = vperm.xlu1 %29657, %v12989_v44   ;;  %13027 = vperm.xlu0 %29658, %v12989_v44  }
0x2633   :  { %29659 = vset.pattern.permute.xlu1 %v35360_v45  ;;  %14050 = vrot.lane.b32.xlu0 %v32846_v36, %s29828_s27  ;;  %v35365_v36 = vmov 1   ;;  %v14588_v45 = vld [vmem:[#allocation3] sm:$0xff] }
0x2634   :  { %13034 = vperm.xlu1 %29659, %v12989_v44   ;;  %29661 = vset.pattern.permute.xlu0 %v35361_v15 }
0x2637   :  { %14072 = vperm.xlu0 %29661, %v14069_v60  }
0x2638   :  { %29660 = vset.pattern.permute.xlu1 %v35362_v12 }
0x2639   :  { %13041 = vperm.xlu1 %29660, %v12989_v44   ;;  %v13025_v44 = vld [vmem:[#allocation2 + $0x28] sm:$0xff] }
0x263b   :  { %14614 = vperm.xlu0 %29661, %v21867_v62  }
0x263d   :  { %29662 = vset.pattern.permute.xlu1 %v35361_v15 }
0x26a4   :  { %v13000_v0 = vpop.permute.xlu1 %12999  ;;  %v12994_v59 = vpop.permute.xlu0 %12993 }
0x26a5   :  { %v13002_v35 = vmul.f32 %v13000_v0, %v12997_v49  ;;  %v12996_v39 = vmul.f32 %v12994_v59, %v12990_v9  ;;  %v14089_v49 = vld [vmem:[%s35099_s13] sm:$0xff]  ;;  %v14090_v9 = vld [vmem:[%s35099_s13 + $0x8] sm:$0xff] }
0x26a7   :  { %v13003_v14 = vadd.f32 %v13002_v35, %v12996_v39  ;;  %v14104_v35 = vand.u32 4294901760, %v14089_v49  ;;  %v14107_v39 = vand.u32 4294901760, %v14090_v9 }
0x26a9   :  { %v13014_v38 = vpop.permute.xlu1 %13013  ;;  %v13007_v11 = vpop.permute.xlu0 %13006 }
0x26aa   :  { %v13009_v57 = vmul.f32 %v13007_v11, %v13004_v21  ;;  %v13016_v33 = vmul.f32 %v13014_v38, %v13011_v40  ;;  %v15326_v38 = vld [vmem:[%s35106_s19] sm:$0xff]  ;;  %v15327_v21 = vld [vmem:[%s35106_s19 + $0x8] sm:$0xff]  ;;  %v32952_v40 = vsub.f32 %v14089_v49, %v14104_v35 }
0x26ab   :  { %v15338_v11 = vand.u32 4294901760, %v15326_v38 }
0x26ac   :  { %v13010_v4 = vadd.f32 %v13009_v57, %v13003_v14  ;;  %v15341_v14 = vand.u32 4294901760, %v15327_v21  ;;  %v32950_v57 = vpack.c.bf16 %v14107_v39, %v14104_v35 }
0x26ae   :  { %v13021_v5 = vpop.permute.xlu1 %13020  ;;  %v13017_v61 = vadd.f32 %v13016_v33, %v13010_v4  ;;  %v13028_v22 = vpop.permute.xlu0 %13027  ;;  %v32954_v33 = vsub.f32 %v14090_v9, %v14107_v39  ;;  %v32956_v4 = vpack.c.bf16 %v15341_v14, %v15338_v11 }
0x26af   :  { %v13023_v19 = vmul.f32 %v13021_v5, %v13018_v32  ;;  %v13030_v27 = vmul.f32 %v13028_v22, %v13025_v44  ;;  %v32958_v32 = vsub.f32 %v15326_v38, %v15338_v11  ;;  %v32960_v5 = vsub.f32 %v15327_v21, %v15341_v14  ;;  %v15328_v44 = vld [vmem:[%s35106_s19 + $0x10] sm:$0xff] }
0x26b0   :  { %28454 = vmatpush3.bf16.msra.mxu0 %v32956_v4  ;;  %v28285_v21 = vpack.c.bf16 %v32954_v33, %v32952_v40 }
0x26b1   :  { %v13024_v41 = vadd.f32 %v13023_v19, %v13017_v61  ;;  %v14091_v61 = vld [vmem:[%s35099_s13 + $0x10] sm:$0xff]  ;;  %v14092_v19 = vld [vmem:[%s35099_s13 + $0x18] sm:$0xff]  ;;  %28455 = vmatprep.subr.bf16.mxu0 %v35313_v42  ;;  %v28465_v11 = vpack.c.bf16 %v32960_v5, %v32958_v32 }
0x26b2   :  { %v14110_v22 = vand.u32 4294901760, %v14091_v61 }
0x26b3   :  { %v13035_v56 = vpop.permute.xlu1 %13034  ;;  %v13031_v1 = vadd.f32 %v13030_v27, %v13024_v41  ;;  %v14113_v41 = vand.u32 4294901760, %v14092_v19  ;;  %v15329_v27 = vld [vmem:[%s35106_s19 + $0x18] sm:$0xff] }
0x26b4   :  { %v13037_v63 = vmul.f32 %v13035_v56, %v13032_v48  ;;  %v14185_v56 = vand.u32 4294901760, %v32952_v40  ;;  %v14192_v48 = vand.u32 4294901760, %v32954_v33 }
0x26b6   :  { %v13038_v50 = vadd.f32 %v13037_v63, %v13031_v1  ;;  %v15344_v63 = vand.u32 4294901760, %v15328_v44 }
0x26b8   :  { %v13042_v24 = vpop.permute.xlu1 %13041 }
0x26b9   :  { %v13044_v8 = vmul.f32 %v13042_v24, %v13039_v13  ;;  %v15347_v13 = vand.u32 4294901760, %v15329_v27  ;;  %v32980_v24 = vpack.c.bf16 %v14113_v41, %v14110_v22 }
0x26bb   :  { %v32894_v54 = vadd.f32 %v13044_v8, %v13038_v50  ;;  %v32982_v50 = vsub.f32 %v14091_v61, %v14110_v22  ;;  %v32984_v8 = vsub.f32 %v14092_v19, %v14113_v41  ;;  %v28297_v19 = vpack.c.bf16 %v14192_v48, %v14185_v56 }
0x26bd   :  { %35363 = vst [vmem:[#allocation14_spill] sm:$0xff] %v32894_v54  ;;  %v13554_v29 = vsel %vm101_vm0, %v32894_v54, 0  ;;  %v28288_v14 = vpack.c.bf16 %v32984_v8, %v32982_v50 }
0x26be   :  { %v13625_v47 = vand.u32 4294901760, %v13554_v29 }
0x26c0   :  { %v13626_v23 = vsub.f32 %v13554_v29, %v13625_v47  ;;  %v15419_v29 = vand.u32 4294901760, %v32958_v32 }
0x26c2   :  { %v13627_v17 = vand.u32 4294901760, %v13626_v23 }
0x26c4   :  { %v13628_v25 = vsub.f32 %v13626_v23, %v13627_v17 }
0x26c6   :  { %v13629_v10 = vand.u32 4294901760, %v13628_v25  ;;  %v14186_v25 = vsub.f32 %v32952_v40, %v14185_v56  ;;  %v35366_v40 = vld [vmem:[#allocation13_spill] sm:$0xff] }
0x26c8   :  { %25635 = vmatmul.mubr.f32.vlgmr.msra.gmra.mrb[50].mxu1 %v13629_v10  ;;  %v14193_v10 = vsub.f32 %v32954_v33, %v14192_v48 }
0x26c9   :  { %28244 = vmatpush3.bf16.msra.mxu1 %v28243_v53  ;;  %25645 = vmatprep.mubr.msk.f32.mxu1 %vm29826_vm1, %v35312_v55 }
0x26ca   :  { %28245 = vmatprep.subr.bf16.mxu1 %v35313_v42 }
0x26cd   :  { %28247 = vmatpush3.bf16.msra.mxu1 %v28246_v30 }
0x26ce   :  { %28248 = vmatprep.subr.bf16.mxu1 %v35313_v42 }
0x26d0   :  { %25646 = vmatmul.mubr.f32.vlgmr.msra.gmra.mrb[50].mxu1 %v13625_v47 }
0x26d1   :  { %28250 = vmatpush3.bf16.msra.mxu1 %v28249_v16  ;;  %25656 = vmatprep.mubr.msk.f32.mxu1 %vm29826_vm1, %v35312_v55  ;;  %v14051_v16 = vpop.permute.xlu0 %14050 }
0x26d2   :  { %28251 = vmatprep.subr.bf16.mxu1 %v35313_v42 }
0x26d5   :  { %28253 = vmatpush3.bf16.msra.mxu1 %v28252_v20 }
0x26d6   :  { %28254 = vmatprep.subr.bf16.mxu1 %v35313_v42 }
0x26d8   :  { %25657 = vmatmul.mubr.f32.vlgmr.msra.gmra.mrb[50].mxu1 %v13626_v23  ;;  %v32990_v23 = vsub.f32 %v15328_v44, %v15344_v63 }
0x26d9   :  { %28256 = vmatpush3.bf16.msra.mxu1 %v32860_v28  ;;  %25667 = vmatprep.mubr.msk.f32.mxu1 %vm29826_vm1, %v35312_v55 }
0x26da   :  { %28257 = vmatprep.subr.bf16.mxu1 %v35313_v42 }
0x26dd   :  { %28259 = vmatpush3.bf16.msra.mxu1 %v32876_v26 }
0x26de   :  { %28260 = vmatprep.subr.bf16.mxu1 %v35313_v42 }
0x26e0   :  { %25668 = vmatmul.mubr.f32.vlgmr.msra.gmra.mrb[50].mxu1 %v13627_v17  ;;  %v32992_v17 = vsub.f32 %v15329_v27, %v15347_v13 }
0x26e1   :  { %28262 = vmatpush3.bf16.msra.mxu1 %v28261_v43  ;;  %25678 = vmatprep.mubr.msk.f32.mxu1 %vm29826_vm1, %v35312_v55  ;;  %v14076_v43 = vsub.f32 1.0, %v14069_v60  ;;  %v15420_v60 = vsub.f32 %v32958_v32, %v15419_v29  ;;  %v14073_v32 = vpop.permute.xlu0 %14072 }
0x26e2   :  { %28263 = vmatprep.subr.bf16.mxu1 %v35313_v42  ;;  %v15440_v62 = vand.u32 4294901760, %v32992_v17  ;;  %v28468_v61 = vpack.c.bf16 %v32992_v17, %v32990_v23 }
0x26e5   :  { %28265 = vmatpush3.bf16.msra.mxu1 %v28264_v3 }
0x26e6   :  { %28266 = vmatprep.subr.bf16.mxu1 %v35313_v42 }
0x26e8   :  { %25679 = vmatmul.mubr.f32.vlgmr.msra.gmra.mrb[50].mxu1 %v13625_v47 }
0x26e9   :  { %28268 = vmatpush3.bf16.msra.mxu1 %v32860_v28  ;;  %25689 = vmatprep.mubr.msk.f32.mxu1 %vm29826_vm1, %v35312_v55  ;;  %v21864_v28 = vld [vmem:[%s35111_s22] ss:$0 sm:$0xff] }
0x26ea   :  { %28269 = vmatprep.subr.bf16.mxu1 %v35313_v42 }
0x26ed   :  { %28271 = vmatpush3.bf16.msra.mxu1 %v32876_v26 }
0x26ee   :  { %28272 = vmatprep.subr.bf16.mxu1 %v35313_v42 }
0x26f0   :  { %25690 = vmatmul.mubr.f32.vlgmr.msra.gmra.mrb[50].mxu1 %v13625_v47  ;;  %v32988_v47 = vpack.c.bf16 %v15347_v13, %v15344_v63 }
0x26f1   :  { %25700 = vmatprep.mubr.msk.f32.mxu1 %vm29826_vm1, %v35312_v55  ;;  %28274 = vmatpush3.bf16.msra.mxu1 %v32950_v57 }
0x26f2   :  { %28275 = vmatprep.subr.bf16.mxu1 %v35313_v42  ;;  %28457 = vmatpush3.bf16.msra.mxu0 %v32988_v47 }
0x26f3   :  { %28458 = vmatprep.subr.bf16.mxu0 %v35313_v42 }
0x26f5   :  { %28277 = vmatpush3.bf16.msra.mxu1 %v32980_v24 }
0x26f6   :  { %28278 = vmatprep.subr.bf16.mxu1 %v35313_v42 }
0x27c3   :  { %v14037_v2 = vpop.f32.mrb[50].mxu1 }
0x27c4   :  { %v29196_v26 = vadd.f32 %v21864_v28, %v14037_v2  ;;  %v25691_v34 = vpop.f32.mrb[51].mxu1  ;;  %v15426_v28 = vand.u32 4294901760, %v32960_v5  ;;  %v14187_v2 = vand.u32 4294901760, %v14186_v25 }
0x27c5   :  { %v15421_v34 = vand.u32 4294901760, %v15420_v60 }
0x27c6   :  { %v14042_v31 = vadd.f32 %v29196_v26, %v14041_v18  ;;  %v14206_v18 = vand.u32 4294901760, %v32984_v8  ;;  %v28477_v22 = vpack.c.bf16 %v15426_v28, %v15419_v29 }
0x27c8   :  { %v21865_v37 = vmul.f32 -1.442695, %v14042_v31  ;;  %v15427_v31 = vsub.f32 %v32960_v5, %v15426_v28 }
0x27ca   :  { %29770 = vpow2.f32 %v21865_v37  ;;  %v15433_v37 = vand.u32 4294901760, %v32990_v23 }
0x27cc   :  { %v28480_v44 = vpack.c.bf16 %v15440_v62, %v15433_v37 }
0x27d4   :  { %v29771_v53 = vpop.eup %29770 }
0x27d5   :  { %v14046_v51 = vadd.f32 1.0, %v29771_v53 }
0x27d7   :  { %29772 = vrcp.f32 %v14046_v51  ;;  %v14207_v51 = vsub.f32 %v32984_v8, %v14206_v18 }
0x27e1   :  { %v32932_v30 = vpop.eup %29772 }
0x27e2   :  { %v14053_v20 = vmul.f32 %v32932_v30, %v14051_v16 }
0x27e4   :  { %14055 = vrot.lane.b32.xlu1 %v14053_v20, %s29829_s5  ;;  %v15428_v20 = vand.u32 4294901760, %v15427_v31 }
0x27e6   :  { %v28459_v49 = vpack.c.bf16 %v15428_v20, %v15421_v34 }
0x27e8   :  { %14079 = vperm.xlu1 %29662, %v14076_v43   ;;  %v15434_v43 = vsub.f32 %v32990_v23, %v15433_v37 }
0x27ea   :  { %v15435_v9 = vand.u32 4294901760, %v15434_v43  ;;  %v14597_v43 = vld [vmem:[%s35103_s15 + $0x30] sm:$0xff] }
0x27ec   :  { %29663 = vset.pattern.permute.xlu1 %v35365_v36 }
0x2856   :  { %v14056_v3 = vpop.permute.xlu1 %14055 }
0x2857   :  { %v14058_v0 = vadd.f32 %v35364_v6, %v14056_v3  ;;  %v14199_v6 = vand.u32 4294901760, %v32982_v50 }
0x2859   :  { %v14059_v59 = vadd.f32 %v29196_v26, %v14058_v0  ;;  %v14194_v26 = vand.u32 4294901760, %v14193_v10  ;;  %v14200_v53 = vsub.f32 %v32982_v50, %v14199_v6  ;;  %v14208_v0 = vand.u32 4294901760, %v14207_v51  ;;  %v14596_v51 = vld [vmem:[%s35103_s15 + $0x28] sm:$0xff] }
0x285a   :  { %v28300_v41 = vpack.c.bf16 %v14206_v18, %v14199_v6  ;;  %v14594_v6 = vld [vmem:[%s35103_s15 + $0x18] sm:$0xff] }
0x285b   :  { %29774 = vtanh.f32 %v14059_v59  ;;  %v28279_v16 = vpack.c.bf16 %v14194_v26, %v14187_v2  ;;  %v14201_v3 = vand.u32 4294901760, %v14200_v53  ;;  %v15441_v59 = vsub.f32 %v32992_v17, %v15440_v62  ;;  %v14593_v2 = vld [vmem:[%s35103_s15 + $0x10] sm:$0xff]  ;;  %v14595_v53 = vld [vmem:[%s35103_s15 + $0x20] sm:$0xff] }
0x285c   :  { %v14624_v18 = vand.u32 4294901760, %v14593_v2  ;;  %v14627_v26 = vand.u32 4294901760, %v14594_v6  ;;  %v14630_v62 = vand.u32 4294901760, %v14595_v53 }
0x285d   :  { %v28282_v35 = vpack.c.bf16 %v14208_v0, %v14201_v3  ;;  %v15442_v39 = vand.u32 4294901760, %v15441_v59  ;;  %v14598_v3 = vld [vmem:[%s35103_s15 + $0x38] sm:$0xff]  ;;  %v14636_v0 = vand.u32 4294901760, %v14597_v43 }
0x285e   :  { %v33108_v34 = vpack.c.bf16 %v14627_v26, %v14624_v18  ;;  %v33110_v31 = vsub.f32 %v14593_v2, %v14624_v18  ;;  %v33112_v37 = vsub.f32 %v14594_v6, %v14627_v26  ;;  %v14639_v59 = vand.u32 4294901760, %v14598_v3 }
0x285f   :  { %v28462_v38 = vpack.c.bf16 %v15442_v39, %v15435_v9  ;;  %v14599_v9 = vld [vmem:[%s35103_s15 + $0x40] sm:$0xff] }
0x2860   :  { %v14642_v39 = vand.u32 4294901760, %v14599_v9 }
0x2865   :  { %v29775_v1 = vpop.eup %29774 }
0x2866   :  { %14064 = vrot.lane.b32.xlu1 %v29775_v1, %s29830_s29  ;;  %v14061_v1 = vsub.f32 1.0, %v32932_v30 }
0x2867   :  { %v14080_v27 = vpop.permute.xlu1 %14079 }
0x2868   :  { %v14062_v33 = vmul.f32 %v14061_v1, %v35366_v40  ;;  %v14082_v5 = vmul.f32 %v14080_v27, %v35366_v40 }
0x28d8   :  { %v14065_v63 = vpop.permute.xlu1 %14064 }
0x28d9   :  { %v14067_v13 = vmul.f32 %v32932_v30, %v14065_v63  ;;  %v14591_v30 = vld [vmem:[%s35103_s15] sm:$0xff]  ;;  %v33162_v63 = vsub.f32 %v14595_v53, %v14630_v62 }
0x28db   :  { %v14068_v25 = vadd.f32 %v14067_v13, %v14062_v33  ;;  %v33166_v33 = vsub.f32 %v14597_v43, %v14636_v0  ;;  %v35215_v43 = vand.u32 4294901760, %v33112_v37 }
0x28dd   :  { %v14075_v50 = vmul.f32 %v14073_v32, %v14068_v25  ;;  %v33168_v25 = vsub.f32 %v14598_v3, %v14639_v59  ;;  %v14605_v32 = vld [vmem:[%s35103_s15 + $0x70] sm:$0xff] }
0x28df   :  { %v33023_v8 = vadd.f32 %v14082_v5, %v14075_v50  ;;  %v14606_v5 = vld [vmem:[%s35103_s15 + $0x78] sm:$0xff]  ;;  %v33176_v50 = vsub.f32 %v14599_v9, %v14642_v39 }
0x28e1   :  { %35367 = vst [vmem:[#allocation7_spill] sm:$0xff] %v33023_v8  ;;  %v14101_v56 = vsel %vm101_vm0, %v33023_v8, 0 }
0x28e2   :  { %v33027_v48 = vand.u32 4294901760, %v14101_v56 }
0x28e4   :  { %v14173_v29 = vsub.f32 %v14101_v56, %v33027_v48 }
0x28e6   :  { %v14174_v23 = vand.u32 4294901760, %v14173_v29 }
0x28e8   :  { %v14175_v17 = vsub.f32 %v14173_v29, %v14174_v23 }
0x28ea   :  { %v14176_v10 = vand.u32 4294901760, %v14175_v17 }
0x28ec   :  { %25701 = vmatmul.mubr.f32.vlgmr.msra.gmra.mrb[52].mxu1 %v14176_v10  ;;  %25977 = vmatmul.mubr.f32.vlgmr.msra.gmra.mrb[48].mxu0 %v14176_v10 }
0x28ed   :  { %28280 = vmatpush3.bf16.msra.mxu1 %v28279_v16  ;;  %28460 = vmatpush3.bf16.msra.mxu0 %v28459_v49  ;;  %v14633_v16 = vand.u32 4294901760, %v14596_v51  ;;  %v33132_v49 = vpack.c.bf16 %v14639_v59, %v14636_v0  ;;  %v14733_v59 = vsub.f32 %v33112_v37, %v35215_v43 }
0x28ee   :  { %28281 = vmatprep.subr.bf16.mxu1 %v35313_v42  ;;  %28461 = vmatprep.subr.bf16.mxu0 %v35313_v42 }
0x28ef   :  { %25711 = vmatprep.mubr.msk.f32.mxu1 %vm29826_vm1, %v35312_v55  ;;  %25987 = vmatprep.mubr.msk.f32.mxu0 %vm29826_vm1, %v35312_v55  ;;  %v33122_v20 = vpack.c.bf16 %v14633_v16, %v14630_v62  ;;  %v33164_v13 = vsub.f32 %v14596_v51, %v14633_v16  ;;  %v35216_v16 = vand.u32 4294901760, %v33110_v31 }
0x28f1   :  { %28283 = vmatpush3.bf16.msra.mxu1 %v28282_v35  ;;  %28463 = vmatpush3.bf16.msra.mxu0 %v28462_v38  ;;  %v14600_v35 = vld [vmem:[%s35103_s15 + $0x48] sm:$0xff]  ;;  %v14726_v0 = vsub.f32 %v33110_v31, %v35216_v16 }
0x28f2   :  { %28284 = vmatprep.subr.bf16.mxu1 %v35313_v42  ;;  %28464 = vmatprep.subr.bf16.mxu0 %v35313_v42  ;;  %v14645_v38 = vand.u32 4294901760, %v14600_v35 }
0x28f3   :  { %v14727_v9 = vand.u32 4294901760, %v14726_v0 }
0x28f4   :  { %25712 = vmatmul.mubr.f32.vlgmr.msra.gmra.mrb[54].mxu1 %v33027_v48  ;;  %25988 = vmatmul.mubr.f32.vlgmr.msra.gmra.mrb[48].mxu0 %v33027_v48  ;;  %v33178_v56 = vsub.f32 %v14600_v35, %v14645_v38  ;;  %v14734_v35 = vand.u32 4294901760, %v14733_v59 }
0x28f5   :  { %28286 = vmatpush3.bf16.msra.mxu1 %v28285_v21  ;;  %28466 = vmatpush3.bf16.msra.mxu0 %v28465_v11  ;;  %v33142_v21 = vpack.c.bf16 %v14645_v38, %v14642_v39  ;;  %v14601_v11 = vld [vmem:[%s35103_s15 + $0x50] sm:$0xff]  ;;  %v35214_v39 = vand.u32 4294901760, %v33162_v63  ;;  %v35213_v38 = vand.u32 4294901760, %v33164_v13 }
0x28f6   :  { %28287 = vmatprep.subr.bf16.mxu1 %v35313_v42  ;;  %28467 = vmatprep.subr.bf16.mxu0 %v35313_v42 }
0x28f7   :  { %25722 = vmatprep.mubr.msk.f32.mxu1 %vm29826_vm1, %v35312_v55  ;;  %25998 = vmatprep.mubr.msk.f32.mxu0 %vm29826_vm1, %v35312_v55 }
0x28f9   :  { %28289 = vmatpush3.bf16.msra.mxu1 %v28288_v14  ;;  %28469 = vmatpush3.bf16.msra.mxu0 %v28468_v61  ;;  %v14602_v14 = vld [vmem:[%s35103_s15 + $0x58] sm:$0xff]  ;;  %v14648_v61 = vand.u32 4294901760, %v14601_v11 }
0x28fa   :  { %28290 = vmatprep.subr.bf16.mxu1 %v35313_v42  ;;  %28470 = vmatprep.subr.bf16.mxu0 %v35313_v42 }
0x28fc   :  { %25723 = vmatmul.mubr.f32.vlgmr.msra.gmra.mrb[56].mxu1 %v14173_v29  ;;  %25999 = vmatmul.mubr.f32.vlgmr.msra.gmra.mrb[48].mxu0 %v14173_v29 }
0x28fd   :  { %28292 = vmatpush3.bf16.msra.mxu1 %v32950_v57  ;;  %28472 = vmatpush3.bf16.msra.mxu0 %v32956_v4 }
0x28fe   :  { %28293 = vmatprep.subr.bf16.mxu1 %v35313_v42  ;;  %28473 = vmatprep.subr.bf16.mxu0 %v35313_v42 }
0x28ff   :  { %25733 = vmatprep.mubr.msk.f32.mxu1 %vm29826_vm1, %v35312_v55  ;;  %26009 = vmatprep.mubr.msk.f32.mxu0 %vm29826_vm1, %v35312_v55 }
0x2901   :  { %28295 = vmatpush3.bf16.msra.mxu1 %v32980_v24  ;;  %28475 = vmatpush3.bf16.msra.mxu0 %v32988_v47 }
0x2902   :  { %28296 = vmatprep.subr.bf16.mxu1 %v35313_v42  ;;  %28476 = vmatprep.subr.bf16.mxu0 %v35313_v42 }
0x2904   :  { %25734 = vmatmul.mubr.f32.vlgmr.msra.gmra.mrb[58].mxu1 %v14174_v23  ;;  %26010 = vmatmul.mubr.f32.vlgmr.msra.gmra.mrb[48].mxu0 %v14174_v23 }
0x2905   :  { %28298 = vmatpush3.bf16.msra.mxu1 %v28297_v19  ;;  %28478 = vmatpush3.bf16.msra.mxu0 %v28477_v22  ;;  %v14651_v19 = vand.u32 4294901760, %v14602_v14 }
0x2906   :  { %28299 = vmatprep.subr.bf16.mxu1 %v35313_v42  ;;  %28479 = vmatprep.subr.bf16.mxu0 %v35313_v42 }
0x2907   :  { %25744 = vmatprep.mubr.msk.f32.mxu1 %vm29826_vm1, %v35312_v55  ;;  %26020 = vmatprep.mubr.msk.f32.mxu0 %vm29826_vm1, %v35312_v55  ;;  %v33152_v22 = vpack.c.bf16 %v14651_v19, %v14648_v61  ;;  %v33182_v29 = vsub.f32 %v14602_v14, %v14651_v19  ;;  %v14740_v14 = vsub.f32 %v33162_v63, %v35214_v39 }
0x2909   :  { %28301 = vmatpush3.bf16.msra.mxu1 %v28300_v41  ;;  %28481 = vmatpush3.bf16.msra.mxu0 %v28480_v44  ;;  %v14603_v41 = vld [vmem:[%s35103_s15 + $0x60] sm:$0xff]  ;;  %v14604_v44 = vld [vmem:[%s35103_s15 + $0x68] sm:$0xff]  ;;  %v14741_v19 = vand.u32 4294901760, %v14740_v14  ;;  %v35205_v14 = vand.u32 4294901760, %v33182_v29 }
0x290a   :  { %28302 = vmatprep.subr.bf16.mxu1 %v35313_v42  ;;  %28482 = vmatprep.subr.bf16.mxu0 %v35313_v42  ;;  %v14654_v27 = vand.u32 4294901760, %v14603_v41  ;;  %v14657_v1 = vand.u32 4294901760, %v14604_v44 }
0x290c   :  { %25745 = vmatmul.mubr.f32.vlgmr.msra.gmra.mrb[60].mxu1 %v33027_v48  ;;  %26021 = vmatmul.mubr.f32.vlgmr.msra.gmra.mrb[48].mxu0 %v33027_v48  ;;  %v33184_v23 = vpack.c.bf16 %v14657_v1, %v14654_v27  ;;  %v33186_v17 = vsub.f32 %v14603_v41, %v14654_v27  ;;  %v33188_v10 = vsub.f32 %v14604_v44, %v14657_v1  ;;  %v35212_v44 = vand.u32 4294901760, %v33166_v33 }
0x290d   :  { %28304 = vmatpush3.bf16.msra.mxu1 %v32950_v57  ;;  %28484 = vmatpush3.bf16.msra.mxu0 %v32956_v4  ;;  %v14592_v57 = vld [vmem:[%s35103_s15 + $0x8] sm:$0xff]  ;;  %v14618_v4 = vand.u32 4294901760, %v14591_v30  ;;  %v35211_v27 = vand.u32 4294901760, %v33168_v25 }
0x290e   :  { %28305 = vmatprep.subr.bf16.mxu1 %v35313_v42  ;;  %28485 = vmatprep.subr.bf16.mxu0 %v35313_v42 }
0x290f   :  { %25755 = vmatprep.mubr.msk.f32.mxu1 %vm29826_vm1, %v35312_v55  ;;  %26031 = vmatprep.mubr.msk.f32.mxu0 %vm29826_vm1, %v35312_v55  ;;  %v33096_v60 = vsub.f32 %v14591_v30, %v14618_v4  ;;  %v14660_v30 = vand.u32 4294901760, %v14605_v32 }
0x2911   :  { %28307 = vmatpush3.bf16.msra.mxu1 %v32980_v24  ;;  %28487 = vmatpush3.bf16.msra.mxu0 %v32988_v47  ;;  %v14621_v24 = vand.u32 4294901760, %v14592_v57  ;;  %v33193_v2 = vsub.f32 %v14605_v32, %v14660_v30  ;;  %v14754_v32 = vsub.f32 %v33166_v33, %v35212_v44 }
0x2912   :  { %28308 = vmatprep.subr.bf16.mxu1 %v35313_v42  ;;  %28488 = vmatprep.subr.bf16.mxu0 %v35313_v42 }
0x2913   :  { %v33094_v47 = vpack.c.bf16 %v14621_v24, %v14618_v4  ;;  %v33098_v28 = vsub.f32 %v14592_v57, %v14621_v24  ;;  %v14663_v57 = vand.u32 4294901760, %v14606_v5  ;;  %v35218_v4 = vand.u32 4294901760, %v33096_v60 }
0x2914   :  { %25756 = vmatmul.mubr.f32.vlgmr.msra.gmra.mrb[62].mxu1 %v33027_v48  ;;  %26032 = vmatmul.mubr.f32.vlgmr.msra.gmra.mrb[48].mxu0 %v33027_v48  ;;  %v33180_v48 = vsub.f32 %v14601_v11, %v14648_v61  ;;  %v33220_v11 = vpack.c.bf16 %v14734_v35, %v14727_v9  ;;  %v14747_v61 = vsub.f32 %v33164_v13, %v35213_v38 }
0x2915   :  { %25790 = vmatprep.mubr.msk.f32.mxu1 %vm29826_vm1, %v35312_v55  ;;  %26042 = vmatprep.mubr.msk.f32.mxu0 %vm29826_vm1, %v35312_v55  ;;  %v35217_v24 = vand.u32 4294901760, %v33098_v28  ;;  %v33196_v6 = vpack.c.bf16 %v14663_v57, %v14660_v30  ;;  %v33198_v18 = vsub.f32 %v14606_v5, %v14663_v57  ;;  %v14712_v26 = vsub.f32 %v33096_v60, %v35218_v4 }
0x2916   :  { %28310 = vmatpush3.bf16.msra.mxu1 %v33094_v47  ;;  %v14748_v41 = vand.u32 4294901760, %v14747_v61  ;;  %v14761_v5 = vsub.f32 %v33168_v25, %v35211_v27  ;;  %v14755_v30 = vand.u32 4294901760, %v14754_v32  ;;  %v35203_v35 = vand.u32 4294901760, %v33180_v48 }
0x2917   :  { %28311 = vmatprep.subr.bf16.mxu1 %v35313_v42  ;;  %v14719_v53 = vsub.f32 %v33098_v28, %v35217_v24  ;;  %v14713_v51 = vand.u32 4294901760, %v14712_v26  ;;  %v35207_v26 = vand.u32 4294901760, %v33176_v50 }
0x2918   :  { %v33230_v1 = vpack.c.bf16 %v14748_v41, %v14741_v19  ;;  %v14762_v57 = vand.u32 4294901760, %v14761_v5  ;;  %v14782_v19 = vsub.f32 %v33180_v48, %v35203_v35  ;;  %v14789_v41 = vsub.f32 %v33182_v29, %v35205_v14 }
0x2919   :  { %v14720_v62 = vand.u32 4294901760, %v14719_v53  ;;  %v35204_v53 = vand.u32 4294901760, %v33178_v56 }
0x291a   :  { %28313 = vmatpush3.bf16.msra.mxu1 %v33108_v34  ;;  %v14783_v32 = vand.u32 4294901760, %v14782_v19  ;;  %v14790_v5 = vand.u32 4294901760, %v14789_v41  ;;  %v35209_v19 = vand.u32 4294901760, %v33198_v18 }
0x291b   :  { %28314 = vmatprep.subr.bf16.mxu1 %v35313_v42  ;;  %v33210_v3 = vpack.c.bf16 %v14720_v62, %v14713_v51  ;;  %v33240_v51 = vpack.c.bf16 %v14762_v57, %v14755_v30  ;;  %v14768_v62 = vsub.f32 %v33176_v50, %v35207_v26  ;;  %v14775_v0 = vsub.f32 %v33178_v56, %v35204_v53 }
0x291c   :  { %v35206_v30 = vand.u32 4294901760, %v33186_v17  ;;  %v35210_v57 = vand.u32 4294901760, %v33188_v10  ;;  %v35208_v53 = vand.u32 4294901760, %v33193_v2 }
0x291d   :  { %v14769_v59 = vand.u32 4294901760, %v14768_v62  ;;  %v14776_v9 = vand.u32 4294901760, %v14775_v0  ;;  %v28348_v62 = vpack.c.bf16 %v14790_v5, %v14783_v32  ;;  %v14817_v32 = vsub.f32 %v33198_v18, %v35209_v19 }
0x291e   :  { %28316 = vmatpush3.bf16.msra.mxu1 %v33122_v20  ;;  %v14796_v0 = vsub.f32 %v33186_v17, %v35206_v30  ;;  %v14810_v14 = vsub.f32 %v33193_v2, %v35208_v53  ;;  %v28369_v53 = vpack.c.bf16 %v33178_v56, %v33176_v50 }
0x291f   :  { %28317 = vmatprep.subr.bf16.mxu1 %v35313_v42  ;;  %v33250_v61 = vpack.c.bf16 %v14776_v9, %v14769_v59  ;;  %v14803_v59 = vsub.f32 %v33188_v10, %v35210_v57  ;;  %v14818_v30 = vand.u32 4294901760, %v14817_v32  ;;  %v21866_v57 = vld [vmem:[%s35105_s14] ss:$0 sm:$0xff] }
0x2920   :  { %v14797_v9 = vand.u32 4294901760, %v14796_v0  ;;  %v14811_v5 = vand.u32 4294901760, %v14810_v14  ;;  %v28357_v0 = vpack.c.bf16 %v33098_v28, %v33096_v60  ;;  %v28372_v14 = vpack.c.bf16 %v33182_v29, %v33180_v48 }
0x2921   :  { %v14804_v35 = vand.u32 4294901760, %v14803_v59  ;;  %v28360_v59 = vpack.c.bf16 %v33112_v37, %v33110_v31 }
0x2922   :  { %28319 = vmatpush3.bf16.msra.mxu1 %v33132_v49  ;;  %v28354_v26 = vpack.c.bf16 %v14818_v30, %v14811_v5 }
0x2923   :  { %28320 = vmatprep.subr.bf16.mxu1 %v35313_v42  ;;  %v28351_v41 = vpack.c.bf16 %v14804_v35, %v14797_v9  ;;  %v28363_v35 = vpack.c.bf16 %v33164_v13, %v33162_v63  ;;  %v28366_v9 = vpack.c.bf16 %v33168_v25, %v33166_v33 }
0x2926   :  { %28322 = vmatpush3.bf16.msra.mxu1 %v33142_v21 }
0x2927   :  { %28323 = vmatprep.subr.bf16.mxu1 %v35313_v42 }
0x292a   :  { %28325 = vmatpush3.bf16.msra.mxu1 %v33152_v22 }
0x292b   :  { %28326 = vmatprep.subr.bf16.mxu1 %v35313_v42 }
0x292e   :  { %28328 = vmatpush3.bf16.msra.mxu1 %v33184_v23 }
0x292f   :  { %28329 = vmatprep.subr.bf16.mxu1 %v35313_v42 }
0x2932   :  { %28331 = vmatpush3.bf16.msra.mxu1 %v33196_v6 }
0x2933   :  { %28332 = vmatprep.subr.bf16.mxu1 %v35313_v42 }
0x29bf   :  { %v14178_v5 = vpop.f32.mrb[52].mxu1 }
0x29c0   :  { %v25702_v19 = vpop.f32.mrb[53].mxu1  ;;  %v14179_v27 = vadd.f32 %v21866_v57, %v14178_v5 }
0x29c7   :  { %v14269_v44 = vpop.f32.mrb[54].mxu1 }
0x29c8   :  { %v14270_v38 = vadd.f32 %v14269_v44, %v14179_v27  ;;  %v25713_v39 = vpop.f32.mrb[55].mxu1  ;;  %v35378_v27 = vand.u32 4294901760, %v33176_v50  ;;  %v35384_v50 = vand.u32 4294901760, %v33193_v2 }
0x29cf   :  { %v14349_v43 = vpop.f32.mrb[56].mxu1 }
0x29d0   :  { %v14350_v16 = vadd.f32 %v14349_v43, %v14270_v38  ;;  %v25724_v24 = vpop.f32.mrb[57].mxu1 }
0x29d7   :  { %v14426_v4 = vpop.f32.mrb[58].mxu1 }
0x29d8   :  { %v14427_v40 = vadd.f32 %v14426_v4, %v14350_v16  ;;  %v25735_v54 = vpop.f32.mrb[59].mxu1  ;;  %v35373_v16 = vand.u32 4294901760, %v33112_v37 }
0x29df   :  { %v14509_v30 = vpop.f32.mrb[60].mxu1 }
0x29e0   :  { %v14510_v8 = vadd.f32 %v14509_v30, %v14427_v40  ;;  %v25746_v36 = vpop.f32.mrb[61].mxu1  ;;  %v15822_v30 = vld [vmem:[%s35109_s21] sm:$0xff] }
0x29e1   :  { %v35371_v36 = vand.u32 4294901760, %v33098_v28  ;;  %v35375_v28 = vand.u32 4294901760, %v33164_v13  ;;  %v35381_v13 = vand.u32 4294901760, %v33182_v29  ;;  %v15837_v5 = vand.u32 4294901760, %v15822_v30 }
0x29e7   :  { %v14584_v32 = vpop.f32.mrb[62].mxu1  ;;  %v33293_v12 = vpop.f32.mrb[48].mxu0 }
0x29e8   :  { %v14585_v19 = vadd.f32 %v14584_v32, %v14510_v8  ;;  %v25757_v15 = vpop.f32.mrb[63].mxu1  ;;  %v26033_v58 = vpop.f32.mrb[49].mxu0  ;;  %v35372_v8 = vand.u32 4294901760, %v33110_v31  ;;  %v35377_v31 = vand.u32 4294901760, %v33168_v25  ;;  %v35383_v25 = vand.u32 4294901760, %v33188_v10  ;;  %v15823_v32 = vld [vmem:[%s35109_s21 + $0x8] sm:$0xff] }
0x29e9   :  { %v35368_v58 = vpack.c.bf16 %v33188_v10, %v33186_v17  ;;  %v35370_v15 = vand.u32 4294901760, %v33096_v60  ;;  %v35374_v60 = vand.u32 4294901760, %v33162_v63  ;;  %v35380_v63 = vand.u32 4294901760, %v33180_v48 }
0x29ea   :  { %v14589_v57 = vadd.f32 %v14588_v45, %v14585_v19  ;;  %v35369_v45 = vpack.c.bf16 %v33198_v18, %v33193_v2  ;;  %v15840_v19 = vand.u32 4294901760, %v15823_v32 }
0x29eb   :  { %v28405_v40 = vpack.c.bf16 %v35371_v36, %v35370_v15  ;;  %v28411_v38 = vpack.c.bf16 %v35375_v28, %v35374_v60 }
0x29ec   :  { %29776 = vtanh.f32 %v14589_v57  ;;  %v33439_v57 = vpack.c.bf16 %v15840_v19, %v15837_v5 }
0x29ee   :  { %28490 = vmatpush3.bf16.msra.mxu0 %v33439_v57 }
0x29ef   :  { %28491 = vmatprep.subr.bf16.mxu0 %v35313_v42 }
0x29f6   :  { %v29777_v44 = vpop.eup %29776 }
0x29f7   :  { %v33295_v39 = vand.u32 4294901760, %v29777_v44 }
0x29f9   :  { %v14699_v24 = vsub.f32 %v29777_v44, %v33295_v39  ;;  %v33441_v44 = vsub.f32 %v15822_v30, %v15837_v5 }
0x29fb   :  { %v14700_v43 = vand.u32 4294901760, %v14699_v24 }
0x29fd   :  { %v14701_v4 = vsub.f32 %v14699_v24, %v14700_v43 }
0x29ff   :  { %v14702_v54 = vand.u32 4294901760, %v14701_v4 }
0x2a01   :  { %25791 = vmatmul.mubr.f32.vlgmr.msra.gmra.mrb[64].mxu1 %v14702_v54  ;;  %v15918_v54 = vand.u32 4294901760, %v33441_v44 }
0x2a02   :  { %28334 = vmatpush3.bf16.msra.mxu1 %v33210_v3  ;;  %25825 = vmatprep.mubr.msk.f32.mxu1 %vm29826_vm1, %v35312_v55  ;;  %v28408_v3 = vpack.c.bf16 %v35373_v16, %v35372_v8 }
0x2a03   :  { %28335 = vmatprep.subr.bf16.mxu1 %v35313_v42 }
0x2a06   :  { %28337 = vmatpush3.bf16.msra.mxu1 %v33220_v11  ;;  %v35376_v11 = vand.u32 4294901760, %v33166_v33  ;;  %v35382_v33 = vand.u32 4294901760, %v33186_v17  ;;  %v29816_v17 = vld [vmem:[%s35107_s4] sm:$0xff] }
0x2a07   :  { %28338 = vmatprep.subr.bf16.mxu1 %v35313_v42 }
0x2a08   :  { %v28414_v37 = vpack.c.bf16 %v35377_v31, %v35376_v11 }
0x2a0a   :  { %28340 = vmatpush3.bf16.msra.mxu1 %v33230_v1  ;;  %v35379_v1 = vand.u32 4294901760, %v33178_v56  ;;  %v35385_v56 = vand.u32 4294901760, %v33198_v18 }
0x2a0b   :  { %28341 = vmatprep.subr.bf16.mxu1 %v35313_v42 }
0x2a0e   :  { %28343 = vmatpush3.bf16.msra.mxu1 %v33240_v51  ;;  %v28423_v51 = vpack.c.bf16 %v35383_v25, %v35382_v33 }
0x2a0f   :  { %28344 = vmatprep.subr.bf16.mxu1 %v35313_v42 }
0x2a12   :  { %28346 = vmatpush3.bf16.msra.mxu1 %v33250_v61  ;;  %v28426_v61 = vpack.c.bf16 %v35385_v56, %v35384_v50  ;;  %v15270_v50 = vld [vmem:[#allocation2] sm:$0xff] }
0x2a13   :  { %28347 = vmatprep.subr.bf16.mxu1 %v35313_v42 }
0x2a16   :  { %28349 = vmatpush3.bf16.msra.mxu1 %v28348_v62 }
0x2a17   :  { %28350 = vmatprep.subr.bf16.mxu1 %v35313_v42 }
0x2a1a   :  { %28352 = vmatpush3.bf16.msra.mxu1 %v28351_v41  ;;  %v35386_v41 = vmov 6  }
0x2a1b   :  { %28353 = vmatprep.subr.bf16.mxu1 %v35313_v42 }
0x2a1e   :  { %28355 = vmatpush3.bf16.msra.mxu1 %v28354_v26  ;;  %v28417_v26 = vpack.c.bf16 %v35379_v1, %v35378_v27 }
0x2a1f   :  { %28356 = vmatprep.subr.bf16.mxu1 %v35313_v42 }
0x2a21   :  { %25826 = vmatmul.mubr.f32.vlgmr.msra.gmra.mrb[64].mxu1 %v33295_v39 }
0x2a22   :  { %28358 = vmatpush3.bf16.msra.mxu1 %v28357_v0  ;;  %25860 = vmatprep.mubr.msk.f32.mxu1 %vm29826_vm1, %v35312_v55  ;;  %v35387_v0 = vmov 5  }
0x2a23   :  { %28359 = vmatprep.subr.bf16.mxu1 %v35313_v42 }
0x2a26   :  { %28361 = vmatpush3.bf16.msra.mxu1 %v28360_v59  ;;  %v35388_v59 = vmov 0  }
0x2a27   :  { %28362 = vmatprep.subr.bf16.mxu1 %v35313_v42 }
0x2a2a   :  { %28364 = vmatpush3.bf16.msra.mxu1 %v28363_v35  ;;  %v21868_v35 = vld [vmem:[%s35108_s20] ss:$0 sm:$0xff] }
0x2a2b   :  { %28365 = vmatprep.subr.bf16.mxu1 %v35313_v42 }
0x2a2e   :  { %28367 = vmatpush3.bf16.msra.mxu1 %v28366_v9  ;;  %v35389_v9 = vmov 7  }
0x2a2f   :  { %28368 = vmatprep.subr.bf16.mxu1 %v35313_v42 }
0x2a32   :  { %28370 = vmatpush3.bf16.msra.mxu1 %v28369_v53  ;;  %v28420_v53 = vpack.c.bf16 %v35381_v13, %v35380_v63 }
0x2a33   :  { %28371 = vmatprep.subr.bf16.mxu1 %v35313_v42 }
0x2a36   :  { %28373 = vmatpush3.bf16.msra.mxu1 %v28372_v14  ;;  %v33428_v14 = vadd.f32 %v21868_v35, %v33293_v12  ;;  %v33443_v12 = vsub.f32 %v15823_v32, %v15840_v19  ;;  %v15312_v32 = vld [vmem:[#allocation2 + $0x30] sm:$0xff] }
0x2a37   :  { %28374 = vmatprep.subr.bf16.mxu1 %v35313_v42 }
0x2a3a   :  { %28376 = vmatpush3.bf16.msra.mxu1 %v35368_v58  ;;  %v15925_v58 = vand.u32 4294901760, %v33443_v12 }
0x2a3b   :  { %28377 = vmatprep.subr.bf16.mxu1 %v35313_v42 }
0x2a3c   :  { %v15926_v8 = vsub.f32 %v33443_v12, %v15925_v58  ;;  %v28513_v13 = vpack.c.bf16 %v15925_v58, %v15918_v54 }
0x2a3e   :  { %28379 = vmatpush3.bf16.msra.mxu1 %v35369_v45  ;;  %v15927_v28 = vand.u32 4294901760, %v15926_v8  ;;  %v16349_v8 = vld [vmem:[%s35110_s3 + $0x18] sm:$0xff] }
0x2a3f   :  { %28380 = vmatprep.subr.bf16.mxu1 %v35313_v42 }
0x2a41   :  { %25861 = vmatmul.mubr.f32.vlgmr.msra.gmra.mrb[64].mxu1 %v14699_v24  ;;  %v15825_v24 = vld [vmem:[%s35109_s21 + $0x18] sm:$0xff] }
0x2a42   :  { %28382 = vmatpush3.bf16.msra.mxu1 %v33094_v47  ;;  %25895 = vmatprep.mubr.msk.f32.mxu1 %vm29826_vm1, %v35312_v55  ;;  %v15846_v4 = vand.u32 4294901760, %v15825_v24 }
0x2a43   :  { %28383 = vmatprep.subr.bf16.mxu1 %v35313_v42 }
0x2a44   :  { %v33459_v36 = vsub.f32 %v15825_v24, %v15846_v4 }
0x2a46   :  { %28385 = vmatpush3.bf16.msra.mxu1 %v33108_v34  ;;  %v15939_v60 = vand.u32 4294901760, %v33459_v36 }
0x2a47   :  { %28386 = vmatprep.subr.bf16.mxu1 %v35313_v42 }
0x2a48   :  { %v15940_v11 = vsub.f32 %v33459_v36, %v15939_v60 }
0x2a4a   :  { %28388 = vmatpush3.bf16.msra.mxu1 %v33122_v20  ;;  %v15941_v27 = vand.u32 4294901760, %v15940_v11 }
0x2a4b   :  { %28389 = vmatprep.subr.bf16.mxu1 %v35313_v42 }
0x2a4e   :  { %28391 = vmatpush3.bf16.msra.mxu1 %v33132_v49 }
0x2a4f   :  { %28392 = vmatprep.subr.bf16.mxu1 %v35313_v42 }
0x2a52   :  { %28394 = vmatpush3.bf16.msra.mxu1 %v33142_v21 }
0x2a53   :  { %28395 = vmatprep.subr.bf16.mxu1 %v35313_v42 }
0x2a56   :  { %28397 = vmatpush3.bf16.msra.mxu1 %v33152_v22 }
0x2a57   :  { %28398 = vmatprep.subr.bf16.mxu1 %v35313_v42 }
0x2a5a   :  { %28400 = vmatpush3.bf16.msra.mxu1 %v33184_v23 }
0x2a5b   :  { %28401 = vmatprep.subr.bf16.mxu1 %v35313_v42 }
0x2a5e   :  { %28403 = vmatpush3.bf16.msra.mxu1 %v33196_v6 }
0x2a5f   :  { %28404 = vmatprep.subr.bf16.mxu1 %v35313_v42 }
0x2a61   :  { %25896 = vmatmul.mubr.f32.vlgmr.msra.gmra.mrb[64].mxu1 %v14700_v43 }
0x2a62   :  { %28406 = vmatpush3.bf16.msra.mxu1 %v28405_v40  ;;  %25930 = vmatprep.mubr.msk.f32.mxu1 %vm29826_vm1, %v35312_v55  ;;  %v15919_v40 = vsub.f32 %v33441_v44, %v15918_v54 }
0x2a63   :  { %28407 = vmatprep.subr.bf16.mxu1 %v35313_v42 }
0x2a64   :  { %v15920_v16 = vand.u32 4294901760, %v15919_v40 }
0x2a66   :  { %28409 = vmatpush3.bf16.msra.mxu1 %v28408_v3  ;;  %v28495_v31 = vpack.c.bf16 %v15927_v28, %v15920_v16 }
0x2a67   :  { %28410 = vmatprep.subr.bf16.mxu1 %v35313_v42 }
0x2a6a   :  { %28412 = vmatpush3.bf16.msra.mxu1 %v28411_v38 }
0x2a6b   :  { %28413 = vmatprep.subr.bf16.mxu1 %v35313_v42 }
0x2a6e   :  { %28415 = vmatpush3.bf16.msra.mxu1 %v28414_v37 }
0x2a6f   :  { %28416 = vmatprep.subr.bf16.mxu1 %v35313_v42 }
0x2a72   :  { %28418 = vmatpush3.bf16.msra.mxu1 %v28417_v26  ;;  %v28501_v26 = vpack.c.bf16 %v33443_v12, %v33441_v44  ;;  %v15319_v44 = vld [vmem:[#allocation2 + $0x38] sm:$0xff] }
0x2a73   :  { %28419 = vmatprep.subr.bf16.mxu1 %v35313_v42 }
0x2a76   :  { %28421 = vmatpush3.bf16.msra.mxu1 %v28420_v53 }
0x2a77   :  { %28422 = vmatprep.subr.bf16.mxu1 %v35313_v42 }
0x2a7a   :  { %28424 = vmatpush3.bf16.msra.mxu1 %v28423_v51  ;;  %v15277_v51 = vld [vmem:[#allocation2 + $0x8] sm:$0xff] }
0x2a7b   :  { %28425 = vmatprep.subr.bf16.mxu1 %v35313_v42 }
0x2a7e   :  { %28427 = vmatpush3.bf16.msra.mxu1 %v28426_v61 }
0x2a7f   :  { %28428 = vmatprep.subr.bf16.mxu1 %v35313_v42 }
0x2a81   :  { %25931 = vmatmul.mubr.f32.vlgmr.msra.gmra.mrb[64].mxu1 %v33295_v39 }
0x2a82   :  { %28430 = vmatpush3.bf16.msra.mxu1 %v33094_v47  ;;  %25965 = vmatprep.mubr.msk.f32.mxu1 %vm29826_vm1, %v35312_v55  ;;  %v14615_v47 = vpop.permute.xlu0 %14614 }
0x2a83   :  { %28431 = vmatprep.subr.bf16.mxu1 %v35313_v42 }
0x2a86   :  { %28433 = vmatpush3.bf16.msra.mxu1 %v33108_v34 }
0x2a87   :  { %28434 = vmatprep.subr.bf16.mxu1 %v35313_v42 }
0x2a8a   :  { %28436 = vmatpush3.bf16.msra.mxu1 %v33122_v20 }
0x2a8b   :  { %28437 = vmatprep.subr.bf16.mxu1 %v35313_v42 }
0x2a8e   :  { %28439 = vmatpush3.bf16.msra.mxu1 %v33132_v49 }
0x2a8f   :  { %28440 = vmatprep.subr.bf16.mxu1 %v35313_v42 }
0x2a92   :  { %28442 = vmatpush3.bf16.msra.mxu1 %v33142_v21 }
0x2a93   :  { %28443 = vmatprep.subr.bf16.mxu1 %v35313_v42 }
0x2a96   :  { %28445 = vmatpush3.bf16.msra.mxu1 %v33152_v22 }
0x2a97   :  { %28446 = vmatprep.subr.bf16.mxu1 %v35313_v42 }
0x2a9a   :  { %28448 = vmatpush3.bf16.msra.mxu1 %v33184_v23 }
0x2a9b   :  { %28449 = vmatprep.subr.bf16.mxu1 %v35313_v42 }
0x2a9e   :  { %28451 = vmatpush3.bf16.msra.mxu1 %v33196_v6 }
0x2a9f   :  { %28704 = vmatprep.subr.bf16.mxu1 %v35313_v42 }
0x2aa1   :  { %25966 = vmatmul.mubr.f32.vlgmr.msra.gmra.mrb[64].mxu1 %v33295_v39  ;;  %v15824_v39 = vld [vmem:[%s35109_s21 + $0x10] sm:$0xff] }
0x2aa2   :  { %26384 = vmatprep.mubr.msk.f32.mxu1 %vm29826_vm1, %v35312_v55  ;;  %v15843_v43 = vand.u32 4294901760, %v15824_v39 }
0x2aa4   :  { %v33455_v45 = vpack.c.bf16 %v15846_v4, %v15843_v43  ;;  %v33457_v15 = vsub.f32 %v15824_v39, %v15843_v43 }
0x2aa6   :  { %28493 = vmatpush3.bf16.msra.mxu0 %v33455_v45  ;;  %v15932_v3 = vand.u32 4294901760, %v33457_v15  ;;  %v28504_v63 = vpack.c.bf16 %v33459_v36, %v33457_v15 }
0x2aa7   :  { %28494 = vmatprep.subr.bf16.mxu0 %v35313_v42 }
0x2aa8   :  { %v15933_v38 = vsub.f32 %v33457_v15, %v15932_v3  ;;  %v28516_v53 = vpack.c.bf16 %v15939_v60, %v15932_v3  ;;  %v35391_v3 = vld [vmem:[#allocation6_spill] sm:$0xff] }
0x2aa9   :  { %v16321_v60 = vadd.f32 %v33428_v14, %v35391_v3 }
0x2aaa   :  { %v15934_v37 = vand.u32 4294901760, %v15933_v38 }
0x2aac   :  { %v28498_v1 = vpack.c.bf16 %v15941_v27, %v15934_v37 }
0x2b74   :  { %v15254_v34 = vpop.f32.mrb[64].mxu1 }
0x2b75   :  { %v29197_v20 = vadd.f32 %v15254_v34, %v14615_v47  ;;  %v25967_v49 = vpop.f32.mrb[65].mxu1  ;;  %v15284_v47 = vld [vmem:[#allocation2 + $0x10] sm:$0xff] }
0x2b77   :  { %v15258_v21 = vsel %vm8416_vm10, %v29197_v20, -inf }
0x2b78   :  { %15259 = vmax.xlane.f32.xlu1 %v15258_v21 }
0x2c05   :  { %v15260_v22 = vpop.xlane.xlu1 %15259 }
0x2c06   :  { %v15261_v48 = vsub.f32 %v29197_v20, %v15260_v22 }
0x2c08   :  { %v15262_v29 = vmul.f32 1.442695, %v15261_v48  ;;  %v15291_v48 = vld [vmem:[#allocation2 + $0x18] sm:$0xff] }
0x2c0a   :  { %29778 = vpow2.f32 %v15262_v29 }
0x2c14   :  { %v29779_v23 = vpop.eup %29778 }
0x2c15   :  { %v15264_v10 = vmul.f32 %v29816_v17, %v29779_v23  ;;  %v15298_v17 = vld [vmem:[#allocation2 + $0x20] sm:$0xff] }
0x2c17   :  { %v15265_v2 = vsel %vm8416_vm10, %v15264_v10, 0.0 }
0x2c18   :  { %15266 = vadd.xlane.f32.xlu0 %v15265_v2 }
0x2ca5   :  { %v15267_v6 = vpop.xlane.xlu0 %15266 }
0x2ca6   :  { %29780 = vrcp.f32 %v15267_v6 }
0x2cb0   :  { %v29781_v18 = vpop.eup %29780 }
0x2cb1   :  { %v15269_v62 = vmul.f32 %v29781_v18, %v15264_v10  ;;  %v15305_v18 = vld [vmem:[#allocation2 + $0x28] sm:$0xff] }
0x2cb3   :  { %15279 = vperm.xlu1 %29663, %v15269_v62   ;;  %15273 = vperm.xlu0 %29661, %v15269_v62  }
0x2cb7   :  { %29664 = vset.pattern.permute.xlu1 %v35332_v7  ;;  %29665 = vset.pattern.permute.xlu0 %v35333_v46 }
0x2cb8   :  { %15286 = vperm.xlu1 %29664, %v15269_v62   ;;  %15293 = vperm.xlu0 %29665, %v15269_v62  }
0x2cbc   :  { %29666 = vset.pattern.permute.xlu1 %v35334_v52  ;;  %29668 = vset.pattern.permute.xlu0 %v35386_v41 }
0x2cbd   :  { %15300 = vperm.xlu1 %29666, %v15269_v62   ;;  %15314 = vperm.xlu0 %29668, %v15269_v62  }
0x2cc1   :  { %29667 = vset.pattern.permute.xlu1 %v35387_v0  ;;  %29671 = vset.pattern.permute.xlu0 %v35388_v59  ;;  %v16868_v0 = vld [vmem:[#allocation3] sm:$0xff] }
0x2cc2   :  { %15307 = vperm.xlu1 %29667, %v15269_v62  }
0x2cc6   :  { %29669 = vset.pattern.permute.xlu1 %v35389_v9 }
0x2cc7   :  { %15321 = vperm.xlu1 %29669, %v15269_v62  }
0x2ccb   :  { %16330 = vrot.lane.b32.xlu1 %v33428_v14, %s29828_s27 }
0x2ccc   :  { %29670 = vset.pattern.permute.xlu1 %v35388_v59 }
0x2ccf   :  { %16352 = vperm.xlu1 %29670, %v16349_v8  }
0x2d32   :  { %v15280_v33 = vpop.permute.xlu1 %15279  ;;  %v15274_v25 = vpop.permute.xlu0 %15273 }
0x2d33   :  { %v15282_v56 = vmul.f32 %v15280_v33, %v15277_v51  ;;  %v15276_v61 = vmul.f32 %v15274_v25, %v15270_v50  ;;  %v16369_v33 = vld [vmem:[%s35099_s13] sm:$0xff]  ;;  %v16370_v25 = vld [vmem:[%s35099_s13 + $0x8] sm:$0xff] }
0x2d34   :  { %v16384_v51 = vand.u32 4294901760, %v16369_v33  ;;  %v16387_v50 = vand.u32 4294901760, %v16370_v25 }
0x2d35   :  { %v15283_v20 = vadd.f32 %v15282_v56, %v15276_v61  ;;  %v17606_v56 = vld [vmem:[%s35106_s19] sm:$0xff]  ;;  %v17607_v61 = vld [vmem:[%s35106_s19 + $0x8] sm:$0xff] }
0x2d37   :  { %v15287_v34 = vpop.permute.xlu1 %15286  ;;  %v15294_v21 = vpop.permute.xlu0 %15293 }
0x2d38   :  { %v15289_v49 = vmul.f32 %v15287_v34, %v15284_v47  ;;  %v15296_v29 = vmul.f32 %v15294_v21, %v15291_v48  ;;  %v17618_v47 = vand.u32 4294901760, %v17606_v56  ;;  %v17621_v34 = vand.u32 4294901760, %v17607_v61 }
0x2d39   :  { %v33532_v21 = vsub.f32 %v16370_v25, %v16387_v50 }
0x2d3a   :  { %v15290_v22 = vadd.f32 %v15289_v49, %v15283_v20  ;;  %v33528_v20 = vpack.c.bf16 %v16387_v50, %v16384_v51  ;;  %v33530_v49 = vsub.f32 %v16369_v33, %v16384_v51  ;;  %v33536_v48 = vsub.f32 %v17606_v56, %v17618_v47 }
0x2d3b   :  { %v35392_v51 = vmov 1  }
0x2d3c   :  { %v15301_v23 = vpop.permute.xlu1 %15300  ;;  %v15297_v10 = vadd.f32 %v15296_v29, %v15290_v22  ;;  %v15315_v6 = vpop.permute.xlu0 %15314  ;;  %v33534_v22 = vpack.c.bf16 %v17621_v34, %v17618_v47  ;;  %v33538_v29 = vsub.f32 %v17607_v61, %v17621_v34  ;;  %v28537_v47 = vpack.c.bf16 %v33532_v21, %v33530_v49 }
0x2d3d   :  { %v15303_v2 = vmul.f32 %v15301_v23, %v15298_v17  ;;  %v15317_v5 = vmul.f32 %v15315_v6, %v15312_v32  ;;  %v16371_v23 = vld [vmem:[%s35099_s13 + $0x10] sm:$0xff]  ;;  %v16372_v17 = vld [vmem:[%s35099_s13 + $0x18] sm:$0xff] }
0x2d3e   :  { %v17608_v6 = vld [vmem:[%s35106_s19 + $0x10] sm:$0xff]  ;;  %28706 = vmatpush3.bf16.msra.mxu1 %v33534_v22  ;;  %v28717_v34 = vpack.c.bf16 %v33538_v29, %v33536_v48 }
0x2d3f   :  { %v15304_v35 = vadd.f32 %v15303_v2, %v15297_v10  ;;  %v16390_v10 = vand.u32 4294901760, %v16371_v23  ;;  %v16393_v2 = vand.u32 4294901760, %v16372_v17  ;;  %v17624_v32 = vand.u32 4294901760, %v17608_v6  ;;  %28707 = vmatprep.subr.bf16.mxu1 %v35313_v42 }
0x2d41   :  { %v15308_v62 = vpop.permute.xlu1 %15307 }
0x2d42   :  { %v15310_v30 = vmul.f32 %v15308_v62, %v15305_v18  ;;  %v17609_v18 = vld [vmem:[%s35106_s19 + $0x18] sm:$0xff]  ;;  %v16465_v62 = vand.u32 4294901760, %v33530_v49 }
0x2d44   :  { %v15311_v19 = vadd.f32 %v15310_v30, %v15304_v35  ;;  %v16472_v35 = vand.u32 4294901760, %v33532_v21 }
0x2d46   :  { %v15322_v12 = vpop.permute.xlu1 %15321  ;;  %v15318_v39 = vadd.f32 %v15317_v5, %v15311_v19  ;;  %v17627_v5 = vand.u32 4294901760, %v17609_v18  ;;  %v33558_v19 = vpack.c.bf16 %v16393_v2, %v16390_v10 }
0x2d47   :  { %v15324_v24 = vmul.f32 %v15322_v12, %v15319_v44  ;;  %v33560_v44 = vsub.f32 %v16371_v23, %v16390_v10  ;;  %v33562_v12 = vsub.f32 %v16372_v17, %v16393_v2  ;;  %v28549_v10 = vpack.c.bf16 %v16472_v35, %v16465_v62 }
0x2d49   :  { %v33473_v43 = vadd.f32 %v15324_v24, %v15318_v39  ;;  %v17699_v39 = vand.u32 4294901760, %v33536_v48  ;;  %v21872_v24 = vld [vmem:[#allocation5] ss:$0 sm:$0xff]  ;;  %v28540_v23 = vpack.c.bf16 %v33562_v12, %v33560_v44 }
0x2d4b   :  { %35390 = vst [vmem:[#allocation15_spill] sm:$0xff] %v33473_v43  ;;  %v15834_v4 = vsel %vm101_vm0, %v33473_v43, 0 }
0x2d4c   :  { %v15905_v54 = vand.u32 4294901760, %v15834_v4 }
0x2d4e   :  { %v15906_v58 = vsub.f32 %v15834_v4, %v15905_v54  ;;  %v33566_v4 = vpack.c.bf16 %v17627_v5, %v17624_v32 }
0x2d50   :  { %v15907_v15 = vand.u32 4294901760, %v15906_v58  ;;  %28709 = vmatpush3.bf16.msra.mxu1 %v33566_v4 }
0x2d51   :  { %28710 = vmatprep.subr.bf16.mxu1 %v35313_v42 }
0x2d52   :  { %v15908_v36 = vsub.f32 %v15906_v58, %v15907_v15 }
0x2d54   :  { %v15909_v40 = vand.u32 4294901760, %v15908_v36  ;;  %v16473_v36 = vsub.f32 %v33532_v21, %v16472_v35 }
0x2d56   :  { %26043 = vmatmul.mubr.f32.vlgmr.msra.gmra.mrb[50].mxu0 %v15909_v40  ;;  %v17700_v40 = vsub.f32 %v33536_v48, %v17699_v39 }
0x2d57   :  { %28496 = vmatpush3.bf16.msra.mxu0 %v28495_v31  ;;  %26053 = vmatprep.mubr.msk.f32.mxu0 %vm29826_vm1, %v35312_v55 }
0x2d58   :  { %28497 = vmatprep.subr.bf16.mxu0 %v35313_v42 }
0x2d5b   :  { %28499 = vmatpush3.bf16.msra.mxu0 %v28498_v1  ;;  %v16331_v1 = vpop.permute.xlu1 %16330 }
0x2d5c   :  { %28500 = vmatprep.subr.bf16.mxu0 %v35313_v42 }
0x2d5e   :  { %26054 = vmatmul.mubr.f32.vlgmr.msra.gmra.mrb[50].mxu0 %v15905_v54 }
0x2d5f   :  { %28502 = vmatpush3.bf16.msra.mxu0 %v28501_v26  ;;  %26064 = vmatprep.mubr.msk.f32.mxu0 %vm29826_vm1, %v35312_v55 }
0x2d60   :  { %28503 = vmatprep.subr.bf16.mxu0 %v35313_v42 }
0x2d63   :  { %28505 = vmatpush3.bf16.msra.mxu0 %v28504_v63  ;;  %v16356_v63 = vsub.f32 1.0, %v16349_v8  ;;  %v17706_v8 = vand.u32 4294901760, %v33538_v29 }
0x2d64   :  { %28506 = vmatprep.subr.bf16.mxu0 %v35313_v42 }
0x2d65   :  { %v28729_v2 = vpack.c.bf16 %v17706_v8, %v17699_v39 }
0x2d66   :  { %26065 = vmatmul.mubr.f32.vlgmr.msra.gmra.mrb[50].mxu0 %v15906_v58  ;;  %v33570_v58 = vsub.f32 %v17609_v18, %v17627_v5 }
0x2d67   :  { %28508 = vmatpush3.bf16.msra.mxu0 %v33439_v57  ;;  %26075 = vmatprep.mubr.msk.f32.mxu0 %vm29826_vm1, %v35312_v55 }
0x2d68   :  { %28509 = vmatprep.subr.bf16.mxu0 %v35313_v42 }
0x2d6b   :  { %28511 = vmatpush3.bf16.msra.mxu0 %v33455_v45 }
0x2d6c   :  { %28512 = vmatprep.subr.bf16.mxu0 %v35313_v42 }
0x2d6e   :  { %26076 = vmatmul.mubr.f32.vlgmr.msra.gmra.mrb[50].mxu0 %v15907_v15  ;;  %v16466_v15 = vsub.f32 %v33530_v49, %v16465_v62 }
0x2d6f   :  { %28514 = vmatpush3.bf16.msra.mxu0 %v28513_v13  ;;  %26086 = vmatprep.mubr.msk.f32.mxu0 %vm29826_vm1, %v35312_v55 }
0x2d70   :  { %28515 = vmatprep.subr.bf16.mxu0 %v35313_v42 }
0x2d73   :  { %28517 = vmatpush3.bf16.msra.mxu0 %v28516_v53 }
0x2d74   :  { %28518 = vmatprep.subr.bf16.mxu0 %v35313_v42 }
0x2d76   :  { %26087 = vmatmul.mubr.f32.vlgmr.msra.gmra.mrb[50].mxu0 %v15905_v54 }
0x2d77   :  { %28520 = vmatpush3.bf16.msra.mxu0 %v33439_v57  ;;  %26097 = vmatprep.mubr.msk.f32.mxu0 %vm29826_vm1, %v35312_v55  ;;  %v21869_v57 = vld [vmem:[%s35111_s22] ss:$0 sm:$0xff] }
0x2d78   :  { %28521 = vmatprep.subr.bf16.mxu0 %v35313_v42 }
0x2d7b   :  { %28523 = vmatpush3.bf16.msra.mxu0 %v33455_v45 }
0x2d7c   :  { %28524 = vmatprep.subr.bf16.mxu0 %v35313_v42 }
0x2d7e   :  { %26098 = vmatmul.mubr.f32.vlgmr.msra.gmra.mrb[50].mxu0 %v15905_v54  ;;  %v33568_v54 = vsub.f32 %v17608_v6, %v17624_v32 }
0x2d7f   :  { %26108 = vmatprep.mubr.msk.f32.mxu0 %vm29826_vm1, %v35312_v55  ;;  %28526 = vmatpush3.bf16.msra.mxu0 %v33528_v20 }
0x2d80   :  { %28527 = vmatprep.subr.bf16.mxu0 %v35313_v42  ;;  %v28720_v17 = vpack.c.bf16 %v33570_v58, %v33568_v54 }
0x2d83   :  { %28529 = vmatpush3.bf16.msra.mxu0 %v33558_v19 }
0x2d84   :  { %28530 = vmatprep.subr.bf16.mxu0 %v35313_v42 }
0x2e51   :  { %v16317_v16 = vpop.f32.mrb[50].mxu0 }
0x2e52   :  { %v29199_v45 = vadd.f32 %v21869_v57, %v16317_v16  ;;  %v26099_v28 = vpop.f32.mrb[51].mxu0  ;;  %v16467_v57 = vand.u32 4294901760, %v16466_v15  ;;  %v16479_v16 = vand.u32 4294901760, %v33560_v44 }
0x2e53   :  { %v17707_v28 = vsub.f32 %v33538_v29, %v17706_v8 }
0x2e54   :  { %v16322_v38 = vadd.f32 %v29199_v45, %v16321_v60  ;;  %v16474_v60 = vand.u32 4294901760, %v16473_v36 }
0x2e56   :  { %v21870_v11 = vmul.f32 -1.442695, %v16322_v38  ;;  %v17713_v38 = vand.u32 4294901760, %v33568_v54 }
0x2e58   :  { %29782 = vpow2.f32 %v21870_v11  ;;  %v16480_v11 = vsub.f32 %v33560_v44, %v16479_v16 }
0x2e62   :  { %v29783_v31 = vpop.eup %29782 }
0x2e63   :  { %v16326_v37 = vadd.f32 1.0, %v29783_v31 }
0x2e65   :  { %29784 = vrcp.f32 %v16326_v37  ;;  %v17720_v37 = vand.u32 4294901760, %v33570_v58 }
0x2e67   :  { %v28732_v18 = vpack.c.bf16 %v17720_v37, %v17713_v38 }
0x2e6f   :  { %v33511_v27 = vpop.eup %29784 }
0x2e70   :  { %v16333_v26 = vmul.f32 %v33511_v27, %v16331_v1  ;;  %v28531_v1 = vpack.c.bf16 %v16474_v60, %v16467_v57  ;;  %v16341_v32 = vsub.f32 1.0, %v33511_v27  ;;  %v16873_v57 = vld [vmem:[%s35103_s15 + $0x10] sm:$0xff] }
0x2e72   :  { %16335 = vrot.lane.b32.xlu0 %v16333_v26, %s29829_s5  ;;  %v17708_v26 = vand.u32 4294901760, %v17707_v28 }
0x2e76   :  { %16359 = vperm.xlu0 %29671, %v16356_v63   ;;  %v17714_v63 = vsub.f32 %v33568_v54, %v17713_v38 }
0x2e78   :  { %v17715_v25 = vand.u32 4294901760, %v17714_v63  ;;  %v16877_v63 = vld [vmem:[%s35103_s15 + $0x30] sm:$0xff] }
0x2ee4   :  { %v16336_v13 = vpop.permute.xlu0 %16335 }
0x2ee5   :  { %v16338_v14 = vadd.f32 %v35391_v3, %v16336_v13  ;;  %v16486_v3 = vand.u32 4294901760, %v33562_v12  ;;  %v16481_v13 = vand.u32 4294901760, %v16480_v11  ;;  %v16875_v11 = vld [vmem:[%s35103_s15 + $0x20] sm:$0xff] }
0x2ee7   :  { %v16339_v53 = vadd.f32 %v29199_v45, %v16338_v14  ;;  %v17701_v45 = vand.u32 4294901760, %v17700_v40  ;;  %v16487_v31 = vsub.f32 %v33562_v12, %v16486_v3  ;;  %v28552_v6 = vpack.c.bf16 %v16486_v3, %v16479_v16  ;;  %v16874_v16 = vld [vmem:[%s35103_s15 + $0x18] sm:$0xff] }
0x2ee8   :  { %v16904_v3 = vand.u32 4294901760, %v16873_v57  ;;  %v16907_v60 = vand.u32 4294901760, %v16874_v16 }
0x2ee9   :  { %29786 = vtanh.f32 %v16339_v53  ;;  %v16488_v14 = vand.u32 4294901760, %v16487_v31  ;;  %v17721_v53 = vsub.f32 %v33570_v58, %v17720_v37  ;;  %v28711_v33 = vpack.c.bf16 %v17708_v26, %v17701_v45  ;;  %v16876_v31 = vld [vmem:[%s35103_s15 + $0x28] sm:$0xff] }
0x2eea   :  { %v33687_v45 = vpack.c.bf16 %v16907_v60, %v16904_v3  ;;  %v33689_v28 = vsub.f32 %v16873_v57, %v16904_v3  ;;  %v33691_v38 = vsub.f32 %v16874_v16, %v16907_v60  ;;  %v16910_v37 = vand.u32 4294901760, %v16875_v11 }
0x2eeb   :  { %v28534_v50 = vpack.c.bf16 %v16488_v14, %v16481_v13  ;;  %v17722_v56 = vand.u32 4294901760, %v17721_v53  ;;  %v16878_v13 = vld [vmem:[%s35103_s15 + $0x38] sm:$0xff]  ;;  %v16916_v14 = vand.u32 4294901760, %v16877_v63 }
0x2eec   :  { %v16919_v53 = vand.u32 4294901760, %v16878_v13 }
0x2eed   :  { %v28714_v61 = vpack.c.bf16 %v17722_v56, %v17715_v25  ;;  %v16879_v25 = vld [vmem:[%s35103_s15 + $0x40] sm:$0xff] }
0x2eee   :  { %v16922_v56 = vand.u32 4294901760, %v16879_v25 }
0x2ef3   :  { %v29787_v30 = vpop.eup %29786 }
0x2ef4   :  { %16344 = vrot.lane.b32.xlu1 %v29787_v30, %s29830_s29  ;;  %v16353_v30 = vpop.permute.xlu1 %16352 }
0x2ef5   :  { %v16360_v21 = vpop.permute.xlu0 %16359 }
0x2ef8   :  { %16894 = vperm.xlu1 %29670, %v21872_v24   ;;  %v35393_v24 = vld [vmem:[#allocation7_spill] sm:$0xff] }
0x2ef9   :  { %v16342_v15 = vmul.f32 %v16341_v32, %v35393_v24  ;;  %v16362_v29 = vmul.f32 %v16360_v21, %v35393_v24  ;;  %v33747_v21 = vsub.f32 %v16878_v13, %v16919_v53 }
0x2efc   :  { %29672 = vset.pattern.permute.xlu1 %v35392_v51 }
0x2f66   :  { %v16345_v5 = vpop.permute.xlu1 %16344 }
0x2f67   :  { %v16347_v49 = vmul.f32 %v33511_v27, %v16345_v5  ;;  %v16871_v27 = vld [vmem:[%s35103_s15] sm:$0xff]  ;;  %v33741_v5 = vsub.f32 %v16875_v11, %v16910_v37 }
0x2f69   :  { %v16348_v48 = vadd.f32 %v16347_v49, %v16342_v15  ;;  %v33745_v49 = vsub.f32 %v16877_v63, %v16916_v14  ;;  %v35236_v63 = vand.u32 4294901760, %v33691_v38 }
0x2f6b   :  { %v16355_v44 = vmul.f32 %v16353_v30, %v16348_v48  ;;  %v16885_v48 = vld [vmem:[%s35103_s15 + $0x70] sm:$0xff] }
0x2f6d   :  { %v33602_v12 = vadd.f32 %v16362_v29, %v16355_v44  ;;  %v16886_v29 = vld [vmem:[%s35103_s15 + $0x78] sm:$0xff]  ;;  %v33755_v44 = vsub.f32 %v16879_v25, %v16922_v56 }
0x2f6f   :  { %35394 = vst [vmem:[#allocation6_spill] sm:$0xff] %v33602_v12  ;;  %v16381_v62 = vsel %vm101_vm0, %v33602_v12, 0 }
0x2f70   :  { %v33606_v35 = vand.u32 4294901760, %v16381_v62 }
0x2f72   :  { %v16453_v39 = vsub.f32 %v16381_v62, %v33606_v35 }
0x2f74   :  { %v16454_v54 = vand.u32 4294901760, %v16453_v39 }
0x2f76   :  { %v16455_v58 = vsub.f32 %v16453_v39, %v16454_v54 }
0x2f78   :  { %v16456_v36 = vand.u32 4294901760, %v16455_v58 }
0x2f7a   :  { %26109 = vmatmul.mubr.f32.vlgmr.msra.gmra.mrb[52].mxu0 %v16456_v36  ;;  %26385 = vmatmul.mubr.f32.vlgmr.msra.gmra.mrb[66].mxu1 %v16456_v36 }
0x2f7b   :  { %28532 = vmatpush3.bf16.msra.mxu0 %v28531_v1  ;;  %28712 = vmatpush3.bf16.msra.mxu1 %v28711_v33  ;;  %v16913_v1 = vand.u32 4294901760, %v16876_v31  ;;  %v33711_v33 = vpack.c.bf16 %v16919_v53, %v16916_v14  ;;  %v17013_v53 = vsub.f32 %v33691_v38, %v35236_v63 }
0x2f7c   :  { %28533 = vmatprep.subr.bf16.mxu0 %v35313_v42  ;;  %28713 = vmatprep.subr.bf16.mxu1 %v35313_v42 }
0x2f7d   :  { %26119 = vmatprep.mubr.msk.f32.mxu0 %vm29826_vm1, %v35312_v55  ;;  %26395 = vmatprep.mubr.msk.f32.mxu1 %vm29826_vm1, %v35312_v55  ;;  %v33701_v26 = vpack.c.bf16 %v16913_v1, %v16910_v37  ;;  %v33743_v15 = vsub.f32 %v16876_v31, %v16913_v1  ;;  %v35237_v1 = vand.u32 4294901760, %v33689_v28 }
0x2f7f   :  { %28535 = vmatpush3.bf16.msra.mxu0 %v28534_v50  ;;  %28715 = vmatpush3.bf16.msra.mxu1 %v28714_v61  ;;  %v16880_v50 = vld [vmem:[%s35103_s15 + $0x48] sm:$0xff]  ;;  %v17006_v14 = vsub.f32 %v33689_v28, %v35237_v1 }
0x2f80   :  { %28536 = vmatprep.subr.bf16.mxu0 %v35313_v42  ;;  %28716 = vmatprep.subr.bf16.mxu1 %v35313_v42  ;;  %v16925_v61 = vand.u32 4294901760, %v16880_v50 }
0x2f81   :  { %v17007_v25 = vand.u32 4294901760, %v17006_v14 }
0x2f82   :  { %26120 = vmatmul.mubr.f32.vlgmr.msra.gmra.mrb[54].mxu0 %v33606_v35  ;;  %26396 = vmatmul.mubr.f32.vlgmr.msra.gmra.mrb[66].mxu1 %v33606_v35  ;;  %v33757_v62 = vsub.f32 %v16880_v50, %v16925_v61  ;;  %v17014_v50 = vand.u32 4294901760, %v17013_v53 }
0x2f83   :  { %28538 = vmatpush3.bf16.msra.mxu0 %v28537_v47  ;;  %28718 = vmatpush3.bf16.msra.mxu1 %v28717_v34  ;;  %v33721_v47 = vpack.c.bf16 %v16925_v61, %v16922_v56  ;;  %v16881_v34 = vld [vmem:[%s35103_s15 + $0x50] sm:$0xff]  ;;  %v35235_v56 = vand.u32 4294901760, %v33741_v5  ;;  %v35234_v61 = vand.u32 4294901760, %v33743_v15 }
0x2f84   :  { %28539 = vmatprep.subr.bf16.mxu0 %v35313_v42  ;;  %28719 = vmatprep.subr.bf16.mxu1 %v35313_v42 }
0x2f85   :  { %26130 = vmatprep.mubr.msk.f32.mxu0 %vm29826_vm1, %v35312_v55  ;;  %26406 = vmatprep.mubr.msk.f32.mxu1 %vm29826_vm1, %v35312_v55 }
0x2f87   :  { %28541 = vmatpush3.bf16.msra.mxu0 %v28540_v23  ;;  %28721 = vmatpush3.bf16.msra.mxu1 %v28720_v17  ;;  %v16882_v23 = vld [vmem:[%s35103_s15 + $0x58] sm:$0xff]  ;;  %v16928_v17 = vand.u32 4294901760, %v16881_v34 }
0x2f88   :  { %28542 = vmatprep.subr.bf16.mxu0 %v35313_v42  ;;  %28722 = vmatprep.subr.bf16.mxu1 %v35313_v42 }
0x2f8a   :  { %26131 = vmatmul.mubr.f32.vlgmr.msra.gmra.mrb[56].mxu0 %v16453_v39  ;;  %26407 = vmatmul.mubr.f32.vlgmr.msra.gmra.mrb[66].mxu1 %v16453_v39 }
0x2f8b   :  { %28544 = vmatpush3.bf16.msra.mxu0 %v33528_v20  ;;  %28724 = vmatpush3.bf16.msra.mxu1 %v33534_v22 }
0x2f8c   :  { %28545 = vmatprep.subr.bf16.mxu0 %v35313_v42  ;;  %28725 = vmatprep.subr.bf16.mxu1 %v35313_v42 }
0x2f8d   :  { %26141 = vmatprep.mubr.msk.f32.mxu0 %vm29826_vm1, %v35312_v55  ;;  %26417 = vmatprep.mubr.msk.f32.mxu1 %vm29826_vm1, %v35312_v55 }
0x2f8f   :  { %28547 = vmatpush3.bf16.msra.mxu0 %v33558_v19  ;;  %28727 = vmatpush3.bf16.msra.mxu1 %v33566_v4 }
0x2f90   :  { %28548 = vmatprep.subr.bf16.mxu0 %v35313_v42  ;;  %28728 = vmatprep.subr.bf16.mxu1 %v35313_v42 }
0x2f92   :  { %26142 = vmatmul.mubr.f32.vlgmr.msra.gmra.mrb[58].mxu0 %v16454_v54  ;;  %26418 = vmatmul.mubr.f32.vlgmr.msra.gmra.mrb[66].mxu1 %v16454_v54 }
0x2f93   :  { %28550 = vmatpush3.bf16.msra.mxu0 %v28549_v10  ;;  %28730 = vmatpush3.bf16.msra.mxu1 %v28729_v2  ;;  %v16931_v10 = vand.u32 4294901760, %v16882_v23 }
0x2f94   :  { %28551 = vmatprep.subr.bf16.mxu0 %v35313_v42  ;;  %28731 = vmatprep.subr.bf16.mxu1 %v35313_v42 }
0x2f95   :  { %26152 = vmatprep.mubr.msk.f32.mxu0 %vm29826_vm1, %v35312_v55  ;;  %26428 = vmatprep.mubr.msk.f32.mxu1 %vm29826_vm1, %v35312_v55  ;;  %v33731_v2 = vpack.c.bf16 %v16931_v10, %v16928_v17  ;;  %v33761_v39 = vsub.f32 %v16882_v23, %v16931_v10  ;;  %v17020_v23 = vsub.f32 %v33741_v5, %v35235_v56 }
0x2f97   :  { %28553 = vmatpush3.bf16.msra.mxu0 %v28552_v6  ;;  %28733 = vmatpush3.bf16.msra.mxu1 %v28732_v18  ;;  %v16883_v6 = vld [vmem:[%s35103_s15 + $0x60] sm:$0xff]  ;;  %v16884_v18 = vld [vmem:[%s35103_s15 + $0x68] sm:$0xff]  ;;  %v17021_v10 = vand.u32 4294901760, %v17020_v23  ;;  %v35226_v23 = vand.u32 4294901760, %v33761_v39 }
0x2f98   :  { %28554 = vmatprep.subr.bf16.mxu0 %v35313_v42  ;;  %28734 = vmatprep.subr.bf16.mxu1 %v35313_v42  ;;  %v16934_v30 = vand.u32 4294901760, %v16883_v6  ;;  %v16937_v32 = vand.u32 4294901760, %v16884_v18 }
0x2f9a   :  { %26153 = vmatmul.mubr.f32.vlgmr.msra.gmra.mrb[60].mxu0 %v33606_v35  ;;  %26429 = vmatmul.mubr.f32.vlgmr.msra.gmra.mrb[66].mxu1 %v33606_v35  ;;  %v33763_v54 = vpack.c.bf16 %v16937_v32, %v16934_v30  ;;  %v33765_v58 = vsub.f32 %v16883_v6, %v16934_v30  ;;  %v33767_v36 = vsub.f32 %v16884_v18, %v16937_v32  ;;  %v35233_v18 = vand.u32 4294901760, %v33745_v49 }
0x2f9b   :  { %28556 = vmatpush3.bf16.msra.mxu0 %v33528_v20  ;;  %28736 = vmatpush3.bf16.msra.mxu1 %v33534_v22  ;;  %v16872_v20 = vld [vmem:[%s35103_s15 + $0x8] sm:$0xff]  ;;  %v16898_v22 = vand.u32 4294901760, %v16871_v27  ;;  %v35232_v30 = vand.u32 4294901760, %v33747_v21 }
0x2f9c   :  { %28557 = vmatprep.subr.bf16.mxu0 %v35313_v42  ;;  %28737 = vmatprep.subr.bf16.mxu1 %v35313_v42 }
0x2f9d   :  { %26163 = vmatprep.mubr.msk.f32.mxu0 %vm29826_vm1, %v35312_v55  ;;  %26439 = vmatprep.mubr.msk.f32.mxu1 %vm29826_vm1, %v35312_v55  ;;  %v33675_v40 = vsub.f32 %v16871_v27, %v16898_v22  ;;  %v16940_v27 = vand.u32 4294901760, %v16885_v48 }
0x2f9f   :  { %28559 = vmatpush3.bf16.msra.mxu0 %v33558_v19  ;;  %28739 = vmatpush3.bf16.msra.mxu1 %v33566_v4  ;;  %v16901_v19 = vand.u32 4294901760, %v16872_v20  ;;  %v33772_v57 = vsub.f32 %v16885_v48, %v16940_v27  ;;  %v17034_v48 = vsub.f32 %v33745_v49, %v35233_v18 }
0x2fa0   :  { %28560 = vmatprep.subr.bf16.mxu0 %v35313_v42  ;;  %28740 = vmatprep.subr.bf16.mxu1 %v35313_v42 }
0x2fa1   :  { %v33673_v4 = vpack.c.bf16 %v16901_v19, %v16898_v22  ;;  %v33677_v8 = vsub.f32 %v16872_v20, %v16901_v19  ;;  %v16943_v20 = vand.u32 4294901760, %v16886_v29  ;;  %v35239_v22 = vand.u32 4294901760, %v33675_v40 }
0x2fa2   :  { %26164 = vmatmul.mubr.f32.vlgmr.msra.gmra.mrb[62].mxu0 %v33606_v35  ;;  %26440 = vmatmul.mubr.f32.vlgmr.msra.gmra.mrb[66].mxu1 %v33606_v35  ;;  %v33759_v35 = vsub.f32 %v16881_v34, %v16928_v17  ;;  %v33799_v34 = vpack.c.bf16 %v17014_v50, %v17007_v25  ;;  %v17027_v17 = vsub.f32 %v33743_v15, %v35234_v61 }
0x2fa3   :  { %26198 = vmatprep.mubr.msk.f32.mxu0 %vm29826_vm1, %v35312_v55  ;;  %26450 = vmatprep.mubr.msk.f32.mxu1 %vm29826_vm1, %v35312_v55  ;;  %v35238_v19 = vand.u32 4294901760, %v33677_v8  ;;  %v33775_v16 = vpack.c.bf16 %v16943_v20, %v16940_v27  ;;  %v33777_v3 = vsub.f32 %v16886_v29, %v16943_v20  ;;  %v16992_v60 = vsub.f32 %v33675_v40, %v35239_v22 }
0x2fa4   :  { %28562 = vmatpush3.bf16.msra.mxu0 %v33673_v4  ;;  %v17028_v6 = vand.u32 4294901760, %v17027_v17  ;;  %v17041_v29 = vsub.f32 %v33747_v21, %v35232_v30  ;;  %v17035_v27 = vand.u32 4294901760, %v17034_v48  ;;  %v35224_v50 = vand.u32 4294901760, %v33759_v35 }
0x2fa5   :  { %28563 = vmatprep.subr.bf16.mxu0 %v35313_v42  ;;  %v16999_v11 = vsub.f32 %v33677_v8, %v35238_v19  ;;  %v16993_v31 = vand.u32 4294901760, %v16992_v60  ;;  %v35228_v60 = vand.u32 4294901760, %v33755_v44 }
0x2fa6   :  { %v33809_v32 = vpack.c.bf16 %v17028_v6, %v17021_v10  ;;  %v17042_v20 = vand.u32 4294901760, %v17041_v29  ;;  %v17062_v10 = vsub.f32 %v33759_v35, %v35224_v50  ;;  %v17069_v6 = vsub.f32 %v33761_v39, %v35226_v23 }
0x2fa7   :  { %v17000_v37 = vand.u32 4294901760, %v16999_v11  ;;  %v35225_v11 = vand.u32 4294901760, %v33757_v62 }
0x2fa8   :  { %28565 = vmatpush3.bf16.msra.mxu0 %v33687_v45  ;;  %v17063_v48 = vand.u32 4294901760, %v17062_v10  ;;  %v17070_v29 = vand.u32 4294901760, %v17069_v6  ;;  %v35230_v10 = vand.u32 4294901760, %v33777_v3 }
0x2fa9   :  { %28566 = vmatprep.subr.bf16.mxu0 %v35313_v42  ;;  %v33789_v13 = vpack.c.bf16 %v17000_v37, %v16993_v31  ;;  %v33819_v31 = vpack.c.bf16 %v17042_v20, %v17035_v27  ;;  %v17048_v37 = vsub.f32 %v33755_v44, %v35228_v60  ;;  %v17055_v14 = vsub.f32 %v33757_v62, %v35225_v11 }
0x2faa   :  { %v35227_v27 = vand.u32 4294901760, %v33765_v58  ;;  %v35231_v20 = vand.u32 4294901760, %v33767_v36  ;;  %v35229_v11 = vand.u32 4294901760, %v33772_v57 }
0x2fab   :  { %v17049_v53 = vand.u32 4294901760, %v17048_v37  ;;  %v17056_v25 = vand.u32 4294901760, %v17055_v14  ;;  %v28600_v37 = vpack.c.bf16 %v17070_v29, %v17063_v48  ;;  %v17097_v48 = vsub.f32 %v33777_v3, %v35230_v10 }
0x2fac   :  { %28568 = vmatpush3.bf16.msra.mxu0 %v33701_v26  ;;  %v17076_v14 = vsub.f32 %v33765_v58, %v35227_v27  ;;  %v17090_v23 = vsub.f32 %v33772_v57, %v35229_v11  ;;  %v28621_v11 = vpack.c.bf16 %v33757_v62, %v33755_v44 }
0x2fad   :  { %28569 = vmatprep.subr.bf16.mxu0 %v35313_v42  ;;  %v33829_v17 = vpack.c.bf16 %v17056_v25, %v17049_v53  ;;  %v17083_v53 = vsub.f32 %v33767_v36, %v35231_v20  ;;  %v17098_v27 = vand.u32 4294901760, %v17097_v48  ;;  %v21871_v20 = vld [vmem:[%s35105_s14] ss:$0 sm:$0xff] }
0x2fae   :  { %v17077_v25 = vand.u32 4294901760, %v17076_v14  ;;  %v17091_v29 = vand.u32 4294901760, %v17090_v23  ;;  %v28609_v14 = vpack.c.bf16 %v33677_v8, %v33675_v40  ;;  %v28624_v23 = vpack.c.bf16 %v33761_v39, %v33759_v35 }
0x2faf   :  { %v17084_v50 = vand.u32 4294901760, %v17083_v53  ;;  %v28612_v53 = vpack.c.bf16 %v33691_v38, %v33689_v28 }
0x2fb0   :  { %28571 = vmatpush3.bf16.msra.mxu0 %v33711_v33  ;;  %v28606_v60 = vpack.c.bf16 %v17098_v27, %v17091_v29 }
0x2fb1   :  { %28572 = vmatprep.subr.bf16.mxu0 %v35313_v42  ;;  %v28603_v6 = vpack.c.bf16 %v17084_v50, %v17077_v25  ;;  %v28615_v50 = vpack.c.bf16 %v33743_v15, %v33741_v5  ;;  %v28618_v25 = vpack.c.bf16 %v33747_v21, %v33745_v49 }
0x2fb4   :  { %28574 = vmatpush3.bf16.msra.mxu0 %v33721_v47 }
0x2fb5   :  { %28575 = vmatprep.subr.bf16.mxu0 %v35313_v42 }
0x2fb8   :  { %28577 = vmatpush3.bf16.msra.mxu0 %v33731_v2 }
0x2fb9   :  { %28578 = vmatprep.subr.bf16.mxu0 %v35313_v42 }
0x2fbc   :  { %28580 = vmatpush3.bf16.msra.mxu0 %v33763_v54 }
0x2fbd   :  { %28581 = vmatprep.subr.bf16.mxu0 %v35313_v42 }
0x2fc0   :  { %28583 = vmatpush3.bf16.msra.mxu0 %v33775_v16 }
0x2fc1   :  { %28584 = vmatprep.subr.bf16.mxu0 %v35313_v42 }
0x304d   :  { %v16458_v29 = vpop.f32.mrb[52].mxu0 }
0x304e   :  { %v26110_v10 = vpop.f32.mrb[53].mxu0  ;;  %v16459_v30 = vadd.f32 %v21871_v20, %v16458_v29 }
0x3055   :  { %v16549_v18 = vpop.f32.mrb[54].mxu0 }
0x3056   :  { %v16550_v61 = vadd.f32 %v16549_v18, %v16459_v30  ;;  %v26121_v56 = vpop.f32.mrb[55].mxu0  ;;  %v35405_v30 = vand.u32 4294901760, %v33755_v44  ;;  %v35411_v44 = vand.u32 4294901760, %v33772_v57 }
0x305d   :  { %v16629_v63 = vpop.f32.mrb[56].mxu0 }
0x305e   :  { %v16630_v1 = vadd.f32 %v16629_v63, %v16550_v61  ;;  %v26132_v19 = vpop.f32.mrb[57].mxu0 }
0x3065   :  { %v16706_v22 = vpop.f32.mrb[58].mxu0 }
0x3066   :  { %v16707_v43 = vadd.f32 %v16706_v22, %v16630_v1  ;;  %v26143_v24 = vpop.f32.mrb[59].mxu0  ;;  %v35400_v1 = vand.u32 4294901760, %v33691_v38 }
0x306d   :  { %v16789_v27 = vpop.f32.mrb[60].mxu0 }
0x306e   :  { %v16790_v12 = vadd.f32 %v16789_v27, %v16707_v43  ;;  %v26154_v51 = vpop.f32.mrb[61].mxu0  ;;  %v35398_v43 = vand.u32 4294901760, %v33677_v8  ;;  %v35402_v8 = vand.u32 4294901760, %v33743_v15  ;;  %v35408_v15 = vand.u32 4294901760, %v33761_v39  ;;  %v18102_v27 = vld [vmem:[%s35109_s21] sm:$0xff] }
0x3075   :  { %v16864_v48 = vpop.f32.mrb[62].mxu0  ;;  %v33872_v9 = vpop.f32.mrb[66].mxu1 }
0x3076   :  { %v16865_v10 = vadd.f32 %v16864_v48, %v16790_v12  ;;  %v26165_v59 = vpop.f32.mrb[63].mxu0  ;;  %v26441_v41 = vpop.f32.mrb[67].mxu1  ;;  %v35399_v12 = vand.u32 4294901760, %v33689_v28  ;;  %v35404_v28 = vand.u32 4294901760, %v33747_v21  ;;  %v35410_v21 = vand.u32 4294901760, %v33767_v36 }
0x3077   :  { %v35395_v41 = vpack.c.bf16 %v33767_v36, %v33765_v58  ;;  %v35397_v59 = vand.u32 4294901760, %v33675_v40  ;;  %v35401_v40 = vand.u32 4294901760, %v33741_v5  ;;  %v35407_v5 = vand.u32 4294901760, %v33759_v35 }
0x3078   :  { %v16869_v20 = vadd.f32 %v16868_v0, %v16865_v10  ;;  %v35396_v0 = vpack.c.bf16 %v33777_v3, %v33772_v57  ;;  %v18117_v48 = vand.u32 4294901760, %v18102_v27 }
0x3079   :  { %v28657_v51 = vpack.c.bf16 %v35398_v43, %v35397_v59  ;;  %v28663_v61 = vpack.c.bf16 %v35402_v8, %v35401_v40 }
0x307a   :  { %29788 = vtanh.f32 %v16869_v20  ;;  %v34020_v20 = vsub.f32 %v18102_v27, %v18117_v48 }
0x3084   :  { %v29789_v18 = vpop.eup %29788 }
0x3085   :  { %v33874_v56 = vand.u32 4294901760, %v29789_v18 }
0x3087   :  { %v16979_v19 = vsub.f32 %v29789_v18, %v33874_v56 }
0x3089   :  { %v16980_v63 = vand.u32 4294901760, %v16979_v19 }
0x308b   :  { %v16981_v22 = vsub.f32 %v16979_v19, %v16980_v63 }
0x308d   :  { %v16982_v24 = vand.u32 4294901760, %v16981_v22 }
0x308f   :  { %26199 = vmatmul.mubr.f32.vlgmr.msra.gmra.mrb[64].mxu0 %v16982_v24  ;;  %v18198_v24 = vand.u32 4294901760, %v34020_v20 }
0x3090   :  { %28586 = vmatpush3.bf16.msra.mxu0 %v33789_v13  ;;  %26233 = vmatprep.mubr.msk.f32.mxu0 %vm29826_vm1, %v35312_v55  ;;  %v28660_v13 = vpack.c.bf16 %v35400_v1, %v35399_v12 }
0x3091   :  { %28587 = vmatprep.subr.bf16.mxu0 %v35313_v42 }
0x3094   :  { %28589 = vmatpush3.bf16.msra.mxu0 %v33799_v34  ;;  %v35403_v34 = vand.u32 4294901760, %v33745_v49  ;;  %v35409_v49 = vand.u32 4294901760, %v33765_v58  ;;  %v29817_v58 = vld [vmem:[%s35107_s4] sm:$0xff] }
0x3095   :  { %28590 = vmatprep.subr.bf16.mxu0 %v35313_v42 }
0x3096   :  { %v28666_v38 = vpack.c.bf16 %v35404_v28, %v35403_v34 }
0x3098   :  { %28592 = vmatpush3.bf16.msra.mxu0 %v33809_v32  ;;  %v35406_v32 = vand.u32 4294901760, %v33757_v62  ;;  %v35412_v62 = vand.u32 4294901760, %v33777_v3 }
0x3099   :  { %28593 = vmatprep.subr.bf16.mxu0 %v35313_v42 }
0x309c   :  { %28595 = vmatpush3.bf16.msra.mxu0 %v33819_v31  ;;  %v28675_v31 = vpack.c.bf16 %v35410_v21, %v35409_v49 }
0x309d   :  { %28596 = vmatprep.subr.bf16.mxu0 %v35313_v42 }
0x30a0   :  { %28598 = vmatpush3.bf16.msra.mxu0 %v33829_v17  ;;  %v28678_v17 = vpack.c.bf16 %v35412_v62, %v35411_v44  ;;  %v17550_v44 = vld [vmem:[#allocation2] sm:$0xff] }
0x30a1   :  { %28599 = vmatprep.subr.bf16.mxu0 %v35313_v42 }
0x30a4   :  { %28601 = vmatpush3.bf16.msra.mxu0 %v28600_v37 }
0x30a5   :  { %28602 = vmatprep.subr.bf16.mxu0 %v35313_v42 }
0x30a8   :  { %28604 = vmatpush3.bf16.msra.mxu0 %v28603_v6  ;;  %v21873_v6 = vld [vmem:[%s35108_s20] ss:$0 sm:$0xff] }
0x30a9   :  { %28605 = vmatprep.subr.bf16.mxu0 %v35313_v42 }
0x30ac   :  { %28607 = vmatpush3.bf16.msra.mxu0 %v28606_v60  ;;  %v28669_v60 = vpack.c.bf16 %v35406_v32, %v35405_v30 }
0x30ad   :  { %28608 = vmatprep.subr.bf16.mxu0 %v35313_v42 }
0x30af   :  { %26234 = vmatmul.mubr.f32.vlgmr.msra.gmra.mrb[64].mxu0 %v33874_v56 }
0x30b0   :  { %28610 = vmatpush3.bf16.msra.mxu0 %v28609_v14  ;;  %26268 = vmatprep.mubr.msk.f32.mxu0 %vm29826_vm1, %v35312_v55  ;;  %v35413_v14 = vmov 5  }
0x30b1   :  { %28611 = vmatprep.subr.bf16.mxu0 %v35313_v42 }
0x30b4   :  { %28613 = vmatpush3.bf16.msra.mxu0 %v28612_v53  ;;  %v34004_v53 = vadd.f32 %v21873_v6, %v33872_v9  ;;  %v18103_v9 = vld [vmem:[%s35109_s21 + $0x8] sm:$0xff] }
0x30b5   :  { %28614 = vmatprep.subr.bf16.mxu0 %v35313_v42  ;;  %v18120_v29 = vand.u32 4294901760, %v18103_v9 }
0x30b7   :  { %v34018_v10 = vpack.c.bf16 %v18120_v29, %v18117_v48  ;;  %v34022_v18 = vsub.f32 %v18103_v9, %v18120_v29  ;;  %v17592_v9 = vld [vmem:[#allocation2 + $0x30] sm:$0xff] }
0x30b8   :  { %28616 = vmatpush3.bf16.msra.mxu0 %v28615_v50  ;;  %v35414_v50 = vmov 6  }
0x30b9   :  { %28617 = vmatprep.subr.bf16.mxu0 %v35313_v42  ;;  %28742 = vmatpush3.bf16.msra.mxu1 %v34018_v10 }
0x30ba   :  { %28743 = vmatprep.subr.bf16.mxu1 %v35313_v42 }
0x30bc   :  { %28619 = vmatpush3.bf16.msra.mxu0 %v28618_v25  ;;  %v35415_v25 = vmov 0  }
0x30bd   :  { %28620 = vmatprep.subr.bf16.mxu0 %v35313_v42 }
0x30c0   :  { %28622 = vmatpush3.bf16.msra.mxu0 %v28621_v11  ;;  %v28672_v11 = vpack.c.bf16 %v35408_v15, %v35407_v5 }
0x30c1   :  { %28623 = vmatprep.subr.bf16.mxu0 %v35313_v42 }
0x30c4   :  { %28625 = vmatpush3.bf16.msra.mxu0 %v28624_v23  ;;  %v35416_v23 = vmov 7  }
0x30c5   :  { %28626 = vmatprep.subr.bf16.mxu0 %v35313_v42 }
0x30c8   :  { %28628 = vmatpush3.bf16.msra.mxu0 %v35395_v41  ;;  %v18205_v41 = vand.u32 4294901760, %v34022_v18 }
0x30c9   :  { %28629 = vmatprep.subr.bf16.mxu0 %v35313_v42 }
0x30ca   :  { %v18206_v12 = vsub.f32 %v34022_v18, %v18205_v41  ;;  %v28765_v15 = vpack.c.bf16 %v18205_v41, %v18198_v24 }
0x30cc   :  { %28631 = vmatpush3.bf16.msra.mxu0 %v35396_v0  ;;  %v18207_v8 = vand.u32 4294901760, %v18206_v12  ;;  %v18629_v12 = vld [vmem:[%s35110_s3 + $0x20] sm:$0xff] }
0x30cd   :  { %28632 = vmatprep.subr.bf16.mxu0 %v35313_v42 }
0x30cf   :  { %26269 = vmatmul.mubr.f32.vlgmr.msra.gmra.mrb[64].mxu0 %v16979_v19  ;;  %v18105_v19 = vld [vmem:[%s35109_s21 + $0x18] sm:$0xff] }
0x30d0   :  { %28634 = vmatpush3.bf16.msra.mxu0 %v33673_v4  ;;  %26303 = vmatprep.mubr.msk.f32.mxu0 %vm29826_vm1, %v35312_v55  ;;  %v18126_v22 = vand.u32 4294901760, %v18105_v19 }
0x30d1   :  { %28635 = vmatprep.subr.bf16.mxu0 %v35313_v42 }
0x30d2   :  { %v34038_v43 = vsub.f32 %v18105_v19, %v18126_v22 }
0x30d4   :  { %28637 = vmatpush3.bf16.msra.mxu0 %v33687_v45  ;;  %v18219_v40 = vand.u32 4294901760, %v34038_v43 }
0x30d5   :  { %28638 = vmatprep.subr.bf16.mxu0 %v35313_v42 }
0x30d6   :  { %v18220_v34 = vsub.f32 %v34038_v43, %v18219_v40 }
0x30d8   :  { %28640 = vmatpush3.bf16.msra.mxu0 %v33701_v26  ;;  %v18221_v30 = vand.u32 4294901760, %v18220_v34 }
0x30d9   :  { %28641 = vmatprep.subr.bf16.mxu0 %v35313_v42 }
0x30dc   :  { %28643 = vmatpush3.bf16.msra.mxu0 %v33711_v33 }
0x30dd   :  { %28644 = vmatprep.subr.bf16.mxu0 %v35313_v42 }
0x30e0   :  { %28646 = vmatpush3.bf16.msra.mxu0 %v33721_v47 }
0x30e1   :  { %28647 = vmatprep.subr.bf16.mxu0 %v35313_v42 }
0x30e4   :  { %28649 = vmatpush3.bf16.msra.mxu0 %v33731_v2 }
0x30e5   :  { %28650 = vmatprep.subr.bf16.mxu0 %v35313_v42 }
0x30e8   :  { %28652 = vmatpush3.bf16.msra.mxu0 %v33763_v54 }
0x30e9   :  { %28653 = vmatprep.subr.bf16.mxu0 %v35313_v42 }
0x30ec   :  { %28655 = vmatpush3.bf16.msra.mxu0 %v33775_v16 }
0x30ed   :  { %28656 = vmatprep.subr.bf16.mxu0 %v35313_v42 }
0x30ef   :  { %26304 = vmatmul.mubr.f32.vlgmr.msra.gmra.mrb[64].mxu0 %v16980_v63 }
0x30f0   :  { %28658 = vmatpush3.bf16.msra.mxu0 %v28657_v51  ;;  %26338 = vmatprep.mubr.msk.f32.mxu0 %vm29826_vm1, %v35312_v55  ;;  %v18199_v51 = vsub.f32 %v34020_v20, %v18198_v24 }
0x30f1   :  { %28659 = vmatprep.subr.bf16.mxu0 %v35313_v42 }
0x30f2   :  { %v18200_v1 = vand.u32 4294901760, %v18199_v51 }
0x30f4   :  { %28661 = vmatpush3.bf16.msra.mxu0 %v28660_v13  ;;  %v28747_v28 = vpack.c.bf16 %v18207_v8, %v18200_v1 }
0x30f5   :  { %28662 = vmatprep.subr.bf16.mxu0 %v35313_v42 }
0x30f8   :  { %28664 = vmatpush3.bf16.msra.mxu0 %v28663_v61 }
0x30f9   :  { %28665 = vmatprep.subr.bf16.mxu0 %v35313_v42 }
0x30fc   :  { %28667 = vmatpush3.bf16.msra.mxu0 %v28666_v38 }
0x30fd   :  { %28668 = vmatprep.subr.bf16.mxu0 %v35313_v42 }
0x3100   :  { %28670 = vmatpush3.bf16.msra.mxu0 %v28669_v60  ;;  %v28753_v60 = vpack.c.bf16 %v34022_v18, %v34020_v20  ;;  %v17599_v20 = vld [vmem:[#allocation2 + $0x38] sm:$0xff] }
0x3101   :  { %28671 = vmatprep.subr.bf16.mxu0 %v35313_v42 }
0x3104   :  { %28673 = vmatpush3.bf16.msra.mxu0 %v28672_v11 }
0x3105   :  { %28674 = vmatprep.subr.bf16.mxu0 %v35313_v42 }
0x3108   :  { %28676 = vmatpush3.bf16.msra.mxu0 %v28675_v31  ;;  %v17557_v31 = vld [vmem:[#allocation2 + $0x8] sm:$0xff] }
0x3109   :  { %28677 = vmatprep.subr.bf16.mxu0 %v35313_v42 }
0x310c   :  { %28679 = vmatpush3.bf16.msra.mxu0 %v28678_v17 }
0x310d   :  { %28680 = vmatprep.subr.bf16.mxu0 %v35313_v42 }
0x310f   :  { %26339 = vmatmul.mubr.f32.vlgmr.msra.gmra.mrb[64].mxu0 %v33874_v56 }
0x3110   :  { %28682 = vmatpush3.bf16.msra.mxu0 %v33673_v4  ;;  %26373 = vmatprep.mubr.msk.f32.mxu0 %vm29826_vm1, %v35312_v55  ;;  %v16895_v4 = vpop.permute.xlu1 %16894 }
0x3111   :  { %28683 = vmatprep.subr.bf16.mxu0 %v35313_v42 }
0x3114   :  { %28685 = vmatpush3.bf16.msra.mxu0 %v33687_v45 }
0x3115   :  { %28686 = vmatprep.subr.bf16.mxu0 %v35313_v42 }
0x3118   :  { %28688 = vmatpush3.bf16.msra.mxu0 %v33701_v26 }
0x3119   :  { %28689 = vmatprep.subr.bf16.mxu0 %v35313_v42 }
0x311c   :  { %28691 = vmatpush3.bf16.msra.mxu0 %v33711_v33 }
0x311d   :  { %28692 = vmatprep.subr.bf16.mxu0 %v35313_v42 }
0x3120   :  { %28694 = vmatpush3.bf16.msra.mxu0 %v33721_v47 }
0x3121   :  { %28695 = vmatprep.subr.bf16.mxu0 %v35313_v42 }
0x3124   :  { %28697 = vmatpush3.bf16.msra.mxu0 %v33731_v2 }
0x3125   :  { %28698 = vmatprep.subr.bf16.mxu0 %v35313_v42 }
0x3128   :  { %28700 = vmatpush3.bf16.msra.mxu0 %v33763_v54 }
0x3129   :  { %28701 = vmatprep.subr.bf16.mxu0 %v35313_v42 }
0x312c   :  { %28703 = vmatpush3.bf16.msra.mxu0 %v33775_v16 }
0x312d   :  { %28956 = vmatprep.subr.bf16.mxu0 %v35313_v42 }
0x312f   :  { %26374 = vmatmul.mubr.f32.vlgmr.msra.gmra.mrb[64].mxu0 %v33874_v56  ;;  %v18104_v56 = vld [vmem:[%s35109_s21 + $0x10] sm:$0xff] }
0x3130   :  { %26792 = vmatprep.mubr.msk.f32.mxu0 %vm29826_vm1, %v35312_v55  ;;  %v18123_v63 = vand.u32 4294901760, %v18104_v56 }
0x3132   :  { %v34034_v0 = vpack.c.bf16 %v18126_v22, %v18123_v63  ;;  %v34036_v59 = vsub.f32 %v18104_v56, %v18123_v63 }
0x3134   :  { %28745 = vmatpush3.bf16.msra.mxu1 %v34034_v0  ;;  %v18212_v13 = vand.u32 4294901760, %v34036_v59  ;;  %v28756_v5 = vpack.c.bf16 %v34038_v43, %v34036_v59 }
0x3135   :  { %28746 = vmatprep.subr.bf16.mxu1 %v35313_v42 }
0x3136   :  { %v18213_v61 = vsub.f32 %v34036_v59, %v18212_v13  ;;  %v28768_v11 = vpack.c.bf16 %v18219_v40, %v18212_v13  ;;  %v35418_v13 = vld [vmem:[#allocation9_spill] sm:$0xff] }
0x3137   :  { %v18601_v40 = vadd.f32 %v34004_v53, %v35418_v13 }
0x3138   :  { %v18214_v38 = vand.u32 4294901760, %v18213_v61 }
0x313a   :  { %v28750_v32 = vpack.c.bf16 %v18221_v30, %v18214_v38  ;;  %v21877_v30 = vld [vmem:[#allocation5] ss:$0 sm:$0xff] }
0x3202   :  { %v17534_v45 = vpop.f32.mrb[64].mxu0 }
0x3203   :  { %v29200_v26 = vadd.f32 %v17534_v45, %v16895_v4  ;;  %v26375_v33 = vpop.f32.mrb[65].mxu0  ;;  %v17564_v45 = vld [vmem:[#allocation2 + $0x10] sm:$0xff] }
0x3205   :  { %v17538_v47 = vsel %vm8416_vm10, %v29200_v26, -inf }
0x3206   :  { %17539 = vmax.xlane.f32.xlu0 %v17538_v47 }
0x3293   :  { %v17540_v2 = vpop.xlane.xlu0 %17539 }
0x3294   :  { %v17541_v35 = vsub.f32 %v29200_v26, %v17540_v2  ;;  %v17571_v2 = vld [vmem:[#allocation2 + $0x18] sm:$0xff] }
0x3296   :  { %v17542_v39 = vmul.f32 1.442695, %v17541_v35 }
0x3298   :  { %29790 = vpow2.f32 %v17542_v39 }
0x32a2   :  { %v29791_v54 = vpop.eup %29790 }
0x32a3   :  { %v17544_v36 = vmul.f32 %v29817_v58, %v29791_v54  ;;  %v17578_v54 = vld [vmem:[#allocation2 + $0x20] sm:$0xff] }
0x32a5   :  { %v17545_v57 = vsel %vm8416_vm10, %v17544_v36, 0.0 }
0x32a6   :  { %17546 = vadd.xlane.f32.xlu1 %v17545_v57 }
0x3333   :  { %v17547_v16 = vpop.xlane.xlu1 %17546 }
0x3334   :  { %29792 = vrcp.f32 %v17547_v16 }
0x333e   :  { %v29793_v3 = vpop.eup %29792 }
0x333f   :  { %v17549_v37 = vmul.f32 %v29793_v3, %v17544_v36 }
0x3341   :  { %17559 = vperm.xlu1 %29672, %v17549_v37   ;;  %17553 = vperm.xlu0 %29671, %v17549_v37  }
0x3345   :  { %29674 = vset.pattern.permute.xlu1 %v35333_v46  ;;  %29673 = vset.pattern.permute.xlu0 %v35332_v7 }
0x3346   :  { %17573 = vperm.xlu1 %29674, %v17549_v37   ;;  %17566 = vperm.xlu0 %29673, %v17549_v37  }
0x334a   :  { %29675 = vset.pattern.permute.xlu1 %v35334_v52  ;;  %29676 = vset.pattern.permute.xlu0 %v35413_v14 }
0x334b   :  { %17580 = vperm.xlu1 %29675, %v17549_v37   ;;  %17587 = vperm.xlu0 %29676, %v17549_v37  }
0x334f   :  { %29677 = vset.pattern.permute.xlu1 %v35414_v50  ;;  %18610 = vrot.lane.b32.xlu0 %v34004_v53, %s29828_s27  ;;  %v35419_v53 = vmov 1   ;;  %v19148_v50 = vld [vmem:[#allocation3] sm:$0xff] }
0x3350   :  { %17594 = vperm.xlu1 %29677, %v17549_v37   ;;  %29679 = vset.pattern.permute.xlu0 %v35415_v25 }
0x3353   :  { %18632 = vperm.xlu0 %29679, %v18629_v12  }
0x3354   :  { %29678 = vset.pattern.permute.xlu1 %v35416_v23 }
0x3355   :  { %17601 = vperm.xlu1 %29678, %v17549_v37   ;;  %v17585_v37 = vld [vmem:[#allocation2 + $0x28] sm:$0xff] }
0x3357   :  { %19174 = vperm.xlu0 %29679, %v21877_v30  }
0x3359   :  { %29680 = vset.pattern.permute.xlu1 %v35415_v25 }
0x33c0   :  { %v17560_v49 = vpop.permute.xlu1 %17559  ;;  %v17554_v21 = vpop.permute.xlu0 %17553 }
0x33c1   :  { %v17562_v62 = vmul.f32 %v17560_v49, %v17557_v31  ;;  %v17556_v17 = vmul.f32 %v17554_v21, %v17550_v44  ;;  %v18649_v31 = vld [vmem:[%s35099_s13] sm:$0xff]  ;;  %v18650_v44 = vld [vmem:[%s35099_s13 + $0x8] sm:$0xff] }
0x33c3   :  { %v17563_v33 = vadd.f32 %v17562_v62, %v17556_v17  ;;  %v18664_v62 = vand.u32 4294901760, %v18649_v31  ;;  %v18667_v17 = vand.u32 4294901760, %v18650_v44 }
0x33c5   :  { %v17574_v4 = vpop.permute.xlu1 %17573  ;;  %v17567_v26 = vpop.permute.xlu0 %17566 }
0x33c6   :  { %v17569_v47 = vmul.f32 %v17567_v26, %v17564_v45  ;;  %v17576_v35 = vmul.f32 %v17574_v4, %v17571_v2  ;;  %v19886_v4 = vld [vmem:[%s35106_s19] sm:$0xff]  ;;  %v19887_v45 = vld [vmem:[%s35106_s19 + $0x8] sm:$0xff]  ;;  %v34110_v2 = vsub.f32 %v18649_v31, %v18664_v62 }
0x33c7   :  { %v19898_v26 = vand.u32 4294901760, %v19886_v4 }
0x33c8   :  { %v17570_v39 = vadd.f32 %v17569_v47, %v17563_v33  ;;  %v19901_v33 = vand.u32 4294901760, %v19887_v45  ;;  %v34108_v47 = vpack.c.bf16 %v18667_v17, %v18664_v62 }
0x33ca   :  { %v17581_v58 = vpop.permute.xlu1 %17580  ;;  %v17577_v36 = vadd.f32 %v17576_v35, %v17570_v39  ;;  %v17588_v16 = vpop.permute.xlu0 %17587  ;;  %v34112_v35 = vsub.f32 %v18650_v44, %v18667_v17  ;;  %v34114_v39 = vpack.c.bf16 %v19901_v33, %v19898_v26 }
0x33cb   :  { %v17583_v57 = vmul.f32 %v17581_v58, %v17578_v54  ;;  %v17590_v6 = vmul.f32 %v17588_v16, %v17585_v37  ;;  %v34116_v54 = vsub.f32 %v19886_v4, %v19898_v26  ;;  %v34118_v58 = vsub.f32 %v19887_v45, %v19901_v33  ;;  %v19888_v37 = vld [vmem:[%s35106_s19 + $0x10] sm:$0xff] }
0x33cc   :  { %28958 = vmatpush3.bf16.msra.mxu0 %v34114_v39  ;;  %v28789_v4 = vpack.c.bf16 %v34112_v35, %v34110_v2 }
0x33cd   :  { %v17584_v3 = vadd.f32 %v17583_v57, %v17577_v36  ;;  %v18651_v36 = vld [vmem:[%s35099_s13 + $0x10] sm:$0xff]  ;;  %v18652_v57 = vld [vmem:[%s35099_s13 + $0x18] sm:$0xff]  ;;  %28959 = vmatprep.subr.bf16.mxu0 %v35313_v42  ;;  %v28969_v45 = vpack.c.bf16 %v34118_v58, %v34116_v54 }
0x33ce   :  { %v18670_v16 = vand.u32 4294901760, %v18651_v36 }
0x33cf   :  { %v17595_v27 = vpop.permute.xlu1 %17594  ;;  %v17591_v48 = vadd.f32 %v17590_v6, %v17584_v3  ;;  %v18673_v3 = vand.u32 4294901760, %v18652_v57  ;;  %v19889_v6 = vld [vmem:[%s35106_s19 + $0x18] sm:$0xff] }
0x33d0   :  { %v17597_v29 = vmul.f32 %v17595_v27, %v17592_v9  ;;  %v18745_v27 = vand.u32 4294901760, %v34110_v2  ;;  %v18752_v9 = vand.u32 4294901760, %v34112_v35 }
0x33d2   :  { %v17598_v56 = vadd.f32 %v17597_v29, %v17591_v48  ;;  %v19904_v29 = vand.u32 4294901760, %v19888_v37 }
0x33d4   :  { %v17602_v18 = vpop.permute.xlu1 %17601 }
0x33d5   :  { %v17604_v19 = vmul.f32 %v17602_v18, %v17599_v20  ;;  %v19907_v20 = vand.u32 4294901760, %v19889_v6  ;;  %v34138_v18 = vpack.c.bf16 %v18673_v3, %v18670_v16 }
0x33d7   :  { %v34052_v63 = vadd.f32 %v17604_v19, %v17598_v56  ;;  %v34140_v56 = vsub.f32 %v18651_v36, %v18670_v16  ;;  %v34142_v19 = vsub.f32 %v18652_v57, %v18673_v3  ;;  %v28801_v36 = vpack.c.bf16 %v18752_v9, %v18745_v27 }
0x33d9   :  { %35417 = vst [vmem:[#allocation16_spill] sm:$0xff] %v34052_v63  ;;  %v18114_v22 = vsel %vm101_vm0, %v34052_v63, 0  ;;  %v28792_v26 = vpack.c.bf16 %v34142_v19, %v34140_v56 }
0x33da   :  { %v18185_v24 = vand.u32 4294901760, %v18114_v22 }
0x33dc   :  { %v18186_v41 = vsub.f32 %v18114_v22, %v18185_v24  ;;  %v19979_v22 = vand.u32 4294901760, %v34116_v54 }
0x33de   :  { %v18187_v59 = vand.u32 4294901760, %v18186_v41 }
0x33e0   :  { %v18188_v43 = vsub.f32 %v18186_v41, %v18187_v59 }
0x33e2   :  { %v18189_v51 = vand.u32 4294901760, %v18188_v43  ;;  %v18746_v43 = vsub.f32 %v34110_v2, %v18745_v27  ;;  %v35420_v2 = vld [vmem:[#allocation6_spill] sm:$0xff] }
0x33e4   :  { %26451 = vmatmul.mubr.f32.vlgmr.msra.gmra.mrb[68].mxu1 %v18189_v51  ;;  %v18753_v51 = vsub.f32 %v34112_v35, %v18752_v9 }
0x33e5   :  { %28748 = vmatpush3.bf16.msra.mxu1 %v28747_v28  ;;  %26461 = vmatprep.mubr.msk.f32.mxu1 %vm29826_vm1, %v35312_v55 }
0x33e6   :  { %28749 = vmatprep.subr.bf16.mxu1 %v35313_v42 }
0x33e9   :  { %28751 = vmatpush3.bf16.msra.mxu1 %v28750_v32 }
0x33ea   :  { %28752 = vmatprep.subr.bf16.mxu1 %v35313_v42 }
0x33ec   :  { %26462 = vmatmul.mubr.f32.vlgmr.msra.gmra.mrb[68].mxu1 %v18185_v24 }
0x33ed   :  { %28754 = vmatpush3.bf16.msra.mxu1 %v28753_v60  ;;  %26472 = vmatprep.mubr.msk.f32.mxu1 %vm29826_vm1, %v35312_v55  ;;  %v18611_v60 = vpop.permute.xlu0 %18610 }
0x33ee   :  { %28755 = vmatprep.subr.bf16.mxu1 %v35313_v42 }
0x33f1   :  { %28757 = vmatpush3.bf16.msra.mxu1 %v28756_v5 }
0x33f2   :  { %28758 = vmatprep.subr.bf16.mxu1 %v35313_v42 }
0x33f4   :  { %26473 = vmatmul.mubr.f32.vlgmr.msra.gmra.mrb[68].mxu1 %v18186_v41  ;;  %v34148_v41 = vsub.f32 %v19888_v37, %v19904_v29 }
0x33f5   :  { %28760 = vmatpush3.bf16.msra.mxu1 %v34018_v10  ;;  %26483 = vmatprep.mubr.msk.f32.mxu1 %vm29826_vm1, %v35312_v55 }
0x33f6   :  { %28761 = vmatprep.subr.bf16.mxu1 %v35313_v42 }
0x33f9   :  { %28763 = vmatpush3.bf16.msra.mxu1 %v34034_v0 }
0x33fa   :  { %28764 = vmatprep.subr.bf16.mxu1 %v35313_v42 }
0x33fc   :  { %26484 = vmatmul.mubr.f32.vlgmr.msra.gmra.mrb[68].mxu1 %v18187_v59  ;;  %v34150_v59 = vsub.f32 %v19889_v6, %v19907_v20 }
0x33fd   :  { %28766 = vmatpush3.bf16.msra.mxu1 %v28765_v15  ;;  %26494 = vmatprep.mubr.msk.f32.mxu1 %vm29826_vm1, %v35312_v55  ;;  %v18636_v15 = vsub.f32 1.0, %v18629_v12  ;;  %v19980_v12 = vsub.f32 %v34116_v54, %v19979_v22  ;;  %v18633_v54 = vpop.permute.xlu0 %18632 }
0x33fe   :  { %28767 = vmatprep.subr.bf16.mxu1 %v35313_v42  ;;  %v20000_v30 = vand.u32 4294901760, %v34150_v59  ;;  %v28972_v33 = vpack.c.bf16 %v34150_v59, %v34148_v41 }
0x3401   :  { %28769 = vmatpush3.bf16.msra.mxu1 %v28768_v11 }
0x3402   :  { %28770 = vmatprep.subr.bf16.mxu1 %v35313_v42 }
0x3404   :  { %26495 = vmatmul.mubr.f32.vlgmr.msra.gmra.mrb[68].mxu1 %v18185_v24 }
0x3405   :  { %28772 = vmatpush3.bf16.msra.mxu1 %v34018_v10  ;;  %26505 = vmatprep.mubr.msk.f32.mxu1 %vm29826_vm1, %v35312_v55  ;;  %v21874_v10 = vld [vmem:[%s35111_s22] ss:$0 sm:$0xff] }
0x3406   :  { %28773 = vmatprep.subr.bf16.mxu1 %v35313_v42 }
0x3409   :  { %28775 = vmatpush3.bf16.msra.mxu1 %v34034_v0 }
0x340a   :  { %28776 = vmatprep.subr.bf16.mxu1 %v35313_v42 }
0x340c   :  { %26506 = vmatmul.mubr.f32.vlgmr.msra.gmra.mrb[68].mxu1 %v18185_v24  ;;  %v34146_v24 = vpack.c.bf16 %v19907_v20, %v19904_v29 }
0x340d   :  { %26516 = vmatprep.mubr.msk.f32.mxu1 %vm29826_vm1, %v35312_v55  ;;  %28778 = vmatpush3.bf16.msra.mxu1 %v34108_v47 }
0x340e   :  { %28779 = vmatprep.subr.bf16.mxu1 %v35313_v42  ;;  %28961 = vmatpush3.bf16.msra.mxu0 %v34146_v24 }
0x340f   :  { %28962 = vmatprep.subr.bf16.mxu0 %v35313_v42 }
0x3411   :  { %28781 = vmatpush3.bf16.msra.mxu1 %v34138_v18 }
0x3412   :  { %28782 = vmatprep.subr.bf16.mxu1 %v35313_v42 }
0x34df   :  { %v18597_v1 = vpop.f32.mrb[68].mxu1 }
0x34e0   :  { %v29202_v0 = vadd.f32 %v21874_v10, %v18597_v1  ;;  %v26507_v8 = vpop.f32.mrb[69].mxu1  ;;  %v19986_v10 = vand.u32 4294901760, %v34118_v58  ;;  %v18747_v1 = vand.u32 4294901760, %v18746_v43 }
0x34e1   :  { %v19981_v8 = vand.u32 4294901760, %v19980_v12 }
0x34e2   :  { %v18602_v61 = vadd.f32 %v29202_v0, %v18601_v40  ;;  %v18766_v40 = vand.u32 4294901760, %v34142_v19  ;;  %v28981_v57 = vpack.c.bf16 %v19986_v10, %v19979_v22 }
0x34e4   :  { %v21875_v34 = vmul.f32 -1.442695, %v18602_v61  ;;  %v19987_v61 = vsub.f32 %v34118_v58, %v19986_v10  ;;  %v19153_v10 = vld [vmem:[%s35103_s15 + $0x10] sm:$0xff] }
0x34e6   :  { %29794 = vpow2.f32 %v21875_v34  ;;  %v19993_v34 = vand.u32 4294901760, %v34148_v41 }
0x34e8   :  { %v28984_v3 = vpack.c.bf16 %v20000_v30, %v19993_v34 }
0x34f0   :  { %v29795_v28 = vpop.eup %29794 }
0x34f1   :  { %v18606_v38 = vadd.f32 1.0, %v29795_v28 }
0x34f3   :  { %29796 = vrcp.f32 %v18606_v38  ;;  %v18767_v38 = vsub.f32 %v34142_v19, %v18766_v40 }
0x34fd   :  { %v34090_v32 = vpop.eup %29796 }
0x34fe   :  { %v18613_v5 = vmul.f32 %v34090_v32, %v18611_v60  ;;  %v18621_v6 = vsub.f32 1.0, %v34090_v32 }
0x3500   :  { %18615 = vrot.lane.b32.xlu1 %v18613_v5, %s29829_s5  ;;  %v19988_v5 = vand.u32 4294901760, %v19987_v61  ;;  %v18622_v35 = vmul.f32 %v18621_v6, %v35420_v2 }
0x3504   :  { %18639 = vperm.xlu1 %29680, %v18636_v15   ;;  %v19994_v15 = vsub.f32 %v34148_v41, %v19993_v34  ;;  %v19155_v34 = vld [vmem:[%s35103_s15 + $0x20] sm:$0xff] }
0x3506   :  { %v19995_v31 = vand.u32 4294901760, %v19994_v15  ;;  %v19158_v15 = vld [vmem:[%s35103_s15 + $0x38] sm:$0xff] }
0x3508   :  { %29681 = vset.pattern.permute.xlu1 %v35419_v53 }
0x3572   :  { %v18616_v11 = vpop.permute.xlu1 %18615 }
0x3573   :  { %v18618_v49 = vadd.f32 %v35418_v13, %v18616_v11  ;;  %v18759_v13 = vand.u32 4294901760, %v34140_v56  ;;  %v18768_v11 = vand.u32 4294901760, %v18767_v38  ;;  %v19190_v38 = vand.u32 4294901760, %v19155_v34 }
0x3575   :  { %v18619_v21 = vadd.f32 %v29202_v0, %v18618_v49  ;;  %v18754_v0 = vand.u32 4294901760, %v18753_v51  ;;  %v18760_v28 = vsub.f32 %v34140_v56, %v18759_v13  ;;  %v20001_v49 = vsub.f32 %v34150_v59, %v20000_v30 }
0x3576   :  { %v28804_v16 = vpack.c.bf16 %v18766_v40, %v18759_v13  ;;  %v19184_v13 = vand.u32 4294901760, %v19153_v10  ;;  %v34320_v6 = vsub.f32 %v19155_v34, %v19190_v38 }
0x3577   :  { %29798 = vtanh.f32 %v18619_v21  ;;  %v28783_v60 = vpack.c.bf16 %v18754_v0, %v18747_v1  ;;  %v18761_v53 = vand.u32 4294901760, %v18760_v28  ;;  %v28963_v21 = vpack.c.bf16 %v19988_v5, %v19981_v8  ;;  %v19154_v1 = vld [vmem:[%s35103_s15 + $0x18] sm:$0xff]  ;;  %v19156_v28 = vld [vmem:[%s35103_s15 + $0x28] sm:$0xff]  ;;  %v19157_v5 = vld [vmem:[%s35103_s15 + $0x30] sm:$0xff] }
0x3578   :  { %v20002_v62 = vand.u32 4294901760, %v20001_v49  ;;  %v19187_v40 = vand.u32 4294901760, %v19154_v1  ;;  %v34268_v8 = vsub.f32 %v19153_v10, %v19184_v13  ;;  %v19193_v30 = vand.u32 4294901760, %v19156_v28 }
0x3579   :  { %v28786_v44 = vpack.c.bf16 %v18768_v11, %v18761_v53  ;;  %v19196_v53 = vand.u32 4294901760, %v19157_v5  ;;  %v19199_v11 = vand.u32 4294901760, %v19158_v15 }
0x357a   :  { %v28966_v17 = vpack.c.bf16 %v20002_v62, %v19995_v31  ;;  %v34266_v0 = vpack.c.bf16 %v19187_v40, %v19184_v13  ;;  %v34270_v61 = vsub.f32 %v19154_v1, %v19187_v40  ;;  %v19160_v31 = vld [vmem:[%s35103_s15 + $0x48] sm:$0xff] }
0x357b   :  { %v34290_v49 = vpack.c.bf16 %v19199_v11, %v19196_v53  ;;  %v19205_v62 = vand.u32 4294901760, %v19160_v31 }
0x3581   :  { %v29799_v48 = vpop.eup %29798 }
0x3582   :  { %18624 = vrot.lane.b32.xlu1 %v29799_v48, %s29830_s29 }
0x3583   :  { %v18640_v37 = vpop.permute.xlu1 %18639 }
0x3584   :  { %v18642_v58 = vmul.f32 %v18640_v37, %v35420_v2 }
0x35f4   :  { %v18625_v48 = vpop.permute.xlu1 %18624 }
0x35f5   :  { %v18627_v29 = vmul.f32 %v34090_v32, %v18625_v48  ;;  %v19151_v32 = vld [vmem:[%s35103_s15] sm:$0xff]  ;;  %v34322_v48 = vsub.f32 %v19156_v28, %v19193_v30 }
0x35f7   :  { %v18628_v20 = vadd.f32 %v18627_v29, %v18622_v35  ;;  %v34324_v29 = vsub.f32 %v19157_v5, %v19196_v53  ;;  %v34326_v35 = vsub.f32 %v19158_v15, %v19199_v11 }
0x35f9   :  { %v18635_v56 = vmul.f32 %v18633_v54, %v18628_v20  ;;  %v19165_v20 = vld [vmem:[%s35103_s15 + $0x70] sm:$0xff]  ;;  %v19166_v54 = vld [vmem:[%s35103_s15 + $0x78] sm:$0xff] }
0x35fb   :  { %v34181_v19 = vadd.f32 %v18642_v58, %v18635_v56  ;;  %v34336_v56 = vsub.f32 %v19160_v31, %v19205_v62  ;;  %v35256_v31 = vand.u32 4294901760, %v34320_v6 }
0x35fd   :  { %35421 = vst [vmem:[#allocation9_spill] sm:$0xff] %v34181_v19  ;;  %v18661_v27 = vsel %vm101_vm0, %v34181_v19, 0 }
0x35fe   :  { %v34185_v9 = vand.u32 4294901760, %v18661_v27 }
0x3600   :  { %v18733_v22 = vsub.f32 %v18661_v27, %v34185_v9 }
0x3602   :  { %v18734_v41 = vand.u32 4294901760, %v18733_v22 }
0x3604   :  { %v18735_v59 = vsub.f32 %v18733_v22, %v18734_v41 }
0x3606   :  { %v18736_v43 = vand.u32 4294901760, %v18735_v59 }
0x3608   :  { %26517 = vmatmul.mubr.f32.vlgmr.msra.gmra.mrb[70].mxu1 %v18736_v43  ;;  %26793 = vmatmul.mubr.f32.vlgmr.msra.gmra.mrb[66].mxu0 %v18736_v43  ;;  %v19220_v43 = vand.u32 4294901760, %v19165_v20 }
0x3609   :  { %28784 = vmatpush3.bf16.msra.mxu1 %v28783_v60  ;;  %28964 = vmatpush3.bf16.msra.mxu0 %v28963_v21  ;;  %v34280_v60 = vpack.c.bf16 %v19193_v30, %v19190_v38  ;;  %v19159_v21 = vld [vmem:[%s35103_s15 + $0x40] sm:$0xff]  ;;  %v35258_v38 = vand.u32 4294901760, %v34268_v8  ;;  %v35257_v30 = vand.u32 4294901760, %v34270_v61 }
0x360a   :  { %28785 = vmatprep.subr.bf16.mxu1 %v35313_v42  ;;  %28965 = vmatprep.subr.bf16.mxu0 %v35313_v42 }
0x360b   :  { %26527 = vmatprep.mubr.msk.f32.mxu1 %vm29826_vm1, %v35312_v55  ;;  %26803 = vmatprep.mubr.msk.f32.mxu0 %vm29826_vm1, %v35312_v55  ;;  %v19286_v15 = vsub.f32 %v34268_v8, %v35258_v38  ;;  %v19293_v53 = vsub.f32 %v34270_v61, %v35257_v30 }
0x360d   :  { %28787 = vmatpush3.bf16.msra.mxu1 %v28786_v44  ;;  %28967 = vmatpush3.bf16.msra.mxu0 %v28966_v17  ;;  %v19202_v44 = vand.u32 4294901760, %v19159_v21  ;;  %v19287_v11 = vand.u32 4294901760, %v19286_v15 }
0x360e   :  { %28788 = vmatprep.subr.bf16.mxu1 %v35313_v42  ;;  %28968 = vmatprep.subr.bf16.mxu0 %v35313_v42 }
0x360f   :  { %v34300_v17 = vpack.c.bf16 %v19205_v62, %v19202_v44  ;;  %v34334_v58 = vsub.f32 %v19159_v21, %v19202_v44  ;;  %v19294_v21 = vand.u32 4294901760, %v19293_v53  ;;  %v35255_v44 = vand.u32 4294901760, %v34322_v48 }
0x3610   :  { %26528 = vmatmul.mubr.f32.vlgmr.msra.gmra.mrb[72].mxu1 %v34185_v9  ;;  %26804 = vmatmul.mubr.f32.vlgmr.msra.gmra.mrb[66].mxu0 %v34185_v9 }
0x3611   :  { %28790 = vmatpush3.bf16.msra.mxu1 %v28789_v4  ;;  %28970 = vmatpush3.bf16.msra.mxu0 %v28969_v45  ;;  %v19161_v4 = vld [vmem:[%s35103_s15 + $0x50] sm:$0xff]  ;;  %v19162_v45 = vld [vmem:[%s35103_s15 + $0x58] sm:$0xff]  ;;  %v34378_v62 = vpack.c.bf16 %v19294_v21, %v19287_v11 }
0x3612   :  { %28791 = vmatprep.subr.bf16.mxu1 %v35313_v42  ;;  %28971 = vmatprep.subr.bf16.mxu0 %v35313_v42 }
0x3613   :  { %26538 = vmatprep.mubr.msk.f32.mxu1 %vm29826_vm1, %v35312_v55  ;;  %26814 = vmatprep.mubr.msk.f32.mxu0 %vm29826_vm1, %v35312_v55 }
0x3615   :  { %28793 = vmatpush3.bf16.msra.mxu1 %v28792_v26  ;;  %28973 = vmatpush3.bf16.msra.mxu0 %v28972_v33  ;;  %v19208_v26 = vand.u32 4294901760, %v19161_v4  ;;  %v19211_v33 = vand.u32 4294901760, %v19162_v45 }
0x3616   :  { %28794 = vmatprep.subr.bf16.mxu1 %v35313_v42  ;;  %28974 = vmatprep.subr.bf16.mxu0 %v35313_v42 }
0x3617   :  { %v34338_v27 = vsub.f32 %v19161_v4, %v19208_v26  ;;  %v19300_v4 = vsub.f32 %v34320_v6, %v35256_v31 }
0x3618   :  { %26539 = vmatmul.mubr.f32.vlgmr.msra.gmra.mrb[74].mxu1 %v18733_v22  ;;  %26815 = vmatmul.mubr.f32.vlgmr.msra.gmra.mrb[66].mxu0 %v18733_v22 }
0x3619   :  { %28796 = vmatpush3.bf16.msra.mxu1 %v34108_v47  ;;  %28976 = vmatpush3.bf16.msra.mxu0 %v34114_v39  ;;  %v35245_v11 = vand.u32 4294901760, %v34338_v27 }
0x361a   :  { %28797 = vmatprep.subr.bf16.mxu1 %v35313_v42  ;;  %28977 = vmatprep.subr.bf16.mxu0 %v35313_v42 }
0x361b   :  { %26549 = vmatprep.mubr.msk.f32.mxu1 %vm29826_vm1, %v35312_v55  ;;  %26825 = vmatprep.mubr.msk.f32.mxu0 %vm29826_vm1, %v35312_v55 }
0x361d   :  { %28799 = vmatpush3.bf16.msra.mxu1 %v34138_v18  ;;  %28979 = vmatpush3.bf16.msra.mxu0 %v34146_v24 }
0x361e   :  { %28800 = vmatprep.subr.bf16.mxu1 %v35313_v42  ;;  %28980 = vmatprep.subr.bf16.mxu0 %v35313_v42 }
0x3620   :  { %26550 = vmatmul.mubr.f32.vlgmr.msra.gmra.mrb[76].mxu1 %v18734_v41  ;;  %26826 = vmatmul.mubr.f32.vlgmr.msra.gmra.mrb[66].mxu0 %v18734_v41 }
0x3621   :  { %28802 = vmatpush3.bf16.msra.mxu1 %v28801_v36  ;;  %28982 = vmatpush3.bf16.msra.mxu0 %v28981_v57  ;;  %v34310_v36 = vpack.c.bf16 %v19211_v33, %v19208_v26  ;;  %v19163_v57 = vld [vmem:[%s35103_s15 + $0x60] sm:$0xff]  ;;  %v19301_v26 = vand.u32 4294901760, %v19300_v4 }
0x3622   :  { %28803 = vmatprep.subr.bf16.mxu1 %v35313_v42  ;;  %28983 = vmatprep.subr.bf16.mxu0 %v35313_v42 }
0x3623   :  { %26560 = vmatprep.mubr.msk.f32.mxu1 %vm29826_vm1, %v35312_v55  ;;  %26836 = vmatprep.mubr.msk.f32.mxu0 %vm29826_vm1, %v35312_v55 }
0x3625   :  { %28805 = vmatpush3.bf16.msra.mxu1 %v28804_v16  ;;  %28985 = vmatpush3.bf16.msra.mxu0 %v28984_v3  ;;  %v19164_v16 = vld [vmem:[%s35103_s15 + $0x68] sm:$0xff]  ;;  %v19214_v3 = vand.u32 4294901760, %v19163_v57 }
0x3626   :  { %28806 = vmatprep.subr.bf16.mxu1 %v35313_v42  ;;  %28986 = vmatprep.subr.bf16.mxu0 %v35313_v42  ;;  %v19217_v37 = vand.u32 4294901760, %v19164_v16 }
0x3627   :  { %v34344_v41 = vsub.f32 %v19163_v57, %v19214_v3  ;;  %v35254_v57 = vand.u32 4294901760, %v34324_v29 }
0x3628   :  { %26561 = vmatmul.mubr.f32.vlgmr.msra.gmra.mrb[78].mxu1 %v34185_v9  ;;  %26837 = vmatmul.mubr.f32.vlgmr.msra.gmra.mrb[66].mxu0 %v34185_v9  ;;  %v34342_v22 = vpack.c.bf16 %v19217_v37, %v19214_v3  ;;  %v34346_v59 = vsub.f32 %v19164_v16, %v19217_v37  ;;  %v35253_v16 = vand.u32 4294901760, %v34326_v35 }
0x3629   :  { %28808 = vmatpush3.bf16.msra.mxu1 %v34108_v47  ;;  %28988 = vmatpush3.bf16.msra.mxu0 %v34114_v39  ;;  %v19152_v47 = vld [vmem:[%s35103_s15 + $0x8] sm:$0xff]  ;;  %v19178_v39 = vand.u32 4294901760, %v19151_v32  ;;  %v19314_v37 = vsub.f32 %v34324_v29, %v35254_v57 }
0x362a   :  { %28809 = vmatprep.subr.bf16.mxu1 %v35313_v42  ;;  %28989 = vmatprep.subr.bf16.mxu0 %v35313_v42 }
0x362b   :  { %26571 = vmatprep.mubr.msk.f32.mxu1 %vm29826_vm1, %v35312_v55  ;;  %26847 = vmatprep.mubr.msk.f32.mxu0 %vm29826_vm1, %v35312_v55  ;;  %v34254_v51 = vsub.f32 %v19151_v32, %v19178_v39  ;;  %v19223_v32 = vand.u32 4294901760, %v19166_v54 }
0x362d   :  { %28811 = vmatpush3.bf16.msra.mxu1 %v34138_v18  ;;  %28991 = vmatpush3.bf16.msra.mxu0 %v34146_v24  ;;  %v19181_v18 = vand.u32 4294901760, %v19152_v47  ;;  %v34354_v10 = vpack.c.bf16 %v19223_v32, %v19220_v43  ;;  %v34356_v1 = vsub.f32 %v19166_v54, %v19223_v32  ;;  %v19315_v54 = vand.u32 4294901760, %v19314_v37 }
0x362e   :  { %28812 = vmatprep.subr.bf16.mxu1 %v35313_v42  ;;  %28992 = vmatprep.subr.bf16.mxu0 %v35313_v42  ;;  %v35252_v32 = vand.u32 4294901760, %v34334_v58 }
0x362f   :  { %v34252_v24 = vpack.c.bf16 %v19181_v18, %v19178_v39  ;;  %v34256_v12 = vsub.f32 %v19152_v47, %v19181_v18  ;;  %v35260_v47 = vand.u32 4294901760, %v34254_v51  ;;  %v34351_v18 = vsub.f32 %v19165_v20, %v19220_v43 }
0x3630   :  { %26572 = vmatmul.mubr.f32.vlgmr.msra.gmra.mrb[80].mxu1 %v34185_v9  ;;  %26848 = vmatmul.mubr.f32.vlgmr.msra.gmra.mrb[66].mxu0 %v34185_v9  ;;  %v34340_v9 = vsub.f32 %v19162_v45, %v19211_v33  ;;  %v19307_v45 = vsub.f32 %v34322_v48, %v35255_v44  ;;  %v19321_v20 = vsub.f32 %v34326_v35, %v35253_v16 }
0x3631   :  { %26606 = vmatprep.mubr.msk.f32.mxu1 %vm29826_vm1, %v35312_v55  ;;  %26858 = vmatprep.mubr.msk.f32.mxu0 %vm29826_vm1, %v35312_v55  ;;  %v35259_v39 = vand.u32 4294901760, %v34256_v12  ;;  %v19272_v13 = vsub.f32 %v34254_v51, %v35260_v47 }
0x3632   :  { %28814 = vmatpush3.bf16.msra.mxu1 %v34252_v24  ;;  %v19308_v33 = vand.u32 4294901760, %v19307_v45  ;;  %v19322_v43 = vand.u32 4294901760, %v19321_v20  ;;  %v35246_v21 = vand.u32 4294901760, %v34340_v9  ;;  %v19342_v45 = vsub.f32 %v34338_v27, %v35245_v11 }
0x3633   :  { %28815 = vmatprep.subr.bf16.mxu1 %v35313_v42  ;;  %v19279_v40 = vsub.f32 %v34256_v12, %v35259_v39  ;;  %v19273_v34 = vand.u32 4294901760, %v19272_v13  ;;  %v35248_v13 = vand.u32 4294901760, %v34336_v56  ;;  %v35247_v20 = vand.u32 4294901760, %v34344_v41 }
0x3634   :  { %v34388_v3 = vpack.c.bf16 %v19308_v33, %v19301_v26  ;;  %v19349_v26 = vsub.f32 %v34340_v9, %v35246_v21  ;;  %v19343_v33 = vand.u32 4294901760, %v19342_v45  ;;  %v35249_v11 = vand.u32 4294901760, %v34351_v18 }
0x3635   :  { %v19280_v28 = vand.u32 4294901760, %v19279_v40  ;;  %v34398_v40 = vpack.c.bf16 %v19322_v43, %v19315_v54  ;;  %v35251_v54 = vand.u32 4294901760, %v34346_v59  ;;  %v35250_v45 = vand.u32 4294901760, %v34356_v1 }
0x3636   :  { %28817 = vmatpush3.bf16.msra.mxu1 %v34266_v0  ;;  %v19350_v37 = vand.u32 4294901760, %v19349_v26  ;;  %v19370_v21 = vsub.f32 %v34351_v18, %v35249_v11  ;;  %v28873_v11 = vpack.c.bf16 %v34336_v56, %v34334_v58 }
0x3637   :  { %28818 = vmatprep.subr.bf16.mxu1 %v35313_v42  ;;  %v34368_v5 = vpack.c.bf16 %v19280_v28, %v19273_v34  ;;  %v19328_v34 = vsub.f32 %v34334_v58, %v35252_v32  ;;  %v19335_v28 = vsub.f32 %v34336_v56, %v35248_v13 }
0x3638   :  { %v28852_v43 = vpack.c.bf16 %v19350_v37, %v19343_v33  ;;  %v19377_v33 = vsub.f32 %v34356_v1, %v35250_v45  ;;  %v19371_v37 = vand.u32 4294901760, %v19370_v21  ;;  %v28876_v21 = vpack.c.bf16 %v34340_v9, %v34338_v27 }
0x3639   :  { %v19329_v15 = vand.u32 4294901760, %v19328_v34  ;;  %v19336_v53 = vand.u32 4294901760, %v19335_v28  ;;  %v19356_v34 = vsub.f32 %v34344_v41, %v35247_v20  ;;  %v19363_v28 = vsub.f32 %v34346_v59, %v35251_v54  ;;  %v21876_v54 = vld [vmem:[%s35105_s14] ss:$0 sm:$0xff] }
0x363a   :  { %28820 = vmatpush3.bf16.msra.mxu1 %v34280_v60  ;;  %v19378_v20 = vand.u32 4294901760, %v19377_v33 }
0x363b   :  { %28821 = vmatprep.subr.bf16.mxu1 %v35313_v42  ;;  %v34408_v4 = vpack.c.bf16 %v19336_v53, %v19329_v15  ;;  %v19357_v15 = vand.u32 4294901760, %v19356_v34  ;;  %v19364_v53 = vand.u32 4294901760, %v19363_v28  ;;  %v28861_v34 = vpack.c.bf16 %v34256_v12, %v34254_v51 }
0x363c   :  { %v28858_v13 = vpack.c.bf16 %v19378_v20, %v19371_v37  ;;  %v28864_v28 = vpack.c.bf16 %v34270_v61, %v34268_v8 }
0x363d   :  { %v28855_v26 = vpack.c.bf16 %v19364_v53, %v19357_v15  ;;  %v28867_v15 = vpack.c.bf16 %v34322_v48, %v34320_v6  ;;  %v28870_v53 = vpack.c.bf16 %v34326_v35, %v34324_v29 }
0x363e   :  { %28823 = vmatpush3.bf16.msra.mxu1 %v34290_v49 }
0x363f   :  { %28824 = vmatprep.subr.bf16.mxu1 %v35313_v42 }
0x3642   :  { %28826 = vmatpush3.bf16.msra.mxu1 %v34300_v17 }
0x3643   :  { %28827 = vmatprep.subr.bf16.mxu1 %v35313_v42 }
0x3646   :  { %28829 = vmatpush3.bf16.msra.mxu1 %v34310_v36 }
0x3647   :  { %28830 = vmatprep.subr.bf16.mxu1 %v35313_v42 }
0x364a   :  { %28832 = vmatpush3.bf16.msra.mxu1 %v34342_v22 }
0x364b   :  { %28833 = vmatprep.subr.bf16.mxu1 %v35313_v42 }
0x364e   :  { %28835 = vmatpush3.bf16.msra.mxu1 %v34354_v10 }
0x364f   :  { %28836 = vmatprep.subr.bf16.mxu1 %v35313_v42 }
0x36db   :  { %v18738_v37 = vpop.f32.mrb[70].mxu1 }
0x36dc   :  { %v26518_v45 = vpop.f32.mrb[71].mxu1  ;;  %v18739_v32 = vadd.f32 %v21876_v54, %v18738_v37 }
0x36e3   :  { %v18829_v16 = vpop.f32.mrb[72].mxu1 }
0x36e4   :  { %v18830_v57 = vadd.f32 %v18829_v16, %v18739_v32  ;;  %v26529_v44 = vpop.f32.mrb[73].mxu1  ;;  %v35433_v32 = vand.u32 4294901760, %v34336_v56  ;;  %v35439_v56 = vand.u32 4294901760, %v34356_v1 }
0x36eb   :  { %v18909_v31 = vpop.f32.mrb[74].mxu1 }
0x36ec   :  { %v18910_v30 = vadd.f32 %v18909_v31, %v18830_v57  ;;  %v26540_v38 = vpop.f32.mrb[75].mxu1  ;;  %v35430_v57 = vand.u32 4294901760, %v34324_v29  ;;  %v35436_v29 = vand.u32 4294901760, %v34344_v41 }
0x36f3   :  { %v18986_v39 = vpop.f32.mrb[76].mxu1 }
0x36f4   :  { %v18987_v47 = vadd.f32 %v18986_v39, %v18910_v30  ;;  %v26551_v19 = vpop.f32.mrb[77].mxu1  ;;  %v35427_v30 = vand.u32 4294901760, %v34270_v61 }
0x36fb   :  { %v19069_v20 = vpop.f32.mrb[78].mxu1 }
0x36fc   :  { %v19070_v2 = vadd.f32 %v19069_v20, %v18987_v47  ;;  %v26562_v63 = vpop.f32.mrb[79].mxu1  ;;  %v35426_v47 = vand.u32 4294901760, %v34268_v8  ;;  %v35431_v8 = vand.u32 4294901760, %v34326_v35  ;;  %v35437_v35 = vand.u32 4294901760, %v34346_v59 }
0x36fd   :  { %v35425_v63 = vand.u32 4294901760, %v34256_v12  ;;  %v35429_v12 = vand.u32 4294901760, %v34322_v48  ;;  %v35435_v48 = vand.u32 4294901760, %v34340_v9 }
0x36fe   :  { %v28918_v61 = vpack.c.bf16 %v35431_v8, %v35430_v57 }
0x3703   :  { %v19144_v33 = vpop.f32.mrb[80].mxu1  ;;  %v34451_v23 = vpop.f32.mrb[66].mxu0 }
0x3704   :  { %v19145_v45 = vadd.f32 %v19144_v33, %v19070_v2  ;;  %v26573_v25 = vpop.f32.mrb[81].mxu1  ;;  %v26849_v14 = vpop.f32.mrb[67].mxu0 }
0x3705   :  { %v35422_v14 = vpack.c.bf16 %v34346_v59, %v34344_v41  ;;  %v35424_v25 = vand.u32 4294901760, %v34254_v51  ;;  %v35428_v51 = vand.u32 4294901760, %v34320_v6  ;;  %v35434_v6 = vand.u32 4294901760, %v34338_v27 }
0x3706   :  { %v19149_v54 = vadd.f32 %v19148_v50, %v19145_v45  ;;  %v35423_v50 = vpack.c.bf16 %v34356_v1, %v34351_v18  ;;  %v20384_v45 = vld [vmem:[%s35109_s21 + $0x10] sm:$0xff] }
0x3707   :  { %v28909_v2 = vpack.c.bf16 %v35425_v63, %v35424_v25 }
0x3708   :  { %29800 = vtanh.f32 %v19149_v54  ;;  %v20385_v54 = vld [vmem:[%s35109_s21 + $0x18] sm:$0xff] }
0x3712   :  { %v29801_v16 = vpop.eup %29800 }
0x3713   :  { %v34453_v44 = vand.u32 4294901760, %v29801_v16 }
0x3715   :  { %v19259_v38 = vsub.f32 %v29801_v16, %v34453_v44  ;;  %v29819_v16 = vld [vmem:[%s35284_s2] sm:$0xff] }
0x3717   :  { %v19260_v31 = vand.u32 4294901760, %v19259_v38 }
0x3719   :  { %v19261_v39 = vsub.f32 %v19259_v38, %v19260_v31 }
0x371b   :  { %v19262_v19 = vand.u32 4294901760, %v19261_v39 }
0x371d   :  { %26607 = vmatmul.mubr.f32.vlgmr.msra.gmra.mrb[82].mxu1 %v19262_v19 }
0x371e   :  { %28838 = vmatpush3.bf16.msra.mxu1 %v34368_v5  ;;  %26641 = vmatprep.mubr.msk.f32.mxu1 %vm29826_vm1, %v35312_v55  ;;  %v28912_v5 = vpack.c.bf16 %v35427_v30, %v35426_v47 }
0x371f   :  { %28839 = vmatprep.subr.bf16.mxu1 %v35313_v42 }
0x3722   :  { %28841 = vmatpush3.bf16.msra.mxu1 %v34378_v62  ;;  %v28915_v62 = vpack.c.bf16 %v35429_v12, %v35428_v51  ;;  %v34630_v51 = vld [vmem:[%s35110_s3 + $0x28] sm:$0xff] }
0x3723   :  { %28842 = vmatprep.subr.bf16.mxu1 %v35313_v42 }
0x3726   :  { %28844 = vmatpush3.bf16.msra.mxu1 %v34388_v3  ;;  %v35432_v3 = vand.u32 4294901760, %v34334_v58  ;;  %v35438_v58 = vand.u32 4294901760, %v34351_v18 }
0x3727   :  { %28845 = vmatprep.subr.bf16.mxu1 %v35313_v42 }
0x372a   :  { %28847 = vmatpush3.bf16.msra.mxu1 %v34398_v40  ;;  %v28924_v40 = vpack.c.bf16 %v35435_v48, %v35434_v6  ;;  %v35445_v48 = vld [vmem:[#allocation14_spill] sm:$0xff] }
0x372b   :  { %28848 = vmatprep.subr.bf16.mxu1 %v35313_v42 }
0x372e   :  { %28850 = vmatpush3.bf16.msra.mxu1 %v34408_v4  ;;  %v28930_v4 = vpack.c.bf16 %v35439_v56, %v35438_v58  ;;  %v19837_v56 = vld [vmem:[#allocation2 + $0x8] sm:$0xff] }
0x372f   :  { %28851 = vmatprep.subr.bf16.mxu1 %v35313_v42 }
0x3732   :  { %28853 = vmatpush3.bf16.msra.mxu1 %v28852_v43 }
0x3733   :  { %28854 = vmatprep.subr.bf16.mxu1 %v35313_v42 }
0x3736   :  { %28856 = vmatpush3.bf16.msra.mxu1 %v28855_v26  ;;  %v35440_v26 = vmov 6  }
0x3737   :  { %28857 = vmatprep.subr.bf16.mxu1 %v35313_v42 }
0x373a   :  { %28859 = vmatpush3.bf16.msra.mxu1 %v28858_v13  ;;  %v28921_v13 = vpack.c.bf16 %v35433_v32, %v35432_v3 }
0x373b   :  { %28860 = vmatprep.subr.bf16.mxu1 %v35313_v42 }
0x373d   :  { %26642 = vmatmul.mubr.f32.vlgmr.msra.gmra.mrb[82].mxu1 %v34453_v44 }
0x373e   :  { %28862 = vmatpush3.bf16.msra.mxu1 %v28861_v34  ;;  %26676 = vmatprep.mubr.msk.f32.mxu1 %vm29826_vm1, %v35312_v55  ;;  %v35441_v34 = vmov 5  }
0x373f   :  { %28863 = vmatprep.subr.bf16.mxu1 %v35313_v42 }
0x3742   :  { %28865 = vmatpush3.bf16.msra.mxu1 %v28864_v28  ;;  %v35442_v28 = vmov 0  }
0x3743   :  { %28866 = vmatprep.subr.bf16.mxu1 %v35313_v42 }
0x3746   :  { %28868 = vmatpush3.bf16.msra.mxu1 %v28867_v15  ;;  %v21878_v15 = vld [vmem:[%s35108_s20] ss:$0 sm:$0xff] }
0x3747   :  { %28869 = vmatprep.subr.bf16.mxu1 %v35313_v42 }
0x374a   :  { %28871 = vmatpush3.bf16.msra.mxu1 %v28870_v53  ;;  %v20383_v53 = vld [vmem:[%s35109_s21 + $0x8] sm:$0xff] }
0x374b   :  { %28872 = vmatprep.subr.bf16.mxu1 %v35313_v42  ;;  %v20400_v20 = vand.u32 4294901760, %v20383_v53 }
0x374e   :  { %28874 = vmatpush3.bf16.msra.mxu1 %v28873_v11  ;;  %v28927_v11 = vpack.c.bf16 %v35437_v35, %v35436_v29 }
0x374f   :  { %28875 = vmatprep.subr.bf16.mxu1 %v35313_v42 }
0x3752   :  { %28877 = vmatpush3.bf16.msra.mxu1 %v28876_v21 }
0x3753   :  { %28878 = vmatprep.subr.bf16.mxu1 %v35313_v42 }
0x3756   :  { %28880 = vmatpush3.bf16.msra.mxu1 %v35422_v14 }
0x3757   :  { %28881 = vmatprep.subr.bf16.mxu1 %v35313_v42 }
0x375a   :  { %28883 = vmatpush3.bf16.msra.mxu1 %v35423_v50 }
0x375b   :  { %28884 = vmatprep.subr.bf16.mxu1 %v35313_v42 }
0x375d   :  { %26677 = vmatmul.mubr.f32.vlgmr.msra.gmra.mrb[82].mxu1 %v19259_v38  ;;  %v20406_v38 = vand.u32 4294901760, %v20385_v54 }
0x375e   :  { %28886 = vmatpush3.bf16.msra.mxu1 %v34252_v24  ;;  %26711 = vmatprep.mubr.msk.f32.mxu1 %vm29826_vm1, %v35312_v55 }
0x375f   :  { %28887 = vmatprep.subr.bf16.mxu1 %v35313_v42  ;;  %v34618_v50 = vsub.f32 %v20385_v54, %v20406_v38 }
0x3762   :  { %28889 = vmatpush3.bf16.msra.mxu1 %v34266_v0 }
0x3763   :  { %28890 = vmatprep.subr.bf16.mxu1 %v35313_v42 }
0x3766   :  { %28892 = vmatpush3.bf16.msra.mxu1 %v34280_v60 }
0x3767   :  { %28893 = vmatprep.subr.bf16.mxu1 %v35313_v42 }
0x376a   :  { %28895 = vmatpush3.bf16.msra.mxu1 %v34290_v49 }
0x376b   :  { %28896 = vmatprep.subr.bf16.mxu1 %v35313_v42 }
0x376e   :  { %28898 = vmatpush3.bf16.msra.mxu1 %v34300_v17 }
0x376f   :  { %28899 = vmatprep.subr.bf16.mxu1 %v35313_v42 }
0x3772   :  { %28901 = vmatpush3.bf16.msra.mxu1 %v34310_v36 }
0x3773   :  { %28902 = vmatprep.subr.bf16.mxu1 %v35313_v42 }
0x3776   :  { %28904 = vmatpush3.bf16.msra.mxu1 %v34342_v22 }
0x3777   :  { %28905 = vmatprep.subr.bf16.mxu1 %v35313_v42 }
0x377a   :  { %28907 = vmatpush3.bf16.msra.mxu1 %v34354_v10 }
0x377b   :  { %28908 = vmatprep.subr.bf16.mxu1 %v35313_v42 }
0x377d   :  { %26712 = vmatmul.mubr.f32.vlgmr.msra.gmra.mrb[82].mxu1 %v19260_v31 }
0x377e   :  { %28910 = vmatpush3.bf16.msra.mxu1 %v28909_v2  ;;  %26746 = vmatprep.mubr.msk.f32.mxu1 %vm29826_vm1, %v35312_v55  ;;  %v35444_v2 = vld [vmem:[#allocation10_spill] sm:$0xff] }
0x377f   :  { %28911 = vmatprep.subr.bf16.mxu1 %v35313_v42 }
0x3782   :  { %28913 = vmatpush3.bf16.msra.mxu1 %v28912_v5  ;;  %v20499_v5 = vand.u32 4294901760, %v34618_v50 }
0x3783   :  { %28914 = vmatprep.subr.bf16.mxu1 %v35313_v42 }
0x3784   :  { %v20500_v57 = vsub.f32 %v34618_v50, %v20499_v5 }
0x3786   :  { %28916 = vmatpush3.bf16.msra.mxu1 %v28915_v62  ;;  %v20501_v3 = vand.u32 4294901760, %v20500_v57 }
0x3787   :  { %28917 = vmatprep.subr.bf16.mxu1 %v35313_v42 }
0x378a   :  { %28919 = vmatpush3.bf16.msra.mxu1 %v28918_v61 }
0x378b   :  { %28920 = vmatprep.subr.bf16.mxu1 %v35313_v42 }
0x378e   :  { %28922 = vmatpush3.bf16.msra.mxu1 %v28921_v13  ;;  %v29820_v13 = vld [vmem:[%s35284_s2 + $0x10] sm:$0xff] }
0x378f   :  { %28923 = vmatprep.subr.bf16.mxu1 %v35313_v42 }
0x3792   :  { %28925 = vmatpush3.bf16.msra.mxu1 %v28924_v40 }
0x3793   :  { %28926 = vmatprep.subr.bf16.mxu1 %v35313_v42 }
0x3796   :  { %28928 = vmatpush3.bf16.msra.mxu1 %v28927_v11 }
0x3797   :  { %28929 = vmatprep.subr.bf16.mxu1 %v35313_v42 }
0x379a   :  { %28931 = vmatpush3.bf16.msra.mxu1 %v28930_v4  ;;  %v19830_v4 = vld [vmem:[#allocation2] sm:$0xff] }
0x379b   :  { %28932 = vmatprep.subr.bf16.mxu1 %v35313_v42 }
0x379d   :  { %26747 = vmatmul.mubr.f32.vlgmr.msra.gmra.mrb[82].mxu1 %v34453_v44 }
0x379e   :  { %28934 = vmatpush3.bf16.msra.mxu1 %v34252_v24  ;;  %26781 = vmatprep.mubr.msk.f32.mxu1 %vm29826_vm1, %v35312_v55  ;;  %v19175_v24 = vpop.permute.xlu0 %19174 }
0x379f   :  { %28935 = vmatprep.subr.bf16.mxu1 %v35313_v42 }
0x37a2   :  { %28937 = vmatpush3.bf16.msra.mxu1 %v34266_v0 }
0x37a3   :  { %28938 = vmatprep.subr.bf16.mxu1 %v35313_v42 }
0x37a6   :  { %28940 = vmatpush3.bf16.msra.mxu1 %v34280_v60 }
0x37a7   :  { %28941 = vmatprep.subr.bf16.mxu1 %v35313_v42 }
0x37aa   :  { %28943 = vmatpush3.bf16.msra.mxu1 %v34290_v49 }
0x37ab   :  { %28944 = vmatprep.subr.bf16.mxu1 %v35313_v42 }
0x37ae   :  { %28946 = vmatpush3.bf16.msra.mxu1 %v34300_v17 }
0x37af   :  { %28947 = vmatprep.subr.bf16.mxu1 %v35313_v42 }
0x37b2   :  { %28949 = vmatpush3.bf16.msra.mxu1 %v34310_v36 }
0x37b3   :  { %28950 = vmatprep.subr.bf16.mxu1 %v35313_v42 }
0x37b6   :  { %28952 = vmatpush3.bf16.msra.mxu1 %v34342_v22  ;;  %v29818_v22 = vld [vmem:[%s35107_s4] sm:$0xff] }
0x37b7   :  { %28953 = vmatprep.subr.bf16.mxu1 %v35313_v42 }
0x37ba   :  { %28955 = vmatpush3.bf16.msra.mxu1 %v34354_v10 }
0x37bd   :  { %26782 = vmatmul.mubr.f32.vlgmr.msra.gmra.mrb[82].mxu1 %v34453_v44  ;;  %v20403_v44 = vand.u32 4294901760, %v20384_v45 }
0x37bf   :  { %v34614_v19 = vpack.c.bf16 %v20406_v38, %v20403_v44  ;;  %v34616_v14 = vsub.f32 %v20384_v45, %v20403_v44 }
0x37c1   :  { %v20492_v30 = vand.u32 4294901760, %v34616_v14  ;;  %v29008_v40 = vpack.c.bf16 %v34618_v50, %v34616_v14 }
0x37c3   :  { %v20493_v62 = vsub.f32 %v34616_v14, %v20492_v30  ;;  %v34648_v35 = vpack.c.bf16 %v20499_v5, %v20492_v30  ;;  %v35447_v30 = vld [vmem:[#allocation7_spill] sm:$0xff] }
0x37c5   :  { %v20494_v61 = vand.u32 4294901760, %v20493_v62 }
0x37c7   :  { %v29002_v32 = vpack.c.bf16 %v20501_v3, %v20494_v61 }
0x3890   :  { %v19814_v0 = vpop.f32.mrb[82].mxu1 }
0x3891   :  { %v29203_v60 = vadd.f32 %v19814_v0, %v19175_v24  ;;  %v26783_v49 = vpop.f32.mrb[83].mxu1 }
0x3893   :  { %v19818_v17 = vsel %vm8416_vm10, %v29203_v60, -inf }
0x3894   :  { %19819 = vmax.xlane.f32.xlu1 %v19818_v17 }
0x3921   :  { %v19820_v27 = vpop.xlane.xlu1 %19819 }
0x3922   :  { %v19821_v9 = vsub.f32 %v29203_v60, %v19820_v27  ;;  %v19844_v60 = vld [vmem:[#allocation2 + $0x10] sm:$0xff] }
0x3924   :  { %v19822_v36 = vmul.f32 1.442695, %v19821_v9 }
0x3926   :  { %29802 = vpow2.f32 %v19822_v36 }
0x3930   :  { %v29803_v41 = vpop.eup %29802 }
0x3931   :  { %v19824_v59 = vmul.f32 %v29818_v22, %v29803_v41  ;;  %v19851_v41 = vld [vmem:[#allocation2 + $0x18] sm:$0xff] }
0x3933   :  { %v19825_v18 = vsel %vm8416_vm10, %v19824_v59, 0.0 }
0x3934   :  { %19826 = vadd.xlane.f32.xlu0 %v19825_v18  ;;  %v19858_v18 = vld [vmem:[#allocation2 + $0x20] sm:$0xff] }
0x39c1   :  { %v19827_v10 = vpop.xlane.xlu0 %19826 }
0x39c2   :  { %29804 = vrcp.f32 %v19827_v10 }
0x39cc   :  { %v29805_v1 = vpop.eup %29804 }
0x39cd   :  { %v19829_v43 = vmul.f32 %v29805_v1, %v19824_v59 }
0x39cf   :  { %19839 = vperm.xlu1 %29681, %v19829_v43   ;;  %19833 = vperm.xlu0 %29679, %v19829_v43  }
0x39d3   :  { %29682 = vset.pattern.permute.xlu1 %v35332_v7  ;;  %29683 = vset.pattern.permute.xlu0 %v35333_v46  ;;  %v35443_v7 = vmov 7   ;;  %v34583_v46 = vadd.f32 %v21878_v15, %v34451_v23  ;;  %v34598_v23 = vsub.f32 %v20383_v53, %v20400_v20 }
0x39d4   :  { %19846 = vperm.xlu1 %29682, %v19829_v43   ;;  %19853 = vperm.xlu0 %29683, %v19829_v43  }
0x39d5   :  { %v20485_v39 = vand.u32 4294901760, %v34598_v23 }
0x39d7   :  { %v20486_v63 = vsub.f32 %v34598_v23, %v20485_v39 }
0x39d8   :  { %29684 = vset.pattern.permute.xlu1 %v35334_v52  ;;  %29686 = vset.pattern.permute.xlu0 %v35440_v26  ;;  %v20382_v52 = vld [vmem:[%s35109_s21] sm:$0xff]  ;;  %v19865_v26 = vld [vmem:[#allocation2 + $0x28] sm:$0xff] }
0x39d9   :  { %19860 = vperm.xlu1 %29684, %v19829_v43   ;;  %19874 = vperm.xlu0 %29686, %v19829_v43   ;;  %v20397_v21 = vand.u32 4294901760, %v20382_v52  ;;  %v20487_v12 = vand.u32 4294901760, %v20486_v63 }
0x39db   :  { %v34594_v33 = vpack.c.bf16 %v20400_v20, %v20397_v21  ;;  %v34596_v37 = vsub.f32 %v20382_v52, %v20397_v21  ;;  %v19879_v21 = vld [vmem:[#allocation2 + $0x38] sm:$0xff] }
0x39dd   :  { %29685 = vset.pattern.permute.xlu1 %v35441_v34  ;;  %29689 = vset.pattern.permute.xlu0 %v35442_v28  ;;  %v20478_v31 = vand.u32 4294901760, %v34596_v37  ;;  %v29005_v6 = vpack.c.bf16 %v34598_v23, %v34596_v37 }
0x39de   :  { %19867 = vperm.xlu1 %29685, %v19829_v43   ;;  %28994 = vmatpush3.bf16.msra.mxu0 %v34594_v33 }
0x39df   :  { %28995 = vmatprep.subr.bf16.mxu0 %v35313_v42  ;;  %v20479_v25 = vsub.f32 %v34596_v37, %v20478_v31  ;;  %v34646_v29 = vpack.c.bf16 %v20485_v39, %v20478_v31  ;;  %v35446_v39 = vld [vmem:[#allocation11_spill] sm:$0xff] }
0x39e1   :  { %v20480_v47 = vand.u32 4294901760, %v20479_v25 }
0x39e2   :  { %29687 = vset.pattern.permute.xlu1 %v35443_v7  ;;  %28997 = vmatpush3.bf16.msra.mxu0 %v34614_v19  ;;  %v19872_v7 = vld [vmem:[#allocation2 + $0x30] sm:$0xff] }
0x39e3   :  { %19881 = vperm.xlu1 %29687, %v19829_v43   ;;  %28998 = vmatprep.subr.bf16.mxu0 %v35313_v42  ;;  %v28999_v8 = vpack.c.bf16 %v20487_v12, %v20480_v47 }
0x39e7   :  { %20890 = vrot.lane.b32.xlu1 %v34583_v46, %s29828_s27 }
0x39e8   :  { %29688 = vset.pattern.permute.xlu1 %v35442_v28 }
0x39eb   :  { %7222 = vrot.lane.b32.xlu1 %v29819_v16, %s29830_s29 }
0x39ef   :  { %9524 = vrot.lane.b32.xlu1 %v35444_v2, %s29829_s5 }
0x39f3   :  { %20912 = vperm.xlu1 %29688, %v34630_v51  }
0x39f7   :  { %7226 = vrot.lane.b32.xlu1 %v29820_v13, %s29830_s29  ;;  %v21879_v13 = vld [vmem:[%s35111_s22] ss:$0 sm:$0xff] }
0x39fb   :  { %14085 = vrot.lane.b32.xlu1 %v35445_v48, %s29829_s5 }
0x3a4e   :  { %v19840_v11 = vpop.permute.xlu1 %19839  ;;  %v19834_v58 = vpop.permute.xlu0 %19833 }
0x3a4f   :  { %v19842_v24 = vmul.f32 %v19840_v11, %v19837_v56  ;;  %v19836_v0 = vmul.f32 %v19834_v58, %v19830_v4  ;;  %v20935_v11 = vld [vmem:[%s35112_s23] sm:$0xff]  ;;  %v20936_v58 = vld [vmem:[%s35112_s23 + $0x8] sm:$0xff] }
0x3a50   :  { %v20972_v56 = vand.u32 4294901760, %v20935_v11 }
0x3a51   :  { %v19843_v17 = vadd.f32 %v19842_v24, %v19836_v0  ;;  %v34720_v24 = vld [vmem:[%s35112_s23 + $0x10] sm:$0xff]  ;;  %v34725_v0 = vld [vmem:[%s35112_s23 + $0x18] sm:$0xff] }
0x3a53   :  { %v19847_v49 = vpop.permute.xlu1 %19846  ;;  %v19854_v9 = vpop.permute.xlu0 %19853 }
0x3a54   :  { %v19849_v27 = vmul.f32 %v19847_v49, %v19844_v60  ;;  %v19856_v22 = vmul.f32 %v19854_v9, %v19851_v41  ;;  %v20978_v60 = vand.u32 4294901760, %v34720_v24  ;;  %v20981_v49 = vand.u32 4294901760, %v34725_v0 }
0x3a56   :  { %v19850_v36 = vadd.f32 %v19849_v27, %v19843_v17  ;;  %v34734_v17 = vld [vmem:[%s35112_s23 + $0x20] sm:$0xff]  ;;  %v34739_v27 = vld [vmem:[%s35112_s23 + $0x28] sm:$0xff]  ;;  %v34741_v9 = vpack.c.bf16 %v20981_v49, %v20978_v60 }
0x3a57   :  { %v20987_v41 = vand.u32 4294901760, %v34739_v27 }
0x3a58   :  { %v19861_v59 = vpop.permute.xlu1 %19860  ;;  %v19857_v10 = vadd.f32 %v19856_v22, %v19850_v36  ;;  %v19875_v43 = vpop.permute.xlu0 %19874  ;;  %v20984_v36 = vand.u32 4294901760, %v34734_v17 }
0x3a59   :  { %v19863_v1 = vmul.f32 %v19861_v59, %v19858_v18  ;;  %v19877_v52 = vmul.f32 %v19875_v43, %v19872_v7  ;;  %v34790_v7 = vld [vmem:[%s35112_s23 + $0x48] sm:$0xff] }
0x3a5a   :  { %v34754_v18 = vpack.c.bf16 %v20987_v41, %v20984_v36 }
0x3a5b   :  { %v19864_v28 = vadd.f32 %v19863_v1, %v19857_v10  ;;  %v34762_v10 = vld [vmem:[%s35112_s23 + $0x30] sm:$0xff]  ;;  %v34767_v1 = vld [vmem:[%s35112_s23 + $0x38] sm:$0xff] }
0x3a5c   :  { %v20990_v43 = vand.u32 4294901760, %v34762_v10 }
0x3a5d   :  { %v19868_v34 = vpop.permute.xlu1 %19867 }
0x3a5e   :  { %v19870_v15 = vmul.f32 %v19868_v34, %v19865_v26  ;;  %v20993_v26 = vand.u32 4294901760, %v34767_v1  ;;  %v29821_v34 = vld [vmem:[%s35284_s2 + $0x8] sm:$0xff] }
0x3a60   :  { %v19871_v53 = vadd.f32 %v19870_v15, %v19864_v28  ;;  %v34780_v28 = vpack.c.bf16 %v20993_v26, %v20990_v43  ;;  %v34785_v15 = vld [vmem:[%s35112_s23 + $0x40] sm:$0xff] }
0x3a62   :  { %v19882_v20 = vpop.permute.xlu1 %19881  ;;  %v19878_v37 = vadd.f32 %v19877_v52, %v19871_v53  ;;  %v20996_v52 = vand.u32 4294901760, %v34785_v15  ;;  %v20999_v53 = vand.u32 4294901760, %v34790_v7 }
0x3a63   :  { %v19884_v23 = vmul.f32 %v19882_v20, %v19879_v21  ;;  %v20916_v21 = vsub.f32 1.0, %v34630_v51  ;;  %v35449_v20 = vld [vmem:[#allocation12_spill] sm:$0xff] }
0x3a65   :  { %v34650_v45 = vadd.f32 %v19884_v23, %v19878_v37  ;;  %v34803_v37 = vpack.c.bf16 %v20999_v53, %v20996_v52  ;;  %v29822_v23 = vld [vmem:[%s35284_s2 + $0x18] sm:$0xff] }
0x3a66   :  { %v34652_v54 = vpop.permute.xlu1 %20890 }
0x3a67   :  { %v20394_v16 = vsel %vm101_vm0, %v34650_v45, 0 }
0x3a68   :  { %v20465_v44 = vand.u32 4294901760, %v20394_v16 }
0x3a6a   :  { %v20466_v38 = vsub.f32 %v20394_v16, %v20465_v44  ;;  %v7223_v31 = vpop.permute.xlu1 %7222  ;;  %v29823_v16 = vld [vmem:[%s35284_s2 + $0x28] sm:$0xff] }
0x3a6b   :  { %7240 = vst.msk [vmem:[#allocation4] sm:$0xff] %vm6495_vm6, %v7223_v31 }
0x3a6c   :  { %9523 = vst.msk [vmem:[#allocation4] sm:$0xff] %vm101_vm0, %v35446_v39  ;;  %v20467_v14 = vand.u32 4294901760, %v20466_v38 }
0x3a6e   :  { %v9525_v50 = vpop.permute.xlu1 %9524  ;;  %v20468_v25 = vsub.f32 %v20466_v38, %v20467_v14 }
0x3a6f   :  { %9528 = vst.msk [vmem:[#allocation4] sm:$0xff] %vm9527_vm11, %v9525_v50 }
0x3a70   :  { %v20469_v63 = vand.u32 4294901760, %v20468_v25 }
0x3a72   :  { %v34660_v2 = vpop.permute.xlu1 %20912  ;;  %26859 = vmatmul.mubr.f32.vlgmr.msra.gmra.mrb[68].mxu0 %v20469_v63 }
0x3a73   :  { %29000 = vmatpush3.bf16.msra.mxu0 %v28999_v8  ;;  %26869 = vmatprep.mubr.msk.f32.mxu0 %vm29826_vm1, %v35312_v55 }
0x3a74   :  { %29001 = vmatprep.subr.bf16.mxu0 %v35313_v42 }
0x3a76   :  { %v7227_v47 = vpop.permute.xlu1 %7226  ;;  %v20929_v12 = vld [vmem:[#allocation4] sm:$0xff] }
0x3a77   :  { %7242 = vst.msk [vmem:[#allocation4 + $0x10] sm:$0xff] %vm6495_vm6, %v7227_v47  ;;  %29003 = vmatpush3.bf16.msra.mxu0 %v29002_v32  ;;  %v20954_v62 = vsel %vm20952_vm12, %v20929_v12, 0  ;;  %v35451_v47 = vld [vmem:[#allocation13_spill] sm:$0xff] }
0x3a78   :  { %14084 = vst.msk [vmem:[#allocation4 + $0x10] sm:$0xff] %vm101_vm0, %v35447_v30  ;;  %29004 = vmatprep.subr.bf16.mxu0 %v35313_v42  ;;  %v34681_v57 = vand.u32 4294901760, %v20954_v62 }
0x3a7a   :  { %v14086_v5 = vpop.permute.xlu1 %14085  ;;  %26870 = vmatmul.mubr.f32.vlgmr.msra.gmra.mrb[68].mxu0 %v20465_v44  ;;  %v34688_v8 = vsub.f32 %v20954_v62, %v34681_v57 }
0x3a7b   :  { %14088 = vst.msk [vmem:[#allocation4 + $0x10] sm:$0xff] %vm9527_vm11, %v14086_v5  ;;  %29006 = vmatpush3.bf16.msra.mxu0 %v29005_v6  ;;  %26880 = vmatprep.mubr.msk.f32.mxu0 %vm29826_vm1, %v35312_v55 }
0x3a7c   :  { %29007 = vmatprep.subr.bf16.mxu0 %v35313_v42  ;;  %v21048_v61 = vand.u32 4294901760, %v34688_v8 }
0x3a7e   :  { %v21049_v3 = vsub.f32 %v34688_v8, %v21048_v61 }
0x3a7f   :  { %29009 = vmatpush3.bf16.msra.mxu0 %v29008_v40 }
0x3a80   :  { %29010 = vmatprep.subr.bf16.mxu0 %v35313_v42  ;;  %v21050_v32 = vand.u32 4294901760, %v21049_v3 }
0x3a82   :  { %26881 = vmatmul.mubr.f32.vlgmr.msra.gmra.mrb[68].mxu0 %v20466_v38  ;;  %v21782_v38 = vld [vmem:[%s35110_s3 + $0x18] sm:$0xff] }
0x3a83   :  { %29012 = vmatpush3.bf16.msra.mxu0 %v34594_v33  ;;  %26891 = vmatprep.mubr.msk.f32.mxu0 %vm29826_vm1, %v35312_v55  ;;  %v20931_v25 = vld [vmem:[#allocation4 + $0x10] sm:$0xff] }
0x3a84   :  { %29013 = vmatprep.subr.bf16.mxu0 %v35313_v42  ;;  %v20960_v5 = vsel %vm20952_vm12, %v20931_v25, 0 }
0x3a87   :  { %29015 = vmatpush3.bf16.msra.mxu0 %v34614_v19 }
0x3a88   :  { %29016 = vmatprep.subr.bf16.mxu0 %v35313_v42 }
0x3a8a   :  { %26892 = vmatmul.mubr.f32.vlgmr.msra.gmra.mrb[68].mxu0 %v20467_v14 }
0x3a8b   :  { %29018 = vmatpush3.bf16.msra.mxu0 %v34646_v29  ;;  %26902 = vmatprep.mubr.msk.f32.mxu0 %vm29826_vm1, %v35312_v55 }
0x3a8c   :  { %29019 = vmatprep.subr.bf16.mxu0 %v35313_v42 }
0x3a8f   :  { %29021 = vmatpush3.bf16.msra.mxu0 %v34648_v35 }
0x3a90   :  { %29022 = vmatprep.subr.bf16.mxu0 %v35313_v42 }
0x3a92   :  { %26903 = vmatmul.mubr.f32.vlgmr.msra.gmra.mrb[68].mxu0 %v20465_v44 }
0x3a93   :  { %29024 = vmatpush3.bf16.msra.mxu0 %v34594_v33  ;;  %26913 = vmatprep.mubr.msk.f32.mxu0 %vm29826_vm1, %v35312_v55  ;;  %v35448_v33 = vld [vmem:[#allocation8_spill] sm:$0xff] }
0x3a94   :  { %29025 = vmatprep.subr.bf16.mxu0 %v35313_v42  ;;  %v20881_v48 = vadd.f32 %v34583_v46, %v35448_v33  ;;  %v20975_v46 = vand.u32 4294901760, %v20936_v58 }
0x3a96   :  { %v34715_v4 = vpack.c.bf16 %v20975_v46, %v20972_v56  ;;  %v34830_v63 = vsub.f32 %v20936_v58, %v20975_v46 }
0x3a97   :  { %29027 = vmatpush3.bf16.msra.mxu0 %v34614_v19 }
0x3a98   :  { %29029 = vmatprep.subr.bf16.mxu0 %v34715_v4 }
0x3a9a   :  { %26914 = vmatmul.mubr.f32.vlgmr.msra.gmra.mrb[68].mxu0 %v20465_v44  ;;  %v21780_v44 = vld [vmem:[%s35110_s3 + $0x8] sm:$0xff] }
0x3a9b   :  { %26936 = vmatprep.mubr.f32.mxu0 %v21050_v32  ;;  %29031 = vmatpush3.bf16.msra.mxu0 %v34715_v4  ;;  %v34845_v32 = vsub.f32 %v34720_v24, %v20978_v60  ;;  %v34880_v60 = vsub.f32 %v34762_v10, %v20990_v43 }
0x3a9c   :  { %29033 = vmatprep.subr.bf16.mxu0 %v34741_v9 }
0x3a9f   :  { %29035 = vmatpush3.bf16.msra.mxu0 %v34741_v9 }
0x3aa0   :  { %29037 = vmatprep.subr.bf16.mxu0 %v34754_v18 }
0x3aa3   :  { %29039 = vmatpush3.bf16.msra.mxu0 %v34754_v18 }
0x3aa4   :  { %29041 = vmatprep.subr.bf16.mxu0 %v34780_v28 }
0x3aa7   :  { %29043 = vmatpush3.bf16.msra.mxu0 %v34780_v28 }
0x3aa8   :  { %29045 = vmatprep.subr.bf16.mxu0 %v34803_v37 }
0x3aab   :  { %29047 = vmatpush3.bf16.msra.mxu0 %v34803_v37 }
0x3b6d   :  { %v20877_v6 = vpop.f32.mrb[68].mxu0 }
0x3b6e   :  { %v34706_v55 = vadd.f32 %v21879_v13, %v20877_v6  ;;  %v26915_v42 = vpop.f32.mrb[69].mxu0  ;;  %v34848_v13 = vsub.f32 %v34725_v0, %v20981_v49  ;;  %v34885_v49 = vsub.f32 %v34767_v1, %v20993_v26  ;;  %v21151_v26 = vand.u32 4294901760, %v34880_v60 }
0x3b6f   :  { %v21123_v42 = vand.u32 4294901760, %v34845_v32 }
0x3b70   :  { %v20882_v40 = vadd.f32 %v34706_v55, %v20881_v48  ;;  %v34851_v48 = vand.u32 4294901760, %v20960_v5 }
0x3b72   :  { %v21880_v29 = vmul.f32 -1.442695, %v20882_v40  ;;  %v21130_v40 = vand.u32 4294901760, %v34848_v13 }
0x3b74   :  { %29806 = vpow2.f32 %v21880_v29  ;;  %v34858_v29 = vsub.f32 %v34734_v17, %v20984_v36  ;;  %v21131_v46 = vsub.f32 %v34848_v13, %v21130_v40 }
0x3b76   :  { %v21137_v0 = vand.u32 4294901760, %v34858_v29  ;;  %v21132_v43 = vand.u32 4294901760, %v21131_v46 }
0x3b78   :  { %v21138_v1 = vsub.f32 %v34858_v29, %v21137_v0 }
0x3b7e   :  { %v29807_v35 = vpop.eup %29806 }
0x3b7f   :  { %v20886_v19 = vadd.f32 1.0, %v29807_v35  ;;  %v34863_v35 = vsub.f32 %v34739_v27, %v20987_v41  ;;  %v29824_v41 = vld [vmem:[%s35284_s2 + $0x20] sm:$0xff] }
0x3b81   :  { %29808 = vrcp.f32 %v20886_v19  ;;  %v21144_v27 = vand.u32 4294901760, %v34863_v35 }
0x3b8b   :  { %v34745_v22 = vpop.eup %29808 }
0x3b8c   :  { %v20893_v59 = vmul.f32 %v34745_v22, %v34652_v54  ;;  %v35450_v54 = vld [vmem:[#allocation15_spill] sm:$0xff] }
0x3b8e   :  { %20895 = vrot.lane.b32.xlu0 %v20893_v59, %s29829_s5 }
0x3b92   :  { %7224 = vrot.lane.b32.xlu0 %v29821_v34, %s29830_s29  ;;  %v21158_v34 = vand.u32 4294901760, %v34885_v49 }
0x3b96   :  { %11805 = vrot.lane.b32.xlu0 %v35449_v20, %s29829_s5  ;;  %v21145_v20 = vsub.f32 %v34863_v35, %v21144_v27 }
0x3b9a   :  { %20919 = vperm.xlu0 %29689, %v20916_v21  }
0x3b9e   :  { %7228 = vrot.lane.b32.xlu0 %v29822_v23, %s29830_s29  ;;  %v34910_v23 = vsub.f32 %v34785_v15, %v20996_v52  ;;  %v21779_v15 = vld [vmem:[%s35110_s3] sm:$0xff] }
0x3ba0   :  { %v21165_v25 = vand.u32 4294901760, %v34910_v23 }
0x3ba2   :  { %16365 = vrot.lane.b32.xlu0 %v35450_v54, %s29829_s5  ;;  %v21171_v54 = vsub.f32 %v34790_v7, %v20999_v53  ;;  %v21152_v7 = vsub.f32 %v34880_v60, %v21151_v26  ;;  %v21159_v53 = vsub.f32 %v34885_v49, %v21158_v34 }
0x3ba6   :  { %7232 = vrot.lane.b32.xlu0 %v29823_v16, %s29830_s29 }
0x3baa   :  { %20925 = vrot.lane.b32.xlu0 %v34650_v45, %s29829_s5  ;;  %v34828_v45 = vsub.f32 %v20935_v11, %v20972_v56  ;;  %v34866_v11 = vsub.f32 %v20960_v5, %v34851_v48  ;;  %v21124_v56 = vsub.f32 %v34845_v32, %v21123_v42 }
0x3bac   :  { %v21109_v30 = vand.u32 4294901760, %v34828_v45  ;;  %v21068_v36 = vand.u32 4294901760, %v34866_v11  ;;  %v21125_v10 = vand.u32 4294901760, %v21124_v56  ;;  %v35453_v56 = vld [vmem:[#allocation6_spill] sm:$0xff] }
0x3bae   :  { %21792 = vperm.xlu0 %29689, %v21780_v44   ;;  %v21110_v62 = vsub.f32 %v34828_v45, %v21109_v30  ;;  %v21069_v16 = vsub.f32 %v34866_v11, %v21068_v36  ;;  %v35452_v44 = vld [vmem:[#allocation16_spill] sm:$0xff]  ;;  %v29052_v52 = vpack.c.bf16 %v21132_v43, %v21125_v10  ;;  %v29072_v43 = vpack.c.bf16 %v34848_v13, %v34845_v32 }
0x3bb0   :  { %v21111_v6 = vand.u32 4294901760, %v21110_v62  ;;  %v21070_v5 = vand.u32 4294901760, %v21069_v16  ;;  %v21781_v62 = vld [vmem:[%s35110_s3 + $0x10] sm:$0xff]  ;;  %v29076_v16 = vpack.c.bf16 %v34863_v35, %v34858_v29 }
0x3bb2   :  { %21802 = vperm.xlu0 %29689, %v21782_v38  }
0x3bb6   :  { %21812 = vperm.xlu0 %29689, %v34630_v51   ;;  %v21116_v51 = vand.u32 4294901760, %v34830_v63 }
0x3bb8   :  { %v21117_v3 = vsub.f32 %v34830_v63, %v21116_v51 }
0x3c00   :  { %v20896_v31 = vpop.permute.xlu0 %20895 }
0x3c01   :  { %v20898_v39 = vadd.f32 %v35448_v33, %v20896_v31  ;;  %v21118_v33 = vand.u32 4294901760, %v21117_v3  ;;  %v21153_v3 = vand.u32 4294901760, %v21152_v7 }
0x3c03   :  { %v20899_v14 = vadd.f32 %v34706_v55, %v20898_v39  ;;  %v29048_v55 = vpack.c.bf16 %v21118_v33, %v21111_v6  ;;  %v21139_v39 = vand.u32 4294901760, %v21138_v1  ;;  %v21160_v33 = vand.u32 4294901760, %v21159_v53 }
0x3c04   :  { %v7225_v50 = vpop.permute.xlu0 %7224 }
0x3c05   :  { %29810 = vtanh.f32 %v20899_v14  ;;  %7241 = vst.msk [vmem:[#allocation4 + $0x8] sm:$0xff] %vm6495_vm6, %v7225_v50  ;;  %29049 = vmatprep.subr.bf16.mxu0 %v29048_v55  ;;  %v21146_v50 = vand.u32 4294901760, %v21145_v20 }
0x3c06   :  { %11804 = vst.msk [vmem:[#allocation4 + $0x8] sm:$0xff] %vm101_vm0, %v35451_v47  ;;  %v21172_v47 = vand.u32 4294901760, %v21171_v54 }
0x3c07   :  { %v29056_v6 = vpack.c.bf16 %v21146_v50, %v21139_v39  ;;  %v29080_v39 = vpack.c.bf16 %v34885_v49, %v34880_v60 }
0x3c08   :  { %v11806_v12 = vpop.permute.xlu0 %11805 }
0x3c09   :  { %11808 = vst.msk [vmem:[#allocation4 + $0x8] sm:$0xff] %vm9527_vm11, %v11806_v12 }
0x3c0f   :  { %v29811_v19 = vpop.eup %29810 }
0x3c10   :  { %20904 = vrot.lane.b32.xlu1 %v29811_v19, %s29830_s29  ;;  %v20930_v58 = vld [vmem:[#allocation4 + $0x8] sm:$0xff]  ;;  %v21166_v19 = vsub.f32 %v34910_v23, %v21165_v25 }
0x3c11   :  { %v20957_v24 = vsel %vm20952_vm12, %v20930_v58, 0  ;;  %v21173_v58 = vsub.f32 %v21171_v54, %v21172_v47 }
0x3c12   :  { %v34887_v17 = vand.u32 4294901760, %v20957_v24 }
0x3c13   :  { %v21174_v10 = vand.u32 4294901760, %v21173_v58 }
0x3c14   :  { %7230 = vrot.lane.b32.xlu1 %v29824_v41, %s29830_s29  ;;  %v34896_v59 = vsub.f32 %v20957_v24, %v34887_v17  ;;  %v21783_v24 = vld [vmem:[%s35110_s3 + $0x20] sm:$0xff]  ;;  %v21167_v41 = vand.u32 4294901760, %v21166_v19 }
0x3c16   :  { %v21058_v21 = vand.u32 4294901760, %v34896_v59  ;;  %v29064_v20 = vpack.c.bf16 %v21174_v10, %v21167_v41 }
0x3c18   :  { %18645 = vrot.lane.b32.xlu1 %v35452_v44, %s29829_s5  ;;  %v21059_v38 = vsub.f32 %v34896_v59, %v21058_v21 }
0x3c19   :  { %v34923_v31 = vpop.permute.xlu0 %20919 }
0x3c1a   :  { %v21060_v14 = vand.u32 4294901760, %v21059_v38 }
0x3c1c   :  { %21787 = vperm.xlu1 %29688, %v21779_v15   ;;  %26937 = vmatmul.mubr.f32.vlgmr.msra.gmra.mrb[70].mxu0 %v21060_v14  ;;  %v29068_v15 = vpack.c.bf16 %v34830_v63, %v34828_v45  ;;  %v29084_v14 = vpack.c.bf16 %v21171_v54, %v34910_v23  ;;  %v29120_v45 = vpack.c.bf16 %v21158_v34, %v21151_v26 }
0x3c1d   :  { %26939 = vmatprep.mubr.f32.mxu0 %v21070_v5  ;;  %v7229_v12 = vpop.permute.xlu0 %7228  ;;  %29051 = vmatpush3.bf16.msra.mxu0 %v29048_v55  ;;  %v29060_v55 = vpack.c.bf16 %v21160_v33, %v21153_v3 }
0x3c1e   :  { %7243 = vst.msk [vmem:[#allocation4 + $0x18] sm:$0xff] %vm6495_vm6, %v7229_v12  ;;  %29053 = vmatprep.subr.bf16.mxu0 %v29052_v52  ;;  %v34966_v12 = vpack.c.bf16 %v21172_v47, %v21165_v25 }
0x3c1f   :  { %16364 = vst.msk [vmem:[#allocation4 + $0x18] sm:$0xff] %vm101_vm0, %v35453_v56 }
0x3c20   :  { %21797 = vperm.xlu1 %29688, %v21781_v62   ;;  %v20901_v62 = vsub.f32 1.0, %v34745_v22 }
0x3c21   :  { %v16366_v46 = vpop.permute.xlu0 %16365  ;;  %29055 = vmatpush3.bf16.msra.mxu0 %v29052_v52 }
0x3c22   :  { %16368 = vst.msk [vmem:[#allocation4 + $0x18] sm:$0xff] %vm9527_vm11, %v16366_v46  ;;  %29057 = vmatprep.subr.bf16.mxu0 %v29056_v6 }
0x3c24   :  { %21807 = vperm.xlu1 %29688, %v21783_v24  }
0x3c25   :  { %v7233_v1 = vpop.permute.xlu0 %7232  ;;  %29059 = vmatpush3.bf16.msra.mxu0 %v29056_v6  ;;  %v35454_v6 = vld [vmem:[#allocation9_spill] sm:$0xff] }
0x3c26   :  { %7245 = vst.msk [vmem:[#allocation4 + $0x28] sm:$0xff] %vm6495_vm6, %v7233_v1  ;;  %29061 = vmatprep.subr.bf16.mxu0 %v29060_v55  ;;  %v20902_v33 = vmul.f32 %v20901_v62, %v35454_v6  ;;  %v20922_v23 = vmul.f32 %v34923_v31, %v35454_v6 }
0x3c29   :  { %v20932_v44 = vld [vmem:[#allocation4 + $0x18] sm:$0xff]  ;;  %29063 = vmatpush3.bf16.msra.mxu0 %v29060_v55  ;;  %v20926_v46 = vpop.permute.xlu0 %20925 }
0x3c2a   :  { %v20963_v38 = vsel %vm20952_vm12, %v20932_v44, 0  ;;  %29065 = vmatprep.subr.bf16.mxu0 %v29064_v20 }
0x3c2b   :  { %v34954_v52 = vand.u32 4294901760, %v20963_v38 }
0x3c2d   :  { %v34959_v7 = vsub.f32 %v20963_v38, %v34954_v52  ;;  %29067 = vmatpush3.bf16.msra.mxu0 %v29064_v20 }
0x3c2e   :  { %29069 = vmatprep.subr.bf16.mxu0 %v29068_v15 }
0x3c2f   :  { %v21078_v53 = vand.u32 4294901760, %v34959_v7 }
0x3c31   :  { %v21079_v50 = vsub.f32 %v34959_v7, %v21078_v53 }
0x3c33   :  { %v21080_v5 = vand.u32 4294901760, %v21079_v50 }
0x3c35   :  { %26940 = vmatmul.mubr.f32.gmra.mrb[72].mxu0 %v21080_v5 }
0x3c82   :  { %v20905_v3 = vpop.permute.xlu1 %20904 }
0x3c83   :  { %v20907_v19 = vmul.f32 %v34745_v22, %v20905_v3 }
0x3c85   :  { %v20908_v58 = vadd.f32 %v20907_v19, %v20902_v33 }
0x3c86   :  { %v7231_v56 = vpop.permute.xlu1 %7230 }
0x3c87   :  { %v20915_v54 = vmul.f32 %v34660_v2, %v20908_v58  ;;  %7244 = vst.msk [vmem:[#allocation4 + $0x20] sm:$0xff] %vm6495_vm6, %v7231_v56 }
0x3c88   :  { %18644 = vst.msk [vmem:[#allocation4 + $0x20] sm:$0xff] %vm101_vm0, %v35454_v6 }
0x3c89   :  { %v20923_v25 = vadd.f32 %v20922_v23, %v20915_v54 }
0x3c8a   :  { %v18646_v47 = vpop.permute.xlu1 %18645 }
0x3c8b   :  { %20924 = vst.msk [vmem:[#allocation4 + $0x28] sm:$0xff] %vm101_vm0, %v20923_v25 }
0x3c8c   :  { %18648 = vst.msk [vmem:[#allocation4 + $0x20] sm:$0xff] %vm9527_vm11, %v18646_v47  ;;  %20928 = vst.msk [vmem:[#allocation4 + $0x28] sm:$0xff] %vm9527_vm11, %v20926_v46 }
0x3c93   :  { %v20933_v22 = vld [vmem:[#allocation4 + $0x20] sm:$0xff]  ;;  %v20934_v31 = vld [vmem:[#allocation4 + $0x28] sm:$0xff] }
0x3c94   :  { %v20966_v24 = vsel %vm20952_vm12, %v20933_v22, 0  ;;  %v20969_v2 = vsel %vm20952_vm12, %v20934_v31, 0 }
0x3c95   :  { %v34981_v55 = vand.u32 4294901760, %v20966_v24  ;;  %v34984_v41 = vand.u32 4294901760, %v20969_v2 }
0x3c97   :  { %v21087_v10 = vsub.f32 %v20966_v24, %v34981_v55  ;;  %v21097_v1 = vsub.f32 %v20969_v2, %v34984_v41 }
0x3c99   :  { %v21088_v20 = vand.u32 4294901760, %v21087_v10  ;;  %v21098_v44 = vand.u32 4294901760, %v21097_v1 }
0x3c9b   :  { %v21089_v38 = vsub.f32 %v21087_v10, %v21088_v20  ;;  %v21099_v50 = vsub.f32 %v21097_v1, %v21098_v44  ;;  %v21788_v29 = vpop.permute.xlu1 %21787 }
0x3c9d   :  { %v21090_v5 = vand.u32 4294901760, %v21089_v38  ;;  %v21100_v62 = vand.u32 4294901760, %v21099_v50 }
0x3c9f   :  { %26942 = vmatprep.mubr.f32.mxu0 %v21090_v5 }
0x3ca0   :  { %26943 = vmatmul.mubr.f32.gmra.mrb[74].mxu0 %v21100_v62 }
0x3ca1   :  { %26965 = vmatprep.mubr.f32.mxu0 %v34681_v57 }
0x3ca4   :  { %26966 = vmatmul.mubr.f32.vlgmr.msra.gmra.mrb[70].mxu0 %v34887_v17 }
0x3ca5   :  { %29071 = vmatpush3.bf16.msra.mxu0 %v29068_v15  ;;  %26968 = vmatprep.mubr.f32.mxu0 %v34851_v48 }
0x3ca6   :  { %29073 = vmatprep.subr.bf16.mxu0 %v29072_v43 }
0x3ca8   :  { %26969 = vmatmul.mubr.f32.gmra.mrb[72].mxu0 %v34954_v52 }
0x3ca9   :  { %29075 = vmatpush3.bf16.msra.mxu0 %v29072_v43  ;;  %26971 = vmatprep.mubr.f32.mxu0 %v34981_v55  ;;  %v29108_v43 = vpack.c.bf16 %v21116_v51, %v21109_v30 }
0x3caa   :  { %29077 = vmatprep.subr.bf16.mxu0 %v29076_v16 }
0x3cac   :  { %26972 = vmatmul.mubr.f32.gmra.mrb[74].mxu0 %v34984_v41 }
0x3cad   :  { %29079 = vmatpush3.bf16.msra.mxu0 %v29076_v16  ;;  %26994 = vmatprep.mubr.f32.mxu0 %v34688_v8  ;;  %v29112_v8 = vpack.c.bf16 %v21130_v40, %v21123_v42  ;;  %v21793_v40 = vpop.permute.xlu0 %21792 }
0x3cae   :  { %29081 = vmatprep.subr.bf16.mxu0 %v29080_v39 }
0x3cb1   :  { %29083 = vmatpush3.bf16.msra.mxu0 %v29080_v39  ;;  %v21803_v35 = vpop.permute.xlu0 %21802 }
0x3cb2   :  { %29085 = vmatprep.subr.bf16.mxu0 %v29084_v14 }
0x3cb5   :  { %29087 = vmatpush3.bf16.msra.mxu0 %v29084_v14 }
0x3cb6   :  { %29089 = vmatprep.subr.bf16.mxu0 %v34715_v4 }
0x3cb8   :  { %26995 = vmatmul.mubr.f32.vlgmr.msra.gmra.mrb[70].mxu0 %v34896_v59 }
0x3cb9   :  { %26997 = vmatprep.mubr.f32.mxu0 %v34866_v11  ;;  %29091 = vmatpush3.bf16.msra.mxu0 %v34715_v4  ;;  %v21798_v11 = vpop.permute.xlu1 %21797 }
0x3cba   :  { %29093 = vmatprep.subr.bf16.mxu0 %v34741_v9 }
0x3cbc   :  { %26998 = vmatmul.mubr.f32.gmra.mrb[72].mxu0 %v34959_v7 }
0x3cbd   :  { %27000 = vmatprep.mubr.f32.mxu0 %v21087_v10  ;;  %29095 = vmatpush3.bf16.msra.mxu0 %v34741_v9  ;;  %v21808_v60 = vpop.permute.xlu1 %21807 }
0x3cbe   :  { %29097 = vmatprep.subr.bf16.mxu0 %v34754_v18 }
0x3cc0   :  { %27001 = vmatmul.mubr.f32.gmra.mrb[74].mxu0 %v21097_v1 }
0x3cc1   :  { %29099 = vmatpush3.bf16.msra.mxu0 %v34754_v18  ;;  %27023 = vmatprep.mubr.f32.mxu0 %v21048_v61  ;;  %v29116_v61 = vpack.c.bf16 %v21144_v27, %v21137_v0  ;;  %v21813_v0 = vpop.permute.xlu0 %21812 }
0x3cc2   :  { %29101 = vmatprep.subr.bf16.mxu0 %v34780_v28 }
0x3cc5   :  { %29103 = vmatpush3.bf16.msra.mxu0 %v34780_v28 }
0x3cc6   :  { %29105 = vmatprep.subr.bf16.mxu0 %v34803_v37 }
0x3cc9   :  { %29107 = vmatpush3.bf16.msra.mxu0 %v34803_v37 }
0x3cca   :  { %29109 = vmatprep.subr.bf16.mxu0 %v29108_v43 }
0x3ccc   :  { %27024 = vmatmul.mubr.f32.vlgmr.msra.gmra.mrb[70].mxu0 %v21058_v21 }
0x3ccd   :  { %27026 = vmatprep.mubr.f32.mxu0 %v21068_v36  ;;  %29111 = vmatpush3.bf16.msra.mxu0 %v29108_v43 }
0x3cce   :  { %29113 = vmatprep.subr.bf16.mxu0 %v29112_v8 }
0x3cd0   :  { %27027 = vmatmul.mubr.f32.gmra.mrb[72].mxu0 %v21078_v53 }
0x3cd1   :  { %27029 = vmatprep.mubr.f32.mxu0 %v21088_v20  ;;  %29115 = vmatpush3.bf16.msra.mxu0 %v29112_v8 }
0x3cd2   :  { %29117 = vmatprep.subr.bf16.mxu0 %v29116_v61 }
0x3cd4   :  { %27030 = vmatmul.mubr.f32.gmra.mrb[74].mxu0 %v21098_v44 }
0x3cd5   :  { %29119 = vmatpush3.bf16.msra.mxu0 %v29116_v61  ;;  %27052 = vmatprep.mubr.f32.mxu0 %v34681_v57 }
0x3cd6   :  { %29121 = vmatprep.subr.bf16.mxu0 %v29120_v45 }
0x3cd9   :  { %29123 = vmatpush3.bf16.msra.mxu0 %v29120_v45 }
0x3cda   :  { %29125 = vmatprep.subr.bf16.mxu0 %v34966_v12 }
0x3cdd   :  { %29127 = vmatpush3.bf16.msra.mxu0 %v34966_v12 }
0x3cde   :  { %29129 = vmatprep.subr.bf16.mxu0 %v34715_v4 }
0x3ce0   :  { %27053 = vmatmul.mubr.f32.vlgmr.msra.gmra.mrb[70].mxu0 %v34887_v17 }
0x3ce1   :  { %27055 = vmatprep.mubr.f32.mxu0 %v34851_v48  ;;  %29131 = vmatpush3.bf16.msra.mxu0 %v34715_v4 }
0x3ce2   :  { %29133 = vmatprep.subr.bf16.mxu0 %v34741_v9 }
0x3ce4   :  { %27056 = vmatmul.mubr.f32.gmra.mrb[72].mxu0 %v34954_v52 }
0x3ce5   :  { %27058 = vmatprep.mubr.f32.mxu0 %v34981_v55  ;;  %29135 = vmatpush3.bf16.msra.mxu0 %v34741_v9 }
0x3ce6   :  { %29137 = vmatprep.subr.bf16.mxu0 %v34754_v18 }
0x3ce8   :  { %27059 = vmatmul.mubr.f32.gmra.mrb[74].mxu0 %v34984_v41 }
0x3ce9   :  { %29139 = vmatpush3.bf16.msra.mxu0 %v34754_v18  ;;  %27081 = vmatprep.mubr.f32.mxu0 %v34681_v57  ;;  %v21881_v57 = vld [vmem:[%s35113_s24] ss:$0 sm:$0xff] }
0x3cea   :  { %29141 = vmatprep.subr.bf16.mxu0 %v34780_v28 }
0x3ced   :  { %29143 = vmatpush3.bf16.msra.mxu0 %v34780_v28 }
0x3cee   :  { %29145 = vmatprep.subr.bf16.mxu0 %v34803_v37 }
0x3cf1   :  { %29147 = vmatpush3.bf16.msra.mxu0 %v34803_v37 }
0x3cf4   :  { %27082 = vmatmul.mubr.f32.vlgmr.msra.gmra.mrb[70].mxu0 %v34887_v17 }
0x3cf5   :  { %27084 = vmatprep.mubr.f32.mxu0 %v34851_v48 }
0x3cf8   :  { %27085 = vmatmul.mubr.f32.gmra.mrb[72].mxu0 %v34954_v52 }
0x3cf9   :  { %27087 = vmatprep.mubr.f32.mxu0 %v34981_v55 }
0x3cfc   :  { %27088 = vmatmul.mubr.f32.gmra.mrb[74].mxu0 %v34984_v41 }
0x3dc7   :  { %v27083_v4 = vpop.f32.mrb[70].mxu0 }
0x3dc8   :  { %v29206_v9 = vadd.f32 %v27083_v4, %v21881_v57  ;;  %v21715_v18 = vpop.f32.mrb[71].mxu0 }
0x3dc9   :  { %v29207_v28 = vadd.f32 %v21881_v57, %v21715_v18 }
0x3dca   :  { %21757 = vrot.lane.b32.xlu0 %v29206_v9, %s29831_s30 }
0x3dcb   :  { %v27086_v37 = vpop.f32.mrb[72].mxu0  ;;  %21755 = vrot.lane.b32.xlu1 %v29207_v28, %s29831_s30 }
0x3dcc   :  { %v29208_v63 = vadd.f32 %v27086_v37, %v21881_v57  ;;  %v21727_v30 = vpop.f32.mrb[73].mxu0 }
0x3dcd   :  { %v29209_v51 = vadd.f32 %v21881_v57, %v21727_v30 }
0x3dce   :  { %21761 = vrot.lane.b32.xlu0 %v29208_v63, %s29831_s30 }
0x3dcf   :  { %v27089_v32 = vpop.f32.mrb[74].mxu0  ;;  %21759 = vrot.lane.b32.xlu1 %v29209_v51, %s29831_s30 }
0x3dd0   :  { %v29210_v13 = vadd.f32 %v27089_v32, %v21881_v57  ;;  %v21739_v48 = vpop.f32.mrb[75].mxu0 }
0x3dd1   :  { %v29211_v42 = vadd.f32 %v21881_v57, %v21739_v48 }
0x3dd2   :  { %21765 = vrot.lane.b32.xlu0 %v29210_v13, %s29831_s30 }
0x3dd3   :  { %21763 = vrot.lane.b32.xlu1 %v29211_v42, %s29831_s30 }
0x3e3c   :  { %v21758_v49 = vpop.permute.xlu0 %21757 }
0x3e3d   :  { %v21774_v17 = vmax.f32 %v29206_v9, %v21758_v49  ;;  %v21756_v27 = vpop.permute.xlu1 %21755 }
0x3e3e   :  { %v21773_v36 = vmax.f32 %v29207_v28, %v21756_v27 }
0x3e3f   :  { %v21816_v59 = vmul.f32 %v21793_v40, %v21774_v17 }
0x3e40   :  { %v21815_v26 = vmul.f32 %v21788_v29, %v21773_v36  ;;  %v21762_v34 = vpop.permute.xlu0 %21761 }
0x3e41   :  { %21822 = vst.msk [vmem:[%s35114_s25 + $0x8] sm:$0xff] %vm1442_vm2, %v21816_v59  ;;  %v21776_v21 = vmax.f32 %v29208_v63, %v21762_v34  ;;  %v21760_v16 = vpop.permute.xlu1 %21759 }
0x3e42   :  { %21821 = vst.msk [vmem:[%s35114_s25] sm:$0xff] %vm1442_vm2, %v21815_v26  ;;  %v21775_v15 = vmax.f32 %v29209_v51, %v21760_v16 }
0x3e43   :  { %v21818_v52 = vmul.f32 %v21803_v35, %v21776_v21 }
0x3e44   :  { %v21817_v39 = vmul.f32 %v21798_v11, %v21775_v15  ;;  %v21766_v7 = vpop.permute.xlu0 %21765 }
0x3e45   :  { %21824 = vst.msk [vmem:[%s35114_s25 + $0x18] sm:$0xff] %vm1442_vm2, %v21818_v52  ;;  %v21778_v53 = vmax.f32 %v29210_v13, %v21766_v7  ;;  %v21764_v14 = vpop.permute.xlu1 %21763 }
0x3e46   :  { %21823 = vst.msk [vmem:[%s35114_s25 + $0x10] sm:$0xff] %vm1442_vm2, %v21817_v39  ;;  %v21777_v12 = vmax.f32 %v29211_v42, %v21764_v14 }
0x3e47   :  { %v21820_v3 = vmul.f32 %v21813_v0, %v21778_v53 }
0x3e48   :  { %v21819_v6 = vmul.f32 %v21808_v60, %v21777_v12 }
0x3e49   :  { %21826 = vst.msk [vmem:[%s35114_s25 + $0x28] sm:$0xff] %vm1442_vm2, %v21820_v3 }
0x3e4a   :  { %21825 = vst.msk [vmem:[%s35114_s25 + $0x20] sm:$0xff] %vm1442_vm2, %v21819_v6 }

</bundles_post_ra>
